<compile_context>
chip_gen: v7x
topology: tpu7x:2x2x1
jax: 0.10.0
libtpu: 0.0.40
codegen_flags: <defaults>
</compile_context>

<pallas_src>
import functools

import jax
import jax.numpy as jnp
import numpy as np
from jax.experimental import pallas as pl
from jax.experimental.pallas import tpu as pltpu


# ----------------------------------------------------------------------------
# Host-side geometry helpers (tiny, cached).
# ----------------------------------------------------------------------------
def _block_geom(B, H, W):
    """Padded-flat geometry for one conv block working on an HxW image."""
    Wp, Hp = W + 2, H + 2
    L = Hp * Wp              # padded pixels per image
    N = B * L                # lane width of the padded-flat activation
    S = N - 2 * (Wp + 1)     # positions covered by one conv matmul
    Smax = N - Wp - 1        # positions covered by the pool max
    return Wp, N, S, Smax


@functools.lru_cache(maxsize=None)
def _conv_mask(B, H, W):
    """(1, S) f32 mask: 1 at interior pixels, 0 at padding positions."""
    Wp, _, S, _ = _block_geom(B, H, W)
    L = (H + 2) * Wp
    q0 = Wp + 1
    m = np.zeros((1, S), np.float32)
    for s in range(S):
        n = (q0 + s) % L
        r, c = n // Wp, n % Wp
        if 1 <= r <= H and 1 <= c <= W:
            m[0, s] = 1.0
    return m


@functools.lru_cache(maxsize=None)
def _pool_select(B, H, W, final):
    """0/1 matrix that picks the 2x2-max anchors and re-embeds them into the
    next block's padded-flat layout (or the final flat layout if `final`)."""
    Wp = W + 2
    L = (H + 2) * Wp
    N = B * L
    Smax = N - Wp - 1
    Ho, Wo = H // 2, W // 2
    if final:
        Lo = Ho * Wo
        sel = np.zeros((Smax, B * Lo), np.float32)
        for b in range(B):
            for ho in range(Ho):
                for wo in range(Wo):
                    q = b * L + (1 + 2 * ho) * Wp + (1 + 2 * wo)
                    sel[q, b * Lo + ho * Wo + wo] = 1.0
    else:
        Wpo = Wo + 2
        Lo = (Ho + 2) * Wpo
        sel = np.zeros((Smax, B * Lo), np.float32)
        for b in range(B):
            for ho in range(Ho):
                for wo in range(Wo):
                    q = b * L + (1 + 2 * ho) * Wp + (1 + 2 * wo)
                    sel[q, b * Lo + (1 + ho) * Wpo + (1 + wo)] = 1.0
    return sel


# ----------------------------------------------------------------------------
# Fused CNN kernel: 9 convs (im2col matmuls) + 3 fused maxpools, one call.
# ----------------------------------------------------------------------------
def _encoder_cnn_kernel(*args, geoms):
    x_ref = args[0]              # (1, N1) f32 padded-flat input
    w_refs = args[1:10]          # (Cout, 9*Cin) bf16
    b_refs = args[10:19]         # (Cout, 1) f32
    m_refs = args[19:22]         # (1, S) f32 interior masks
    sel_refs = args[22:25]       # (Smax, N_next) f32 pool selection matrices
    o_ref = args[25]             # (25, B*Hf*Wf) f32
    act_bufs = args[26:29]       # padded-flat activation scratch, per block
    pat_bufs = args[29:32]       # im2col patch scratch, per block

    # Zero the activation buffers once: padding positions must stay 0.
    for buf in act_bufs:
        buf[...] = jnp.zeros(buf.shape, buf.dtype)

    x = x_ref[...]
    li = 0
    for blk in range(3):
        Wp, N, S, Smax = geoms[blk]
        q0 = Wp + 1
        mask = m_refs[blk][...]
        abuf = act_bufs[blk]
        pbuf = pat_bufs[blk]
        for _layer in range(3):
            cin = x.shape[0]
            w = w_refs[li][...]
            b = b_refs[li][...]
            # im2col: 9 constant-offset lane slices -> (9*cin, S) patch slab.
            for kh in range(3):
                for kw in range(3):
                    t = kh * 3 + kw
                    st = kh * Wp + kw
                    pbuf[t * cin:(t + 1) * cin, :] = x[:, st:st + S]
            patches = pbuf[0:9 * cin, :].astype(jnp.bfloat16)
            y = jnp.dot(w, patches, preferred_element_type=jnp.float32) + b
            if li == 8:                       # final conv uses sigmoid
                y = 1.0 / (1.0 + jnp.exp(-y))
            else:
                y = jnp.tanh(y)
            y = y * mask                      # zero results at pad positions
            abuf[:, q0:q0 + S] = y
            x = abuf[...]                     # (Cout, N) padded-flat
            li += 1
        # Fused MaxPool2d(2): shifted max + selection matmul into next layout.
        sel = sel_refs[blk][...]
        p00 = x[:, 0:Smax]
        p01 = x[:, 1:1 + Smax]
        p10 = x[:, Wp:Wp + Smax]
        p11 = x[:, Wp + 1:Wp + 1 + Smax]
        pooled = jnp.maximum(jnp.maximum(p00, p01), jnp.maximum(p10, p11))
        x = jnp.dot(pooled, sel, preferred_element_type=jnp.float32)
    o_ref[...] = x


def _cnn_pallas(x_flat, conv_w, conv_b, masks, sels, geoms, B, Hf, Wf):
    kern = functools.partial(_encoder_cnn_kernel, geoms=geoms)
    couts = (5, 15, 25)
    scratch = []
    for blk in range(3):
        _, N, _, _ = geoms[blk]
        scratch.append(pltpu.VMEM((couts[blk], N), jnp.float32))
    for blk in range(3):
        _, _, S, _ = geoms[blk]
        scratch.append(pltpu.VMEM((9 * couts[blk], S), jnp.float32))
    return pl.pallas_call(
        kern,
        out_shape=jax.ShapeDtypeStruct((25, B * Hf * Wf), jnp.float32),
        scratch_shapes=scratch,
    )(x_flat, *conv_w, *conv_b, *masks, *sels)


# ----------------------------------------------------------------------------
# Fused MLP heads kernel: grid over heads, feat loaded once per head.
# ----------------------------------------------------------------------------
def _mlp_heads_kernel(x_ref, w1_ref, b1_ref, w2_ref, b2_ref, w3_ref, b3_ref,
                      o_ref):
    x = x_ref[...].astype(jnp.bfloat16)                       # (B, F)
    h = jnp.dot(x, w1_ref[...], preferred_element_type=jnp.float32)
    h = jnp.tanh(h + b1_ref[...])
    h = jnp.dot(h.astype(jnp.bfloat16), w2_ref[...],
                preferred_element_type=jnp.float32)
    h = jnp.tanh(h + b2_ref[...])
    z = jnp.dot(h.astype(jnp.bfloat16), w3_ref[...],
                preferred_element_type=jnp.float32) + b3_ref[...]
    o_ref[...] = 1.0 / (1.0 + jnp.exp(-z))


def _mlp_pallas(feat, params):
    nh, F, H1 = params["w1"].shape
    H2 = params["w2"].shape[-1]
    Ppad = params["w3"].shape[-1]
    B = feat.shape[0]
    return pl.pallas_call(
        _mlp_heads_kernel,
        out_shape=jax.ShapeDtypeStruct((nh, B, Ppad), jnp.float32),
        grid=(nh,),
        in_specs=[
            pl.BlockSpec((B, F), lambda h: (0, 0)),
            pl.BlockSpec((None, F, H1), lambda h: (h, 0, 0)),
            pl.BlockSpec((None, 1, H1), lambda h: (h, 0, 0)),
            pl.BlockSpec((None, H1, H2), lambda h: (h, 0, 0)),
            pl.BlockSpec((None, 1, H2), lambda h: (h, 0, 0)),
            pl.BlockSpec((None, H2, Ppad), lambda h: (h, 0, 0)),
            pl.BlockSpec((None, 1, Ppad), lambda h: (h, 0, 0)),
        ],
        out_specs=pl.BlockSpec((None, B, Ppad), lambda h: (h, 0, 0)),
        compiler_params=pltpu.CompilerParams(
            dimension_semantics=("parallel",)),
    )(feat, params["w1"], params["b1"], params["w2"], params["b2"],
      params["w3"], params["b3"])


# ----------------------------------------------------------------------------
# Parameter init (mirrors nn.Conv2d / nn.Linear shapes; kernel-ready layout).
# ----------------------------------------------------------------------------
def init_encoder_params(key, shapes, num_pixels):
    conv_io = [(1, 5), (5, 5), (5, 5),
               (5, 15), (15, 15), (15, 15),
               (15, 25), (25, 25), (25, 25)]
    n_heads = len(shapes)
    keys = jax.random.split(key, len(conv_io) + n_heads)

    conv_w, conv_b = [], []
    for i, (ci, co) in enumerate(conv_io):
        kw_, kb_ = jax.random.split(keys[i])
        lim = 1.0 / np.sqrt(9 * ci)
        w = jax.random.uniform(kw_, (co, 9 * ci), jnp.float32, -lim, lim)
        b = jax.random.uniform(kb_, (co, 1), jnp.float32, -lim, lim)
        conv_w.append(w.astype(jnp.bfloat16))
        conv_b.append(b)

    feat = num_pixels // 2 ** (2 * 3) * 25
    p_sizes = [int(np.prod(s)) for s in shapes]
    p_pad = max(128, ((max(p_sizes) + 127) // 128) * 128)

    def dense(k, fin, fout):
        ka, kb = jax.random.split(k)
        lim = 1.0 / np.sqrt(fin)
        return (jax.random.uniform(ka, (fin, fout), jnp.float32, -lim, lim),
                jax.random.uniform(kb, (1, fout), jnp.float32, -lim, lim))

    w1s, b1s, w2s, b2s, w3s, b3s = [], [], [], [], [], []
    for i in range(n_heads):
        k1, k2, k3 = jax.random.split(keys[len(conv_io) + i], 3)
        w1, b1 = dense(k1, feat, 512)
        w2, b2 = dense(k2, 512, 1024)
        w3, b3 = dense(k3, 1024, p_sizes[i])
        w3p = jnp.zeros((1024, p_pad), jnp.float32).at[:, :p_sizes[i]].set(w3)
        b3p = jnp.zeros((1, p_pad), jnp.float32).at[:, :p_sizes[i]].set(b3)
        w1s.append(w1); b1s.append(b1)
        w2s.append(w2); b2s.append(b2)
        w3s.append(w3p); b3s.append(b3p)

    return {
        "conv_w": conv_w, "conv_b": conv_b,
        "w1": jnp.stack(w1s).astype(jnp.bfloat16), "b1": jnp.stack(b1s),
        "w2": jnp.stack(w2s).astype(jnp.bfloat16), "b2": jnp.stack(b2s),
        "w3": jnp.stack(w3s).astype(jnp.bfloat16), "b3": jnp.stack(b3s),
    }


# ----------------------------------------------------------------------------
# Forward pass (matches Encoder.forward).
# ----------------------------------------------------------------------------
@functools.partial(jax.jit, static_argnames=("shapes",))
def encoder_forward(params, x_nchw, shapes):
    B, _, H, W = x_nchw.shape
    Hf, Wf = H // 8, W // 8

    # Input layout plumbing (one tiny op): NCHW -> padded-flat (1, B*(H+2)*(W+2)).
    xt = jnp.transpose(x_nchw.astype(jnp.float32), (1, 0, 2, 3))
    xp = jnp.pad(xt, ((0, 0), (0, 0), (1, 1), (1, 1)))
    x_flat = xp.reshape(1, -1)

    geoms = tuple(_block_geom(B, H >> s, W >> s) for s in range(3))
    masks = [jnp.asarray(_conv_mask(B, H >> s, W >> s)) for s in range(3)]
    sels = [jnp.asarray(_pool_select(B, H >> s, W >> s, s == 2))
            for s in range(3)]

    cnn_out = _cnn_pallas(x_flat, params["conv_w"], params["conv_b"],
                          masks, sels, geoms, B, Hf, Wf)      # (25, B*Hf*Wf)

    # Flatten in torch's NCHW order: feat[b, c*Hf*Wf + p] = cnn_out[c, b*Hf*Wf + p]
    feat = jnp.transpose(cnn_out.reshape(25, B, Hf * Wf),
                         (1, 0, 2)).reshape(B, -1)            # (B, 25*Hf*Wf)

    heads = _mlp_pallas(feat, params)                         # (nh, B, Ppad)
    outs = []
    for i, shp in enumerate(shapes):
        P = int(np.prod(shp))
        outs.append(heads[i, :, :P].reshape((-1,) + tuple(shp)))
    return outs


if __name__ == "__main__":
    key = jax.random.PRNGKey(0)
    pkey, xkey = jax.random.split(key)

    B, H, W = 2, 16, 16
    shapes = ((4, 8), (2, 3, 4))
    num_pixels = H * W            # 256 -> feature dim = 256 // 64 * 25 = 100

    params = init_encoder_params(pkey, shapes, num_pixels)
    x = jax.random.normal(xkey, (B, 1, H, W), dtype=jnp.float32)

    outs = encoder_forward(params, x, shapes=shapes)
    outs = jax.block_until_ready(outs)

    assert outs[0].shape == (B, 4, 8), outs[0].shape
    assert outs[1].shape == (B, 2, 3, 4), outs[1].shape
    assert all(bool(jnp.all(jnp.isfinite(o))) for o in outs)
    assert all(bool(jnp.all((o >= 0.0) & (o <= 1.0))) for o in outs)
    print("KERNEL_OK")
</pallas_src>

<mosaic_0001>
module attributes {stable_mosaic.version = 11 : i64} {
  func.func @_encoder_cnn_kernel(%arg0: memref<1x648xf32, #tpu.memory_space<vmem>>, %arg1: memref<5x9xbf16, #tpu.memory_space<vmem>>, %arg2: memref<5x45xbf16, #tpu.memory_space<vmem>>, %arg3: memref<5x45xbf16, #tpu.memory_space<vmem>>, %arg4: memref<15x45xbf16, #tpu.memory_space<vmem>>, %arg5: memref<15x135xbf16, #tpu.memory_space<vmem>>, %arg6: memref<15x135xbf16, #tpu.memory_space<vmem>>, %arg7: memref<25x135xbf16, #tpu.memory_space<vmem>>, %arg8: memref<25x225xbf16, #tpu.memory_space<vmem>>, %arg9: memref<25x225xbf16, #tpu.memory_space<vmem>>, %arg10: memref<5x1xf32, #tpu.memory_space<vmem>>, %arg11: memref<5x1xf32, #tpu.memory_space<vmem>>, %arg12: memref<5x1xf32, #tpu.memory_space<vmem>>, %arg13: memref<15x1xf32, #tpu.memory_space<vmem>>, %arg14: memref<15x1xf32, #tpu.memory_space<vmem>>, %arg15: memref<15x1xf32, #tpu.memory_space<vmem>>, %arg16: memref<25x1xf32, #tpu.memory_space<vmem>>, %arg17: memref<25x1xf32, #tpu.memory_space<vmem>>, %arg18: memref<25x1xf32, #tpu.memory_space<vmem>>, %arg19: memref<1x610xf32, #tpu.memory_space<vmem>>, %arg20: memref<1x178xf32, #tpu.memory_space<vmem>>, %arg21: memref<1x58xf32, #tpu.memory_space<vmem>>, %arg22: memref<629x200xf32, #tpu.memory_space<vmem>>, %arg23: memref<189x72xf32, #tpu.memory_space<vmem>>, %arg24: memref<65x8xf32, #tpu.memory_space<vmem>>, %arg25: memref<25x8xf32, #tpu.memory_space<vmem>>, %arg26: memref<5x648xf32, #tpu.memory_space<vmem>>, %arg27: memref<15x200xf32, #tpu.memory_space<vmem>>, %arg28: memref<25x72xf32, #tpu.memory_space<vmem>>, %arg29: memref<45x610xf32, #tpu.memory_space<vmem>>, %arg30: memref<135x178xf32, #tpu.memory_space<vmem>>, %arg31: memref<225x58xf32, #tpu.memory_space<vmem>>) attributes {dimension_semantics = [], scalar_prefetch = 0 : i64, scratch_operands = 6 : i64, tpu.core_type = #tpu.core_type<tc>} {
    %cst = arith.constant 0.000000e+00 : f32
    %0 = vector.broadcast %cst : f32 to vector<5x648xf32>
    %c0 = arith.constant 0 : index
    %c0_0 = arith.constant 0 : index
    %1 = vector.load %arg26[%c0, %c0_0] : memref<5x648xf32, #tpu.memory_space<vmem>>, vector<5x648xf32>
    tpu.vector_store %arg26[%c0, %c0_0], %0 {strides = array<i32>} : memref<5x648xf32, #tpu.memory_space<vmem>>, vector<5x648xf32>,
    %cst_1 = arith.constant 0.000000e+00 : f32
    %2 = vector.broadcast %cst_1 : f32 to vector<15x200xf32>
    %c0_2 = arith.constant 0 : index
    %c0_3 = arith.constant 0 : index
    %3 = vector.load %arg27[%c0_2, %c0_3] : memref<15x200xf32, #tpu.memory_space<vmem>>, vector<15x200xf32>
    tpu.vector_store %arg27[%c0_2, %c0_3], %2 {strides = array<i32>} : memref<15x200xf32, #tpu.memory_space<vmem>>, vector<15x200xf32>,
    %cst_4 = arith.constant 0.000000e+00 : f32
    %4 = vector.broadcast %cst_4 : f32 to vector<25x72xf32>
    %c0_5 = arith.constant 0 : index
    %c0_6 = arith.constant 0 : index
    %5 = vector.load %arg28[%c0_5, %c0_6] : memref<25x72xf32, #tpu.memory_space<vmem>>, vector<25x72xf32>
    tpu.vector_store %arg28[%c0_5, %c0_6], %4 {strides = array<i32>} : memref<25x72xf32, #tpu.memory_space<vmem>>, vector<25x72xf32>,
    %c0_7 = arith.constant 0 : index
    %c0_8 = arith.constant 0 : index
    %6 = vector.load %arg0[%c0_7, %c0_8] : memref<1x648xf32, #tpu.memory_space<vmem>>, vector<1x648xf32>
    %c0_9 = arith.constant 0 : index
    %c0_10 = arith.constant 0 : index
    %7 = vector.load %arg19[%c0_9, %c0_10] : memref<1x610xf32, #tpu.memory_space<vmem>>, vector<1x610xf32>
    %c0_11 = arith.constant 0 : index
    %c0_12 = arith.constant 0 : index
    %8 = vector.load %arg1[%c0_11, %c0_12] : memref<5x9xbf16, #tpu.memory_space<vmem>>, vector<5x9xbf16>
    %c0_13 = arith.constant 0 : index
    %c0_14 = arith.constant 0 : index
    %9 = vector.load %arg10[%c0_13, %c0_14] : memref<5x1xf32, #tpu.memory_space<vmem>>, vector<5x1xf32>
    %10 = vector.extract_strided_slice %6 {offsets = [0, 0], sizes = [1, 610], strides = [1, 1]} : vector<1x648xf32> to vector<1x610xf32>
    %c0_15 = arith.constant 0 : index
    %c0_16 = arith.constant 0 : index
    %11 = vector.load %arg29[%c0_15, %c0_16] : memref<45x610xf32, #tpu.memory_space<vmem>>, vector<1x610xf32>
    tpu.vector_store %arg29[%c0_15, %c0_16], %10 {strides = array<i32>} : memref<45x610xf32, #tpu.memory_space<vmem>>, vector<1x610xf32>,
    %12 = vector.extract_strided_slice %6 {offsets = [0, 1], sizes = [1, 610], strides = [1, 1]} : vector<1x648xf32> to vector<1x610xf32>
    %c1 = arith.constant 1 : index
    %c0_17 = arith.constant 0 : index
    %13 = vector.load %arg29[%c1, %c0_17] : memref<45x610xf32, #tpu.memory_space<vmem>>, vector<1x610xf32>
    tpu.vector_store %arg29[%c1, %c0_17], %12 {strides = array<i32>} : memref<45x610xf32, #tpu.memory_space<vmem>>, vector<1x610xf32>,
    %14 = vector.extract_strided_slice %6 {offsets = [0, 2], sizes = [1, 610], strides = [1, 1]} : vector<1x648xf32> to vector<1x610xf32>
    %c2 = arith.constant 2 : index
    %c0_18 = arith.constant 0 : index
    %15 = vector.load %arg29[%c2, %c0_18] : memref<45x610xf32, #tpu.memory_space<vmem>>, vector<1x610xf32>
    tpu.vector_store %arg29[%c2, %c0_18], %14 {strides = array<i32>} : memref<45x610xf32, #tpu.memory_space<vmem>>, vector<1x610xf32>,
    %16 = vector.extract_strided_slice %6 {offsets = [0, 18], sizes = [1, 610], strides = [1, 1]} : vector<1x648xf32> to vector<1x610xf32>
    %c3 = arith.constant 3 : index
    %c0_19 = arith.constant 0 : index
    %17 = vector.load %arg29[%c3, %c0_19] : memref<45x610xf32, #tpu.memory_space<vmem>>, vector<1x610xf32>
    tpu.vector_store %arg29[%c3, %c0_19], %16 {strides = array<i32>} : memref<45x610xf32, #tpu.memory_space<vmem>>, vector<1x610xf32>,
    %18 = vector.extract_strided_slice %6 {offsets = [0, 19], sizes = [1, 610], strides = [1, 1]} : vector<1x648xf32> to vector<1x610xf32>
    %c4 = arith.constant 4 : index
    %c0_20 = arith.constant 0 : index
    %19 = vector.load %arg29[%c4, %c0_20] : memref<45x610xf32, #tpu.memory_space<vmem>>, vector<1x610xf32>
    tpu.vector_store %arg29[%c4, %c0_20], %18 {strides = array<i32>} : memref<45x610xf32, #tpu.memory_space<vmem>>, vector<1x610xf32>,
    %20 = vector.extract_strided_slice %6 {offsets = [0, 20], sizes = [1, 610], strides = [1, 1]} : vector<1x648xf32> to vector<1x610xf32>
    %c5 = arith.constant 5 : index
    %c0_21 = arith.constant 0 : index
    %21 = vector.load %arg29[%c5, %c0_21] : memref<45x610xf32, #tpu.memory_space<vmem>>, vector<1x610xf32>
    tpu.vector_store %arg29[%c5, %c0_21], %20 {strides = array<i32>} : memref<45x610xf32, #tpu.memory_space<vmem>>, vector<1x610xf32>,
    %22 = vector.extract_strided_slice %6 {offsets = [0, 36], sizes = [1, 610], strides = [1, 1]} : vector<1x648xf32> to vector<1x610xf32>
    %c6 = arith.constant 6 : index
    %c0_22 = arith.constant 0 : index
    %23 = vector.load %arg29[%c6, %c0_22] : memref<45x610xf32, #tpu.memory_space<vmem>>, vector<1x610xf32>
    tpu.vector_store %arg29[%c6, %c0_22], %22 {strides = array<i32>} : memref<45x610xf32, #tpu.memory_space<vmem>>, vector<1x610xf32>,
    %24 = vector.extract_strided_slice %6 {offsets = [0, 37], sizes = [1, 610], strides = [1, 1]} : vector<1x648xf32> to vector<1x610xf32>
    %c7 = arith.constant 7 : index
    %c0_23 = arith.constant 0 : index
    %25 = vector.load %arg29[%c7, %c0_23] : memref<45x610xf32, #tpu.memory_space<vmem>>, vector<1x610xf32>
    tpu.vector_store %arg29[%c7, %c0_23], %24 {strides = array<i32>} : memref<45x610xf32, #tpu.memory_space<vmem>>, vector<1x610xf32>,
    %26 = vector.extract_strided_slice %6 {offsets = [0, 38], sizes = [1, 610], strides = [1, 1]} : vector<1x648xf32> to vector<1x610xf32>
    %c8 = arith.constant 8 : index
    %c0_24 = arith.constant 0 : index
    %27 = vector.load %arg29[%c8, %c0_24] : memref<45x610xf32, #tpu.memory_space<vmem>>, vector<1x610xf32>
    tpu.vector_store %arg29[%c8, %c0_24], %26 {strides = array<i32>} : memref<45x610xf32, #tpu.memory_space<vmem>>, vector<1x610xf32>,
    %c0_25 = arith.constant 0 : index
    %c0_26 = arith.constant 0 : index
    %28 = vector.load %arg29[%c0_25, %c0_26] : memref<45x610xf32, #tpu.memory_space<vmem>>, vector<9x610xf32>
    %29 = arith.truncf %28 : vector<9x610xf32> to vector<9x610xbf16>
    %cst_27 = arith.constant dense<0.000000e+00> : vector<5x610xf32>
    %30 = tpu.matmul %8, %29, %cst_27 {dimension_numbers = #tpu.dot_dimension_numbers<[1], [0], [0], [1], [0, 0, 1, 1], [], []>} : vector<5x9xbf16>, vector<9x610xbf16>, vector<5x610xf32> -> vector<5x610xf32>
    %31 = vector.broadcast %9 : vector<5x1xf32> to vector<5x610xf32>
    %32 = arith.addf %30, %31 : vector<5x610xf32>
    %33 = math.tanh %32 : vector<5x610xf32>
    %34 = vector.broadcast %7 : vector<1x610xf32> to vector<5x610xf32>
    %35 = arith.mulf %33, %34 : vector<5x610xf32>
    %c0_28 = arith.constant 0 : index
    %c19 = arith.constant 19 : index
    %36 = vector.load %arg26[%c0_28, %c19] : memref<5x648xf32, #tpu.memory_space<vmem>>, vector<5x610xf32>
    tpu.vector_store %arg26[%c0_28, %c19], %35 {strides = array<i32>} : memref<5x648xf32, #tpu.memory_space<vmem>>, vector<5x610xf32>,
    %c0_29 = arith.constant 0 : index
    %c0_30 = arith.constant 0 : index
    %37 = vector.load %arg26[%c0_29, %c0_30] : memref<5x648xf32, #tpu.memory_space<vmem>>, vector<5x648xf32>
    %c0_31 = arith.constant 0 : index
    %c0_32 = arith.constant 0 : index
    %38 = vector.load %arg2[%c0_31, %c0_32] : memref<5x45xbf16, #tpu.memory_space<vmem>>, vector<5x45xbf16>
    %c0_33 = arith.constant 0 : index
    %c0_34 = arith.constant 0 : index
    %39 = vector.load %arg11[%c0_33, %c0_34] : memref<5x1xf32, #tpu.memory_space<vmem>>, vector<5x1xf32>
    %40 = vector.extract_strided_slice %37 {offsets = [0, 0], sizes = [5, 610], strides = [1, 1]} : vector<5x648xf32> to vector<5x610xf32>
    %c0_35 = arith.constant 0 : index
    %c0_36 = arith.constant 0 : index
    %41 = vector.load %arg29[%c0_35, %c0_36] : memref<45x610xf32, #tpu.memory_space<vmem>>, vector<5x610xf32>
    tpu.vector_store %arg29[%c0_35, %c0_36], %40 {strides = array<i32>} : memref<45x610xf32, #tpu.memory_space<vmem>>, vector<5x610xf32>,
    %42 = vector.extract_strided_slice %37 {offsets = [0, 1], sizes = [5, 610], strides = [1, 1]} : vector<5x648xf32> to vector<5x610xf32>
    %c5_37 = arith.constant 5 : index
    %c0_38 = arith.constant 0 : index
    %43 = vector.load %arg29[%c5_37, %c0_38] : memref<45x610xf32, #tpu.memory_space<vmem>>, vector<5x610xf32>
    tpu.vector_store %arg29[%c5_37, %c0_38], %42 {strides = array<i32>} : memref<45x610xf32, #tpu.memory_space<vmem>>, vector<5x610xf32>,
    %44 = vector.extract_strided_slice %37 {offsets = [0, 2], sizes = [5, 610], strides = [1, 1]} : vector<5x648xf32> to vector<5x610xf32>
    %c10 = arith.constant 10 : index
    %c0_39 = arith.constant 0 : index
    %45 = vector.load %arg29[%c10, %c0_39] : memref<45x610xf32, #tpu.memory_space<vmem>>, vector<5x610xf32>
    tpu.vector_store %arg29[%c10, %c0_39], %44 {strides = array<i32>} : memref<45x610xf32, #tpu.memory_space<vmem>>, vector<5x610xf32>,
    %46 = vector.extract_strided_slice %37 {offsets = [0, 18], sizes = [5, 610], strides = [1, 1]} : vector<5x648xf32> to vector<5x610xf32>
    %c15 = arith.constant 15 : index
    %c0_40 = arith.constant 0 : index
    %47 = vector.load %arg29[%c15, %c0_40] : memref<45x610xf32, #tpu.memory_space<vmem>>, vector<5x610xf32>
    tpu.vector_store %arg29[%c15, %c0_40], %46 {strides = array<i32>} : memref<45x610xf32, #tpu.memory_space<vmem>>, vector<5x610xf32>,
    %48 = vector.extract_strided_slice %37 {offsets = [0, 19], sizes = [5, 610], strides = [1, 1]} : vector<5x648xf32> to vector<5x610xf32>
    %c20 = arith.constant 20 : index
    %c0_41 = arith.constant 0 : index
    %49 = vector.load %arg29[%c20, %c0_41] : memref<45x610xf32, #tpu.memory_space<vmem>>, vector<5x610xf32>
    tpu.vector_store %arg29[%c20, %c0_41], %48 {strides = array<i32>} : memref<45x610xf32, #tpu.memory_space<vmem>>, vector<5x610xf32>,
    %50 = vector.extract_strided_slice %37 {offsets = [0, 20], sizes = [5, 610], strides = [1, 1]} : vector<5x648xf32> to vector<5x610xf32>
    %c25 = arith.constant 25 : index
    %c0_42 = arith.constant 0 : index
    %51 = vector.load %arg29[%c25, %c0_42] : memref<45x610xf32, #tpu.memory_space<vmem>>, vector<5x610xf32>
    tpu.vector_store %arg29[%c25, %c0_42], %50 {strides = array<i32>} : memref<45x610xf32, #tpu.memory_space<vmem>>, vector<5x610xf32>,
    %52 = vector.extract_strided_slice %37 {offsets = [0, 36], sizes = [5, 610], strides = [1, 1]} : vector<5x648xf32> to vector<5x610xf32>
    %c30 = arith.constant 30 : index
    %c0_43 = arith.constant 0 : index
    %53 = vector.load %arg29[%c30, %c0_43] : memref<45x610xf32, #tpu.memory_space<vmem>>, vector<5x610xf32>
    tpu.vector_store %arg29[%c30, %c0_43], %52 {strides = array<i32>} : memref<45x610xf32, #tpu.memory_space<vmem>>, vector<5x610xf32>,
    %54 = vector.extract_strided_slice %37 {offsets = [0, 37], sizes = [5, 610], strides = [1, 1]} : vector<5x648xf32> to vector<5x610xf32>
    %c35 = arith.constant 35 : index
    %c0_44 = arith.constant 0 : index
    %55 = vector.load %arg29[%c35, %c0_44] : memref<45x610xf32, #tpu.memory_space<vmem>>, vector<5x610xf32>
    tpu.vector_store %arg29[%c35, %c0_44], %54 {strides = array<i32>} : memref<45x610xf32, #tpu.memory_space<vmem>>, vector<5x610xf32>,
    %56 = vector.extract_strided_slice %37 {offsets = [0, 38], sizes = [5, 610], strides = [1, 1]} : vector<5x648xf32> to vector<5x610xf32>
    %c40 = arith.constant 40 : index
    %c0_45 = arith.constant 0 : index
    %57 = vector.load %arg29[%c40, %c0_45] : memref<45x610xf32, #tpu.memory_space<vmem>>, vector<5x610xf32>
    tpu.vector_store %arg29[%c40, %c0_45], %56 {strides = array<i32>} : memref<45x610xf32, #tpu.memory_space<vmem>>, vector<5x610xf32>,
    %c0_46 = arith.constant 0 : index
    %c0_47 = arith.constant 0 : index
    %58 = vector.load %arg29[%c0_46, %c0_47] : memref<45x610xf32, #tpu.memory_space<vmem>>, vector<45x610xf32>
    %59 = arith.truncf %58 : vector<45x610xf32> to vector<45x610xbf16>
    %cst_48 = arith.constant dense<0.000000e+00> : vector<5x610xf32>
    %60 = tpu.matmul %38, %59, %cst_48 {dimension_numbers = #tpu.dot_dimension_numbers<[1], [0], [0], [1], [0, 0, 1, 1], [], []>} : vector<5x45xbf16>, vector<45x610xbf16>, vector<5x610xf32> -> vector<5x610xf32>
    %61 = vector.broadcast %39 : vector<5x1xf32> to vector<5x610xf32>
    %62 = arith.addf %60, %61 : vector<5x610xf32>
    %63 = math.tanh %62 : vector<5x610xf32>
    %64 = vector.broadcast %7 : vector<1x610xf32> to vector<5x610xf32>
    %65 = arith.mulf %63, %64 : vector<5x610xf32>
    %c0_49 = arith.constant 0 : index
    %c19_50 = arith.constant 19 : index
    %66 = vector.load %arg26[%c0_49, %c19_50] : memref<5x648xf32, #tpu.memory_space<vmem>>, vector<5x610xf32>
    tpu.vector_store %arg26[%c0_49, %c19_50], %65 {strides = array<i32>} : memref<5x648xf32, #tpu.memory_space<vmem>>, vector<5x610xf32>,
    %c0_51 = arith.constant 0 : index
    %c0_52 = arith.constant 0 : index
    %67 = vector.load %arg26[%c0_51, %c0_52] : memref<5x648xf32, #tpu.memory_space<vmem>>, vector<5x648xf32>
    %c0_53 = arith.constant 0 : index
    %c0_54 = arith.constant 0 : index
    %68 = vector.load %arg3[%c0_53, %c0_54] : memref<5x45xbf16, #tpu.memory_space<vmem>>, vector<5x45xbf16>
    %c0_55 = arith.constant 0 : index
    %c0_56 = arith.constant 0 : index
    %69 = vector.load %arg12[%c0_55, %c0_56] : memref<5x1xf32, #tpu.memory_space<vmem>>, vector<5x1xf32>
    %70 = vector.extract_strided_slice %67 {offsets = [0, 0], sizes = [5, 610], strides = [1, 1]} : vector<5x648xf32> to vector<5x610xf32>
    %c0_57 = arith.constant 0 : index
    %c0_58 = arith.constant 0 : index
    %71 = vector.load %arg29[%c0_57, %c0_58] : memref<45x610xf32, #tpu.memory_space<vmem>>, vector<5x610xf32>
    tpu.vector_store %arg29[%c0_57, %c0_58], %70 {strides = array<i32>} : memref<45x610xf32, #tpu.memory_space<vmem>>, vector<5x610xf32>,
    %72 = vector.extract_strided_slice %67 {offsets = [0, 1], sizes = [5, 610], strides = [1, 1]} : vector<5x648xf32> to vector<5x610xf32>
    %c5_59 = arith.constant 5 : index
    %c0_60 = arith.constant 0 : index
    %73 = vector.load %arg29[%c5_59, %c0_60] : memref<45x610xf32, #tpu.memory_space<vmem>>, vector<5x610xf32>
    tpu.vector_store %arg29[%c5_59, %c0_60], %72 {strides = array<i32>} : memref<45x610xf32, #tpu.memory_space<vmem>>, vector<5x610xf32>,
    %74 = vector.extract_strided_slice %67 {offsets = [0, 2], sizes = [5, 610], strides = [1, 1]} : vector<5x648xf32> to vector<5x610xf32>
    %c10_61 = arith.constant 10 : index
    %c0_62 = arith.constant 0 : index
    %75 = vector.load %arg29[%c10_61, %c0_62] : memref<45x610xf32, #tpu.memory_space<vmem>>, vector<5x610xf32>
    tpu.vector_store %arg29[%c10_61, %c0_62], %74 {strides = array<i32>} : memref<45x610xf32, #tpu.memory_space<vmem>>, vector<5x610xf32>,
    %76 = vector.extract_strided_slice %67 {offsets = [0, 18], sizes = [5, 610], strides = [1, 1]} : vector<5x648xf32> to vector<5x610xf32>
    %c15_63 = arith.constant 15 : index
    %c0_64 = arith.constant 0 : index
    %77 = vector.load %arg29[%c15_63, %c0_64] : memref<45x610xf32, #tpu.memory_space<vmem>>, vector<5x610xf32>
    tpu.vector_store %arg29[%c15_63, %c0_64], %76 {strides = array<i32>} : memref<45x610xf32, #tpu.memory_space<vmem>>, vector<5x610xf32>,
    %78 = vector.extract_strided_slice %67 {offsets = [0, 19], sizes = [5, 610], strides = [1, 1]} : vector<5x648xf32> to vector<5x610xf32>
    %c20_65 = arith.constant 20 : index
    %c0_66 = arith.constant 0 : index
    %79 = vector.load %arg29[%c20_65, %c0_66] : memref<45x610xf32, #tpu.memory_space<vmem>>, vector<5x610xf32>
    tpu.vector_store %arg29[%c20_65, %c0_66], %78 {strides = array<i32>} : memref<45x610xf32, #tpu.memory_space<vmem>>, vector<5x610xf32>,
    %80 = vector.extract_strided_slice %67 {offsets = [0, 20], sizes = [5, 610], strides = [1, 1]} : vector<5x648xf32> to vector<5x610xf32>
    %c25_67 = arith.constant 25 : index
    %c0_68 = arith.constant 0 : index
    %81 = vector.load %arg29[%c25_67, %c0_68] : memref<45x610xf32, #tpu.memory_space<vmem>>, vector<5x610xf32>
    tpu.vector_store %arg29[%c25_67, %c0_68], %80 {strides = array<i32>} : memref<45x610xf32, #tpu.memory_space<vmem>>, vector<5x610xf32>,
    %82 = vector.extract_strided_slice %67 {offsets = [0, 36], sizes = [5, 610], strides = [1, 1]} : vector<5x648xf32> to vector<5x610xf32>
    %c30_69 = arith.constant 30 : index
    %c0_70 = arith.constant 0 : index
    %83 = vector.load %arg29[%c30_69, %c0_70] : memref<45x610xf32, #tpu.memory_space<vmem>>, vector<5x610xf32>
    tpu.vector_store %arg29[%c30_69, %c0_70], %82 {strides = array<i32>} : memref<45x610xf32, #tpu.memory_space<vmem>>, vector<5x610xf32>,
    %84 = vector.extract_strided_slice %67 {offsets = [0, 37], sizes = [5, 610], strides = [1, 1]} : vector<5x648xf32> to vector<5x610xf32>
    %c35_71 = arith.constant 35 : index
    %c0_72 = arith.constant 0 : index
    %85 = vector.load %arg29[%c35_71, %c0_72] : memref<45x610xf32, #tpu.memory_space<vmem>>, vector<5x610xf32>
    tpu.vector_store %arg29[%c35_71, %c0_72], %84 {strides = array<i32>} : memref<45x610xf32, #tpu.memory_space<vmem>>, vector<5x610xf32>,
    %86 = vector.extract_strided_slice %67 {offsets = [0, 38], sizes = [5, 610], strides = [1, 1]} : vector<5x648xf32> to vector<5x610xf32>
    %c40_73 = arith.constant 40 : index
    %c0_74 = arith.constant 0 : index
    %87 = vector.load %arg29[%c40_73, %c0_74] : memref<45x610xf32, #tpu.memory_space<vmem>>, vector<5x610xf32>
    tpu.vector_store %arg29[%c40_73, %c0_74], %86 {strides = array<i32>} : memref<45x610xf32, #tpu.memory_space<vmem>>, vector<5x610xf32>,
    %c0_75 = arith.constant 0 : index
    %c0_76 = arith.constant 0 : index
    %88 = vector.load %arg29[%c0_75, %c0_76] : memref<45x610xf32, #tpu.memory_space<vmem>>, vector<45x610xf32>
    %89 = arith.truncf %88 : vector<45x610xf32> to vector<45x610xbf16>
    %cst_77 = arith.constant dense<0.000000e+00> : vector<5x610xf32>
    %90 = tpu.matmul %68, %89, %cst_77 {dimension_numbers = #tpu.dot_dimension_numbers<[1], [0], [0], [1], [0, 0, 1, 1], [], []>} : vector<5x45xbf16>, vector<45x610xbf16>, vector<5x610xf32> -> vector<5x610xf32>
    %91 = vector.broadcast %69 : vector<5x1xf32> to vector<5x610xf32>
    %92 = arith.addf %90, %91 : vector<5x610xf32>
    %93 = math.tanh %92 : vector<5x610xf32>
    %94 = vector.broadcast %7 : vector<1x610xf32> to vector<5x610xf32>
    %95 = arith.mulf %93, %94 : vector<5x610xf32>
    %c0_78 = arith.constant 0 : index
    %c19_79 = arith.constant 19 : index
    %96 = vector.load %arg26[%c0_78, %c19_79] : memref<5x648xf32, #tpu.memory_space<vmem>>, vector<5x610xf32>
    tpu.vector_store %arg26[%c0_78, %c19_79], %95 {strides = array<i32>} : memref<5x648xf32, #tpu.memory_space<vmem>>, vector<5x610xf32>,
    %c0_80 = arith.constant 0 : index
    %c0_81 = arith.constant 0 : index
    %97 = vector.load %arg26[%c0_80, %c0_81] : memref<5x648xf32, #tpu.memory_space<vmem>>, vector<5x648xf32>
    %c0_82 = arith.constant 0 : index
    %c0_83 = arith.constant 0 : index
    %98 = vector.load %arg22[%c0_82, %c0_83] : memref<629x200xf32, #tpu.memory_space<vmem>>, vector<629x200xf32>
    %99 = vector.extract_strided_slice %97 {offsets = [0, 0], sizes = [5, 629], strides = [1, 1]} : vector<5x648xf32> to vector<5x629xf32>
    %100 = vector.extract_strided_slice %97 {offsets = [0, 1], sizes = [5, 629], strides = [1, 1]} : vector<5x648xf32> to vector<5x629xf32>
    %101 = vector.extract_strided_slice %97 {offsets = [0, 18], sizes = [5, 629], strides = [1, 1]} : vector<5x648xf32> to vector<5x629xf32>
    %102 = vector.extract_strided_slice %97 {offsets = [0, 19], sizes = [5, 629], strides = [1, 1]} : vector<5x648xf32> to vector<5x629xf32>
    %103 = arith.maximumf %99, %100 : vector<5x629xf32>
    %104 = arith.maximumf %101, %102 : vector<5x629xf32>
    %105 = arith.maximumf %103, %104 : vector<5x629xf32>
    %cst_84 = arith.constant dense<0.000000e+00> : vector<5x200xf32>
    %106 = tpu.matmul %105, %98, %cst_84 {dimension_numbers = #tpu.dot_dimension_numbers<[1], [0], [0], [1], [0, 0, 1, 1], [], []>} : vector<5x629xf32>, vector<629x200xf32>, vector<5x200xf32> -> vector<5x200xf32>
    %c0_85 = arith.constant 0 : index
    %c0_86 = arith.constant 0 : index
    %107 = vector.load %arg20[%c0_85, %c0_86] : memref<1x178xf32, #tpu.memory_space<vmem>>, vector<1x178xf32>
    %c0_87 = arith.constant 0 : index
    %c0_88 = arith.constant 0 : index
    %108 = vector.load %arg4[%c0_87, %c0_88] : memref<15x45xbf16, #tpu.memory_space<vmem>>, vector<15x45xbf16>
    %c0_89 = arith.constant 0 : index
    %c0_90 = arith.constant 0 : index
    %109 = vector.load %arg13[%c0_89, %c0_90] : memref<15x1xf32, #tpu.memory_space<vmem>>, vector<15x1xf32>
    %110 = vector.extract_strided_slice %106 {offsets = [0, 0], sizes = [5, 178], strides = [1, 1]} : vector<5x200xf32> to vector<5x178xf32>
    %c0_91 = arith.constant 0 : index
    %c0_92 = arith.constant 0 : index
    %111 = vector.load %arg30[%c0_91, %c0_92] : memref<135x178xf32, #tpu.memory_space<vmem>>, vector<5x178xf32>
    tpu.vector_store %arg30[%c0_91, %c0_92], %110 {strides = array<i32>} : memref<135x178xf32, #tpu.memory_space<vmem>>, vector<5x178xf32>,
    %112 = vector.extract_strided_slice %106 {offsets = [0, 1], sizes = [5, 178], strides = [1, 1]} : vector<5x200xf32> to vector<5x178xf32>
    %c5_93 = arith.constant 5 : index
    %c0_94 = arith.constant 0 : index
    %113 = vector.load %arg30[%c5_93, %c0_94] : memref<135x178xf32, #tpu.memory_space<vmem>>, vector<5x178xf32>
    tpu.vector_store %arg30[%c5_93, %c0_94], %112 {strides = array<i32>} : memref<135x178xf32, #tpu.memory_space<vmem>>, vector<5x178xf32>,
    %114 = vector.extract_strided_slice %106 {offsets = [0, 2], sizes = [5, 178], strides = [1, 1]} : vector<5x200xf32> to vector<5x178xf32>
    %c10_95 = arith.constant 10 : index
    %c0_96 = arith.constant 0 : index
    %115 = vector.load %arg30[%c10_95, %c0_96] : memref<135x178xf32, #tpu.memory_space<vmem>>, vector<5x178xf32>
    tpu.vector_store %arg30[%c10_95, %c0_96], %114 {strides = array<i32>} : memref<135x178xf32, #tpu.memory_space<vmem>>, vector<5x178xf32>,
    %116 = vector.extract_strided_slice %106 {offsets = [0, 10], sizes = [5, 178], strides = [1, 1]} : vector<5x200xf32> to vector<5x178xf32>
    %c15_97 = arith.constant 15 : index
    %c0_98 = arith.constant 0 : index
    %117 = vector.load %arg30[%c15_97, %c0_98] : memref<135x178xf32, #tpu.memory_space<vmem>>, vector<5x178xf32>
    tpu.vector_store %arg30[%c15_97, %c0_98], %116 {strides = array<i32>} : memref<135x178xf32, #tpu.memory_space<vmem>>, vector<5x178xf32>,
    %118 = vector.extract_strided_slice %106 {offsets = [0, 11], sizes = [5, 178], strides = [1, 1]} : vector<5x200xf32> to vector<5x178xf32>
    %c20_99 = arith.constant 20 : index
    %c0_100 = arith.constant 0 : index
    %119 = vector.load %arg30[%c20_99, %c0_100] : memref<135x178xf32, #tpu.memory_space<vmem>>, vector<5x178xf32>
    tpu.vector_store %arg30[%c20_99, %c0_100], %118 {strides = array<i32>} : memref<135x178xf32, #tpu.memory_space<vmem>>, vector<5x178xf32>,
    %120 = vector.extract_strided_slice %106 {offsets = [0, 12], sizes = [5, 178], strides = [1, 1]} : vector<5x200xf32> to vector<5x178xf32>
    %c25_101 = arith.constant 25 : index
    %c0_102 = arith.constant 0 : index
    %121 = vector.load %arg30[%c25_101, %c0_102] : memref<135x178xf32, #tpu.memory_space<vmem>>, vector<5x178xf32>
    tpu.vector_store %arg30[%c25_101, %c0_102], %120 {strides = array<i32>} : memref<135x178xf32, #tpu.memory_space<vmem>>, vector<5x178xf32>,
    %122 = vector.extract_strided_slice %106 {offsets = [0, 20], sizes = [5, 178], strides = [1, 1]} : vector<5x200xf32> to vector<5x178xf32>
    %c30_103 = arith.constant 30 : index
    %c0_104 = arith.constant 0 : index
    %123 = vector.load %arg30[%c30_103, %c0_104] : memref<135x178xf32, #tpu.memory_space<vmem>>, vector<5x178xf32>
    tpu.vector_store %arg30[%c30_103, %c0_104], %122 {strides = array<i32>} : memref<135x178xf32, #tpu.memory_space<vmem>>, vector<5x178xf32>,
    %124 = vector.extract_strided_slice %106 {offsets = [0, 21], sizes = [5, 178], strides = [1, 1]} : vector<5x200xf32> to vector<5x178xf32>
    %c35_105 = arith.constant 35 : index
    %c0_106 = arith.constant 0 : index
    %125 = vector.load %arg30[%c35_105, %c0_106] : memref<135x178xf32, #tpu.memory_space<vmem>>, vector<5x178xf32>
    tpu.vector_store %arg30[%c35_105, %c0_106], %124 {strides = array<i32>} : memref<135x178xf32, #tpu.memory_space<vmem>>, vector<5x178xf32>,
    %126 = vector.extract_strided_slice %106 {offsets = [0, 22], sizes = [5, 178], strides = [1, 1]} : vector<5x200xf32> to vector<5x178xf32>
    %c40_107 = arith.constant 40 : index
    %c0_108 = arith.constant 0 : index
    %127 = vector.load %arg30[%c40_107, %c0_108] : memref<135x178xf32, #tpu.memory_space<vmem>>, vector<5x178xf32>
    tpu.vector_store %arg30[%c40_107, %c0_108], %126 {strides = array<i32>} : memref<135x178xf32, #tpu.memory_space<vmem>>, vector<5x178xf32>,
    %c0_109 = arith.constant 0 : index
    %c0_110 = arith.constant 0 : index
    %128 = vector.load %arg30[%c0_109, %c0_110] : memref<135x178xf32, #tpu.memory_space<vmem>>, vector<45x178xf32>
    %129 = arith.truncf %128 : vector<45x178xf32> to vector<45x178xbf16>
    %cst_111 = arith.constant dense<0.000000e+00> : vector<15x178xf32>
    %130 = tpu.matmul %108, %129, %cst_111 {dimension_numbers = #tpu.dot_dimension_numbers<[1], [0], [0], [1], [0, 0, 1, 1], [], []>} : vector<15x45xbf16>, vector<45x178xbf16>, vector<15x178xf32> -> vector<15x178xf32>
    %131 = vector.broadcast %109 : vector<15x1xf32> to vector<15x178xf32>
    %132 = arith.addf %130, %131 : vector<15x178xf32>
    %133 = math.tanh %132 : vector<15x178xf32>
    %134 = vector.broadcast %107 : vector<1x178xf32> to vector<15x178xf32>
    %135 = arith.mulf %133, %134 : vector<15x178xf32>
    %c0_112 = arith.constant 0 : index
    %c11 = arith.constant 11 : index
    %136 = vector.load %arg27[%c0_112, %c11] : memref<15x200xf32, #tpu.memory_space<vmem>>, vector<15x178xf32>
    tpu.vector_store %arg27[%c0_112, %c11], %135 {strides = array<i32>} : memref<15x200xf32, #tpu.memory_space<vmem>>, vector<15x178xf32>,
    %c0_113 = arith.constant 0 : index
    %c0_114 = arith.constant 0 : index
    %137 = vector.load %arg27[%c0_113, %c0_114] : memref<15x200xf32, #tpu.memory_space<vmem>>, vector<15x200xf32>
    %c0_115 = arith.constant 0 : index
    %c0_116 = arith.constant 0 : index
    %138 = vector.load %arg5[%c0_115, %c0_116] : memref<15x135xbf16, #tpu.memory_space<vmem>>, vector<15x135xbf16>
    %c0_117 = arith.constant 0 : index
    %c0_118 = arith.constant 0 : index
    %139 = vector.load %arg14[%c0_117, %c0_118] : memref<15x1xf32, #tpu.memory_space<vmem>>, vector<15x1xf32>
    %140 = vector.extract_strided_slice %137 {offsets = [0, 0], sizes = [15, 178], strides = [1, 1]} : vector<15x200xf32> to vector<15x178xf32>
    %c0_119 = arith.constant 0 : index
    %c0_120 = arith.constant 0 : index
    %141 = vector.load %arg30[%c0_119, %c0_120] : memref<135x178xf32, #tpu.memory_space<vmem>>, vector<15x178xf32>
    tpu.vector_store %arg30[%c0_119, %c0_120], %140 {strides = array<i32>} : memref<135x178xf32, #tpu.memory_space<vmem>>, vector<15x178xf32>,
    %142 = vector.extract_strided_slice %137 {offsets = [0, 1], sizes = [15, 178], strides = [1, 1]} : vector<15x200xf32> to vector<15x178xf32>
    %c15_121 = arith.constant 15 : index
    %c0_122 = arith.constant 0 : index
    %143 = vector.load %arg30[%c15_121, %c0_122] : memref<135x178xf32, #tpu.memory_space<vmem>>, vector<15x178xf32>
    tpu.vector_store %arg30[%c15_121, %c0_122], %142 {strides = array<i32>} : memref<135x178xf32, #tpu.memory_space<vmem>>, vector<15x178xf32>,
    %144 = vector.extract_strided_slice %137 {offsets = [0, 2], sizes = [15, 178], strides = [1, 1]} : vector<15x200xf32> to vector<15x178xf32>
    %c30_123 = arith.constant 30 : index
    %c0_124 = arith.constant 0 : index
    %145 = vector.load %arg30[%c30_123, %c0_124] : memref<135x178xf32, #tpu.memory_space<vmem>>, vector<15x178xf32>
    tpu.vector_store %arg30[%c30_123, %c0_124], %144 {strides = array<i32>} : memref<135x178xf32, #tpu.memory_space<vmem>>, vector<15x178xf32>,
    %146 = vector.extract_strided_slice %137 {offsets = [0, 10], sizes = [15, 178], strides = [1, 1]} : vector<15x200xf32> to vector<15x178xf32>
    %c45 = arith.constant 45 : index
    %c0_125 = arith.constant 0 : index
    %147 = vector.load %arg30[%c45, %c0_125] : memref<135x178xf32, #tpu.memory_space<vmem>>, vector<15x178xf32>
    tpu.vector_store %arg30[%c45, %c0_125], %146 {strides = array<i32>} : memref<135x178xf32, #tpu.memory_space<vmem>>, vector<15x178xf32>,
    %148 = vector.extract_strided_slice %137 {offsets = [0, 11], sizes = [15, 178], strides = [1, 1]} : vector<15x200xf32> to vector<15x178xf32>
    %c60 = arith.constant 60 : index
    %c0_126 = arith.constant 0 : index
    %149 = vector.load %arg30[%c60, %c0_126] : memref<135x178xf32, #tpu.memory_space<vmem>>, vector<15x178xf32>
    tpu.vector_store %arg30[%c60, %c0_126], %148 {strides = array<i32>} : memref<135x178xf32, #tpu.memory_space<vmem>>, vector<15x178xf32>,
    %150 = vector.extract_strided_slice %137 {offsets = [0, 12], sizes = [15, 178], strides = [1, 1]} : vector<15x200xf32> to vector<15x178xf32>
    %c75 = arith.constant 75 : index
    %c0_127 = arith.constant 0 : index
    %151 = vector.load %arg30[%c75, %c0_127] : memref<135x178xf32, #tpu.memory_space<vmem>>, vector<15x178xf32>
    tpu.vector_store %arg30[%c75, %c0_127], %150 {strides = array<i32>} : memref<135x178xf32, #tpu.memory_space<vmem>>, vector<15x178xf32>,
    %152 = vector.extract_strided_slice %137 {offsets = [0, 20], sizes = [15, 178], strides = [1, 1]} : vector<15x200xf32> to vector<15x178xf32>
    %c90 = arith.constant 90 : index
    %c0_128 = arith.constant 0 : index
    %153 = vector.load %arg30[%c90, %c0_128] : memref<135x178xf32, #tpu.memory_space<vmem>>, vector<15x178xf32>
    tpu.vector_store %arg30[%c90, %c0_128], %152 {strides = array<i32>} : memref<135x178xf32, #tpu.memory_space<vmem>>, vector<15x178xf32>,
    %154 = vector.extract_strided_slice %137 {offsets = [0, 21], sizes = [15, 178], strides = [1, 1]} : vector<15x200xf32> to vector<15x178xf32>
    %c105 = arith.constant 105 : index
    %c0_129 = arith.constant 0 : index
    %155 = vector.load %arg30[%c105, %c0_129] : memref<135x178xf32, #tpu.memory_space<vmem>>, vector<15x178xf32>
    tpu.vector_store %arg30[%c105, %c0_129], %154 {strides = array<i32>} : memref<135x178xf32, #tpu.memory_space<vmem>>, vector<15x178xf32>,
    %156 = vector.extract_strided_slice %137 {offsets = [0, 22], sizes = [15, 178], strides = [1, 1]} : vector<15x200xf32> to vector<15x178xf32>
    %c120 = arith.constant 120 : index
    %c0_130 = arith.constant 0 : index
    %157 = vector.load %arg30[%c120, %c0_130] : memref<135x178xf32, #tpu.memory_space<vmem>>, vector<15x178xf32>
    tpu.vector_store %arg30[%c120, %c0_130], %156 {strides = array<i32>} : memref<135x178xf32, #tpu.memory_space<vmem>>, vector<15x178xf32>,
    %c0_131 = arith.constant 0 : index
    %c0_132 = arith.constant 0 : index
    %158 = vector.load %arg30[%c0_131, %c0_132] : memref<135x178xf32, #tpu.memory_space<vmem>>, vector<135x178xf32>
    %159 = arith.truncf %158 : vector<135x178xf32> to vector<135x178xbf16>
    %cst_133 = arith.constant dense<0.000000e+00> : vector<15x178xf32>
    %160 = tpu.matmul %138, %159, %cst_133 {dimension_numbers = #tpu.dot_dimension_numbers<[1], [0], [0], [1], [0, 0, 1, 1], [], []>} : vector<15x135xbf16>, vector<135x178xbf16>, vector<15x178xf32> -> vector<15x178xf32>
    %161 = vector.broadcast %139 : vector<15x1xf32> to vector<15x178xf32>
    %162 = arith.addf %160, %161 : vector<15x178xf32>
    %163 = math.tanh %162 : vector<15x178xf32>
    %164 = vector.broadcast %107 : vector<1x178xf32> to vector<15x178xf32>
    %165 = arith.mulf %163, %164 : vector<15x178xf32>
    %c0_134 = arith.constant 0 : index
    %c11_135 = arith.constant 11 : index
    %166 = vector.load %arg27[%c0_134, %c11_135] : memref<15x200xf32, #tpu.memory_space<vmem>>, vector<15x178xf32>
    tpu.vector_store %arg27[%c0_134, %c11_135], %165 {strides = array<i32>} : memref<15x200xf32, #tpu.memory_space<vmem>>, vector<15x178xf32>,
    %c0_136 = arith.constant 0 : index
    %c0_137 = arith.constant 0 : index
    %167 = vector.load %arg27[%c0_136, %c0_137] : memref<15x200xf32, #tpu.memory_space<vmem>>, vector<15x200xf32>
    %c0_138 = arith.constant 0 : index
    %c0_139 = arith.constant 0 : index
    %168 = vector.load %arg6[%c0_138, %c0_139] : memref<15x135xbf16, #tpu.memory_space<vmem>>, vector<15x135xbf16>
    %c0_140 = arith.constant 0 : index
    %c0_141 = arith.constant 0 : index
    %169 = vector.load %arg15[%c0_140, %c0_141] : memref<15x1xf32, #tpu.memory_space<vmem>>, vector<15x1xf32>
    %170 = vector.extract_strided_slice %167 {offsets = [0, 0], sizes = [15, 178], strides = [1, 1]} : vector<15x200xf32> to vector<15x178xf32>
    %c0_142 = arith.constant 0 : index
    %c0_143 = arith.constant 0 : index
    %171 = vector.load %arg30[%c0_142, %c0_143] : memref<135x178xf32, #tpu.memory_space<vmem>>, vector<15x178xf32>
    tpu.vector_store %arg30[%c0_142, %c0_143], %170 {strides = array<i32>} : memref<135x178xf32, #tpu.memory_space<vmem>>, vector<15x178xf32>,
    %172 = vector.extract_strided_slice %167 {offsets = [0, 1], sizes = [15, 178], strides = [1, 1]} : vector<15x200xf32> to vector<15x178xf32>
    %c15_144 = arith.constant 15 : index
    %c0_145 = arith.constant 0 : index
    %173 = vector.load %arg30[%c15_144, %c0_145] : memref<135x178xf32, #tpu.memory_space<vmem>>, vector<15x178xf32>
    tpu.vector_store %arg30[%c15_144, %c0_145], %172 {strides = array<i32>} : memref<135x178xf32, #tpu.memory_space<vmem>>, vector<15x178xf32>,
    %174 = vector.extract_strided_slice %167 {offsets = [0, 2], sizes = [15, 178], strides = [1, 1]} : vector<15x200xf32> to vector<15x178xf32>
    %c30_146 = arith.constant 30 : index
    %c0_147 = arith.constant 0 : index
    %175 = vector.load %arg30[%c30_146, %c0_147] : memref<135x178xf32, #tpu.memory_space<vmem>>, vector<15x178xf32>
    tpu.vector_store %arg30[%c30_146, %c0_147], %174 {strides = array<i32>} : memref<135x178xf32, #tpu.memory_space<vmem>>, vector<15x178xf32>,
    %176 = vector.extract_strided_slice %167 {offsets = [0, 10], sizes = [15, 178], strides = [1, 1]} : vector<15x200xf32> to vector<15x178xf32>
    %c45_148 = arith.constant 45 : index
    %c0_149 = arith.constant 0 : index
    %177 = vector.load %arg30[%c45_148, %c0_149] : memref<135x178xf32, #tpu.memory_space<vmem>>, vector<15x178xf32>
    tpu.vector_store %arg30[%c45_148, %c0_149], %176 {strides = array<i32>} : memref<135x178xf32, #tpu.memory_space<vmem>>, vector<15x178xf32>,
    %178 = vector.extract_strided_slice %167 {offsets = [0, 11], sizes = [15, 178], strides = [1, 1]} : vector<15x200xf32> to vector<15x178xf32>
    %c60_150 = arith.constant 60 : index
    %c0_151 = arith.constant 0 : index
    %179 = vector.load %arg30[%c60_150, %c0_151] : memref<135x178xf32, #tpu.memory_space<vmem>>, vector<15x178xf32>
    tpu.vector_store %arg30[%c60_150, %c0_151], %178 {strides = array<i32>} : memref<135x178xf32, #tpu.memory_space<vmem>>, vector<15x178xf32>,
    %180 = vector.extract_strided_slice %167 {offsets = [0, 12], sizes = [15, 178], strides = [1, 1]} : vector<15x200xf32> to vector<15x178xf32>
    %c75_152 = arith.constant 75 : index
    %c0_153 = arith.constant 0 : index
    %181 = vector.load %arg30[%c75_152, %c0_153] : memref<135x178xf32, #tpu.memory_space<vmem>>, vector<15x178xf32>
    tpu.vector_store %arg30[%c75_152, %c0_153], %180 {strides = array<i32>} : memref<135x178xf32, #tpu.memory_space<vmem>>, vector<15x178xf32>,
    %182 = vector.extract_strided_slice %167 {offsets = [0, 20], sizes = [15, 178], strides = [1, 1]} : vector<15x200xf32> to vector<15x178xf32>
    %c90_154 = arith.constant 90 : index
    %c0_155 = arith.constant 0 : index
    %183 = vector.load %arg30[%c90_154, %c0_155] : memref<135x178xf32, #tpu.memory_space<vmem>>, vector<15x178xf32>
    tpu.vector_store %arg30[%c90_154, %c0_155], %182 {strides = array<i32>} : memref<135x178xf32, #tpu.memory_space<vmem>>, vector<15x178xf32>,
    %184 = vector.extract_strided_slice %167 {offsets = [0, 21], sizes = [15, 178], strides = [1, 1]} : vector<15x200xf32> to vector<15x178xf32>
    %c105_156 = arith.constant 105 : index
    %c0_157 = arith.constant 0 : index
    %185 = vector.load %arg30[%c105_156, %c0_157] : memref<135x178xf32, #tpu.memory_space<vmem>>, vector<15x178xf32>
    tpu.vector_store %arg30[%c105_156, %c0_157], %184 {strides = array<i32>} : memref<135x178xf32, #tpu.memory_space<vmem>>, vector<15x178xf32>,
    %186 = vector.extract_strided_slice %167 {offsets = [0, 22], sizes = [15, 178], strides = [1, 1]} : vector<15x200xf32> to vector<15x178xf32>
    %c120_158 = arith.constant 120 : index
    %c0_159 = arith.constant 0 : index
    %187 = vector.load %arg30[%c120_158, %c0_159] : memref<135x178xf32, #tpu.memory_space<vmem>>, vector<15x178xf32>
    tpu.vector_store %arg30[%c120_158, %c0_159], %186 {strides = array<i32>} : memref<135x178xf32, #tpu.memory_space<vmem>>, vector<15x178xf32>,
    %c0_160 = arith.constant 0 : index
    %c0_161 = arith.constant 0 : index
    %188 = vector.load %arg30[%c0_160, %c0_161] : memref<135x178xf32, #tpu.memory_space<vmem>>, vector<135x178xf32>
    %189 = arith.truncf %188 : vector<135x178xf32> to vector<135x178xbf16>
    %cst_162 = arith.constant dense<0.000000e+00> : vector<15x178xf32>
    %190 = tpu.matmul %168, %189, %cst_162 {dimension_numbers = #tpu.dot_dimension_numbers<[1], [0], [0], [1], [0, 0, 1, 1], [], []>} : vector<15x135xbf16>, vector<135x178xbf16>, vector<15x178xf32> -> vector<15x178xf32>
    %191 = vector.broadcast %169 : vector<15x1xf32> to vector<15x178xf32>
    %192 = arith.addf %190, %191 : vector<15x178xf32>
    %193 = math.tanh %192 : vector<15x178xf32>
    %194 = vector.broadcast %107 : vector<1x178xf32> to vector<15x178xf32>
    %195 = arith.mulf %193, %194 : vector<15x178xf32>
    %c0_163 = arith.constant 0 : index
    %c11_164 = arith.constant 11 : index
    %196 = vector.load %arg27[%c0_163, %c11_164] : memref<15x200xf32, #tpu.memory_space<vmem>>, vector<15x178xf32>
    tpu.vector_store %arg27[%c0_163, %c11_164], %195 {strides = array<i32>} : memref<15x200xf32, #tpu.memory_space<vmem>>, vector<15x178xf32>,
    %c0_165 = arith.constant 0 : index
    %c0_166 = arith.constant 0 : index
    %197 = vector.load %arg27[%c0_165, %c0_166] : memref<15x200xf32, #tpu.memory_space<vmem>>, vector<15x200xf32>
    %c0_167 = arith.constant 0 : index
    %c0_168 = arith.constant 0 : index
    %198 = vector.load %arg23[%c0_167, %c0_168] : memref<189x72xf32, #tpu.memory_space<vmem>>, vector<189x72xf32>
    %199 = vector.extract_strided_slice %197 {offsets = [0, 0], sizes = [15, 189], strides = [1, 1]} : vector<15x200xf32> to vector<15x189xf32>
    %200 = vector.extract_strided_slice %197 {offsets = [0, 1], sizes = [15, 189], strides = [1, 1]} : vector<15x200xf32> to vector<15x189xf32>
    %201 = vector.extract_strided_slice %197 {offsets = [0, 10], sizes = [15, 189], strides = [1, 1]} : vector<15x200xf32> to vector<15x189xf32>
    %202 = vector.extract_strided_slice %197 {offsets = [0, 11], sizes = [15, 189], strides = [1, 1]} : vector<15x200xf32> to vector<15x189xf32>
    %203 = arith.maximumf %199, %200 : vector<15x189xf32>
    %204 = arith.maximumf %201, %202 : vector<15x189xf32>
    %205 = arith.maximumf %203, %204 : vector<15x189xf32>
    %cst_169 = arith.constant dense<0.000000e+00> : vector<15x72xf32>
    %206 = tpu.matmul %205, %198, %cst_169 {dimension_numbers = #tpu.dot_dimension_numbers<[1], [0], [0], [1], [0, 0, 1, 1], [], []>} : vector<15x189xf32>, vector<189x72xf32>, vector<15x72xf32> -> vector<15x72xf32>
    %c0_170 = arith.constant 0 : index
    %c0_171 = arith.constant 0 : index
    %207 = vector.load %arg21[%c0_170, %c0_171] : memref<1x58xf32, #tpu.memory_space<vmem>>, vector<1x58xf32>
    %c0_172 = arith.constant 0 : index
    %c0_173 = arith.constant 0 : index
    %208 = vector.load %arg7[%c0_172, %c0_173] : memref<25x135xbf16, #tpu.memory_space<vmem>>, vector<25x135xbf16>
    %c0_174 = arith.constant 0 : index
    %c0_175 = arith.constant 0 : index
    %209 = vector.load %arg16[%c0_174, %c0_175] : memref<25x1xf32, #tpu.memory_space<vmem>>, vector<25x1xf32>
    %210 = vector.extract_strided_slice %206 {offsets = [0, 0], sizes = [15, 58], strides = [1, 1]} : vector<15x72xf32> to vector<15x58xf32>
    %c0_176 = arith.constant 0 : index
    %c0_177 = arith.constant 0 : index
    %211 = vector.load %arg31[%c0_176, %c0_177] : memref<225x58xf32, #tpu.memory_space<vmem>>, vector<15x58xf32>
    tpu.vector_store %arg31[%c0_176, %c0_177], %210 {strides = array<i32>} : memref<225x58xf32, #tpu.memory_space<vmem>>, vector<15x58xf32>,
    %212 = vector.extract_strided_slice %206 {offsets = [0, 1], sizes = [15, 58], strides = [1, 1]} : vector<15x72xf32> to vector<15x58xf32>
    %c15_178 = arith.constant 15 : index
    %c0_179 = arith.constant 0 : index
    %213 = vector.load %arg31[%c15_178, %c0_179] : memref<225x58xf32, #tpu.memory_space<vmem>>, vector<15x58xf32>
    tpu.vector_store %arg31[%c15_178, %c0_179], %212 {strides = array<i32>} : memref<225x58xf32, #tpu.memory_space<vmem>>, vector<15x58xf32>,
    %214 = vector.extract_strided_slice %206 {offsets = [0, 2], sizes = [15, 58], strides = [1, 1]} : vector<15x72xf32> to vector<15x58xf32>
    %c30_180 = arith.constant 30 : index
    %c0_181 = arith.constant 0 : index
    %215 = vector.load %arg31[%c30_180, %c0_181] : memref<225x58xf32, #tpu.memory_space<vmem>>, vector<15x58xf32>
    tpu.vector_store %arg31[%c30_180, %c0_181], %214 {strides = array<i32>} : memref<225x58xf32, #tpu.memory_space<vmem>>, vector<15x58xf32>,
    %216 = vector.extract_strided_slice %206 {offsets = [0, 6], sizes = [15, 58], strides = [1, 1]} : vector<15x72xf32> to vector<15x58xf32>
    %c45_182 = arith.constant 45 : index
    %c0_183 = arith.constant 0 : index
    %217 = vector.load %arg31[%c45_182, %c0_183] : memref<225x58xf32, #tpu.memory_space<vmem>>, vector<15x58xf32>
    tpu.vector_store %arg31[%c45_182, %c0_183], %216 {strides = array<i32>} : memref<225x58xf32, #tpu.memory_space<vmem>>, vector<15x58xf32>,
    %218 = vector.extract_strided_slice %206 {offsets = [0, 7], sizes = [15, 58], strides = [1, 1]} : vector<15x72xf32> to vector<15x58xf32>
    %c60_184 = arith.constant 60 : index
    %c0_185 = arith.constant 0 : index
    %219 = vector.load %arg31[%c60_184, %c0_185] : memref<225x58xf32, #tpu.memory_space<vmem>>, vector<15x58xf32>
    tpu.vector_store %arg31[%c60_184, %c0_185], %218 {strides = array<i32>} : memref<225x58xf32, #tpu.memory_space<vmem>>, vector<15x58xf32>,
    %220 = vector.extract_strided_slice %206 {offsets = [0, 8], sizes = [15, 58], strides = [1, 1]} : vector<15x72xf32> to vector<15x58xf32>
    %c75_186 = arith.constant 75 : index
    %c0_187 = arith.constant 0 : index
    %221 = vector.load %arg31[%c75_186, %c0_187] : memref<225x58xf32, #tpu.memory_space<vmem>>, vector<15x58xf32>
    tpu.vector_store %arg31[%c75_186, %c0_187], %220 {strides = array<i32>} : memref<225x58xf32, #tpu.memory_space<vmem>>, vector<15x58xf32>,
    %222 = vector.extract_strided_slice %206 {offsets = [0, 12], sizes = [15, 58], strides = [1, 1]} : vector<15x72xf32> to vector<15x58xf32>
    %c90_188 = arith.constant 90 : index
    %c0_189 = arith.constant 0 : index
    %223 = vector.load %arg31[%c90_188, %c0_189] : memref<225x58xf32, #tpu.memory_space<vmem>>, vector<15x58xf32>
    tpu.vector_store %arg31[%c90_188, %c0_189], %222 {strides = array<i32>} : memref<225x58xf32, #tpu.memory_space<vmem>>, vector<15x58xf32>,
    %224 = vector.extract_strided_slice %206 {offsets = [0, 13], sizes = [15, 58], strides = [1, 1]} : vector<15x72xf32> to vector<15x58xf32>
    %c105_190 = arith.constant 105 : index
    %c0_191 = arith.constant 0 : index
    %225 = vector.load %arg31[%c105_190, %c0_191] : memref<225x58xf32, #tpu.memory_space<vmem>>, vector<15x58xf32>
    tpu.vector_store %arg31[%c105_190, %c0_191], %224 {strides = array<i32>} : memref<225x58xf32, #tpu.memory_space<vmem>>, vector<15x58xf32>,
    %226 = vector.extract_strided_slice %206 {offsets = [0, 14], sizes = [15, 58], strides = [1, 1]} : vector<15x72xf32> to vector<15x58xf32>
    %c120_192 = arith.constant 120 : index
    %c0_193 = arith.constant 0 : index
    %227 = vector.load %arg31[%c120_192, %c0_193] : memref<225x58xf32, #tpu.memory_space<vmem>>, vector<15x58xf32>
    tpu.vector_store %arg31[%c120_192, %c0_193], %226 {strides = array<i32>} : memref<225x58xf32, #tpu.memory_space<vmem>>, vector<15x58xf32>,
    %c0_194 = arith.constant 0 : index
    %c0_195 = arith.constant 0 : index
    %228 = vector.load %arg31[%c0_194, %c0_195] : memref<225x58xf32, #tpu.memory_space<vmem>>, vector<135x58xf32>
    %229 = arith.truncf %228 : vector<135x58xf32> to vector<135x58xbf16>
    %cst_196 = arith.constant dense<0.000000e+00> : vector<25x58xf32>
    %230 = tpu.matmul %208, %229, %cst_196 {dimension_numbers = #tpu.dot_dimension_numbers<[1], [0], [0], [1], [0, 0, 1, 1], [], []>} : vector<25x135xbf16>, vector<135x58xbf16>, vector<25x58xf32> -> vector<25x58xf32>
    %231 = vector.broadcast %209 : vector<25x1xf32> to vector<25x58xf32>
    %232 = arith.addf %230, %231 : vector<25x58xf32>
    %233 = math.tanh %232 : vector<25x58xf32>
    %234 = vector.broadcast %207 : vector<1x58xf32> to vector<25x58xf32>
    %235 = arith.mulf %233, %234 : vector<25x58xf32>
    %c0_197 = arith.constant 0 : index
    %c7_198 = arith.constant 7 : index
    %236 = vector.load %arg28[%c0_197, %c7_198] : memref<25x72xf32, #tpu.memory_space<vmem>>, vector<25x58xf32>
    tpu.vector_store %arg28[%c0_197, %c7_198], %235 {strides = array<i32>} : memref<25x72xf32, #tpu.memory_space<vmem>>, vector<25x58xf32>,
    %c0_199 = arith.constant 0 : index
    %c0_200 = arith.constant 0 : index
    %237 = vector.load %arg28[%c0_199, %c0_200] : memref<25x72xf32, #tpu.memory_space<vmem>>, vector<25x72xf32>
    %c0_201 = arith.constant 0 : index
    %c0_202 = arith.constant 0 : index
    %238 = vector.load %arg8[%c0_201, %c0_202] : memref<25x225xbf16, #tpu.memory_space<vmem>>, vector<25x225xbf16>
    %c0_203 = arith.constant 0 : index
    %c0_204 = arith.constant 0 : index
    %239 = vector.load %arg17[%c0_203, %c0_204] : memref<25x1xf32, #tpu.memory_space<vmem>>, vector<25x1xf32>
    %240 = vector.extract_strided_slice %237 {offsets = [0, 0], sizes = [25, 58], strides = [1, 1]} : vector<25x72xf32> to vector<25x58xf32>
    %c0_205 = arith.constant 0 : index
    %c0_206 = arith.constant 0 : index
    %241 = vector.load %arg31[%c0_205, %c0_206] : memref<225x58xf32, #tpu.memory_space<vmem>>, vector<25x58xf32>
    tpu.vector_store %arg31[%c0_205, %c0_206], %240 {strides = array<i32>} : memref<225x58xf32, #tpu.memory_space<vmem>>, vector<25x58xf32>,
    %242 = vector.extract_strided_slice %237 {offsets = [0, 1], sizes = [25, 58], strides = [1, 1]} : vector<25x72xf32> to vector<25x58xf32>
    %c25_207 = arith.constant 25 : index
    %c0_208 = arith.constant 0 : index
    %243 = vector.load %arg31[%c25_207, %c0_208] : memref<225x58xf32, #tpu.memory_space<vmem>>, vector<25x58xf32>
    tpu.vector_store %arg31[%c25_207, %c0_208], %242 {strides = array<i32>} : memref<225x58xf32, #tpu.memory_space<vmem>>, vector<25x58xf32>,
    %244 = vector.extract_strided_slice %237 {offsets = [0, 2], sizes = [25, 58], strides = [1, 1]} : vector<25x72xf32> to vector<25x58xf32>
    %c50 = arith.constant 50 : index
    %c0_209 = arith.constant 0 : index
    %245 = vector.load %arg31[%c50, %c0_209] : memref<225x58xf32, #tpu.memory_space<vmem>>, vector<25x58xf32>
    tpu.vector_store %arg31[%c50, %c0_209], %244 {strides = array<i32>} : memref<225x58xf32, #tpu.memory_space<vmem>>, vector<25x58xf32>,
    %246 = vector.extract_strided_slice %237 {offsets = [0, 6], sizes = [25, 58], strides = [1, 1]} : vector<25x72xf32> to vector<25x58xf32>
    %c75_210 = arith.constant 75 : index
    %c0_211 = arith.constant 0 : index
    %247 = vector.load %arg31[%c75_210, %c0_211] : memref<225x58xf32, #tpu.memory_space<vmem>>, vector<25x58xf32>
    tpu.vector_store %arg31[%c75_210, %c0_211], %246 {strides = array<i32>} : memref<225x58xf32, #tpu.memory_space<vmem>>, vector<25x58xf32>,
    %248 = vector.extract_strided_slice %237 {offsets = [0, 7], sizes = [25, 58], strides = [1, 1]} : vector<25x72xf32> to vector<25x58xf32>
    %c100 = arith.constant 100 : index
    %c0_212 = arith.constant 0 : index
    %249 = vector.load %arg31[%c100, %c0_212] : memref<225x58xf32, #tpu.memory_space<vmem>>, vector<25x58xf32>
    tpu.vector_store %arg31[%c100, %c0_212], %248 {strides = array<i32>} : memref<225x58xf32, #tpu.memory_space<vmem>>, vector<25x58xf32>,
    %250 = vector.extract_strided_slice %237 {offsets = [0, 8], sizes = [25, 58], strides = [1, 1]} : vector<25x72xf32> to vector<25x58xf32>
    %c125 = arith.constant 125 : index
    %c0_213 = arith.constant 0 : index
    %251 = vector.load %arg31[%c125, %c0_213] : memref<225x58xf32, #tpu.memory_space<vmem>>, vector<25x58xf32>
    tpu.vector_store %arg31[%c125, %c0_213], %250 {strides = array<i32>} : memref<225x58xf32, #tpu.memory_space<vmem>>, vector<25x58xf32>,
    %252 = vector.extract_strided_slice %237 {offsets = [0, 12], sizes = [25, 58], strides = [1, 1]} : vector<25x72xf32> to vector<25x58xf32>
    %c150 = arith.constant 150 : index
    %c0_214 = arith.constant 0 : index
    %253 = vector.load %arg31[%c150, %c0_214] : memref<225x58xf32, #tpu.memory_space<vmem>>, vector<25x58xf32>
    tpu.vector_store %arg31[%c150, %c0_214], %252 {strides = array<i32>} : memref<225x58xf32, #tpu.memory_space<vmem>>, vector<25x58xf32>,
    %254 = vector.extract_strided_slice %237 {offsets = [0, 13], sizes = [25, 58], strides = [1, 1]} : vector<25x72xf32> to vector<25x58xf32>
    %c175 = arith.constant 175 : index
    %c0_215 = arith.constant 0 : index
    %255 = vector.load %arg31[%c175, %c0_215] : memref<225x58xf32, #tpu.memory_space<vmem>>, vector<25x58xf32>
    tpu.vector_store %arg31[%c175, %c0_215], %254 {strides = array<i32>} : memref<225x58xf32, #tpu.memory_space<vmem>>, vector<25x58xf32>,
    %256 = vector.extract_strided_slice %237 {offsets = [0, 14], sizes = [25, 58], strides = [1, 1]} : vector<25x72xf32> to vector<25x58xf32>
    %c200 = arith.constant 200 : index
    %c0_216 = arith.constant 0 : index
    %257 = vector.load %arg31[%c200, %c0_216] : memref<225x58xf32, #tpu.memory_space<vmem>>, vector<25x58xf32>
    tpu.vector_store %arg31[%c200, %c0_216], %256 {strides = array<i32>} : memref<225x58xf32, #tpu.memory_space<vmem>>, vector<25x58xf32>,
    %c0_217 = arith.constant 0 : index
    %c0_218 = arith.constant 0 : index
    %258 = vector.load %arg31[%c0_217, %c0_218] : memref<225x58xf32, #tpu.memory_space<vmem>>, vector<225x58xf32>
    %259 = arith.truncf %258 : vector<225x58xf32> to vector<225x58xbf16>
    %cst_219 = arith.constant dense<0.000000e+00> : vector<25x58xf32>
    %260 = tpu.matmul %238, %259, %cst_219 {dimension_numbers = #tpu.dot_dimension_numbers<[1], [0], [0], [1], [0, 0, 1, 1], [], []>} : vector<25x225xbf16>, vector<225x58xbf16>, vector<25x58xf32> -> vector<25x58xf32>
    %261 = vector.broadcast %239 : vector<25x1xf32> to vector<25x58xf32>
    %262 = arith.addf %260, %261 : vector<25x58xf32>
    %263 = math.tanh %262 : vector<25x58xf32>
    %264 = vector.broadcast %207 : vector<1x58xf32> to vector<25x58xf32>
    %265 = arith.mulf %263, %264 : vector<25x58xf32>
    %c0_220 = arith.constant 0 : index
    %c7_221 = arith.constant 7 : index
    %266 = vector.load %arg28[%c0_220, %c7_221] : memref<25x72xf32, #tpu.memory_space<vmem>>, vector<25x58xf32>
    tpu.vector_store %arg28[%c0_220, %c7_221], %265 {strides = array<i32>} : memref<25x72xf32, #tpu.memory_space<vmem>>, vector<25x58xf32>,
    %c0_222 = arith.constant 0 : index
    %c0_223 = arith.constant 0 : index
    %267 = vector.load %arg28[%c0_222, %c0_223] : memref<25x72xf32, #tpu.memory_space<vmem>>, vector<25x72xf32>
    %c0_224 = arith.constant 0 : index
    %c0_225 = arith.constant 0 : index
    %268 = vector.load %arg9[%c0_224, %c0_225] : memref<25x225xbf16, #tpu.memory_space<vmem>>, vector<25x225xbf16>
    %c0_226 = arith.constant 0 : index
    %c0_227 = arith.constant 0 : index
    %269 = vector.load %arg18[%c0_226, %c0_227] : memref<25x1xf32, #tpu.memory_space<vmem>>, vector<25x1xf32>
    %270 = vector.extract_strided_slice %267 {offsets = [0, 0], sizes = [25, 58], strides = [1, 1]} : vector<25x72xf32> to vector<25x58xf32>
    %c0_228 = arith.constant 0 : index
    %c0_229 = arith.constant 0 : index
    %271 = vector.load %arg31[%c0_228, %c0_229] : memref<225x58xf32, #tpu.memory_space<vmem>>, vector<25x58xf32>
    tpu.vector_store %arg31[%c0_228, %c0_229], %270 {strides = array<i32>} : memref<225x58xf32, #tpu.memory_space<vmem>>, vector<25x58xf32>,
    %272 = vector.extract_strided_slice %267 {offsets = [0, 1], sizes = [25, 58], strides = [1, 1]} : vector<25x72xf32> to vector<25x58xf32>
    %c25_230 = arith.constant 25 : index
    %c0_231 = arith.constant 0 : index
    %273 = vector.load %arg31[%c25_230, %c0_231] : memref<225x58xf32, #tpu.memory_space<vmem>>, vector<25x58xf32>
    tpu.vector_store %arg31[%c25_230, %c0_231], %272 {strides = array<i32>} : memref<225x58xf32, #tpu.memory_space<vmem>>, vector<25x58xf32>,
    %274 = vector.extract_strided_slice %267 {offsets = [0, 2], sizes = [25, 58], strides = [1, 1]} : vector<25x72xf32> to vector<25x58xf32>
    %c50_232 = arith.constant 50 : index
    %c0_233 = arith.constant 0 : index
    %275 = vector.load %arg31[%c50_232, %c0_233] : memref<225x58xf32, #tpu.memory_space<vmem>>, vector<25x58xf32>
    tpu.vector_store %arg31[%c50_232, %c0_233], %274 {strides = array<i32>} : memref<225x58xf32, #tpu.memory_space<vmem>>, vector<25x58xf32>,
    %276 = vector.extract_strided_slice %267 {offsets = [0, 6], sizes = [25, 58], strides = [1, 1]} : vector<25x72xf32> to vector<25x58xf32>
    %c75_234 = arith.constant 75 : index
    %c0_235 = arith.constant 0 : index
    %277 = vector.load %arg31[%c75_234, %c0_235] : memref<225x58xf32, #tpu.memory_space<vmem>>, vector<25x58xf32>
    tpu.vector_store %arg31[%c75_234, %c0_235], %276 {strides = array<i32>} : memref<225x58xf32, #tpu.memory_space<vmem>>, vector<25x58xf32>,
    %278 = vector.extract_strided_slice %267 {offsets = [0, 7], sizes = [25, 58], strides = [1, 1]} : vector<25x72xf32> to vector<25x58xf32>
    %c100_236 = arith.constant 100 : index
    %c0_237 = arith.constant 0 : index
    %279 = vector.load %arg31[%c100_236, %c0_237] : memref<225x58xf32, #tpu.memory_space<vmem>>, vector<25x58xf32>
    tpu.vector_store %arg31[%c100_236, %c0_237], %278 {strides = array<i32>} : memref<225x58xf32, #tpu.memory_space<vmem>>, vector<25x58xf32>,
    %280 = vector.extract_strided_slice %267 {offsets = [0, 8], sizes = [25, 58], strides = [1, 1]} : vector<25x72xf32> to vector<25x58xf32>
    %c125_238 = arith.constant 125 : index
    %c0_239 = arith.constant 0 : index
    %281 = vector.load %arg31[%c125_238, %c0_239] : memref<225x58xf32, #tpu.memory_space<vmem>>, vector<25x58xf32>
    tpu.vector_store %arg31[%c125_238, %c0_239], %280 {strides = array<i32>} : memref<225x58xf32, #tpu.memory_space<vmem>>, vector<25x58xf32>,
    %282 = vector.extract_strided_slice %267 {offsets = [0, 12], sizes = [25, 58], strides = [1, 1]} : vector<25x72xf32> to vector<25x58xf32>
    %c150_240 = arith.constant 150 : index
    %c0_241 = arith.constant 0 : index
    %283 = vector.load %arg31[%c150_240, %c0_241] : memref<225x58xf32, #tpu.memory_space<vmem>>, vector<25x58xf32>
    tpu.vector_store %arg31[%c150_240, %c0_241], %282 {strides = array<i32>} : memref<225x58xf32, #tpu.memory_space<vmem>>, vector<25x58xf32>,
    %284 = vector.extract_strided_slice %267 {offsets = [0, 13], sizes = [25, 58], strides = [1, 1]} : vector<25x72xf32> to vector<25x58xf32>
    %c175_242 = arith.constant 175 : index
    %c0_243 = arith.constant 0 : index
    %285 = vector.load %arg31[%c175_242, %c0_243] : memref<225x58xf32, #tpu.memory_space<vmem>>, vector<25x58xf32>
    tpu.vector_store %arg31[%c175_242, %c0_243], %284 {strides = array<i32>} : memref<225x58xf32, #tpu.memory_space<vmem>>, vector<25x58xf32>,
    %286 = vector.extract_strided_slice %267 {offsets = [0, 14], sizes = [25, 58], strides = [1, 1]} : vector<25x72xf32> to vector<25x58xf32>
    %c200_244 = arith.constant 200 : index
    %c0_245 = arith.constant 0 : index
    %287 = vector.load %arg31[%c200_244, %c0_245] : memref<225x58xf32, #tpu.memory_space<vmem>>, vector<25x58xf32>
    tpu.vector_store %arg31[%c200_244, %c0_245], %286 {strides = array<i32>} : memref<225x58xf32, #tpu.memory_space<vmem>>, vector<25x58xf32>,
    %c0_246 = arith.constant 0 : index
    %c0_247 = arith.constant 0 : index
    %288 = vector.load %arg31[%c0_246, %c0_247] : memref<225x58xf32, #tpu.memory_space<vmem>>, vector<225x58xf32>
    %289 = arith.truncf %288 : vector<225x58xf32> to vector<225x58xbf16>
    %cst_248 = arith.constant dense<0.000000e+00> : vector<25x58xf32>
    %290 = tpu.matmul %268, %289, %cst_248 {dimension_numbers = #tpu.dot_dimension_numbers<[1], [0], [0], [1], [0, 0, 1, 1], [], []>} : vector<25x225xbf16>, vector<225x58xbf16>, vector<25x58xf32> -> vector<25x58xf32>
    %291 = vector.broadcast %269 : vector<25x1xf32> to vector<25x58xf32>
    %292 = arith.addf %290, %291 : vector<25x58xf32>
    %cst_249 = arith.constant 0.000000e+00 : f32
    %293 = vector.broadcast %cst_249 : f32 to vector<25x58xf32>
    %294 = arith.subf %293, %292 : vector<25x58xf32>
    %295 = math.exp %294 : vector<25x58xf32>
    %cst_250 = arith.constant 1.000000e+00 : f32
    %296 = vector.broadcast %cst_250 : f32 to vector<25x58xf32>
    %297 = arith.addf %296, %295 : vector<25x58xf32>
    %cst_251 = arith.constant 1.000000e+00 : f32
    %298 = vector.broadcast %cst_251 : f32 to vector<25x58xf32>
    %299 = arith.divf %298, %297 : vector<25x58xf32>
    %300 = vector.broadcast %207 : vector<1x58xf32> to vector<25x58xf32>
    %301 = arith.mulf %299, %300 : vector<25x58xf32>
    %c0_252 = arith.constant 0 : index
    %c7_253 = arith.constant 7 : index
    %302 = vector.load %arg28[%c0_252, %c7_253] : memref<25x72xf32, #tpu.memory_space<vmem>>, vector<25x58xf32>
    tpu.vector_store %arg28[%c0_252, %c7_253], %301 {strides = array<i32>} : memref<25x72xf32, #tpu.memory_space<vmem>>, vector<25x58xf32>,
    %c0_254 = arith.constant 0 : index
    %c0_255 = arith.constant 0 : index
    %303 = vector.load %arg28[%c0_254, %c0_255] : memref<25x72xf32, #tpu.memory_space<vmem>>, vector<25x72xf32>
    %c0_256 = arith.constant 0 : index
    %c0_257 = arith.constant 0 : index
    %304 = vector.load %arg24[%c0_256, %c0_257] : memref<65x8xf32, #tpu.memory_space<vmem>>, vector<65x8xf32>
    %305 = vector.extract_strided_slice %303 {offsets = [0, 0], sizes = [25, 65], strides = [1, 1]} : vector<25x72xf32> to vector<25x65xf32>
    %306 = vector.extract_strided_slice %303 {offsets = [0, 1], sizes = [25, 65], strides = [1, 1]} : vector<25x72xf32> to vector<25x65xf32>
    %307 = vector.extract_strided_slice %303 {offsets = [0, 6], sizes = [25, 65], strides = [1, 1]} : vector<25x72xf32> to vector<25x65xf32>
    %308 = vector.extract_strided_slice %303 {offsets = [0, 7], sizes = [25, 65], strides = [1, 1]} : vector<25x72xf32> to vector<25x65xf32>
    %309 = arith.maximumf %305, %306 : vector<25x65xf32>
    %310 = arith.maximumf %307, %308 : vector<25x65xf32>
    %311 = arith.maximumf %309, %310 : vector<25x65xf32>
    %cst_258 = arith.constant dense<0.000000e+00> : vector<25x8xf32>
    %312 = tpu.matmul %311, %304, %cst_258 {dimension_numbers = #tpu.dot_dimension_numbers<[1], [0], [0], [1], [0, 0, 1, 1], [], []>} : vector<25x65xf32>, vector<65x8xf32>, vector<25x8xf32> -> vector<25x8xf32>
    %c0_259 = arith.constant 0 : index
    %c0_260 = arith.constant 0 : index
    %313 = vector.load %arg25[%c0_259, %c0_260] : memref<25x8xf32, #tpu.memory_space<vmem>>, vector<25x8xf32>
    tpu.vector_store %arg25[%c0_259, %c0_260], %312 {strides = array<i32>} : memref<25x8xf32, #tpu.memory_space<vmem>>, vector<25x8xf32>,
    return
  }
}

module attributes {stable_mosaic.version = 11 : i64} {
  func.func @_mlp_heads_kernel(%arg0: i32, %arg1: memref<2x100xf32, #tpu.memory_space<vmem>>, %arg2: memref<1x100x512xbf16, #tpu.memory_space<vmem>>, %arg3: memref<1x1x512xf32, #tpu.memory_space<vmem>>, %arg4: memref<1x512x1024xbf16, #tpu.memory_space<vmem>>, %arg5: memref<1x1x1024xf32, #tpu.memory_space<vmem>>, %arg6: memref<1x1024x128xbf16, #tpu.memory_space<vmem>>, %arg7: memref<1x1x128xf32, #tpu.memory_space<vmem>>, %arg8: memref<1x2x128xf32, #tpu.memory_space<vmem>>) attributes {dimension_semantics = [#tpu.dimension_semantics<parallel>], iteration_bounds = array<i64: 2>, scalar_prefetch = 0 : i64, scratch_operands = 0 : i64, tpu.core_type = #tpu.core_type<tc>, window_params = [{pipeline_mode = #tpu.pipeline_mode<synchronous>, transform_indices = @transform_0, window_bounds = array<i64: 2, 100>}, {transform_indices = @transform_1, window_bounds = array<i64: 1, 100, 512>}, {transform_indices = @transform_2, window_bounds = array<i64: 1, 1, 512>}, {transform_indices = @transform_3, window_bounds = array<i64: 1, 512, 1024>}, {transform_indices = @transform_4, window_bounds = array<i64: 1, 1, 1024>}, {transform_indices = @transform_5, window_bounds = array<i64: 1, 1024, 128>}, {transform_indices = @transform_6, window_bounds = array<i64: 1, 1, 128>}, {transform_indices = @transform_7, window_bounds = array<i64: 1, 2, 128>}]} {
    %c0 = arith.constant 0 : index
    %c0_0 = arith.constant 0 : index
    %0 = vector.load %arg1[%c0, %c0_0] : memref<2x100xf32, #tpu.memory_space<vmem>>, vector<2x100xf32>
    %1 = arith.truncf %0 : vector<2x100xf32> to vector<2x100xbf16>
    %c0_1 = arith.constant 0 : index
    %c0_2 = arith.constant 0 : index
    %c0_3 = arith.constant 0 : index
    %2 = vector.load %arg2[%c0_1, %c0_2, %c0_3] : memref<1x100x512xbf16, #tpu.memory_space<vmem>>, vector<1x100x512xbf16>
    %3 = vector.shape_cast %2 : vector<1x100x512xbf16> to vector<100x512xbf16>
    %cst = arith.constant dense<0.000000e+00> : vector<2x512xf32>
    %4 = tpu.matmul %1, %3, %cst {dimension_numbers = #tpu.dot_dimension_numbers<[1], [0], [0], [1], [0, 0, 1, 1], [], []>} : vector<2x100xbf16>, vector<100x512xbf16>, vector<2x512xf32> -> vector<2x512xf32>
    %c0_4 = arith.constant 0 : index
    %c0_5 = arith.constant 0 : index
    %c0_6 = arith.constant 0 : index
    %5 = vector.load %arg3[%c0_4, %c0_5, %c0_6] : memref<1x1x512xf32, #tpu.memory_space<vmem>>, vector<1x1x512xf32>
    %6 = vector.shape_cast %5 : vector<1x1x512xf32> to vector<1x512xf32>
    %7 = vector.broadcast %6 : vector<1x512xf32> to vector<2x512xf32>
    %8 = arith.addf %4, %7 : vector<2x512xf32>
    %9 = math.tanh %8 : vector<2x512xf32>
    %10 = arith.truncf %9 : vector<2x512xf32> to vector<2x512xbf16>
    %c0_7 = arith.constant 0 : index
    %c0_8 = arith.constant 0 : index
    %c0_9 = arith.constant 0 : index
    %11 = vector.load %arg4[%c0_7, %c0_8, %c0_9] : memref<1x512x1024xbf16, #tpu.memory_space<vmem>>, vector<1x512x1024xbf16>
    %12 = vector.shape_cast %11 : vector<1x512x1024xbf16> to vector<512x1024xbf16>
    %cst_10 = arith.constant dense<0.000000e+00> : vector<2x1024xf32>
    %13 = tpu.matmul %10, %12, %cst_10 {dimension_numbers = #tpu.dot_dimension_numbers<[1], [0], [0], [1], [0, 0, 1, 1], [], []>} : vector<2x512xbf16>, vector<512x1024xbf16>, vector<2x1024xf32> -> vector<2x1024xf32>
    %c0_11 = arith.constant 0 : index
    %c0_12 = arith.constant 0 : index
    %c0_13 = arith.constant 0 : index
    %14 = vector.load %arg5[%c0_11, %c0_12, %c0_13] : memref<1x1x1024xf32, #tpu.memory_space<vmem>>, vector<1x1x1024xf32>
    %15 = vector.shape_cast %14 : vector<1x1x1024xf32> to vector<1x1024xf32>
    %16 = vector.broadcast %15 : vector<1x1024xf32> to vector<2x1024xf32>
    %17 = arith.addf %13, %16 : vector<2x1024xf32>
    %18 = math.tanh %17 : vector<2x1024xf32>
    %19 = arith.truncf %18 : vector<2x1024xf32> to vector<2x1024xbf16>
    %c0_14 = arith.constant 0 : index
    %c0_15 = arith.constant 0 : index
    %c0_16 = arith.constant 0 : index
    %20 = vector.load %arg6[%c0_14, %c0_15, %c0_16] : memref<1x1024x128xbf16, #tpu.memory_space<vmem>>, vector<1x1024x128xbf16>
    %21 = vector.shape_cast %20 : vector<1x1024x128xbf16> to vector<1024x128xbf16>
    %cst_17 = arith.constant dense<0.000000e+00> : vector<2x128xf32>
    %22 = tpu.matmul %19, %21, %cst_17 {dimension_numbers = #tpu.dot_dimension_numbers<[1], [0], [0], [1], [0, 0, 1, 1], [], []>} : vector<2x1024xbf16>, vector<1024x128xbf16>, vector<2x128xf32> -> vector<2x128xf32>
    %c0_18 = arith.constant 0 : index
    %c0_19 = arith.constant 0 : index
    %c0_20 = arith.constant 0 : index
    %23 = vector.load %arg7[%c0_18, %c0_19, %c0_20] : memref<1x1x128xf32, #tpu.memory_space<vmem>>, vector<1x1x128xf32>
    %24 = vector.shape_cast %23 : vector<1x1x128xf32> to vector<1x128xf32>
    %25 = vector.broadcast %24 : vector<1x128xf32> to vector<2x128xf32>
    %26 = arith.addf %22, %25 : vector<2x128xf32>
    %cst_21 = arith.constant 0.000000e+00 : f32
    %27 = vector.broadcast %cst_21 : f32 to vector<2x128xf32>
    %28 = arith.subf %27, %26 : vector<2x128xf32>
    %29 = math.exp %28 : vector<2x128xf32>
    %cst_22 = arith.constant 1.000000e+00 : f32
    %30 = vector.broadcast %cst_22 : f32 to vector<2x128xf32>
    %31 = arith.addf %30, %29 : vector<2x128xf32>
    %cst_23 = arith.constant 1.000000e+00 : f32
    %32 = vector.broadcast %cst_23 : f32 to vector<2x128xf32>
    %33 = arith.divf %32, %31 : vector<2x128xf32>
    %c0_24 = arith.constant 0 : index
    %c0_25 = arith.constant 0 : index
    %c0_26 = arith.constant 0 : index
    %34 = vector.load %arg8[%c0_24, %c0_25, %c0_26] : memref<1x2x128xf32, #tpu.memory_space<vmem>>, vector<1x2x128xf32>
    %35 = vector.shape_cast %34 : vector<1x2x128xf32> to vector<2x128xf32>
    %36 = vector.shape_cast %33 : vector<2x128xf32> to vector<1x2x128xf32>
    tpu.vector_store %arg8[%c0_24, %c0_25, %c0_26], %36 {strides = array<i32>} : memref<1x2x128xf32, #tpu.memory_space<vmem>>, vector<1x2x128xf32>,
    return
  }
  func.func @transform_0(%arg0: i32) -> (i32, i32) {
    %c0_i32 = arith.constant 0 : i32
    %c0_i32_0 = arith.constant 0 : i32
    %c0_i32_1 = arith.constant 0 : i32
    return %c0_i32, %c0_i32_0 : i32, i32
  }
  func.func @transform_1(%arg0: i32) -> (i32, i32, i32) {
    %c0_i32 = arith.constant 0 : i32
    %c0_i32_0 = arith.constant 0 : i32
    %c0_i32_1 = arith.constant 0 : i32
    return %arg0, %c0_i32, %c0_i32_0 : i32, i32, i32
  }
  func.func @transform_2(%arg0: i32) -> (i32, i32, i32) {
    %c0_i32 = arith.constant 0 : i32
    %c0_i32_0 = arith.constant 0 : i32
    %c0_i32_1 = arith.constant 0 : i32
    return %arg0, %c0_i32, %c0_i32_0 : i32, i32, i32
  }
  func.func @transform_3(%arg0: i32) -> (i32, i32, i32) {
    %c0_i32 = arith.constant 0 : i32
    %c0_i32_0 = arith.constant 0 : i32
    %c0_i32_1 = arith.constant 0 : i32
    return %arg0, %c0_i32, %c0_i32_0 : i32, i32, i32
  }
  func.func @transform_4(%arg0: i32) -> (i32, i32, i32) {
    %c0_i32 = arith.constant 0 : i32
    %c0_i32_0 = arith.constant 0 : i32
    %c0_i32_1 = arith.constant 0 : i32
    return %arg0, %c0_i32, %c0_i32_0 : i32, i32, i32
  }
  func.func @transform_5(%arg0: i32) -> (i32, i32, i32) {
    %c0_i32 = arith.constant 0 : i32
    %c0_i32_0 = arith.constant 0 : i32
    %c0_i32_1 = arith.constant 0 : i32
    return %arg0, %c0_i32, %c0_i32_0 : i32, i32, i32
  }
  func.func @transform_6(%arg0: i32) -> (i32, i32, i32) {
    %c0_i32 = arith.constant 0 : i32
    %c0_i32_0 = arith.constant 0 : i32
    %c0_i32_1 = arith.constant 0 : i32
    return %arg0, %c0_i32, %c0_i32_0 : i32, i32, i32
  }
  func.func @transform_7(%arg0: i32) -> (i32, i32, i32) {
    %c0_i32 = arith.constant 0 : i32
    %c0_i32_0 = arith.constant 0 : i32
    %c0_i32_1 = arith.constant 0 : i32
    return %arg0, %c0_i32, %c0_i32_0 : i32, i32, i32
  }
}

</mosaic_0001>

<bundles_post_ra>
// kernel: squeeze.2
= control target key start
LH: loop header
LB: loop body
LE: loop exit
PB: predicated region body
PF: predicated region fallthrough
CT: control target
= control target key end

     0   :  { %s106_s0 = inlined_call_operand.vmem [shape: f32[1,2,32], index: 0, kind: input, shape index: {}]   ;;  %s107_s1 = inlined_call_operand.hbm [shape: f32[2,4,8], index: 1, kind: output, shape index: {}]  }
   0x1   :  { %v5_v0 = vld [vmem:[%s106_s0] sm:$0x3] }
   0x2   :  { %6 = vst [vmem:[#allocation3] sm:$0x3] %v5_v0 }
   0x3   :  { %2 = vsyncpa [#allocation1], 0  ;;  %s77_s0 = smov 120   ;;  %s78_s8 = smov 104   ;;  %vm8_vm0 = vcmask 64512  }
   0x4   :  { %s79_s9 = smov 112   ;;  %s80_s10 = smov [#allocation0]  }
   0x5   :  { %s43_s11 = sshll.u32 %s80_s10, 4  ;;  %s44_s11 = int_to_ptr.vmem [resolvable:$true] %s43_s11 }
   0x6   :  { %s53_s12 = scalar_lea.vmem %s44_s11, 128  ;;  %p58_p1 = scmp.lt.s32.totalorder %s44_s11, %s44_s11 }
   0x7   :  { %p54_p0 = scmp.ne.s32.totalorder %s44_s11, %s53_s12  ;;  %p59_p2 = scmp.lt.s32.totalorder %s53_s12, %s53_s12 }
   0x9   :  { %v10_v1 = vld [vmem:[#allocation3] sm:$0x3]   ;;  %p60_p3 = por %p59_p2, %p58_p1 }
   0xa   :  { %v22_v2 = vld [vmem:[#allocation3] sm:$0x3]   ;;  %11 = vrot.lane.b32.xlu0 %v10_v1, %s77_s0 }
   0xb   :  { %23 = vrot.lane.b32.xlu1 %v22_v2, %s78_s8  ;;  %v7_v3 = vld [vmem:[#allocation3] sm:$0x3]   ;;  %p61_p4 = pnand %p60_p3, %p54_p0 }
   0xc   :  { %v16_v4 = vld [vmem:[#allocation3] sm:$0x3]   ;;  %9 = vst.msk [vmem:[#allocation2] ss:$8 sm:$0x3] %vm8_vm0, %v7_v3  }
   0xe   :  { %17 = vrot.lane.b32.xlu0 %v16_v4, %s79_s9 }
  0x7c   :  { %v12_v5 = vpop.permute.xlu0 %11  }
  0x7d   :  { %v24_v6 = vpop.permute.xlu1 %23   ;;  %15 = vst.msk [vmem:[#allocation2 + $0x1] ss:$8 sm:$0x3] %vm8_vm0, %v12_v5  }
  0x7e   :  { %27 = vst.msk [vmem:[#allocation2 + $0x3] ss:$8 sm:$0x3] %vm8_vm0, %v24_v6  }
  0x80   :  { %v18_v7 = vpop.permute.xlu0 %17  }
  0x81   :  { %21 = vst.msk [vmem:[#allocation2 + $0x2] ss:$8 sm:$0x3] %vm8_vm0, %v18_v7  }
  0x88   :  { %v31_v8 = vld [vmem:[#allocation2] sm:$0xf]  ;;  %v35_v9 = vld [vmem:[#allocation2 + $0x8] sm:$0xf] }
  0x89   :  { %33 = vst [vmem:[#allocation0] sm:$0xf] %v31_v8  ;;  %38 = vst [vmem:[#allocation0 + $0x4] sm:$0xf] %v35_v9 }
  0x8a   :  { %64 = shalt.err (!%p61_p4)
}
  0x8b   :  { %s65_s15 = scalar_lea.hbm %s107_s1, 128 }
  0x8c   :  { %p66_p5 = scmp.ne.s32.totalorder %s107_s1, %s65_s15  ;;  %p69_p6 = scmp.lt.u32.totalorder %s65_s15, %s107_s1 }
  0x8e   :  { %p71_p7 = pnand %p69_p6, %p66_p5 }
  0x90   :  { %74 = shalt.err (!%p71_p7)
}
  0x91   :  { %46 = dma.vmem_to_hbm [thread:$0]  %s44_s11, 128, %s107_s1, [#allocation1]  }
  0x92   :  { %75 = dma.done.wait [#allocation1], 128  }
  0x93   :  { %76 = vsyncadd [#allocation1], 4294967168 }
  0x94   :  { %48 = vsyncpa [#allocation1], 1 }

// kernel: squeeze.3
= control target key start
LH: loop header
LB: loop body
LE: loop exit
PB: predicated region body
PF: predicated region fallthrough
CT: control target
= control target key end

     0   :  { %s73_s8 = smov 116   ;;  %vm7_vm0 = vcmask 31744   ;;  %s74_s9 = smov 120   ;;  %s108_s0 = inlined_call_operand.vmem [shape: f32[1,2,24], index: 0, kind: input, shape index: {}]   ;;  %s109_s1 = inlined_call_operand.vmem [shape: f32[2,2,3,4], index: 1, kind: output, shape index: {}]  }
   0x1   :  { %v4_v0 = vld [vmem:[%s108_s0] sm:$0x3]  ;;  %s72_s0 = smov 124   ;;  %s75_s10 = smov 112  }
   0x2   :  { %5 = vst [vmem:[#allocation1] sm:$0x3] %v4_v0  ;;  %s76_s11 = smov 108  }
   0x9   :  { %v9_v1 = vld [vmem:[#allocation1] sm:$0x3]  }
   0xa   :  { %v21_v2 = vld [vmem:[#allocation1] sm:$0x3]   ;;  %10 = vrot.lane.b32.xlu0 %v9_v1, %s72_s0 }
   0xb   :  { %22 = vrot.lane.b32.xlu1 %v21_v2, %s73_s8  ;;  %v6_v3 = vld [vmem:[#allocation1] sm:$0x3]  }
   0xc   :  { %v15_v4 = vld [vmem:[#allocation1] sm:$0x3]   ;;  %8 = vst.msk [vmem:[#allocation0] ss:$16 sm:$0x3] %vm7_vm0, %v6_v3  }
   0xd   :  { %v27_v5 = vld [vmem:[#allocation1] sm:$0x3]  }
   0xe   :  { %16 = vrot.lane.b32.xlu0 %v15_v4, %s74_s9  ;;  %v33_v6 = vld [vmem:[#allocation1] sm:$0x3]  }
   0xf   :  { %28 = vrot.lane.b32.xlu1 %v27_v5, %s75_s10 }
  0x12   :  { %34 = vrot.lane.b32.xlu0 %v33_v6, %s76_s11 }
  0x7c   :  { %v11_v7 = vpop.permute.xlu0 %10  }
  0x7d   :  { %v23_v8 = vpop.permute.xlu1 %22   ;;  %14 = vst.msk [vmem:[#allocation0 + $0x1] ss:$16 sm:$0x3] %vm7_vm0, %v11_v7  }
  0x7e   :  { %26 = vst.msk [vmem:[#allocation0 + $0x8] ss:$16 sm:$0x3] %vm7_vm0, %v23_v8  }
  0x80   :  { %v17_v9 = vpop.permute.xlu0 %16  }
  0x81   :  { %v29_v10 = vpop.permute.xlu1 %28   ;;  %20 = vst.msk [vmem:[#allocation0 + $0x2] ss:$16 sm:$0x3] %vm7_vm0, %v17_v9  }
  0x82   :  { %32 = vst.msk [vmem:[#allocation0 + $0x9] ss:$16 sm:$0x3] %vm7_vm0, %v29_v10  }
  0x84   :  { %v35_v11 = vpop.permute.xlu0 %34  }
  0x85   :  { %38 = vst.msk [vmem:[#allocation0 + $0xa] ss:$16 sm:$0x3] %vm7_vm0, %v35_v11  }
  0x88   :  { %v42_v12 = vld [vmem:[#allocation0] sm:$0xf]  ;;  %v51_v13 = vld [vmem:[#allocation0 + $0x10] sm:$0xf] }
  0x89   :  { %44 = vst [vmem:[%s109_s1] sm:$0xf] %v42_v12  ;;  %65 = vst [vmem:[%s109_s1 + $0x8] sm:$0xf] %v51_v13 }
  0x8c   :  { %v46_v14 = vld [vmem:[#allocation0 + $0x8] sm:$0xf]  ;;  %v57_v15 = vld [vmem:[#allocation0 + $0x18] sm:$0xf] }
  0x8d   :  { %64 = vst [vmem:[%s109_s1 + $0x4] sm:$0xf] %v46_v14  ;;  %66 = vst [vmem:[%s109_s1 + $0xc] sm:$0xf] %v57_v15 }

// kernel: encoder_forward.3
= control target key start
LH: loop header
LB: loop body
LE: loop exit
PB: predicated region body
PF: predicated region fallthrough
CT: control target
= control target key end

     0   :  { %s5143_s0 = inlined_call_operand.vmem [shape: f32[2,100], index: 0, kind: input, shape index: {}]   ;;  %s5144_s1 = inlined_call_operand.vmem [shape: bf16[2,100,512], index: 1, kind: input, shape index: {}]   ;;  %s5145_s2 = inlined_call_operand.hbm [shape: f32[2,1,512], index: 2, kind: input, shape index: {}]   ;;  %s5146_s3 = inlined_call_operand.hbm [shape: bf16[2,512,1024], index: 3, kind: input, shape index: {}]   ;;  %s5147_s4 = inlined_call_operand.hbm [shape: f32[2,1,1024], index: 4, kind: input, shape index: {}]   ;;  %s5148_s5 = inlined_call_operand.hbm [shape: bf16[2,1024,128], index: 5, kind: input, shape index: {}]   ;;  %s5149_s6 = inlined_call_operand.hbm [shape: f32[2,1,128], index: 6, kind: input, shape index: {}]   ;;  %s5150_s7 = inlined_call_operand.vmem [shape: f32[2,2,128], index: 7, kind: output, shape index: {}]  }
   0x1   :  { %5156 = sst [smem:[#allocation15_spill]] %s5146_s3 }
   0x2   :  { %5157 = sst [smem:[#allocation16_spill]] %s5148_s5 }
   0x3   :  { %12 = vsyncpa [#allocation3], 0 }
   0x4   :  { %14 = vsyncpa [#allocation3 + $0x1], 0 }
   0x5   :  { %15 = vsyncpa [#allocation5], 0 }
   0x6   :  { %17 = vsyncpa [#allocation5 + $0x1], 0 }
   0x7   :  { %18 = vsyncpa [#allocation8], 0 }
   0x8   :  { %20 = vsyncpa [#allocation8 + $0x1], 0  ;;  %s4452_s24 = smov 0   ;;  %s4454_s25 = smov 0  }
   0x9   :  { %s4456_s26 = smov 0   ;;  %s4458_s27 = smov 0  }
   0xa LB: > { %5158 = sst [smem:[#allocation13_spill]] %s4396_s26  ;;  %s4471_s28 = sadd.s32 4294967295, %s4400_s27   ;;  %s4400_s27 = sphi %s4458_s27, %s5175_s27   ;;  %s4396_s26 = sphi %s4456_s26, %s5172_s26   ;;  %s4392_s25 = sphi %s4454_s25, %s5174_s25   ;;  %s4388_s24 = sphi %s4452_s24, %s5173_s24  }
   0xb   : > { %s4474_s29 = sadd.s32 1, %s4400_s27   ;;  %s80_s8 = sadd.s32 1, %s4396_s26 }
   0xc   : > { %s77_s30 = ssub.s32 %s4400_s27, %s4474_s29  ;;  %p87_p1 = scmp.ne.s32.totalorder %s4396_s26, %s4392_s25 }
   0xd   : > { %p78_p0 = scmp.eq.s32.totalorder %s77_s30, 0  ;;  %p88_p2 = scmp.eq.s32.totalorder %s4400_s27, 0 }
   0xe   : > { %p93_p3 = scmp.ne.s32.totalorder %s4392_s25, %s4388_s24  ;;  %p94_p5 = scmp.eq.s32.totalorder %s4471_s28, 0 }
   0xf   : > { %s4484_s9 = scalar_select %p78_p0, %s4396_s26, %s80_s8  }
  0x10   : > { %p89_p4 = por %p88_p2, %p87_p1  ;;  %p4038_p6 = scmp.lt.s32.totalorder %s4400_s27, 2 }
  0x11   : > { %5159 = sst [smem:[#allocation14_spill]] %s4484_s9  ;;  %p4488_p7 = por %p94_p5, %p93_p3 }
  0x12   : > { %s4493_s11 = sand.u32 1, %s4396_s26   ;;  %p4495_p8 = pnand %p4038_p6, %p89_p4 }
  0x13   : > { %s5160_s10 = scalar_select %p4488_p7, 1, 0 }
  0x14   : > { %s5161_s12 = scalar_select %p4495_p8, 1, 0 }
  0x15   : > { %s5152_s13 = sand.u32 1, %s4400_s27   ;;  %s3523_s14 = sshll.u32 %s4493_s11, 11 }
  0x16   : > { %s3896_s15 = sshll.u32 %s4400_s27, 15  ;;  %s281_s16 = scalar_lea.vmem [#allocation4], %s3523_s14 }
  0x17   : > { %s288_s17 = sshll.u32 %s281_s16, 4  ;;  %s5162_s3 = sld [smem:[#allocation15_spill]]  ;;  %s4507_s17 = int_to_ptr.vmem [resolvable:$true] %s288_s17 }
  0x18   : > { %s4511_s21 = scalar_lea.sflag [#allocation5], %s5152_s13  ;;  %p4517_p10 = pneg %p4495_p8 }
  0x1d   : > { %s4505_s20 = scalar_lea.hbm %s5162_s3, %s3896_s15  ;;  %s4213_s8 = scalar_lea.hbm %s5162_s3, 65536 }
  0x1e   : > { %s4208_s22 = scalar_lea.hbm %s4505_s20, 32768  ;;  %p4214_p13 = scmp.lt.u32.totalorder %s4505_s20, %s5162_s3 }
  0x1f   : > { %p4209_p9 = scmp.ne.s32.totalorder %s4505_s20, %s4208_s22  ;;  %p4215_p0 = scmp.lt.u32.totalorder %s4213_s8, %s4208_s22 }
  0x20   : > { %p4217_p2 = scmp.lt.u32.totalorder %s4208_s22, %s4505_s20 }
  0x21   : > { %p4211_p11 = pnand %p4517_p10, %p4209_p9  ;;  %p4216_p1 = por %p4215_p0, %p4214_p13 }
  0x23   : > { %p4212_p12 = pneg %p4211_p11  ;;  %p4218_p3 = por %p4217_p2, %p4216_p1 }
  0x25   : > { %p4219_p4 = pnand %p4218_p3, %p4212_p12 }
  0x27   : > { %4222 = shalt.err (!%p4219_p4)
}
  0x28   : > { %s4223_s16 = scalar_lea.vmem %s4507_s17, 32768  ;;  %s4402_s18 = smov [#allocation4]  }
  0x29   : > { %p4224_p5 = scmp.ne.s32.totalorder %s4507_s17, %s4223_s16  ;;  %s4228_s19 = sshll.u32 %s4402_s18, 4  ;;  %s4229_s19 = int_to_ptr.vmem [resolvable:$false] %s4228_s19 }
  0x2a   : > { %s4230_s24 = scalar_lea.vmem %s4229_s19, 65536  ;;  %p4231_p11 = scmp.lt.s32.totalorder %s4507_s17, %s4229_s19 }
  0x2b   : > { %p4226_p6 = pnand %p4224_p5, %p4517_p10  ;;  %p4232_p7 = scmp.lt.s32.totalorder %s4230_s24, %s4223_s16 }
  0x2d   : > { %p4227_p9 = pneg %p4226_p6  ;;  %p4233_p13 = por %p4232_p7, %p4231_p11 }
  0x2f   : > { %p4234_p0 = pnand %p4233_p13, %p4227_p9 }
  0x31   : > { %4237 = shalt.err (!%p4234_p0)
}
  0x32   : > { %s4403_s22 = smov 512   ;;  %s4404_s30 = smov 32  }
  0x33   : > { %4028 = dma.hbm_to_vmem [thread:$0]  (!%p4495_p8), %s4505_s20, 32768, %s4507_s17, %s4511_s21, %s4403_s22, %s4403_s22, %s4404_s30  }
  0x34   : > { %p3533_p12 = scmp.ge.s32.totalorder %s4400_s27, 1  ;;  %p353_p1 = scmp.lt.s32.totalorder %s4400_s27, 3 }
  0x35   : > { %s3529_s8 = sshll.u32 %s4493_s11, 9  ;;  %s3898_s15 = sshll.u32 %s4400_s27, 13 }
  0x36   : > { %p4544_p7 = pnand %p3533_p12, %p353_p1  ;;  %s321_s16 = scalar_lea.vmem [#allocation7], %s3529_s8 }
  0x37   : > { %s328_s18 = sshll.u32 %s321_s16, 4  ;;  %s5165_s5 = sld [smem:[#allocation16_spill]]  ;;  %s4554_s18 = int_to_ptr.vmem [resolvable:$true] %s328_s18 }
  0x38   : > { %s5164_s14 = scalar_select %p4544_p7, 1, 0 }
  0x39   : > { %s5166_s17 = sand.u32 1, %s4400_s27  }
  0x3a   : > { %s4558_s20 = scalar_lea.sflag [#allocation8], %s5166_s17 }
  0x3d   : > { %s4552_s13 = scalar_lea.hbm %s5165_s5, %s3898_s15  ;;  %s4243_s16 = scalar_lea.hbm %s5165_s5, 16384 }
  0x3e   : > { %s4238_s22 = scalar_lea.hbm %s4552_s13, 8192  ;;  %p4244_p5 = scmp.lt.u32.totalorder %s4552_s13, %s5165_s5 }
  0x3f   : > { %p4239_p2 = scmp.ne.s32.totalorder %s4552_s13, %s4238_s22  ;;  %p4245_p6 = scmp.lt.u32.totalorder %s4243_s16, %s4238_s22 }
  0x40   : > { %p4247_p11 = scmp.lt.u32.totalorder %s4238_s22, %s4552_s13 }
  0x41   : > { %p4241_p3 = pnand %p4239_p2, %p4517_p10  ;;  %p4246_p9 = por %p4245_p6, %p4244_p5 }
  0x43   : > { %p4242_p4 = pneg %p4241_p3  ;;  %p4248_p13 = por %p4247_p11, %p4246_p9 }
  0x45   : > { %p4249_p0 = pnand %p4248_p13, %p4242_p4 }
  0x47   : > { %4252 = shalt.err (!%p4249_p0)
}
  0x48   : > { %s4253_s24 = scalar_lea.vmem %s4554_s18, 8192  ;;  %s4405_s17 = smov [#allocation7]  }
  0x49   : > { %p4254_p12 = scmp.ne.s32.totalorder %s4554_s18, %s4253_s24  ;;  %s4258_s30 = sshll.u32 %s4405_s17, 4  ;;  %s4259_s30 = int_to_ptr.vmem [resolvable:$false] %s4258_s30 }
  0x4a   : > { %s4260_s8 = scalar_lea.vmem %s4259_s30, 16384  ;;  %p4261_p3 = scmp.lt.s32.totalorder %s4554_s18, %s4259_s30 }
  0x4b   : > { %p4256_p1 = pnand %p4254_p12, %p4517_p10  ;;  %p4262_p7 = scmp.lt.s32.totalorder %s4260_s8, %s4253_s24 }
  0x4d   : > { %p4257_p2 = pneg %p4256_p1  ;;  %p4263_p5 = por %p4262_p7, %p4261_p3 }
  0x4f   : > { %p4264_p6 = pnand %p4263_p5, %p4257_p2 }
  0x51   : > { %4267 = shalt.err (!%p4264_p6)
}
  0x52   : > { %s4406_s22 = smov 64   ;;  %s4407_s16 = smov 4  }
  0x53   : > { %4034 = dma.hbm_to_vmem [thread:$0]  (!%p4495_p8), %s4552_s13, 8192, %s4554_s18, %s4558_s20, %s4406_s22, %s4406_s22, %s4407_s16  }
  0x54   : > { %s3520_s15 = sshll.u32 %s4493_s11, 2  ;;  %s3895_s19 = sshll.u32 %s4400_s27, 6 }
  0x55   : > { %s4587_s30 = scalar_lea.hbm %s5145_s2, %s3895_s19  ;;  %s262_s8 = scalar_lea.vmem [#allocation2], %s3520_s15 }
  0x56   : > { %s270_s3 = sshll.u32 %s262_s8, 4  ;;  %s3526_s5 = sshll.u32 %s4493_s11, 3  ;;  %s4589_s3 = int_to_ptr.vmem [resolvable:$true] %s270_s3 }
  0x57   : > { %s259_s9 = scalar_lea.sflag [#allocation3], %s4493_s11  ;;  %s4268_s26 = scalar_lea.hbm %s4587_s30, 64 }
  0x58   : > { %p4269_p7 = scmp.ne.s32.totalorder %s4587_s30, %s4268_s26  ;;  %s4273_s22 = scalar_lea.hbm %s5145_s2, 128 }
  0x59   : > { %p4274_p11 = scmp.lt.u32.totalorder %s4587_s30, %s5145_s2  ;;  %p4275_p13 = scmp.lt.u32.totalorder %s4273_s22, %s4268_s26 }
  0x5a   : > { %p4271_p4 = pnand %p4269_p7, %p4517_p10  ;;  %p4277_p12 = scmp.lt.u32.totalorder %s4268_s26, %s4587_s30 }
  0x5b   : > { %p4276_p0 = por %p4275_p13, %p4274_p11 }
  0x5c   : > { %p4272_p9 = pneg %p4271_p4 }
  0x5d   : > { %p4278_p1 = por %p4277_p12, %p4276_p0 }
  0x5f   : > { %p4279_p2 = pnand %p4278_p1, %p4272_p9 }
  0x61   : > { %4282 = shalt.err (!%p4279_p2)
}
  0x62   : > { %s4283_s15 = scalar_lea.vmem %s4589_s3, 64  ;;  %s4408_s17 = smov [#allocation2]  }
  0x63   : > { %p4284_p3 = scmp.ne.s32.totalorder %s4589_s3, %s4283_s15  ;;  %s4288_s24 = sshll.u32 %s4408_s17, 4  ;;  %s4289_s24 = int_to_ptr.vmem [resolvable:$false] %s4288_s24 }
  0x64   : > { %s4290_s8 = scalar_lea.vmem %s4289_s24, 128  ;;  %p4291_p7 = scmp.lt.s32.totalorder %s4589_s3, %s4289_s24 }
  0x65   : > { %p4286_p5 = pnand %p4284_p3, %p4517_p10  ;;  %p4292_p4 = scmp.lt.s32.totalorder %s4290_s8, %s4283_s15 }
  0x67   : > { %p4287_p6 = pneg %p4286_p5  ;;  %p4293_p11 = por %p4292_p4, %p4291_p7 }
  0x69   : > { %p4294_p13 = pnand %p4293_p11, %p4287_p6 }
  0x6b   : > { %4297 = shalt.err (!%p4294_p13)
}
  0x6c   : > { %4025 = dma.hbm_to_vmem [thread:$0]  (!%p4495_p8), %s4587_s30, 64, %s4589_s3, %s259_s9  }
  0x6d   : > { %s3897_s26 = sshll.u32 %s4400_s27, 7  ;;  %s302_s16 = scalar_lea.vmem [#allocation6], %s3526_s5 }
  0x6e   : > { %s4618_s22 = scalar_lea.hbm %s5147_s4, %s3897_s26  ;;  %s310_s19 = sshll.u32 %s302_s16, 4  ;;  %s311_s19 = int_to_ptr.vmem [resolvable:$true] %s310_s19 }
  0x6f   : > { %s4298_s15 = scalar_lea.hbm %s4618_s22, 128  ;;  %s4303_s30 = scalar_lea.hbm %s5147_s4, 256 }
  0x70   : > { %p4299_p9 = scmp.ne.s32.totalorder %s4618_s22, %s4298_s15  ;;  %p4304_p1 = scmp.lt.u32.totalorder %s4618_s22, %s5147_s4 }
  0x71   : > { %p4305_p2 = scmp.lt.u32.totalorder %s4303_s30, %s4298_s15  ;;  %p4307_p5 = scmp.lt.u32.totalorder %s4298_s15, %s4618_s22 }
  0x72   : > { %p4301_p0 = pnand %p4299_p9, %p4517_p10 }
  0x73   : > { %p4306_p3 = por %p4305_p2, %p4304_p1 }
  0x74   : > { %p4302_p12 = pneg %p4301_p0 }
  0x75   : > { %p4308_p6 = por %p4307_p5, %p4306_p3 }
  0x77   : > { %p4309_p7 = pnand %p4308_p6, %p4302_p12 }
  0x79   : > { %4312 = shalt.err (!%p4309_p7)
}
  0x7a   : > { %s4313_s5 = scalar_lea.vmem %s311_s19, 128  ;;  %s4409_s8 = smov [#allocation6]  }
  0x7b   : > { %p4314_p4 = scmp.ne.s32.totalorder %s311_s19, %s4313_s5  ;;  %s4318_s26 = sshll.u32 %s4409_s8, 4  ;;  %s4319_s26 = int_to_ptr.vmem [resolvable:$false] %s4318_s26 }
  0x7c   : > { %s4320_s13 = scalar_lea.vmem %s4319_s26, 256  ;;  %p4321_p9 = scmp.lt.s32.totalorder %s311_s19, %s4319_s26 }
  0x7d   : > { %p4316_p11 = pnand %p4314_p4, %p4517_p10  ;;  %p4322_p0 = scmp.lt.s32.totalorder %s4320_s13, %s4313_s5 }
  0x7f   : > { %p4317_p13 = pneg %p4316_p11  ;;  %p4323_p8 = por %p4322_p0, %p4321_p9 }
  0x81   : > { %p4324_p1 = pnand %p4323_p8, %p4317_p13 }
  0x83   : > { %4327 = shalt.err (!%p4324_p1)
}
  0x84   : > { %p5167_p2 = scmp.ne.s32.totalorder %s5161_s12, 0  ;;  %s3532_s18 = sshll.u32 %s4400_s27, 4 }
  0x85   : > { %s341_s16 = scalar_lea.vmem [#allocation9], %s4493_s11  ;;  %s346_s30 = scalar_lea.hbm %s5149_s6, %s3532_s18 }
  0x86   : > { %4031 = dma.hbm_to_vmem [thread:$0]  (!%p5167_p2), %s4618_s22, 128, %s311_s19, %s4511_s21  }
  0x87   : > { %s348_s15 = sshll.u32 %s341_s16, 4  ;;  %s4328_s17 = scalar_lea.hbm %s346_s30, 16  ;;  %s349_s15 = int_to_ptr.vmem [resolvable:$true] %s348_s15 }
  0x88   : > { %p4329_p12 = scmp.ne.s32.totalorder %s346_s30, %s4328_s17  ;;  %s4333_s8 = scalar_lea.hbm %s5149_s6, 32 }
  0x89   : > { %p4334_p5 = scmp.lt.u32.totalorder %s346_s30, %s5149_s6  ;;  %p4335_p6 = scmp.lt.u32.totalorder %s4333_s8, %s4328_s17 }
  0x8a   : > { %p4331_p8 = pnand %p4329_p12, %p4517_p10  ;;  %p4337_p4 = scmp.lt.u32.totalorder %s4328_s17, %s346_s30 }
  0x8b   : > { %p4336_p7 = por %p4335_p6, %p4334_p5 }
  0x8c   : > { %p4332_p3 = pneg %p4331_p8 }
  0x8d   : > { %p4338_p11 = por %p4337_p4, %p4336_p7 }
  0x8f   : > { %p4339_p13 = pnand %p4338_p11, %p4332_p3 }
  0x91   : > { %4342 = shalt.err (!%p4339_p13)
}
  0x92   : > { %s4343_s27 = scalar_lea.vmem %s349_s15, 16  ;;  %s4410_s11 = smov [#allocation9]  }
  0x93   : > { %p4344_p9 = scmp.ne.s32.totalorder %s349_s15, %s4343_s27  ;;  %s4348_s21 = sshll.u32 %s4410_s11, 4  ;;  %s4349_s21 = int_to_ptr.vmem [resolvable:$false] %s4348_s21 }
  0x94   : > { %s4350_s22 = scalar_lea.vmem %s4349_s21, 32  ;;  %p4351_p12 = scmp.lt.s32.totalorder %s349_s15, %s4349_s21 }
  0x95   : > { %p4346_p0 = pnand %p4344_p9, %p4517_p10  ;;  %p4352_p8 = scmp.lt.s32.totalorder %s4350_s22, %s4343_s27 }
  0x97   : > { %p4347_p1 = pneg %p4346_p0  ;;  %p4353_p2 = por %p4352_p8, %p4351_p12 }
  0x99   : > { %p4354_p5 = pnand %p4353_p2, %p4347_p1 }
  0x9b   : > { %4357 = shalt.err (!%p4354_p5)
}
  0x9c   : > { %p5168_p6 = scmp.ne.s32.totalorder %s5161_s12, 0  ;;  %p5169_p3 = scmp.ne.s32.totalorder %s5164_s14, 0 }
  0x9d   : > { %s4661_s23 = sand.u32 (!%p5169_p3), 1, %s4392_s25   ;;  %p5170_p10 = scmp.ne.s32.totalorder (!%p5169_p3), %s5160_s10, 0 }
  0x9e   : > { %4037 = dma.hbm_to_vmem [thread:$0]  (!%p5168_p6), %s346_s30, 16, %s349_s15, %s4558_s20  }
  0x9f   : > { %357 = sbr.rel (%p5169_p3) target bundleno = 1108 (0x454), region = 48  ;;  %s3534_s19 = sshll.u32 (!%p5169_p3), %s4661_s23, 2 }
  0xa0   : > { %s360_s18 = scalar_lea.sflag (!%p5169_p3), [#allocation3], %s4661_s23  ;;  %s4665_s16 = scalar_lea.vmem (!%p5169_p3), [#allocation2], %s3534_s19 }
  0xa6   : > { %4375 = dma.done.wait (%p5170_p10), %s360_s18, 64  }
  0xa7   : > { %4377 = vsyncadd (%p5170_p10), %s360_s18, 4294967232  ;;  %s368_s12 = sand.u32 1, %s4471_s28   ;;  %s3535_s14 = sshll.u32 %s4661_s23, 11 }
  0xa8   : > { %s369_s20 = scalar_lea.sflag [#allocation5], %s368_s12  ;;  %s4673_s15 = scalar_lea.vmem [#allocation4], %s3535_s14 }
  0xa9   : > { %4379 = dma.done.wait (%p5170_p10), %s369_s20, 32896  }
  0xaa   : > { %4381 = vsyncadd (%p5170_p10), %s369_s20, 4294934400  ;;  %s3536_s3 = sshll.u32 %s4661_s23, 3  ;;  %s3537_s9 = sshll.u32 %s4661_s23, 9 }
  0xab   : > { %s4681_s30 = scalar_lea.vmem [#allocation6], %s3536_s3  ;;  %s387_s17 = scalar_lea.sflag [#allocation8], %s368_s12 }
  0xac   : > { %s4683_s24 = scalar_lea.vmem [#allocation7], %s3537_s9 }
  0xad   : > { %4383 = dma.done.wait (%p5170_p10), %s387_s17, 8208  }
  0xae   : > { %4385 = vsyncadd (%p5170_p10), %s387_s17, 4294959088  ;;  %p452_p2 = scmp.lt.s32.totalorder %s4471_s28, 1  ;;  %v4411_v0 = vmov 0   ;;  %vm646_vm0 = vcmask 1041408   ;;  %v749_v25 = vld [vmem:[%s4673_s15] sm:$0xff]  ;;  %vm642_vm1 = vcmask 818176  }
  0xaf   : > { %691 = vmatprep.mubr.bf16.mxu0 %v4411_v0  ;;  %732 = vmatprep.mubr.bf16.mxu1 %v4411_v0  ;;  %v753_v26 = vld [vmem:[%s4673_s15 + $0x20] sm:$0xff]  ;;  %v462_v27 = vld [vmem:[%s5143_s0] sm:$0x3]  ;;  %v750_v43 = vld [vmem:[%s4673_s15 + $0x8] sm:$0xff]  ;;  %s398_s11 = scalar_lea.vmem [#allocation9], %s4661_s23 }
  0xb0   : > { %s5177_s28 = smov (!%p452_p2, %s4471_s28), 1  ;;  %v3573_v30 = vcombine.high %v749_v25, %v753_v26  ;;  %v757_v32 = vld [vmem:[%s4673_s15 + $0x40] sm:$0xff]  ;;  %v463_v34 = vpack.c.bf16 %v462_v27, %v462_v27  ;;  %v3572_v36 = vcombine.low %v749_v25, %v753_v26  ;;  %v754_v44 = vld [vmem:[%s4673_s15 + $0x28] sm:$0xff] }
  0xb1   : > { %s4011_s5 = smul.u32 208, %s5177_s28  ;;  %v761_v33 = vld [vmem:[%s4673_s15 + $0x60] sm:$0xff]  ;;  %v758_v46 = vld [vmem:[%s4673_s15 + $0x48] sm:$0xff]  ;;  %v3575_v51 = vcombine.high %v750_v43, %v754_v44  ;;  %v3574_v56 = vcombine.low %v750_v43, %v754_v44  ;;  %s3539_s21 = sshll.u32 %s5177_s28, 1 }
  0xb2   : > { %v3581_v38 = vcombine.high %v757_v32, %v761_v33  ;;  %v765_v41 = vld [vmem:[%s4673_s15 + $0x80] sm:$0xff]  ;;  %v3580_v45 = vcombine.low %v757_v32, %v761_v33  ;;  %v762_v47 = vld [vmem:[%s4673_s15 + $0x68] sm:$0xff]  ;;  %s460_s19 = scalar_lea.vmem %s5150_s7, %s3539_s21 }
  0xb3   : > { %s4697_s13 = scalar_lea.vmem %s5144_s1, %s4011_s5  ;;  %v769_v42 = vld [vmem:[%s4673_s15 + $0xa0] sm:$0xff]  ;;  %v766_v57 = vld [vmem:[%s4673_s15 + $0x88] sm:$0xff]  ;;  %v3583_v60 = vcombine.high %v758_v46, %v762_v47  ;;  %v3582_v0 = vcombine.low %v758_v46, %v762_v47 }
  0xb4   : > { %v4076_v1 = vld [vmem:[%s4697_s13 + $0x4] ss:$16 sps:$4 sm:$0xff]   ;;  %v4078_v2 = vld [vmem:[%s4697_s13] ss:$16 sps:$4 sm:$0xff]   ;;  %v4096_v8 = vld [vmem:[%s4697_s13 + $0xc] ss:$16 sps:$4 sm:$0xff]   ;;  %v3589_v48 = vcombine.high %v765_v41, %v769_v42  ;;  %v3588_v53 = vcombine.low %v765_v41, %v769_v42 }
  0xb5   : > { %659 = vmatprep.subr.bf16.mxu0 %v4076_v1  ;;  %v4079_v3 = vld [vmem:[%s4697_s13 + $0x24] ss:$16 sps:$4 sm:$0xff]   ;;  %v4081_v4 = vld [vmem:[%s4697_s13 + $0x20] ss:$16 sps:$4 sm:$0xff]   ;;  %v4098_v9 = vld [vmem:[%s4697_s13 + $0x8] ss:$16 sps:$4 sm:$0xff]   ;;  %700 = vmatprep.subr.bf16.mxu1 %v4096_v8 }
  0xb6   : > { %660 = vmatpush1.bf16.msra.mxu0 %v4078_v2  ;;  %v4082_v5 = vld [vmem:[%s4697_s13 + $0x44] ss:$16 sps:$4 sm:$0xff]   ;;  %v4084_v6 = vld [vmem:[%s4697_s13 + $0x40] ss:$16 sps:$4 sm:$0xff]   ;;  %v4099_v10 = vld [vmem:[%s4697_s13 + $0x2c] ss:$16 sps:$4 sm:$0xff]   ;;  %701 = vmatpush1.bf16.msra.mxu1 %v4098_v9 }
  0xb7   : > { %661 = vmatprep.subr.bf16.mxu0 %v4079_v3  ;;  %v4085_v7 = vld [vmem:[%s4697_s13 + $0x64] ss:$16 sps:$4 sm:$0xff]   ;;  %v4087_v11 = vld [vmem:[%s4697_s13 + $0x60] ss:$16 sps:$4 sm:$0xff]   ;;  %v4101_v13 = vld [vmem:[%s4697_s13 + $0x28] ss:$16 sps:$4 sm:$0xff]   ;;  %702 = vmatprep.subr.bf16.mxu1 %v4099_v10 }
  0xb8   : > { %v4088_v12 = vld [vmem:[%s4697_s13 + $0x84] ss:$16 sps:$4 sm:$0xff]   ;;  %v4102_v14 = vld [vmem:[%s4697_s13 + $0x4c] ss:$16 sps:$4 sm:$0xff]   ;;  %v4090_v15 = vld [vmem:[%s4697_s13 + $0x80] ss:$16 sps:$4 sm:$0xff]  }
  0xb9   : > { %v4091_v16 = vld [vmem:[%s4697_s13 + $0xa4] ss:$16 sps:$4 sm:$0xff]   ;;  %v4104_v17 = vld [vmem:[%s4697_s13 + $0x48] ss:$16 sps:$4 sm:$0xff]   ;;  %v4105_v19 = vld [vmem:[%s4697_s13 + $0x6c] ss:$16 sps:$4 sm:$0xff]  }
  0xba   : > { %662 = vmatpush1.bf16.msra.mxu0 %v4081_v4  ;;  %703 = vmatpush1.bf16.msra.mxu1 %v4101_v13  ;;  %v488_v18 = vld [vmem:[%s4697_s13 + $0xc0] sm:$0x33]  ;;  %v4107_v23 = vld [vmem:[%s4697_s13 + $0x68] ss:$16 sps:$4 sm:$0xff]   ;;  %v4108_v24 = vld [vmem:[%s4697_s13 + $0x8c] ss:$16 sps:$4 sm:$0xff]  }
  0xbb   : > { %663 = vmatprep.subr.bf16.mxu0 %v4082_v5  ;;  %704 = vmatprep.subr.bf16.mxu1 %v4102_v14  ;;  %v4093_v20 = vld [vmem:[%s4697_s13 + $0xa0] ss:$16 sps:$4 sm:$0xff]   ;;  %v3565_v21 = vcombine.high %v488_v18, %v488_v18  ;;  %v3564_v22 = vcombine.low %v488_v18, %v488_v18  ;;  %v4110_v29 = vld [vmem:[%s4697_s13 + $0x88] ss:$16 sps:$4 sm:$0xff]   ;;  %v4111_v31 = vld [vmem:[%s4697_s13 + $0xac] ss:$16 sps:$4 sm:$0xff]  }
  0xbc   : > { %v489_v35 = vld [vmem:[%s4697_s13 + $0xc8] sm:$0x33]  ;;  %v770_v58 = vld [vmem:[%s4673_s15 + $0xa8] sm:$0xff] }
  0xbd   : > { %v648_v28 = vsel %vm646_vm0, %v3564_v22, 0  ;;  %v4113_v37 = vld [vmem:[%s4697_s13 + $0xa8] ss:$16 sps:$4 sm:$0xff]   ;;  %v3567_v39 = vcombine.high %v489_v35, %v489_v35  ;;  %v3566_v40 = vcombine.low %v489_v35, %v489_v35  ;;  %v774_v1 = vld [vmem:[%s4673_s15 + $0xc8] sm:$0xff]  ;;  %v3591_v4 = vcombine.high %v766_v57, %v770_v58 }
  0xbe   : > { %664 = vmatpush1.bf16.msra.mxu0 %v4084_v6  ;;  %705 = vmatpush1.bf16.msra.mxu1 %v4104_v17  ;;  %v773_v49 = vld [vmem:[%s4673_s15 + $0xc0] sm:$0xff]  ;;  %v778_v2 = vld [vmem:[%s4673_s15 + $0xe8] sm:$0xff]  ;;  %v3590_v8 = vcombine.low %v766_v57, %v770_v58 }
  0xbf   : > { %665 = vmatprep.subr.bf16.mxu0 %v4085_v7  ;;  %706 = vmatprep.subr.bf16.mxu1 %v4105_v19  ;;  %v654_v50 = vsel %vm646_vm0, %v3566_v40, 0  ;;  %v777_v52 = vld [vmem:[%s4673_s15 + $0xe0] sm:$0xff]  ;;  %v782_v9 = vld [vmem:[%s4673_s15 + $0x108] sm:$0xff] }
  0xc0   : > { %v781_v54 = vld [vmem:[%s4673_s15 + $0x100] sm:$0xff]  ;;  %v3597_v59 = vcombine.high %v773_v49, %v777_v52  ;;  %v3596_v61 = vcombine.low %v773_v49, %v777_v52  ;;  %v786_v10 = vld [vmem:[%s4673_s15 + $0x128] sm:$0xff] }
  0xc1   : > { %v785_v55 = vld [vmem:[%s4673_s15 + $0x120] sm:$0xff]  ;;  %v790_v17 = vld [vmem:[%s4673_s15 + $0x148] sm:$0xff] }
  0xc2   : > { %666 = vmatpush1.bf16.msra.mxu0 %v4087_v11  ;;  %707 = vmatpush1.bf16.msra.mxu1 %v4107_v23  ;;  %v789_v62 = vld [vmem:[%s4673_s15 + $0x140] sm:$0xff]  ;;  %v3605_v3 = vcombine.high %v781_v54, %v785_v55  ;;  %v3604_v5 = vcombine.low %v781_v54, %v785_v55  ;;  %v794_v18 = vld [vmem:[%s4673_s15 + $0x168] sm:$0xff] }
  0xc3   : > { %667 = vmatprep.subr.bf16.mxu0 %v4088_v12  ;;  %708 = vmatprep.subr.bf16.mxu1 %v4108_v24  ;;  %v793_v63 = vld [vmem:[%s4673_s15 + $0x160] sm:$0xff]  ;;  %v3599_v12 = vcombine.high %v774_v1, %v778_v2  ;;  %v3606_v24 = vcombine.low %v782_v9, %v786_v10  ;;  %v798_v25 = vld [vmem:[%s4673_s15 + $0x188] sm:$0xff]  ;;  %v3614_v32 = vcombine.low %v790_v17, %v794_v18 }
  0xc4   : > { %v797_v6 = vld [vmem:[%s4673_s15 + $0x180] sm:$0xff]  ;;  %v3613_v11 = vcombine.high %v789_v62, %v793_v63  ;;  %v3612_v13 = vcombine.low %v789_v62, %v793_v63  ;;  %v802_v26 = vld [vmem:[%s4673_s15 + $0x1a8] sm:$0xff] }
  0xc5   : > { %v801_v7 = vld [vmem:[%s4673_s15 + $0x1a0] sm:$0xff]  ;;  %v806_v33 = vld [vmem:[%s4673_s15 + $0x1c8] sm:$0xff]  ;;  %v3622_v40 = vcombine.low %v798_v25, %v802_v26 }
  0xc6   : > { %668 = vmatpush1.bf16.msra.mxu0 %v4090_v15  ;;  %709 = vmatpush1.bf16.msra.mxu1 %v4110_v29  ;;  %v805_v14 = vld [vmem:[%s4673_s15 + $0x1c0] sm:$0xff]  ;;  %v3621_v19 = vcombine.high %v797_v6, %v801_v7  ;;  %v814_v41 = vld [vmem:[%s4673_s15 + $0x208] sm:$0xff] }
  0xc7   : > { %669 = vmatprep.subr.bf16.mxu0 %v4091_v16  ;;  %710 = vmatprep.subr.bf16.mxu1 %v4111_v31  ;;  %v809_v15 = vld [vmem:[%s4673_s15 + $0x1e0] sm:$0xff]  ;;  %v3598_v16 = vcombine.low %v774_v1, %v778_v2  ;;  %v818_v42 = vld [vmem:[%s4673_s15 + $0x228] sm:$0xff] }
  0xc8   : > { %v813_v22 = vld [vmem:[%s4673_s15 + $0x200] sm:$0xff]  ;;  %v3629_v27 = vcombine.high %v805_v14, %v809_v15  ;;  %v3628_v29 = vcombine.low %v805_v14, %v809_v15  ;;  %v822_v49 = vld [vmem:[%s4673_s15 + $0x248] sm:$0xff]  ;;  %v3639_v52 = vcombine.high %v814_v41, %v818_v42  ;;  %v3638_v54 = vcombine.low %v814_v41, %v818_v42 }
  0xc9   : > { %v817_v23 = vld [vmem:[%s4673_s15 + $0x220] sm:$0xff]  ;;  %v830_v55 = vld [vmem:[%s4673_s15 + $0x288] sm:$0xff] }
  0xca   : > { %670 = vmatpush1.bf16.msra.mxu0 %v4093_v20  ;;  %711 = vmatpush1.bf16.msra.mxu1 %v4113_v37  ;;  %v3607_v20 = vcombine.high %v782_v9, %v786_v10  ;;  %v825_v31 = vld [vmem:[%s4673_s15 + $0x260] sm:$0xff]  ;;  %v3637_v35 = vcombine.high %v813_v22, %v817_v23  ;;  %v3636_v37 = vcombine.low %v813_v22, %v817_v23  ;;  %v842_v62 = vld [vmem:[%s4673_s15 + $0x2e8] sm:$0xff] }
  0xcb   : > { %3568 = vmatprep.subr.msk.bf16.mxu0 %vm646_vm0, %v3565_v21  ;;  %3570 = vmatprep.subr.msk.bf16.mxu1 %vm646_vm0, %v3567_v39  ;;  %v3620_v21 = vcombine.low %v797_v6, %v801_v7  ;;  %v833_v39 = vld [vmem:[%s4673_s15 + $0x2a0] sm:$0xff]  ;;  %v850_v7 = vld [vmem:[%s4673_s15 + $0x328] sm:$0xff] }
  0xcc   : > { %v837_v46 = vld [vmem:[%s4673_s15 + $0x2c0] sm:$0xff]  ;;  %v858_v15 = vld [vmem:[%s4673_s15 + $0x368] sm:$0xff] }
  0xcd   : > { %v841_v47 = vld [vmem:[%s4673_s15 + $0x2e0] sm:$0xff]  ;;  %v866_v23 = vld [vmem:[%s4673_s15 + $0x3a8] sm:$0xff] }
  0xce   : > { %672 = vmatpush1.bf16.msra.mxu0 %v648_v28  ;;  %713 = vmatpush1.bf16.msra.mxu1 %v654_v50  ;;  %v3615_v28 = vcombine.high %v790_v17, %v794_v18  ;;  %v826_v50 = vld [vmem:[%s4673_s15 + $0x268] sm:$0xff]  ;;  %v3661_v57 = vcombine.high %v837_v46, %v841_v47 }
  0xcf   : > { %2327 = vmatprep.subr.bf16.mxu0 %v3573_v30  ;;  %2409 = vmatprep.subr.bf16.mxu1 %v3575_v51  ;;  %v821_v30 = vld [vmem:[%s4673_s15 + $0x240] sm:$0xff]  ;;  %v3647_v58 = vcombine.high %v822_v49, %v826_v50 }
  0xd0   : > { %v3645_v43 = vcombine.high %v821_v30, %v825_v31 }
  0xd1   : > { %3569 = vmatmul.mubr.msk.bf16.vlgmr.msra.gmra.mrb[0].mxu0 %vm642_vm1, %v463_v34  ;;  %3571 = vmatmul.mubr.msk.bf16.vlgmr.msra.gmra.mrb[0].mxu1 %vm642_vm1, %v463_v34  ;;  %v810_v34 = vld [vmem:[%s4673_s15 + $0x1e8] sm:$0xff] }
  0xd2   : > { %2328 = vmatpush1.bf16.msra.mxu0 %v3572_v36  ;;  %2410 = vmatpush1.bf16.msra.mxu1 %v3574_v56  ;;  %v3623_v36 = vcombine.high %v798_v25, %v802_v26  ;;  %v3631_v44 = vcombine.high %v806_v33, %v810_v34  ;;  %v834_v56 = vld [vmem:[%s4673_s15 + $0x2a8] sm:$0xff] }
  0xd3   : > { %2329 = vmatprep.subr.bf16.mxu0 %v3581_v38  ;;  %2411 = vmatprep.subr.bf16.mxu1 %v3583_v60  ;;  %v829_v38 = vld [vmem:[%s4673_s15 + $0x280] sm:$0xff]  ;;  %v3646_v60 = vcombine.low %v822_v49, %v826_v50  ;;  %v3655_v63 = vcombine.high %v830_v55, %v834_v56 }
  0xd4   : > { %v3653_v51 = vcombine.high %v829_v38, %v833_v39 }
  0xd6   : > { %2330 = vmatpush1.bf16.msra.mxu0 %v3580_v45  ;;  %2412 = vmatpush1.bf16.msra.mxu1 %v3582_v0  ;;  %v3644_v45 = vcombine.low %v821_v30, %v825_v31  ;;  %v3654_v0 = vcombine.low %v830_v55, %v834_v56  ;;  %v874_v31 = vld [vmem:[%s4673_s15 + $0x3e8] sm:$0xff] }
  0xd7   : > { %2331 = vmatprep.subr.bf16.mxu0 %v3589_v48  ;;  %2413 = vmatprep.subr.bf16.mxu1 %v3591_v4  ;;  %v3630_v48 = vcombine.low %v806_v33, %v810_v34  ;;  %v849_v4 = vld [vmem:[%s4673_s15 + $0x320] sm:$0xff] }
  0xda   : > { %2332 = vmatpush1.bf16.msra.mxu0 %v3588_v53  ;;  %2414 = vmatpush1.bf16.msra.mxu1 %v3590_v8  ;;  %v3652_v53 = vcombine.low %v829_v38, %v833_v39  ;;  %v882_v39 = vld [vmem:[%s4673_s15 + $0x428] sm:$0xff] }
  0xdb   : > { %2333 = vmatprep.subr.bf16.mxu0 %v3597_v59  ;;  %2415 = vmatprep.subr.bf16.mxu1 %v3599_v12  ;;  %v3660_v59 = vcombine.low %v837_v46, %v841_v47  ;;  %v857_v12 = vld [vmem:[%s4673_s15 + $0x360] sm:$0xff]  ;;  %v4806_v46 = vld [vmem:[%s4665_s16] sm:$0xf] }
  0xde   : > { %2334 = vmatpush1.bf16.msra.mxu0 %v3596_v61  ;;  %2416 = vmatpush1.bf16.msra.mxu1 %v3598_v16  ;;  %v838_v61 = vld [vmem:[%s4673_s15 + $0x2c8] sm:$0xff] }
  0xdf   : > { %2335 = vmatprep.subr.bf16.mxu0 %v3605_v3  ;;  %2417 = vmatprep.subr.bf16.mxu1 %v3607_v20  ;;  %v3663_v1 = vcombine.high %v838_v61, %v842_v62  ;;  %v3662_v2 = vcombine.low %v838_v61, %v842_v62  ;;  %v845_v3 = vld [vmem:[%s4673_s15 + $0x300] sm:$0xff] }
  0xe0   : > { %v3669_v6 = vcombine.high %v845_v3, %v849_v4  ;;  %v3668_v8 = vcombine.low %v845_v3, %v849_v4  ;;  %v865_v20 = vld [vmem:[%s4673_s15 + $0x3a0] sm:$0xff]  ;;  %v890_v3 = vld [vmem:[%s4673_s15 + $0x468] sm:$0xff] }
  0xe1   : > { %v885_v62 = vld [vmem:[%s4673_s15 + $0x440] sm:$0xff] }
  0xe2   : > { %2336 = vmatpush1.bf16.msra.mxu0 %v3604_v5  ;;  %2418 = vmatpush1.bf16.msra.mxu1 %v3606_v24  ;;  %v846_v5 = vld [vmem:[%s4673_s15 + $0x308] sm:$0xff] }
  0xe3   : > { %2337 = vmatprep.subr.bf16.mxu0 %v3613_v11  ;;  %2419 = vmatprep.subr.bf16.mxu1 %v3615_v28  ;;  %v3670_v9 = vcombine.low %v846_v5, %v850_v7  ;;  %v3671_v10 = vcombine.high %v846_v5, %v850_v7  ;;  %v853_v11 = vld [vmem:[%s4673_s15 + $0x340] sm:$0xff] }
  0xe4   : > { %v3677_v14 = vcombine.high %v853_v11, %v857_v12  ;;  %v3676_v16 = vcombine.low %v853_v11, %v857_v12  ;;  %v873_v28 = vld [vmem:[%s4673_s15 + $0x3e0] sm:$0xff]  ;;  %v894_v11 = vld [vmem:[%s4673_s15 + $0x488] sm:$0xff] }
  0xe5   : > { %v898_v12 = vld [vmem:[%s4673_s15 + $0x4a8] sm:$0xff] }
  0xe6   : > { %2338 = vmatpush1.bf16.msra.mxu0 %v3612_v13  ;;  %2420 = vmatpush1.bf16.msra.mxu1 %v3614_v32  ;;  %v854_v13 = vld [vmem:[%s4673_s15 + $0x348] sm:$0xff] }
  0xe7   : > { %2339 = vmatprep.subr.bf16.mxu0 %v3621_v19  ;;  %2421 = vmatprep.subr.bf16.mxu1 %v3623_v36  ;;  %v3678_v17 = vcombine.low %v854_v13, %v858_v15  ;;  %v3679_v18 = vcombine.high %v854_v13, %v858_v15  ;;  %v861_v19 = vld [vmem:[%s4673_s15 + $0x380] sm:$0xff] }
  0xe8   : > { %v3685_v22 = vcombine.high %v861_v19, %v865_v20  ;;  %v3684_v24 = vcombine.low %v861_v19, %v865_v20  ;;  %v881_v36 = vld [vmem:[%s4673_s15 + $0x420] sm:$0xff]  ;;  %v902_v19 = vld [vmem:[%s4673_s15 + $0x4c8] sm:$0xff] }
  0xe9   : > { %v906_v20 = vld [vmem:[%s4673_s15 + $0x4e8] sm:$0xff] }
  0xea   : > { %2340 = vmatpush1.bf16.msra.mxu0 %v3620_v21  ;;  %2422 = vmatpush1.bf16.msra.mxu1 %v3622_v40  ;;  %v862_v21 = vld [vmem:[%s4673_s15 + $0x388] sm:$0xff] }
  0xeb   : > { %2341 = vmatprep.subr.bf16.mxu0 %v3629_v27  ;;  %2423 = vmatprep.subr.bf16.mxu1 %v3631_v44  ;;  %v3686_v25 = vcombine.low %v862_v21, %v866_v23  ;;  %v3687_v26 = vcombine.high %v862_v21, %v866_v23  ;;  %v869_v27 = vld [vmem:[%s4673_s15 + $0x3c0] sm:$0xff]  ;;  %v3718_v23 = vcombine.low %v894_v11, %v898_v12 }
  0xec   : > { %v3693_v30 = vcombine.high %v869_v27, %v873_v28  ;;  %v3692_v32 = vcombine.low %v869_v27, %v873_v28  ;;  %v913_v28 = vld [vmem:[%s4673_s15 + $0x520] sm:$0xff] }
  0xee   : > { %2342 = vmatpush1.bf16.msra.mxu0 %v3628_v29  ;;  %2424 = vmatpush1.bf16.msra.mxu1 %v3630_v48  ;;  %v870_v29 = vld [vmem:[%s4673_s15 + $0x3c8] sm:$0xff] }
  0xef   : > { %2343 = vmatprep.subr.bf16.mxu0 %v3637_v35  ;;  %2425 = vmatprep.subr.bf16.mxu1 %v3639_v52  ;;  %v3694_v33 = vcombine.low %v870_v29, %v874_v31  ;;  %v3695_v34 = vcombine.high %v870_v29, %v874_v31  ;;  %v877_v35 = vld [vmem:[%s4673_s15 + $0x400] sm:$0xff]  ;;  %v910_v29 = vld [vmem:[%s4673_s15 + $0x508] sm:$0xff] }
  0xf0   : > { %v3701_v38 = vcombine.high %v877_v35, %v881_v36  ;;  %v3700_v40 = vcombine.low %v877_v35, %v881_v36  ;;  %v917_v35 = vld [vmem:[%s4673_s15 + $0x540] sm:$0xff] }
  0xf1   : > { %v921_v36 = vld [vmem:[%s4673_s15 + $0x560] sm:$0xff] }
  0xf2   : > { %2344 = vmatpush1.bf16.msra.mxu0 %v3636_v37  ;;  %2426 = vmatpush1.bf16.msra.mxu1 %v3638_v54  ;;  %v878_v37 = vld [vmem:[%s4673_s15 + $0x408] sm:$0xff] }
  0xf3   : > { %2345 = vmatprep.subr.bf16.mxu0 %v3645_v43  ;;  %2427 = vmatprep.subr.bf16.mxu1 %v3647_v58  ;;  %v3702_v41 = vcombine.low %v878_v37, %v882_v39  ;;  %v3703_v42 = vcombine.high %v878_v37, %v882_v39  ;;  %v492_v43 = vlaneseq  ;;  %v918_v37 = vld [vmem:[%s4673_s15 + $0x548] sm:$0xff] }
  0xf5   : > { %v4802_v44 = vshrl.u32 %v492_v43, 7  ;;  %v925_v43 = vld [vmem:[%s4673_s15 + $0x580] sm:$0xff] }
  0xf6   : > { %2346 = vmatpush1.bf16.msra.mxu0 %v3644_v45  ;;  %2428 = vmatpush1.bf16.msra.mxu1 %v3646_v60 }
  0xf7   : > { %2347 = vmatprep.subr.bf16.mxu0 %v3653_v51  ;;  %2429 = vmatprep.subr.bf16.mxu1 %v3655_v63  ;;  %v494_v45 = vsub.s32 0, %v4802_v44  ;;  %v498_v47 = vsub.s32 1, %v4802_v44  ;;  %v506_v56 = vsub.s32 3, %v4802_v44 }
  0xf9   : > { %v495_v48 = vrot.slane %v4806_v46, %v494_v45  ;;  %v499_v49 = vrot.slane %v4806_v46, %v498_v47 }
  0xfa   : > { %2348 = vmatpush1.bf16.msra.mxu0 %v3652_v53  ;;  %2430 = vmatpush1.bf16.msra.mxu1 %v3654_v0 }
  0xfb   : > { %2349 = vmatprep.subr.bf16.mxu0 %v3661_v57  ;;  %2431 = vmatprep.subr.bf16.mxu1 %v3663_v1  ;;  %v507_v57 = vrot.slane %v4806_v46, %v506_v56  ;;  %v889_v1 = vld [vmem:[%s4673_s15 + $0x460] sm:$0xff] }
  0xfc   : > { %v3709_v7 = vcombine.high %v885_v62, %v889_v1  ;;  %v3708_v13 = vcombine.low %v885_v62, %v889_v1  ;;  %v941_v1 = vld [vmem:[%s4673_s15 + $0x600] sm:$0xff] }
  0xfe   : > { %2350 = vmatpush1.bf16.msra.mxu0 %v3660_v59  ;;  %2432 = vmatpush1.bf16.msra.mxu1 %v3662_v2  ;;  %v886_v2 = vld [vmem:[%s4673_s15 + $0x448] sm:$0xff] }
  0xff   : > { %2351 = vmatprep.subr.bf16.mxu0 %v3669_v6  ;;  %2433 = vmatprep.subr.bf16.mxu1 %v3671_v10  ;;  %v897_v10 = vld [vmem:[%s4673_s15 + $0x4a0] sm:$0xff] }
 0x102   : > { %2352 = vmatpush1.bf16.msra.mxu0 %v3668_v8  ;;  %2434 = vmatpush1.bf16.msra.mxu1 %v3670_v9  ;;  %v3711_v8 = vcombine.high %v886_v2, %v890_v3  ;;  %v893_v9 = vld [vmem:[%s4673_s15 + $0x480] sm:$0xff] }
 0x103   : > { %2353 = vmatprep.subr.bf16.mxu0 %v3677_v14  ;;  %2435 = vmatprep.subr.bf16.mxu1 %v3679_v18  ;;  %v3710_v14 = vcombine.low %v886_v2, %v890_v3  ;;  %v3717_v15 = vcombine.high %v893_v9, %v897_v10  ;;  %v905_v18 = vld [vmem:[%s4673_s15 + $0x4e0] sm:$0xff]  ;;  %v942_v3 = vld [vmem:[%s4673_s15 + $0x608] sm:$0xff] }
 0x104   : > { %v945_v2 = vld [vmem:[%s4673_s15 + $0x620] sm:$0xff] }
 0x106   : > { %2354 = vmatpush1.bf16.msra.mxu0 %v3676_v16  ;;  %2436 = vmatpush1.bf16.msra.mxu1 %v3678_v17  ;;  %v3719_v16 = vcombine.high %v894_v11, %v898_v12  ;;  %v901_v17 = vld [vmem:[%s4673_s15 + $0x4c0] sm:$0xff] }
 0x107   : > { %2355 = vmatprep.subr.bf16.mxu0 %v3685_v22  ;;  %2437 = vmatprep.subr.bf16.mxu1 %v3687_v26  ;;  %v3716_v22 = vcombine.low %v893_v9, %v897_v10  ;;  %v909_v26 = vld [vmem:[%s4673_s15 + $0x500] sm:$0xff]  ;;  %v3724_v31 = vcombine.low %v901_v17, %v905_v18  ;;  %v3765_v9 = vcombine.high %v941_v1, %v945_v2 }
 0x108   : > { %v3732_v39 = vcombine.low %v909_v26, %v913_v28  ;;  %v949_v11 = vld [vmem:[%s4673_s15 + $0x640] sm:$0xff] }
 0x109   : > { %v953_v12 = vld [vmem:[%s4673_s15 + $0x660] sm:$0xff] }
 0x10a   : > { %2356 = vmatpush1.bf16.msra.mxu0 %v3684_v24  ;;  %2438 = vmatpush1.bf16.msra.mxu1 %v3686_v25  ;;  %v3725_v24 = vcombine.high %v901_v17, %v905_v18  ;;  %v3727_v25 = vcombine.high %v902_v19, %v906_v20  ;;  %v3773_v17 = vcombine.high %v949_v11, %v953_v12 }
 0x10b   : > { %2357 = vmatprep.subr.bf16.mxu0 %v3693_v30  ;;  %2439 = vmatprep.subr.bf16.mxu1 %v3695_v34  ;;  %v914_v30 = vld [vmem:[%s4673_s15 + $0x528] sm:$0xff] }
 0x10c   : > { %v3735_v34 = vcombine.high %v910_v29, %v914_v30 }
 0x10e   : > { %2358 = vmatpush1.bf16.msra.mxu0 %v3692_v32  ;;  %2440 = vmatpush1.bf16.msra.mxu1 %v3694_v33  ;;  %v3726_v32 = vcombine.low %v902_v19, %v906_v20  ;;  %v3733_v33 = vcombine.high %v909_v26, %v913_v28  ;;  %v957_v19 = vld [vmem:[%s4673_s15 + $0x680] sm:$0xff] }
 0x10f   : > { %2368 = vmatprep.subr.bf16.mxu0 %v3701_v38  ;;  %2450 = vmatprep.subr.bf16.mxu1 %v3703_v42  ;;  %v922_v38 = vld [vmem:[%s4673_s15 + $0x568] sm:$0xff]  ;;  %v961_v20 = vld [vmem:[%s4673_s15 + $0x6a0] sm:$0xff] }
 0x110   : > { %v3743_v42 = vcombine.high %v918_v37, %v922_v38  ;;  %v965_v28 = vld [vmem:[%s4673_s15 + $0x6c0] sm:$0xff] }
 0x1a4   : > { %v693_v50 = vpop.f32.mrb[0].mxu0  ;;  %v4819_v58 = vpop.f32.mrb[0].mxu1 }
 0x1a5   : > { %v694_v51 = vadd.f32 %v693_v50, %v495_v48  ;;  %v695_v52 = vpop.f32.mrb[1].mxu0  ;;  %v736_v59 = vpop.f32.mrb[1].mxu1  ;;  %v929_v48 = vld [vmem:[%s4673_s15 + $0x5a0] sm:$0xff]  ;;  %v930_v50 = vld [vmem:[%s4673_s15 + $0x5a8] sm:$0xff] }
 0x1a6   : > { %v696_v53 = vadd.f32 %v695_v52, %v499_v49  ;;  %v697_v54 = vpop.f32.mrb[2].mxu0  ;;  %v737_v60 = vadd.f32 %v736_v59, %v507_v57  ;;  %v738_v61 = vpop.f32.mrb[2].mxu1  ;;  %v926_v49 = vld [vmem:[%s4673_s15 + $0x588] sm:$0xff]  ;;  %v3742_v52 = vcombine.low %v918_v37, %v922_v38  ;;  %v937_v57 = vld [vmem:[%s4673_s15 + $0x5e0] sm:$0xff] }
 0x1a7   : > { %4180 = vtanh.f32 %v694_v51  ;;  %v698_v55 = vpop.f32.mrb[3].mxu0  ;;  %v739_v63 = vpop.f32.mrb[3].mxu1  ;;  %v3740_v51 = vcombine.low %v917_v35, %v921_v36  ;;  %v3751_v54 = vcombine.high %v926_v49, %v930_v50  ;;  %v934_v59 = vld [vmem:[%s4673_s15 + $0x5c8] sm:$0xff]  ;;  %v3748_v61 = vcombine.low %v925_v43, %v929_v48  ;;  %v973_v37 = vld [vmem:[%s4673_s15 + $0x700] sm:$0xff] }
 0x1a8   : > { %4182 = vtanh.f32 %v696_v53  ;;  %v3749_v53 = vcombine.high %v925_v43, %v929_v48  ;;  %v933_v55 = vld [vmem:[%s4673_s15 + $0x5c0] sm:$0xff]  ;;  %v3750_v62 = vcombine.low %v926_v49, %v930_v50 }
 0x1a9   : > { %4184 = vtanh.f32 %v737_v60  ;;  %v938_v60 = vld [vmem:[%s4673_s15 + $0x5e8] sm:$0xff]  ;;  %v3757_v63 = vcombine.high %v933_v55, %v937_v57  ;;  %v981_v50 = vld [vmem:[%s4673_s15 + $0x740] sm:$0xff] }
 0x1b1   : > { %v4181_v0 = vpop.eup %4180 }
 0x1b2   : > { %v4183_v4 = vpop.eup %4182  ;;  %v4827_v6 = vpack.c.bf16 %v4181_v0, %v4181_v0  ;;  %v3759_v0 = vcombine.high %v934_v59, %v938_v60 }
 0x1b3   : > { %v4825_v5 = vpack.c.bf16 %v4183_v4, %v4183_v4  ;;  %v4185_v21 = vpop.eup %4184  ;;  %v946_v4 = vld [vmem:[%s4673_s15 + $0x628] sm:$0xff] }
 0x1b4   : > { %v4842_v27 = vpack.c.bf16 %v4185_v21, %v4185_v21  ;;  %v3767_v10 = vcombine.high %v942_v3, %v946_v4  ;;  %v958_v21 = vld [vmem:[%s4673_s15 + $0x688] sm:$0xff] }
 0x1b5   : > { %2359 = vmatprep.mubr.bf16.mxu0 %v4825_v5  ;;  %2441 = vmatprep.mubr.bf16.mxu1 %v4825_v5 }
 0x1b6   : > { %2360 = vmatmul.mubr.bf16.vlgmr.msra.gmra.mrb[4].mxu0 %v4827_v6  ;;  %2442 = vmatmul.mubr.bf16.vlgmr.msra.gmra.mrb[4].mxu1 %v4827_v6 }
 0x1b7   : > { %2369 = vmatpush1.bf16.msra.mxu0 %v3700_v40  ;;  %2451 = vmatpush1.bf16.msra.mxu1 %v3702_v41  ;;  %v3734_v40 = vcombine.low %v910_v29, %v914_v30  ;;  %v3741_v41 = vcombine.high %v917_v35, %v921_v36  ;;  %v502_v29 = vsub.s32 2, %v4802_v44  ;;  %v969_v30 = vld [vmem:[%s4673_s15 + $0x6e0] sm:$0xff] }
 0x1b8   : > { %2370 = vmatprep.subr.bf16.mxu0 %v3709_v7  ;;  %2452 = vmatprep.subr.bf16.mxu1 %v3711_v8  ;;  %v3756_v7 = vcombine.low %v933_v55, %v937_v57  ;;  %v3758_v8 = vcombine.low %v934_v59, %v938_v60  ;;  %v3789_v35 = vcombine.high %v965_v28, %v969_v30  ;;  %v989_v60 = vld [vmem:[%s4673_s15 + $0x780] sm:$0xff] }
 0x1b9   : > { %2400 = vmatprep.mubr.bf16.mxu0 %v4842_v27  ;;  %2482 = vmatprep.mubr.bf16.mxu1 %v4842_v27  ;;  %v503_v38 = vrot.slane %v4806_v46, %v502_v29  ;;  %v985_v46 = vld [vmem:[%s4673_s15 + $0x760] sm:$0xff] }
 0x1ba   : > { %v3805_v57 = vcombine.high %v981_v50, %v985_v46 }
 0x1bb   : > { %2371 = vmatpush1.bf16.msra.mxu0 %v3708_v13  ;;  %2453 = vmatpush1.bf16.msra.mxu1 %v3710_v14  ;;  %v950_v13 = vld [vmem:[%s4673_s15 + $0x648] sm:$0xff] }
 0x1bc   : > { %2372 = vmatprep.subr.bf16.mxu0 %v3717_v15  ;;  %2454 = vmatprep.subr.bf16.mxu1 %v3719_v16  ;;  %v954_v14 = vld [vmem:[%s4673_s15 + $0x668] sm:$0xff]  ;;  %v3764_v15 = vcombine.low %v941_v1, %v945_v2  ;;  %v3766_v16 = vcombine.low %v942_v3, %v946_v4  ;;  %v997_v3 = vld [vmem:[%s4673_s15 + $0x7c0] sm:$0xff] }
 0x1bd   : > { %v3775_v18 = vcombine.high %v950_v13, %v954_v14  ;;  %v1001_v4 = vld [vmem:[%s4673_s15 + $0x7e0] sm:$0xff] }
 0x1bf   : > { %2373 = vmatpush1.bf16.msra.mxu0 %v3716_v22  ;;  %2455 = vmatpush1.bf16.msra.mxu1 %v3718_v23  ;;  %v962_v22 = vld [vmem:[%s4673_s15 + $0x6a8] sm:$0xff]  ;;  %v3772_v23 = vcombine.low %v949_v11, %v953_v12  ;;  %v3821_v11 = vcombine.high %v997_v3, %v1001_v4 }
 0x1c0   : > { %2374 = vmatprep.subr.bf16.mxu0 %v3725_v24  ;;  %2456 = vmatprep.subr.bf16.mxu1 %v3727_v25  ;;  %v3774_v24 = vcombine.low %v950_v13, %v954_v14  ;;  %v3781_v25 = vcombine.high %v957_v19, %v961_v20  ;;  %v3783_v26 = vcombine.high %v958_v21, %v962_v22  ;;  %v751_v13 = vld [vmem:[%s4673_s15 + $0x10] sm:$0xff] }
 0x1c1   : > { %v755_v14 = vld [vmem:[%s4673_s15 + $0x30] sm:$0xff] }
 0x1c3   : > { %2375 = vmatpush1.bf16.msra.mxu0 %v3724_v31  ;;  %2457 = vmatpush1.bf16.msra.mxu1 %v3726_v32  ;;  %v966_v31 = vld [vmem:[%s4673_s15 + $0x6c8] sm:$0xff] }
 0x1c4   : > { %2376 = vmatprep.subr.bf16.mxu0 %v3733_v33  ;;  %2458 = vmatprep.subr.bf16.mxu1 %v3735_v34  ;;  %v970_v32 = vld [vmem:[%s4673_s15 + $0x6e8] sm:$0xff]  ;;  %v3780_v33 = vcombine.low %v957_v19, %v961_v20  ;;  %v3782_v34 = vcombine.low %v958_v21, %v962_v22  ;;  %v3577_v20 = vcombine.high %v751_v13, %v755_v14  ;;  %v759_v22 = vld [vmem:[%s4673_s15 + $0x50] sm:$0xff] }
 0x1c5   : > { %v3791_v36 = vcombine.high %v966_v31, %v970_v32  ;;  %v3790_v43 = vcombine.low %v966_v31, %v970_v32 }
 0x1c7   : > { %2377 = vmatpush1.bf16.msra.mxu0 %v3732_v39  ;;  %2459 = vmatpush1.bf16.msra.mxu1 %v3734_v40  ;;  %v977_v39 = vld [vmem:[%s4673_s15 + $0x720] sm:$0xff]  ;;  %v974_v40 = vld [vmem:[%s4673_s15 + $0x708] sm:$0xff] }
 0x1c8   : > { %2378 = vmatprep.subr.bf16.mxu0 %v3741_v41  ;;  %2460 = vmatprep.subr.bf16.mxu1 %v3743_v42  ;;  %v978_v41 = vld [vmem:[%s4673_s15 + $0x728] sm:$0xff]  ;;  %v3788_v42 = vcombine.low %v965_v28, %v969_v30  ;;  %v3797_v48 = vcombine.high %v973_v37, %v977_v39  ;;  %v3576_v28 = vcombine.low %v751_v13, %v755_v14  ;;  %v807_v14 = vld [vmem:[%s4673_s15 + $0x1d0] sm:$0xff] }
 0x1c9   : > { %v3799_v49 = vcombine.high %v974_v40, %v978_v41  ;;  %v3798_v55 = vcombine.low %v974_v40, %v978_v41  ;;  %v775_v41 = vld [vmem:[%s4673_s15 + $0xd0] sm:$0xff] }
 0x1cb   : > { %2379 = vmatpush1.bf16.msra.mxu0 %v3740_v51  ;;  %2461 = vmatpush1.bf16.msra.mxu1 %v3742_v52  ;;  %v735_v51 = vadd.f32 %v4819_v58, %v503_v38  ;;  %v982_v52 = vld [vmem:[%s4673_s15 + $0x748] sm:$0xff] }
 0x1cc   : > { %2380 = vmatprep.subr.bf16.mxu0 %v3749_v53  ;;  %2462 = vmatprep.subr.bf16.mxu1 %v3751_v54  ;;  %v986_v53 = vld [vmem:[%s4673_s15 + $0x768] sm:$0xff]  ;;  %v3796_v54 = vcombine.low %v973_v37, %v977_v39 }
 0x1cd   : > { %v3807_v59 = vcombine.high %v982_v52, %v986_v53  ;;  %4186 = vtanh.f32 %v735_v51  ;;  %v990_v58 = vld [vmem:[%s4673_s15 + $0x788] sm:$0xff] }
 0x1cf   : > { %2381 = vmatpush1.bf16.msra.mxu0 %v3748_v61  ;;  %2463 = vmatpush1.bf16.msra.mxu1 %v3750_v62  ;;  %v993_v61 = vld [vmem:[%s4673_s15 + $0x7a0] sm:$0xff]  ;;  %v994_v62 = vld [vmem:[%s4673_s15 + $0x7a8] sm:$0xff] }
 0x1d0   : > { %2382 = vmatprep.subr.bf16.mxu0 %v3757_v63  ;;  %2464 = vmatprep.subr.bf16.mxu1 %v3759_v0  ;;  %v3804_v63 = vcombine.low %v981_v50, %v985_v46  ;;  %v3806_v0 = vcombine.low %v982_v52, %v986_v53  ;;  %v3813_v1 = vcombine.high %v989_v60, %v993_v61  ;;  %v783_v46 = vld [vmem:[%s4673_s15 + $0x110] sm:$0xff]  ;;  %v784_v53 = vld [vmem:[%s4673_s15 + $0x118] sm:$0xff] }
 0x1d1   : > { %v3815_v2 = vcombine.high %v990_v58, %v994_v62  ;;  %v787_v52 = vld [vmem:[%s4673_s15 + $0x130] sm:$0xff] }
 0x1d3   : > { %2383 = vmatpush1.bf16.msra.mxu0 %v3756_v7  ;;  %2465 = vmatpush1.bf16.msra.mxu1 %v3758_v8  ;;  %v998_v7 = vld [vmem:[%s4673_s15 + $0x7c8] sm:$0xff] }
 0x1d4   : > { %2384 = vmatprep.subr.bf16.mxu0 %v3765_v9  ;;  %2466 = vmatprep.subr.bf16.mxu1 %v3767_v10  ;;  %v1002_v8 = vld [vmem:[%s4673_s15 + $0x7e8] sm:$0xff]  ;;  %v3812_v9 = vcombine.low %v989_v60, %v993_v61  ;;  %v3814_v10 = vcombine.low %v990_v58, %v994_v62  ;;  %v791_v61 = vld [vmem:[%s4673_s15 + $0x150] sm:$0xff]  ;;  %v792_v62 = vld [vmem:[%s4673_s15 + $0x158] sm:$0xff] }
 0x1d5   : > { %v3823_v12 = vcombine.high %v998_v7, %v1002_v8  ;;  %v3822_v19 = vcombine.low %v998_v7, %v1002_v8  ;;  %v795_v58 = vld [vmem:[%s4673_s15 + $0x170] sm:$0xff]  ;;  %v800_v8 = vld [vmem:[%s4673_s15 + $0x198] sm:$0xff] }
 0x1d6   : > { %v803_v7 = vld [vmem:[%s4673_s15 + $0x1b0] sm:$0xff] }
 0x1d7   : > { %2385 = vmatpush1.bf16.msra.mxu0 %v3764_v15  ;;  %2467 = vmatpush1.bf16.msra.mxu1 %v3766_v16  ;;  %v752_v15 = vld [vmem:[%s4673_s15 + $0x18] sm:$0xff] }
 0x1d8   : > { %2386 = vmatprep.subr.bf16.mxu0 %v3773_v17  ;;  %2468 = vmatprep.subr.bf16.mxu1 %v3775_v18  ;;  %v756_v16 = vld [vmem:[%s4673_s15 + $0x38] sm:$0xff]  ;;  %v4187_v17 = vpop.eup %4186  ;;  %v3820_v18 = vcombine.low %v997_v3, %v1001_v4  ;;  %v799_v4 = vld [vmem:[%s4673_s15 + $0x190] sm:$0xff] }
 0x1d9   : > { %v3579_v21 = vcombine.high %v752_v15, %v756_v16  ;;  %v3578_v30 = vcombine.low %v752_v15, %v756_v16  ;;  %v811_v15 = vld [vmem:[%s4673_s15 + $0x1f0] sm:$0xff]  ;;  %v808_v16 = vld [vmem:[%s4673_s15 + $0x1d8] sm:$0xff] }
 0x1db   : > { %2387 = vmatpush1.bf16.msra.mxu0 %v3772_v23  ;;  %2469 = vmatpush1.bf16.msra.mxu1 %v3774_v24  ;;  %v4903_v23 = vpack.c.bf16 %v4187_v17, %v4187_v17  ;;  %v763_v24 = vld [vmem:[%s4673_s15 + $0x70] sm:$0xff]  ;;  %v812_v17 = vld [vmem:[%s4673_s15 + $0x1f8] sm:$0xff] }
 0x1dc   : > { %2388 = vmatprep.subr.bf16.mxu0 %v3781_v25  ;;  %2470 = vmatprep.subr.bf16.mxu1 %v3783_v26  ;;  %v760_v25 = vld [vmem:[%s4673_s15 + $0x58] sm:$0xff]  ;;  %v3585_v31 = vcombine.high %v759_v22, %v763_v24  ;;  %v3584_v37 = vcombine.low %v759_v22, %v763_v24  ;;  %v815_v22 = vld [vmem:[%s4673_s15 + $0x210] sm:$0xff] }
 0x1dd   : > { %v764_v26 = vld [vmem:[%s4673_s15 + $0x78] sm:$0xff]  ;;  %v819_v24 = vld [vmem:[%s4673_s15 + $0x230] sm:$0xff] }
 0x1de   : > { %v3587_v32 = vcombine.high %v760_v25, %v764_v26  ;;  %v3586_v38 = vcombine.low %v760_v25, %v764_v26  ;;  %v816_v25 = vld [vmem:[%s4673_s15 + $0x218] sm:$0xff] }
 0x1df   : > { %2389 = vmatpush1.bf16.msra.mxu0 %v3780_v33  ;;  %2471 = vmatpush1.bf16.msra.mxu1 %v3782_v34  ;;  %v767_v33 = vld [vmem:[%s4673_s15 + $0x90] sm:$0xff]  ;;  %v820_v26 = vld [vmem:[%s4673_s15 + $0x238] sm:$0xff] }
 0x1e0   : > { %2390 = vmatprep.subr.bf16.mxu0 %v3789_v35  ;;  %2472 = vmatprep.subr.bf16.mxu1 %v3791_v36  ;;  %v771_v34 = vld [vmem:[%s4673_s15 + $0xb0] sm:$0xff]  ;;  %v768_v35 = vld [vmem:[%s4673_s15 + $0x98] sm:$0xff] }
 0x1e1   : > { %v772_v36 = vld [vmem:[%s4673_s15 + $0xb8] sm:$0xff]  ;;  %v3593_v39 = vcombine.high %v767_v33, %v771_v34 }
 0x1e2   : > { %v3595_v40 = vcombine.high %v768_v35, %v772_v36  ;;  %v3594_v50 = vcombine.low %v768_v35, %v772_v36  ;;  %v824_v35 = vld [vmem:[%s4673_s15 + $0x258] sm:$0xff] }
 0x1e3   : > { %2391 = vmatpush1.bf16.msra.mxu0 %v3788_v42  ;;  %2473 = vmatpush1.bf16.msra.mxu1 %v3790_v43  ;;  %v779_v42 = vld [vmem:[%s4673_s15 + $0xf0] sm:$0xff]  ;;  %v776_v43 = vld [vmem:[%s4673_s15 + $0xd8] sm:$0xff] }
 0x1e4   : > { %2392 = vmatprep.subr.bf16.mxu0 %v3797_v48  ;;  %2474 = vmatprep.subr.bf16.mxu1 %v3799_v49  ;;  %v780_v48 = vld [vmem:[%s4673_s15 + $0xf8] sm:$0xff]  ;;  %v3592_v49 = vcombine.low %v767_v33, %v771_v34  ;;  %v823_v33 = vld [vmem:[%s4673_s15 + $0x250] sm:$0xff] }
 0x1e5   : > { %v3603_v51 = vcombine.high %v776_v43, %v780_v48  ;;  %v827_v34 = vld [vmem:[%s4673_s15 + $0x270] sm:$0xff]  ;;  %v828_v36 = vld [vmem:[%s4673_s15 + $0x278] sm:$0xff] }
 0x1e7   : > { %2393 = vmatpush1.bf16.msra.mxu0 %v3796_v54  ;;  %2475 = vmatpush1.bf16.msra.mxu1 %v3798_v55  ;;  %v788_v54 = vld [vmem:[%s4673_s15 + $0x138] sm:$0xff]  ;;  %v3600_v55 = vcombine.low %v775_v41, %v779_v42 }
 0x1e8   : > { %2394 = vmatprep.subr.bf16.mxu0 %v3805_v57  ;;  %2476 = vmatprep.subr.bf16.mxu1 %v3807_v59  ;;  %v3602_v57 = vcombine.low %v776_v43, %v780_v48  ;;  %v3609_v59 = vcombine.high %v783_v46, %v787_v52  ;;  %v3611_v60 = vcombine.high %v784_v53, %v788_v54  ;;  %v832_v43 = vld [vmem:[%s4673_s15 + $0x298] sm:$0xff] }
 0x1e9   : > { %v836_v48 = vld [vmem:[%s4673_s15 + $0x2b8] sm:$0xff] }
 0x1eb   : > { %2395 = vmatpush1.bf16.msra.mxu0 %v3804_v63  ;;  %2477 = vmatpush1.bf16.msra.mxu1 %v3806_v0  ;;  %v796_v63 = vld [vmem:[%s4673_s15 + $0x178] sm:$0xff]  ;;  %v3608_v0 = vcombine.low %v783_v46, %v787_v52  ;;  %v839_v46 = vld [vmem:[%s4673_s15 + $0x2d0] sm:$0xff] }
 0x1ec   : > { %2396 = vmatprep.subr.bf16.mxu0 %v3813_v1  ;;  %2478 = vmatprep.subr.bf16.mxu1 %v3815_v2  ;;  %v3610_v1 = vcombine.low %v784_v53, %v788_v54  ;;  %v3617_v2 = vcombine.high %v791_v61, %v795_v58  ;;  %v3619_v3 = vcombine.high %v792_v62, %v796_v63  ;;  %v843_v52 = vld [vmem:[%s4673_s15 + $0x2f0] sm:$0xff]  ;;  %v840_v53 = vld [vmem:[%s4673_s15 + $0x2d8] sm:$0xff] }
 0x1ed   : > { %v844_v54 = vld [vmem:[%s4673_s15 + $0x2f8] sm:$0xff] }
 0x1ef   : > { %2397 = vmatpush1.bf16.msra.mxu0 %v3812_v9  ;;  %2479 = vmatpush1.bf16.msra.mxu1 %v3814_v10  ;;  %v804_v9 = vld [vmem:[%s4673_s15 + $0x1b8] sm:$0xff]  ;;  %v3616_v10 = vcombine.low %v791_v61, %v795_v58  ;;  %v847_v61 = vld [vmem:[%s4673_s15 + $0x310] sm:$0xff] }
 0x1f0   : > { %2398 = vmatprep.subr.bf16.mxu0 %v3821_v11  ;;  %2480 = vmatprep.subr.bf16.mxu1 %v3823_v12  ;;  %v3618_v11 = vcombine.low %v792_v62, %v796_v63  ;;  %v3625_v12 = vcombine.high %v799_v4, %v803_v7  ;;  %v3627_v13 = vcombine.high %v800_v8, %v804_v9  ;;  %v851_v58 = vld [vmem:[%s4673_s15 + $0x330] sm:$0xff]  ;;  %v848_v62 = vld [vmem:[%s4673_s15 + $0x318] sm:$0xff] }
 0x1f1   : > { %v852_v63 = vld [vmem:[%s4673_s15 + $0x338] sm:$0xff] }
 0x1f3   : > { %2399 = vmatpush1.bf16.msra.mxu0 %v3820_v18  ;;  %2481 = vmatpush1.bf16.msra.mxu1 %v3822_v19  ;;  %v3624_v18 = vcombine.low %v799_v4, %v803_v7  ;;  %v3626_v19 = vcombine.low %v800_v8, %v804_v9  ;;  %v855_v4 = vld [vmem:[%s4673_s15 + $0x350] sm:$0xff]  ;;  %v856_v8 = vld [vmem:[%s4673_s15 + $0x358] sm:$0xff] }
 0x1f4   : > { %2491 = vmatprep.subr.bf16.mxu0 %v3577_v20  ;;  %2573 = vmatprep.subr.bf16.mxu1 %v3579_v21  ;;  %v3633_v20 = vcombine.high %v807_v14, %v811_v15  ;;  %v3635_v21 = vcombine.high %v808_v16, %v812_v17  ;;  %v859_v7 = vld [vmem:[%s4673_s15 + $0x370] sm:$0xff]  ;;  %v860_v9 = vld [vmem:[%s4673_s15 + $0x378] sm:$0xff] }
 0x1f6   : > { %2401 = vmatmul.mubr.bf16.vlgmr.msra.gmra.mrb[4].mxu0 %v4903_v23  ;;  %2483 = vmatmul.mubr.bf16.vlgmr.msra.gmra.mrb[4].mxu1 %v4903_v23 }
 0x1f7   : > { %2492 = vmatpush1.bf16.msra.mxu0 %v3576_v28  ;;  %2523 = vmatprep.mubr.bf16.mxu0 %v4825_v5  ;;  %v3632_v28 = vcombine.low %v807_v14, %v811_v15  ;;  %v863_v14 = vld [vmem:[%s4673_s15 + $0x390] sm:$0xff] }
 0x1f8   : > { %2574 = vmatpush1.bf16.msra.mxu1 %v3578_v30  ;;  %2605 = vmatprep.mubr.bf16.mxu1 %v4825_v5  ;;  %v3601_v5 = vcombine.high %v775_v41, %v779_v42  ;;  %v3634_v30 = vcombine.low %v808_v16, %v812_v17  ;;  %v831_v41 = vld [vmem:[%s4673_s15 + $0x290] sm:$0xff]  ;;  %v864_v16 = vld [vmem:[%s4673_s15 + $0x398] sm:$0xff] }
 0x1f9   : > { %2493 = vmatprep.subr.bf16.mxu0 %v3585_v31  ;;  %2575 = vmatprep.subr.bf16.mxu1 %v3587_v32  ;;  %v3641_v31 = vcombine.high %v815_v22, %v819_v24  ;;  %v3643_v32 = vcombine.high %v816_v25, %v820_v26  ;;  %v835_v42 = vld [vmem:[%s4673_s15 + $0x2b0] sm:$0xff]  ;;  %v868_v17 = vld [vmem:[%s4673_s15 + $0x3b8] sm:$0xff] }
 0x1fa   : > { %v867_v15 = vld [vmem:[%s4673_s15 + $0x3b0] sm:$0xff] }
 0x1fb   : > { %2494 = vmatpush1.bf16.msra.mxu0 %v3584_v37  ;;  %v3640_v37 = vcombine.low %v815_v22, %v819_v24  ;;  %v871_v22 = vld [vmem:[%s4673_s15 + $0x3d0] sm:$0xff] }
 0x1fc   : > { %2576 = vmatpush1.bf16.msra.mxu1 %v3586_v38  ;;  %2495 = vmatprep.subr.bf16.mxu0 %v3593_v39  ;;  %v3642_v38 = vcombine.low %v816_v25, %v820_v26  ;;  %v3649_v39 = vcombine.high %v823_v33, %v827_v34  ;;  %v875_v24 = vld [vmem:[%s4673_s15 + $0x3f0] sm:$0xff]  ;;  %v872_v25 = vld [vmem:[%s4673_s15 + $0x3d8] sm:$0xff] }
 0x1fd   : > { %2577 = vmatprep.subr.bf16.mxu1 %v3595_v40  ;;  %v3651_v40 = vcombine.high %v824_v35, %v828_v36  ;;  %v876_v26 = vld [vmem:[%s4673_s15 + $0x3f8] sm:$0xff] }
 0x1ff   : > { %2496 = vmatpush1.bf16.msra.mxu0 %v3592_v49  ;;  %v3648_v49 = vcombine.low %v823_v33, %v827_v34  ;;  %v879_v33 = vld [vmem:[%s4673_s15 + $0x410] sm:$0xff] }
 0x200   : > { %2578 = vmatpush1.bf16.msra.mxu1 %v3594_v50  ;;  %2497 = vmatprep.subr.bf16.mxu0 %v3601_v5  ;;  %v3650_v50 = vcombine.low %v824_v35, %v828_v36  ;;  %v3657_v5 = vcombine.high %v831_v41, %v835_v42  ;;  %v883_v34 = vld [vmem:[%s4673_s15 + $0x430] sm:$0xff]  ;;  %v880_v35 = vld [vmem:[%s4673_s15 + $0x418] sm:$0xff] }
 0x201   : > { %2579 = vmatprep.subr.bf16.mxu1 %v3603_v51  ;;  %v3659_v51 = vcombine.high %v832_v43, %v836_v48  ;;  %v884_v36 = vld [vmem:[%s4673_s15 + $0x438] sm:$0xff] }
 0x203   : > { %2498 = vmatpush1.bf16.msra.mxu0 %v3600_v55  ;;  %v3656_v55 = vcombine.low %v831_v41, %v835_v42  ;;  %v887_v41 = vld [vmem:[%s4673_s15 + $0x450] sm:$0xff] }
 0x204   : > { %2580 = vmatpush1.bf16.msra.mxu1 %v3602_v57  ;;  %2499 = vmatprep.subr.bf16.mxu0 %v3609_v59  ;;  %v3658_v57 = vcombine.low %v832_v43, %v836_v48  ;;  %v3665_v59 = vcombine.high %v839_v46, %v843_v52  ;;  %v891_v42 = vld [vmem:[%s4673_s15 + $0x470] sm:$0xff]  ;;  %v3704_v43 = vcombine.low %v879_v33, %v883_v34  ;;  %v888_v48 = vld [vmem:[%s4673_s15 + $0x458] sm:$0xff] }
 0x205   : > { %2581 = vmatprep.subr.bf16.mxu1 %v3611_v60  ;;  %v3667_v60 = vcombine.high %v840_v53, %v844_v54 }
 0x207   : > { %2500 = vmatpush1.bf16.msra.mxu0 %v3608_v0  ;;  %v3664_v0 = vcombine.low %v839_v46, %v843_v52  ;;  %v899_v46 = vld [vmem:[%s4673_s15 + $0x4b0] sm:$0xff] }
 0x208   : > { %2582 = vmatpush1.bf16.msra.mxu1 %v3610_v1  ;;  %2501 = vmatprep.subr.bf16.mxu0 %v3617_v2  ;;  %v3666_v1 = vcombine.low %v840_v53, %v844_v54  ;;  %v3673_v2 = vcombine.high %v847_v61, %v851_v58  ;;  %v896_v53 = vld [vmem:[%s4673_s15 + $0x498] sm:$0xff] }
 0x209   : > { %2583 = vmatprep.subr.bf16.mxu1 %v3619_v3  ;;  %v3675_v3 = vcombine.high %v848_v62, %v852_v63  ;;  %v900_v54 = vld [vmem:[%s4673_s15 + $0x4b8] sm:$0xff] }
 0x20b   : > { %2502 = vmatpush1.bf16.msra.mxu0 %v3616_v10  ;;  %v3672_v10 = vcombine.low %v847_v61, %v851_v58  ;;  %v903_v61 = vld [vmem:[%s4673_s15 + $0x4d0] sm:$0xff] }
 0x20c   : > { %2584 = vmatpush1.bf16.msra.mxu1 %v3618_v11  ;;  %2503 = vmatprep.subr.bf16.mxu0 %v3625_v12  ;;  %v3674_v11 = vcombine.low %v848_v62, %v852_v63  ;;  %v3681_v12 = vcombine.high %v855_v4, %v859_v7  ;;  %v907_v58 = vld [vmem:[%s4673_s15 + $0x4f0] sm:$0xff]  ;;  %v904_v62 = vld [vmem:[%s4673_s15 + $0x4d8] sm:$0xff] }
 0x20d   : > { %2585 = vmatprep.subr.bf16.mxu1 %v3627_v13  ;;  %v3683_v13 = vcombine.high %v856_v8, %v860_v9 }
 0x20f   : > { %2504 = vmatpush1.bf16.msra.mxu0 %v3624_v18  ;;  %v3680_v18 = vcombine.low %v855_v4, %v859_v7  ;;  %v912_v4 = vld [vmem:[%s4673_s15 + $0x518] sm:$0xff] }
 0x210   : > { %2586 = vmatpush1.bf16.msra.mxu1 %v3626_v19  ;;  %2505 = vmatprep.subr.bf16.mxu0 %v3633_v20  ;;  %v3682_v19 = vcombine.low %v856_v8, %v860_v9  ;;  %v3689_v20 = vcombine.high %v863_v14, %v867_v15  ;;  %v916_v7 = vld [vmem:[%s4673_s15 + $0x538] sm:$0xff]  ;;  %v3728_v8 = vcombine.low %v903_v61, %v907_v58 }
 0x211   : > { %2587 = vmatprep.subr.bf16.mxu1 %v3635_v21  ;;  %v3691_v21 = vcombine.high %v864_v16, %v868_v17 }
 0x213   : > { %2506 = vmatpush1.bf16.msra.mxu0 %v3632_v28  ;;  %v3688_v28 = vcombine.low %v863_v14, %v867_v15  ;;  %v920_v14 = vld [vmem:[%s4673_s15 + $0x558] sm:$0xff] }
 0x214   : > { %2588 = vmatpush1.bf16.msra.mxu1 %v3634_v30  ;;  %2507 = vmatprep.subr.bf16.mxu0 %v3641_v31  ;;  %v3690_v30 = vcombine.low %v864_v16, %v868_v17  ;;  %v3697_v31 = vcombine.high %v871_v22, %v875_v24  ;;  %v924_v15 = vld [vmem:[%s4673_s15 + $0x578] sm:$0xff]  ;;  %v3738_v17 = vcombine.low %v912_v4, %v916_v7 }
 0x215   : > { %2589 = vmatprep.subr.bf16.mxu1 %v3643_v32  ;;  %v3699_v32 = vcombine.high %v872_v25, %v876_v26 }
 0x217   : > { %2508 = vmatpush1.bf16.msra.mxu0 %v3640_v37  ;;  %v3696_v37 = vcombine.low %v871_v22, %v875_v24  ;;  %v928_v22 = vld [vmem:[%s4673_s15 + $0x598] sm:$0xff] }
 0x218   : > { %2590 = vmatpush1.bf16.msra.mxu1 %v3642_v38  ;;  %2509 = vmatprep.subr.bf16.mxu0 %v3649_v39  ;;  %v3698_v38 = vcombine.low %v872_v25, %v876_v26  ;;  %v3705_v39 = vcombine.high %v879_v33, %v883_v34  ;;  %v932_v24 = vld [vmem:[%s4673_s15 + $0x5b8] sm:$0xff]  ;;  %v3746_v26 = vcombine.low %v920_v14, %v924_v15 }
 0x219   : > { %2591 = vmatprep.subr.bf16.mxu1 %v3651_v40  ;;  %v3707_v40 = vcombine.high %v880_v35, %v884_v36  ;;  %v936_v33 = vld [vmem:[%s4673_s15 + $0x5d8] sm:$0xff] }
 0x21a   : > { %v940_v34 = vld [vmem:[%s4673_s15 + $0x5f8] sm:$0xff] }
 0x21b   : > { %2510 = vmatpush1.bf16.msra.mxu0 %v3648_v49  ;;  %v892_v49 = vld [vmem:[%s4673_s15 + $0x478] sm:$0xff] }
 0x21c   : > { %2592 = vmatpush1.bf16.msra.mxu1 %v3650_v50  ;;  %2511 = vmatprep.subr.bf16.mxu0 %v3657_v5  ;;  %v3706_v50 = vcombine.low %v880_v35, %v884_v36  ;;  %v3713_v5 = vcombine.high %v887_v41, %v891_v42  ;;  %v3715_v52 = vcombine.high %v888_v48, %v892_v49 }
 0x21d   : > { %2593 = vmatprep.subr.bf16.mxu1 %v3659_v51  ;;  %v895_v51 = vld [vmem:[%s4673_s15 + $0x490] sm:$0xff]  ;;  %v3754_v36 = vcombine.low %v928_v22, %v932_v24 }
 0x21e   : > { %v3720_v63 = vcombine.low %v895_v51, %v899_v46 }
 0x21f   : > { %2512 = vmatpush1.bf16.msra.mxu0 %v3656_v55  ;;  %v3712_v55 = vcombine.low %v887_v41, %v891_v42  ;;  %v944_v41 = vld [vmem:[%s4673_s15 + $0x618] sm:$0xff] }
 0x220   : > { %2594 = vmatpush1.bf16.msra.mxu1 %v3658_v57  ;;  %2513 = vmatprep.subr.bf16.mxu0 %v3665_v59  ;;  %v3714_v57 = vcombine.low %v888_v48, %v892_v49  ;;  %v3721_v59 = vcombine.high %v895_v51, %v899_v46  ;;  %v948_v42 = vld [vmem:[%s4673_s15 + $0x638] sm:$0xff]  ;;  %v3762_v48 = vcombine.low %v936_v33, %v940_v34  ;;  %v955_v51 = vld [vmem:[%s4673_s15 + $0x670] sm:$0xff] }
 0x221   : > { %2595 = vmatprep.subr.bf16.mxu1 %v3667_v60  ;;  %v3723_v60 = vcombine.high %v896_v53, %v900_v54  ;;  %v952_v46 = vld [vmem:[%s4673_s15 + $0x658] sm:$0xff] }
 0x223   : > { %2514 = vmatpush1.bf16.msra.mxu0 %v3664_v0  ;;  %v3722_v0 = vcombine.low %v896_v53, %v900_v54  ;;  %v3770_v54 = vcombine.low %v944_v41, %v948_v42 }
 0x224   : > { %2596 = vmatpush1.bf16.msra.mxu1 %v3666_v1  ;;  %2515 = vmatprep.subr.bf16.mxu0 %v3673_v2  ;;  %v3729_v1 = vcombine.high %v903_v61, %v907_v58  ;;  %v911_v2 = vld [vmem:[%s4673_s15 + $0x510] sm:$0xff]  ;;  %v960_v61 = vld [vmem:[%s4673_s15 + $0x698] sm:$0xff] }
 0x225   : > { %2597 = vmatprep.subr.bf16.mxu1 %v3675_v3  ;;  %v915_v3 = vld [vmem:[%s4673_s15 + $0x530] sm:$0xff]  ;;  %v964_v58 = vld [vmem:[%s4673_s15 + $0x6b8] sm:$0xff] }
 0x226   : > { %v3736_v16 = vcombine.low %v911_v2, %v915_v3 }
 0x227   : > { %2516 = vmatpush1.bf16.msra.mxu0 %v3672_v10  ;;  %v3737_v10 = vcombine.high %v911_v2, %v915_v3  ;;  %v968_v2 = vld [vmem:[%s4673_s15 + $0x6d8] sm:$0xff] }
 0x228   : > { %2598 = vmatpush1.bf16.msra.mxu1 %v3674_v11  ;;  %2517 = vmatprep.subr.bf16.mxu0 %v3681_v12  ;;  %v3739_v11 = vcombine.high %v912_v4, %v916_v7  ;;  %v919_v12 = vld [vmem:[%s4673_s15 + $0x550] sm:$0xff]  ;;  %v972_v3 = vld [vmem:[%s4673_s15 + $0x6f8] sm:$0xff]  ;;  %v3786_v7 = vcombine.low %v960_v61, %v964_v58 }
 0x229   : > { %2599 = vmatprep.subr.bf16.mxu1 %v3683_v13  ;;  %v923_v13 = vld [vmem:[%s4673_s15 + $0x570] sm:$0xff] }
 0x22a   : > { %v3744_v25 = vcombine.low %v919_v12, %v923_v13 }
 0x22b   : > { %2518 = vmatpush1.bf16.msra.mxu0 %v3680_v18  ;;  %v3745_v18 = vcombine.high %v919_v12, %v923_v13  ;;  %v976_v12 = vld [vmem:[%s4673_s15 + $0x718] sm:$0xff] }
 0x22c   : > { %2600 = vmatpush1.bf16.msra.mxu1 %v3682_v19  ;;  %2519 = vmatprep.subr.bf16.mxu0 %v3689_v20  ;;  %v3747_v19 = vcombine.high %v920_v14, %v924_v15  ;;  %v927_v20 = vld [vmem:[%s4673_s15 + $0x590] sm:$0xff]  ;;  %v980_v13 = vld [vmem:[%s4673_s15 + $0x738] sm:$0xff]  ;;  %v3794_v15 = vcombine.low %v968_v2, %v972_v3 }
 0x22d   : > { %2601 = vmatprep.subr.bf16.mxu1 %v3691_v21  ;;  %v931_v21 = vld [vmem:[%s4673_s15 + $0x5b0] sm:$0xff] }
 0x22e   : > { %v3752_v35 = vcombine.low %v927_v20, %v931_v21 }
 0x22f   : > { %2520 = vmatpush1.bf16.msra.mxu0 %v3688_v28  ;;  %v3753_v28 = vcombine.high %v927_v20, %v931_v21  ;;  %v984_v20 = vld [vmem:[%s4673_s15 + $0x758] sm:$0xff] }
 0x230   : > { %2602 = vmatpush1.bf16.msra.mxu1 %v3690_v30  ;;  %2521 = vmatprep.subr.bf16.mxu0 %v3697_v31  ;;  %v3755_v30 = vcombine.high %v928_v22, %v932_v24  ;;  %v935_v31 = vld [vmem:[%s4673_s15 + $0x5d0] sm:$0xff]  ;;  %v988_v21 = vld [vmem:[%s4673_s15 + $0x778] sm:$0xff]  ;;  %v3802_v24 = vcombine.low %v976_v12, %v980_v13 }
 0x231   : > { %2603 = vmatprep.subr.bf16.mxu1 %v3699_v32  ;;  %v939_v32 = vld [vmem:[%s4673_s15 + $0x5f0] sm:$0xff] }
 0x233   : > { %2522 = vmatpush1.bf16.msra.mxu0 %v3696_v37  ;;  %v3761_v37 = vcombine.high %v935_v31, %v939_v32 }
 0x234   : > { %2604 = vmatpush1.bf16.msra.mxu1 %v3698_v38  ;;  %2532 = vmatprep.subr.bf16.mxu0 %v3705_v39  ;;  %v3763_v38 = vcombine.high %v936_v33, %v940_v34  ;;  %v943_v39 = vld [vmem:[%s4673_s15 + $0x610] sm:$0xff]  ;;  %v3810_v34 = vcombine.low %v984_v20, %v988_v21 }
 0x235   : > { %2614 = vmatprep.subr.bf16.mxu1 %v3707_v40  ;;  %v947_v40 = vld [vmem:[%s4673_s15 + $0x630] sm:$0xff] }
 0x236   : > { %2524 = vmatmul.mubr.bf16.vlgmr.msra.gmra.mrb[8].mxu0 %v4827_v6  ;;  %v3769_v49 = vcombine.high %v943_v39, %v947_v40  ;;  %v3768_v53 = vcombine.low %v943_v39, %v947_v40  ;;  %v1000_v39 = vld [vmem:[%s4673_s15 + $0x7d8] sm:$0xff] }
 0x237   : > { %2606 = vmatmul.mubr.bf16.vlgmr.msra.gmra.mrb[8].mxu1 %v4827_v6  ;;  %2533 = vmatpush1.bf16.msra.mxu0 %v3704_v43  ;;  %v908_v6 = vld [vmem:[%s4673_s15 + $0x4f8] sm:$0xff]  ;;  %v3760_v43 = vcombine.low %v935_v31, %v939_v32 }
 0x238   : > { %2564 = vmatprep.mubr.bf16.mxu0 %v4842_v27  ;;  %2615 = vmatpush1.bf16.msra.mxu1 %v3706_v50  ;;  %v3730_v9 = vcombine.low %v904_v62, %v908_v6  ;;  %v3771_v50 = vcombine.high %v944_v41, %v948_v42  ;;  %v992_v31 = vld [vmem:[%s4673_s15 + $0x798] sm:$0xff] }
 0x239   : > { %2646 = vmatprep.mubr.bf16.mxu1 %v4842_v27  ;;  %2534 = vmatprep.subr.bf16.mxu0 %v3713_v5  ;;  %v3731_v27 = vcombine.high %v904_v62, %v908_v6  ;;  %v951_v5 = vld [vmem:[%s4673_s15 + $0x650] sm:$0xff]  ;;  %v996_v32 = vld [vmem:[%s4673_s15 + $0x7b8] sm:$0xff] }
 0x23a   : > { %2616 = vmatprep.subr.bf16.mxu1 %v3715_v52  ;;  %v956_v52 = vld [vmem:[%s4673_s15 + $0x678] sm:$0xff]  ;;  %v3776_v62 = vcombine.low %v951_v5, %v955_v51  ;;  %v3818_v42 = vcombine.low %v992_v31, %v996_v32 }
 0x23b   : > { %2535 = vmatpush1.bf16.msra.mxu0 %v3712_v55  ;;  %v3777_v55 = vcombine.high %v951_v5, %v955_v51  ;;  %v3778_v6 = vcombine.low %v952_v46, %v956_v52  ;;  %v1004_v40 = vld [vmem:[%s4673_s15 + $0x7f8] sm:$0xff]  ;;  %v4116_v5 = vld [vmem:[%s4683_s24 + $0x40] sm:$0xff]  }
 0x23c   : > { %2617 = vmatpush1.bf16.msra.mxu1 %v3714_v57  ;;  %2536 = vmatprep.subr.bf16.mxu0 %v3721_v59  ;;  %v3779_v57 = vcombine.high %v952_v46, %v956_v52  ;;  %v959_v59 = vld [vmem:[%s4673_s15 + $0x690] sm:$0xff] }
 0x23d   : > { %2618 = vmatprep.subr.bf16.mxu1 %v3723_v60  ;;  %v963_v60 = vld [vmem:[%s4673_s15 + $0x6b0] sm:$0xff] }
 0x23e   : > { %v3784_v4 = vcombine.low %v959_v59, %v963_v60  ;;  %v4117_v51 = vld [vmem:[%s4683_s24 + $0xc0] sm:$0xff]  }
 0x23f   : > { %2537 = vmatpush1.bf16.msra.mxu0 %v3720_v63  ;;  %v3785_v63 = vcombine.high %v959_v59, %v963_v60  ;;  %v4118_v46 = vld [vmem:[%s4683_s24] sm:$0xff]   ;;  %v4124_v59 = vld [vmem:[%s4683_s24 + $0x50] sm:$0xff]  }
 0x240   : > { %2619 = vmatpush1.bf16.msra.mxu1 %v3722_v0  ;;  %2538 = vmatprep.subr.bf16.mxu0 %v3729_v1  ;;  %v3787_v0 = vcombine.high %v960_v61, %v964_v58  ;;  %v967_v1 = vld [vmem:[%s4673_s15 + $0x6d0] sm:$0xff]  ;;  %v4125_v60 = vld [vmem:[%s4683_s24 + $0xd0] sm:$0xff]  }
 0x241   : > { %2620 = vmatprep.subr.bf16.mxu1 %v3731_v27  ;;  %v971_v27 = vld [vmem:[%s4673_s15 + $0x6f0] sm:$0xff]  ;;  %v4126_v61 = vld [vmem:[%s4683_s24 + $0x10] sm:$0xff]  }
 0x242   : > { %v3792_v14 = vcombine.low %v967_v1, %v971_v27  ;;  %v4119_v52 = vld [vmem:[%s4683_s24 + $0x80] sm:$0xff]   ;;  %v4127_v58 = vld [vmem:[%s4683_s24 + $0x90] sm:$0xff]  }
 0x243   : > { %2539 = vmatpush1.bf16.msra.mxu0 %v3728_v8  ;;  %v3793_v8 = vcombine.high %v967_v1, %v971_v27  ;;  %v4133_v1 = vld [vmem:[%s4683_s24 + $0xe0] sm:$0xff]  }
 0x244   : > { %2621 = vmatpush1.bf16.msra.mxu1 %v3730_v9  ;;  %2540 = vmatprep.subr.bf16.mxu0 %v3737_v10  ;;  %v3795_v9 = vcombine.high %v968_v2, %v972_v3  ;;  %v975_v10 = vld [vmem:[%s4673_s15 + $0x710] sm:$0xff]  ;;  %v4136_v3 = vld [vmem:[%s4683_s24 + $0x68] sm:$0xff]  }
 0x245   : > { %2622 = vmatprep.subr.bf16.mxu1 %v3739_v11  ;;  %v979_v11 = vld [vmem:[%s4673_s15 + $0x730] sm:$0xff] }
 0x246   : > { %v3800_v22 = vcombine.low %v975_v10, %v979_v11  ;;  %v4134_v27 = vld [vmem:[%s4683_s24 + $0x20] sm:$0xff]  }
 0x247   : > { %2541 = vmatpush1.bf16.msra.mxu0 %v3736_v16  ;;  %v3801_v16 = vcombine.high %v975_v10, %v979_v11  ;;  %v4135_v2 = vld [vmem:[%s4683_s24 + $0xa0] sm:$0xff]   ;;  %v4141_v10 = vld [vmem:[%s4683_s24 + $0xf0] sm:$0xff]  }
 0x248   : > { %2623 = vmatpush1.bf16.msra.mxu1 %v3738_v17  ;;  %2542 = vmatprep.subr.bf16.mxu0 %v3745_v18  ;;  %v3803_v17 = vcombine.high %v976_v12, %v980_v13  ;;  %v983_v18 = vld [vmem:[%s4673_s15 + $0x750] sm:$0xff]  ;;  %v4142_v11 = vld [vmem:[%s4683_s24 + $0x30] sm:$0xff]   ;;  %v4144_v13 = vld [vmem:[%s4683_s24 + $0x78] sm:$0xff]  }
 0x249   : > { %2624 = vmatprep.subr.bf16.mxu1 %v3747_v19  ;;  %v987_v19 = vld [vmem:[%s4673_s15 + $0x770] sm:$0xff]  ;;  %v4143_v12 = vld [vmem:[%s4683_s24 + $0xb0] sm:$0xff]  }
 0x24a   : > { %v3808_v33 = vcombine.low %v983_v18, %v987_v19 }
 0x24b   : > { %2543 = vmatpush1.bf16.msra.mxu0 %v3744_v25  ;;  %v3809_v25 = vcombine.high %v983_v18, %v987_v19  ;;  %v4149_v18 = vld [vmem:[%s4683_s24 + $0x1c0] sm:$0xff]   ;;  %v5073_v19 = vld [vmem:[%s4681_s30] sm:$0xff] }
 0x24c   : > { %2625 = vmatpush1.bf16.msra.mxu1 %v3746_v26  ;;  %2544 = vmatprep.subr.bf16.mxu0 %v3753_v28  ;;  %v3811_v26 = vcombine.high %v984_v20, %v988_v21  ;;  %v991_v28 = vld [vmem:[%s4673_s15 + $0x790] sm:$0xff]  ;;  %v1010_v20 = vrot.slane %v5073_v19, %v494_v45  ;;  %v1018_v21 = vrot.slane %v5073_v19, %v502_v29 }
 0x24d   : > { %2626 = vmatprep.subr.bf16.mxu1 %v3755_v30  ;;  %v995_v30 = vld [vmem:[%s4673_s15 + $0x7b0] sm:$0xff] }
 0x24e   : > { %v3816_v41 = vcombine.low %v991_v28, %v995_v30 }
 0x24f   : > { %2545 = vmatpush1.bf16.msra.mxu0 %v3752_v35  ;;  %v3817_v35 = vcombine.high %v991_v28, %v995_v30 }
 0x250   : > { %2627 = vmatpush1.bf16.msra.mxu1 %v3754_v36  ;;  %2546 = vmatprep.subr.bf16.mxu0 %v3761_v37  ;;  %v3819_v36 = vcombine.high %v992_v31, %v996_v32  ;;  %v999_v37 = vld [vmem:[%s4673_s15 + $0x7d0] sm:$0xff] }
 0x251   : > { %2628 = vmatprep.subr.bf16.mxu1 %v3763_v38  ;;  %v1003_v38 = vld [vmem:[%s4673_s15 + $0x7f0] sm:$0xff] }
 0x253   : > { %2547 = vmatpush1.bf16.msra.mxu0 %v3760_v43  ;;  %v3825_v43 = vcombine.high %v999_v37, %v1003_v38 }
 0x254   : > { %2629 = vmatpush1.bf16.msra.mxu1 %v3762_v48  ;;  %2548 = vmatprep.subr.bf16.mxu0 %v3769_v49  ;;  %v3827_v48 = vcombine.high %v1000_v39, %v1004_v40  ;;  %v3824_v49 = vcombine.low %v999_v37, %v1003_v38 }
 0x255   : > { %2630 = vmatprep.subr.bf16.mxu1 %v3771_v50  ;;  %v3826_v50 = vcombine.low %v1000_v39, %v1004_v40  ;;  %v4150_v40 = vld [vmem:[%s4683_s24 + $0x100] sm:$0xff]  }
 0x257   : > { %2549 = vmatpush1.bf16.msra.mxu0 %v3768_v53  ;;  %v4120_v53 = vld [vmem:[%s4683_s24 + $0x48] sm:$0xff]  }
 0x258   : > { %2631 = vmatpush1.bf16.msra.mxu1 %v3770_v54  ;;  %2550 = vmatprep.subr.bf16.mxu0 %v3777_v55  ;;  %v4121_v54 = vld [vmem:[%s4683_s24 + $0xc8] sm:$0xff]  }
 0x259   : > { %2632 = vmatprep.subr.bf16.mxu1 %v3779_v57  ;;  %v4122_v55 = vld [vmem:[%s4683_s24 + $0x8] sm:$0xff]  }
 0x25a   : > { %v4123_v57 = vld [vmem:[%s4683_s24 + $0x88] sm:$0xff]  }
 0x25b   : > { %2551 = vmatpush1.bf16.msra.mxu0 %v3776_v62  ;;  %v4129_v62 = vld [vmem:[%s4683_s24 + $0xd8] sm:$0xff]  }
 0x25c   : > { %2633 = vmatpush1.bf16.msra.mxu1 %v3778_v6  ;;  %2552 = vmatprep.subr.bf16.mxu0 %v3785_v63  ;;  %v4130_v6 = vld [vmem:[%s4683_s24 + $0x18] sm:$0xff]  }
 0x25d   : > { %2634 = vmatprep.subr.bf16.mxu1 %v3787_v0  ;;  %v4131_v63 = vld [vmem:[%s4683_s24 + $0x98] sm:$0xff]   ;;  %v4132_v0 = vld [vmem:[%s4683_s24 + $0x60] sm:$0xff]  }
 0x25f   : > { %2553 = vmatpush1.bf16.msra.mxu0 %v3784_v4  ;;  %v4137_v4 = vld [vmem:[%s4683_s24 + $0xe8] sm:$0xff]  }
 0x260   : > { %2635 = vmatpush1.bf16.msra.mxu1 %v3786_v7  ;;  %2554 = vmatprep.subr.bf16.mxu0 %v3793_v8  ;;  %v4138_v7 = vld [vmem:[%s4683_s24 + $0x28] sm:$0xff]  }
 0x261   : > { %2636 = vmatprep.subr.bf16.mxu1 %v3795_v9  ;;  %v4139_v8 = vld [vmem:[%s4683_s24 + $0xa8] sm:$0xff]   ;;  %v4140_v9 = vld [vmem:[%s4683_s24 + $0x70] sm:$0xff]  }
 0x263   : > { %2555 = vmatpush1.bf16.msra.mxu0 %v3792_v14  ;;  %v4145_v14 = vld [vmem:[%s4683_s24 + $0xf8] sm:$0xff]  }
 0x264   : > { %2637 = vmatpush1.bf16.msra.mxu1 %v3794_v15  ;;  %2556 = vmatprep.subr.bf16.mxu0 %v3801_v16  ;;  %v4146_v15 = vld [vmem:[%s4683_s24 + $0x38] sm:$0xff]  }
 0x265   : > { %2638 = vmatprep.subr.bf16.mxu1 %v3803_v17  ;;  %v4147_v16 = vld [vmem:[%s4683_s24 + $0xb8] sm:$0xff]   ;;  %v4148_v17 = vld [vmem:[%s4683_s24 + $0x140] sm:$0xff]  }
 0x267   : > { %2557 = vmatpush1.bf16.msra.mxu0 %v3800_v22  ;;  %v1014_v22 = vrot.slane %v5073_v19, %v498_v47 }
 0x268   : > { %2639 = vmatpush1.bf16.msra.mxu1 %v3802_v24  ;;  %2558 = vmatprep.subr.bf16.mxu0 %v3809_v25  ;;  %v1022_v24 = vrot.slane %v5073_v19, %v506_v56 }
 0x269   : > { %2640 = vmatprep.subr.bf16.mxu1 %v3811_v26 }
 0x26b   : > { %2559 = vmatpush1.bf16.msra.mxu0 %v3808_v33 }
 0x26c   : > { %2641 = vmatpush1.bf16.msra.mxu1 %v3810_v34  ;;  %2560 = vmatprep.subr.bf16.mxu0 %v3817_v35 }
 0x26d   : > { %2642 = vmatprep.subr.bf16.mxu1 %v3819_v36 }
 0x26f   : > { %2561 = vmatpush1.bf16.msra.mxu0 %v3816_v41 }
 0x270   : > { %2643 = vmatpush1.bf16.msra.mxu1 %v3818_v42  ;;  %2562 = vmatprep.subr.bf16.mxu0 %v3825_v43  ;;  %v4151_v43 = vld [vmem:[%s4683_s24 + $0x180] sm:$0xff]  }
 0x271   : > { %2644 = vmatprep.subr.bf16.mxu1 %v3827_v48  ;;  %v4152_v48 = vld [vmem:[%s4683_s24 + $0x148] sm:$0xff]  }
 0x273   : > { %2563 = vmatpush1.bf16.msra.mxu0 %v3824_v49 }
 0x274   : > { %2645 = vmatpush1.bf16.msra.mxu1 %v3826_v50  ;;  %3899 = vmatprep.subr.bf16.mxu0 %v4116_v5  ;;  %v4153_v50 = vld [vmem:[%s4683_s24 + $0x1c8] sm:$0xff]  }
 0x275   : > { %3921 = vmatprep.subr.bf16.mxu1 %v4117_v51  ;;  %v4154_v5 = vld [vmem:[%s4683_s24 + $0x108] sm:$0xff]  }
 0x276   : > { %2565 = vmatmul.mubr.bf16.vlgmr.msra.gmra.mrb[8].mxu0 %v4903_v23  ;;  %v4155_v51 = vld [vmem:[%s4683_s24 + $0x188] sm:$0xff]  }
 0x277   : > { %2647 = vmatmul.mubr.bf16.vlgmr.msra.gmra.mrb[8].mxu1 %v4903_v23  ;;  %3900 = vmatpush3.bf16.msra.mxu0 %v4118_v46  ;;  %v4128_v23 = vld [vmem:[%s4683_s24 + $0x58] sm:$0xff]   ;;  %v4156_v46 = vld [vmem:[%s4683_s24 + $0x150] sm:$0xff]  }
 0x278   : > { %3922 = vmatpush3.bf16.msra.mxu1 %v4119_v52  ;;  %3901 = vmatprep.subr.bf16.mxu0 %v4120_v53  ;;  %v4157_v52 = vld [vmem:[%s4683_s24 + $0x1d0] sm:$0xff]  }
 0x279   : > { %3923 = vmatprep.subr.bf16.mxu1 %v4121_v54  ;;  %v4158_v53 = vld [vmem:[%s4683_s24 + $0x110] sm:$0xff]  }
 0x27a   : > { %v4159_v54 = vld [vmem:[%s4683_s24 + $0x190] sm:$0xff]  }
 0x27b   : > { %3902 = vmatpush3.bf16.msra.mxu0 %v4122_v55  ;;  %v4160_v55 = vld [vmem:[%s4683_s24 + $0x158] sm:$0xff]  }
 0x27c   : > { %3924 = vmatpush3.bf16.msra.mxu1 %v4123_v57  ;;  %3903 = vmatprep.subr.bf16.mxu0 %v4124_v59  ;;  %v4161_v57 = vld [vmem:[%s4683_s24 + $0x1d8] sm:$0xff]  }
 0x27d   : > { %3925 = vmatprep.subr.bf16.mxu1 %v4125_v60  ;;  %v4162_v59 = vld [vmem:[%s4683_s24 + $0x118] sm:$0xff]  }
 0x27e   : > { %v4163_v60 = vld [vmem:[%s4683_s24 + $0x198] sm:$0xff]  }
 0x27f   : > { %3904 = vmatpush3.bf16.msra.mxu0 %v4126_v61  ;;  %v4164_v61 = vld [vmem:[%s4683_s24 + $0x160] sm:$0xff]  }
 0x280   : > { %3926 = vmatpush3.bf16.msra.mxu1 %v4127_v58  ;;  %3905 = vmatprep.subr.bf16.mxu0 %v4128_v23  ;;  %v4165_v58 = vld [vmem:[%s4683_s24 + $0x1e0] sm:$0xff]  }
 0x281   : > { %3927 = vmatprep.subr.bf16.mxu1 %v4129_v62  ;;  %v4166_v23 = vld [vmem:[%s4683_s24 + $0x120] sm:$0xff]  }
 0x282   : > { %v4167_v62 = vld [vmem:[%s4683_s24 + $0x1a0] sm:$0xff]  }
 0x283   : > { %3906 = vmatpush3.bf16.msra.mxu0 %v4130_v6  ;;  %v4168_v6 = vld [vmem:[%s4683_s24 + $0x168] sm:$0xff]  }
 0x284   : > { %3928 = vmatpush3.bf16.msra.mxu1 %v4131_v63  ;;  %3907 = vmatprep.subr.bf16.mxu0 %v4132_v0  ;;  %v4169_v63 = vld [vmem:[%s4683_s24 + $0x1e8] sm:$0xff]  }
 0x285   : > { %3929 = vmatprep.subr.bf16.mxu1 %v4133_v1  ;;  %v4170_v0 = vld [vmem:[%s4683_s24 + $0x128] sm:$0xff]  }
 0x286   : > { %v4171_v1 = vld [vmem:[%s4683_s24 + $0x1a8] sm:$0xff]  }
 0x287   : > { %3908 = vmatpush3.bf16.msra.mxu0 %v4134_v27  ;;  %v4172_v27 = vld [vmem:[%s4683_s24 + $0x170] sm:$0xff]  }
 0x288   : > { %3930 = vmatpush3.bf16.msra.mxu1 %v4135_v2  ;;  %3909 = vmatprep.subr.bf16.mxu0 %v4136_v3  ;;  %v4173_v2 = vld [vmem:[%s4683_s24 + $0x1f0] sm:$0xff]  }
 0x289   : > { %3931 = vmatprep.subr.bf16.mxu1 %v4137_v4  ;;  %v4174_v3 = vld [vmem:[%s4683_s24 + $0x130] sm:$0xff]  }
 0x28a   : > { %v4175_v4 = vld [vmem:[%s4683_s24 + $0x1b0] sm:$0xff]  }
 0x28b   : > { %3910 = vmatpush3.bf16.msra.mxu0 %v4138_v7  ;;  %v4176_v7 = vld [vmem:[%s4683_s24 + $0x178] sm:$0xff]  }
 0x28c   : > { %3932 = vmatpush3.bf16.msra.mxu1 %v4139_v8  ;;  %3911 = vmatprep.subr.bf16.mxu0 %v4140_v9  ;;  %v4177_v8 = vld [vmem:[%s4683_s24 + $0x1f8] sm:$0xff]  }
 0x28d   : > { %3933 = vmatprep.subr.bf16.mxu1 %v4141_v10  ;;  %v4178_v9 = vld [vmem:[%s4683_s24 + $0x138] sm:$0xff]  }
 0x28e   : > { %v4179_v10 = vld [vmem:[%s4683_s24 + $0x1b8] sm:$0xff]  }
 0x28f   : > { %3912 = vmatpush3.bf16.msra.mxu0 %v4142_v11  ;;  %v1025_v11 = vsub.s32 4, %v4802_v44 }
 0x290   : > { %3934 = vmatpush3.bf16.msra.mxu1 %v4143_v12  ;;  %3913 = vmatprep.subr.bf16.mxu0 %v4144_v13  ;;  %v1033_v12 = vsub.s32 6, %v4802_v44  ;;  %v1029_v13 = vsub.s32 5, %v4802_v44 }
 0x291   : > { %3935 = vmatprep.subr.bf16.mxu1 %v4145_v14  ;;  %v1037_v14 = vsub.s32 7, %v4802_v44 }
 0x293   : > { %3914 = vmatpush3.bf16.msra.mxu0 %v4146_v15  ;;  %v1026_v15 = vrot.slane %v5073_v19, %v1025_v11 }
 0x294   : > { %3936 = vmatpush3.bf16.msra.mxu1 %v4147_v16  ;;  %3943 = vmatprep.subr.bf16.mxu0 %v4148_v17  ;;  %v1034_v16 = vrot.slane %v5073_v19, %v1033_v12  ;;  %v1030_v17 = vrot.slane %v5073_v19, %v1029_v13 }
 0x295   : > { %3965 = vmatprep.subr.bf16.mxu1 %v4149_v18  ;;  %v1038_v18 = vrot.slane %v5073_v19, %v1037_v14 }
 0x2c9   : > { %v2402_v25 = vpop.f32.mrb[4].mxu0  ;;  %v2484_v26 = vpop.f32.mrb[4].mxu1 }
 0x2ca   : > { %v3987_v28 = vadd.f32 %v2402_v25, %v1010_v20  ;;  %v3989_v30 = vadd.f32 %v2484_v26, %v1018_v21  ;;  %v2404_v31 = vpop.f32.mrb[5].mxu0  ;;  %v2486_v32 = vpop.f32.mrb[5].mxu1 }
 0x2cb   : > { %v3988_v45 = vadd.f32 %v2404_v31, %v1014_v22  ;;  %v3990_v33 = vadd.f32 %v2486_v32, %v1022_v24  ;;  %v2406_v34 = vpop.f32.mrb[6].mxu0  ;;  %v2488_v29 = vpop.f32.mrb[6].mxu1 }
 0x2cc   : > { %4188 = vtanh.f32 %v3987_v28  ;;  %v2407_v35 = vpop.f32.mrb[7].mxu0  ;;  %v2489_v47 = vpop.f32.mrb[7].mxu1 }
 0x2cd   : > { %4190 = vtanh.f32 %v3989_v30 }
 0x2ce   : > { %4192 = vtanh.f32 %v3988_v45 }
 0x2cf   : > { %4194 = vtanh.f32 %v3990_v33 }
 0x2d6   : > { %v4189_v56 = vpop.eup %4188 }
 0x2d7   : > { %v4191_v36 = vpop.eup %4190  ;;  %v2663_v41 = vpack.c.bf16 %v4189_v56, %v4189_v56 }
 0x2d8   : > { %v4193_v37 = vpop.eup %4192  ;;  %v2665_v49 = vpack.c.bf16 %v4191_v36, %v4191_v36 }
 0x2d9   : > { %v4195_v38 = vpop.eup %4194  ;;  %v2664_v39 = vpack.c.bf16 %v4193_v37, %v4193_v37 }
 0x2da   : > { %v2666_v42 = vpack.c.bf16 %v4195_v38, %v4195_v38 }
 0x2db   : > { %3222 = vmatprep.mubr.bf16.mxu0 %v2664_v39  ;;  %v3828_v39 = vld [vmem:[%s398_s11] ss:$0 sm:$0xff] }
 0x2dc   : > { %3262 = vmatprep.mubr.bf16.mxu1 %v2666_v42  ;;  %3223 = vmatmul.mubr.bf16.vlgmr.msra.gmra.mrb[12].mxu0 %v2663_v41 }
 0x2dd   : > { %3263 = vmatmul.mubr.bf16.vlgmr.msra.gmra.mrb[12].mxu1 %v2665_v49  ;;  %3944 = vmatpush3.bf16.msra.mxu0 %v4150_v40 }
 0x2de   : > { %3966 = vmatpush3.bf16.msra.mxu1 %v4151_v43  ;;  %3945 = vmatprep.subr.bf16.mxu0 %v4152_v48 }
 0x2df   : > { %3967 = vmatprep.subr.bf16.mxu1 %v4153_v50 }
 0x2e1   : > { %3946 = vmatpush3.bf16.msra.mxu0 %v4154_v5 }
 0x2e2   : > { %3968 = vmatpush3.bf16.msra.mxu1 %v4155_v51  ;;  %3947 = vmatprep.subr.bf16.mxu0 %v4156_v46 }
 0x2e3   : > { %3969 = vmatprep.subr.bf16.mxu1 %v4157_v52 }
 0x2e5   : > { %3948 = vmatpush3.bf16.msra.mxu0 %v4158_v53 }
 0x2e6   : > { %3970 = vmatpush3.bf16.msra.mxu1 %v4159_v54  ;;  %3949 = vmatprep.subr.bf16.mxu0 %v4160_v55 }
 0x2e7   : > { %3971 = vmatprep.subr.bf16.mxu1 %v4161_v57 }
 0x2e9   : > { %3950 = vmatpush3.bf16.msra.mxu0 %v4162_v59 }
 0x2ea   : > { %3972 = vmatpush3.bf16.msra.mxu1 %v4163_v60  ;;  %3951 = vmatprep.subr.bf16.mxu0 %v4164_v61 }
 0x2eb   : > { %3973 = vmatprep.subr.bf16.mxu1 %v4165_v58 }
 0x2ed   : > { %3952 = vmatpush3.bf16.msra.mxu0 %v4166_v23 }
 0x2ee   : > { %3974 = vmatpush3.bf16.msra.mxu1 %v4167_v62  ;;  %3953 = vmatprep.subr.bf16.mxu0 %v4168_v6 }
 0x2ef   : > { %3975 = vmatprep.subr.bf16.mxu1 %v4169_v63 }
 0x2f1   : > { %3954 = vmatpush3.bf16.msra.mxu0 %v4170_v0 }
 0x2f2   : > { %3976 = vmatpush3.bf16.msra.mxu1 %v4171_v1  ;;  %3955 = vmatprep.subr.bf16.mxu0 %v4172_v27 }
 0x2f3   : > { %3977 = vmatprep.subr.bf16.mxu1 %v4173_v2 }
 0x2f5   : > { %3956 = vmatpush3.bf16.msra.mxu0 %v4174_v3 }
 0x2f6   : > { %3978 = vmatpush3.bf16.msra.mxu1 %v4175_v4  ;;  %3957 = vmatprep.subr.bf16.mxu0 %v4176_v7 }
 0x2f7   : > { %3979 = vmatprep.subr.bf16.mxu1 %v4177_v8 }
 0x2f9   : > { %3958 = vmatpush3.bf16.msra.mxu0 %v4178_v9 }
 0x2fa   : > { %3980 = vmatpush3.bf16.msra.mxu1 %v4179_v10 }
 0x349   : > { %v2566_v20 = vpop.f32.mrb[8].mxu0 }
 0x34a   : > { %v3991_v21 = vadd.f32 %v2566_v20, %v1026_v15  ;;  %v2648_v22 = vpop.f32.mrb[8].mxu1  ;;  %v2568_v24 = vpop.f32.mrb[9].mxu0 }
 0x34b   : > { %v3993_v25 = vadd.f32 %v2648_v22, %v1034_v16  ;;  %v3992_v26 = vadd.f32 %v2568_v24, %v1030_v17  ;;  %v2650_v28 = vpop.f32.mrb[9].mxu1  ;;  %v2570_v30 = vpop.f32.mrb[10].mxu0 }
 0x34c   : > { %4196 = vtanh.f32 %v3991_v21  ;;  %v3994_v31 = vadd.f32 %v2650_v28, %v1038_v18  ;;  %v2652_v32 = vpop.f32.mrb[10].mxu1  ;;  %v2571_v44 = vpop.f32.mrb[11].mxu0 }
 0x34d   : > { %4198 = vtanh.f32 %v3993_v25  ;;  %v2653_v45 = vpop.f32.mrb[11].mxu1 }
 0x34e   : > { %4200 = vtanh.f32 %v3992_v26 }
 0x34f   : > { %4202 = vtanh.f32 %v3994_v31 }
 0x356   : > { %v4197_v33 = vpop.eup %4196 }
 0x357   : > { %v4199_v34 = vpop.eup %4198  ;;  %v2667_v47 = vpack.c.bf16 %v4197_v33, %v4197_v33 }
 0x358   : > { %v4201_v19 = vpop.eup %4200  ;;  %v2669_v36 = vpack.c.bf16 %v4199_v34, %v4199_v34 }
 0x359   : > { %v4203_v29 = vpop.eup %4202  ;;  %v2668_v35 = vpack.c.bf16 %v4201_v19, %v4201_v19 }
 0x35a   : > { %v2670_v56 = vpack.c.bf16 %v4203_v29, %v4203_v29 }
 0x35b   : > { %3302 = vmatprep.mubr.bf16.mxu0 %v2668_v35 }
 0x35c   : > { %3342 = vmatprep.mubr.bf16.mxu1 %v2670_v56  ;;  %3303 = vmatmul.mubr.bf16.vlgmr.msra.gmra.mrb[16].mxu0 %v2667_v47 }
 0x35d   : > { %3343 = vmatmul.mubr.bf16.vlgmr.msra.gmra.mrb[16].mxu1 %v2669_v36 }
 0x3af   : > { %v3915_v37 = vpop.f32.mrb[12].mxu0 }
 0x3b0   : > { %v3937_v38 = vpop.f32.mrb[12].mxu1  ;;  %v3916_v40 = vpop.f32.mrb[13].mxu0 }
 0x3b1   : > { %v3917_v41 = vadd.f32 %v3916_v40, %v3915_v37  ;;  %v3938_v42 = vpop.f32.mrb[13].mxu1  ;;  %v3918_v43 = vpop.f32.mrb[14].mxu0 }
 0x3b2   : > { %v3939_v48 = vadd.f32 %v3938_v42, %v3937_v38  ;;  %v3940_v49 = vpop.f32.mrb[14].mxu1  ;;  %v3919_v50 = vpop.f32.mrb[15].mxu0 }
 0x3b3   : > { %v3225_v5 = vadd.f32 %v3917_v41, %v3828_v39  ;;  %v3941_v51 = vpop.f32.mrb[15].mxu1 }
 0x3b5   : > { %v3265_v46 = vadd.f32 %v3939_v48, %v3225_v5 }
 0x42f   : > { %v3959_v52 = vpop.f32.mrb[16].mxu0 }
 0x430   : > { %v3981_v53 = vpop.f32.mrb[16].mxu1  ;;  %v3960_v54 = vpop.f32.mrb[17].mxu0 }
 0x431   : > { %v3961_v55 = vadd.f32 %v3960_v54, %v3959_v52  ;;  %v3982_v57 = vpop.f32.mrb[17].mxu1  ;;  %v3962_v59 = vpop.f32.mrb[18].mxu0 }
 0x432   : > { %v3983_v60 = vadd.f32 %v3982_v57, %v3981_v53  ;;  %v3984_v61 = vpop.f32.mrb[18].mxu1  ;;  %v3963_v58 = vpop.f32.mrb[19].mxu0 }
 0x433   : > { %v3305_v23 = vadd.f32 %v3961_v55, %v3265_v46  ;;  %v3985_v62 = vpop.f32.mrb[19].mxu1 }
 0x435   : > { %v3345_v6 = vadd.f32 %v3983_v60, %v3305_v23 }
 0x437   : > { %v3350_v63 = vsub.f32 0.0, %v3345_v6 }
 0x439   : > { %v3351_v0 = vmul.f32 1.442695, %v3350_v63 }
 0x43b   : > { %4204 = vpow2.f32 %v3351_v0 }
 0x445   : > { %v4205_v1 = vpop.eup %4204 }
 0x446   : > { %v3353_v27 = vadd.f32 1.0, %v4205_v1 }
 0x448   : > { %4206 = vrcp.f32 %v3353_v27 }
 0x452   : > { %v4207_v2 = vpop.eup %4206 }
 0x453   : > { %3356 = vst [vmem:[%s460_s19] sm:$0x3] %v4207_v2 }
 0x454 PF: > { %s5171_s18 = sld [smem:[#allocation13_spill]]  ;;  %s5172_s26 = sld [smem:[#allocation14_spill]] }
 0x455   : > { %p23_p7 = scmp.ge.s32.totalorder %s4474_s29, 4   ;;  %s5173_s24 = smov %s4392_s25 }
 0x456   : > { %s5175_s27 = smov %s4474_s29 }
 0x457   :  { %25 = sbr.rel (!%p23_p7) target bundleno = 10 (0xa), region = 139 }
 0x45a   : > { %s5174_s25 = smov %s5171_s18 }
 0x45e   :  { %3376 = vsyncpa [#allocation3], 1 }
 0x45f   :  { %3378 = vsyncpa [#allocation3 + $0x1], 1 }
 0x460   :  { %3379 = vsyncpa [#allocation5], 1 }
 0x461   :  { %3381 = vsyncpa [#allocation5 + $0x1], 1 }
 0x462   :  { %3382 = vsyncpa [#allocation8], 1 }
 0x463   :  { %3384 = vsyncpa [#allocation8 + $0x1], 1 }

// kernel: encoder_forward.2
= control target key start
LH: loop header
LB: loop body
LE: loop exit
PB: predicated region body
PF: predicated region fallthrough
CT: control target
= control target key end

     0   :  { %s6949_s0 = inlined_call_operand.vmem [shape: f32[1,648], index: 0, kind: input, shape index: {}]   ;;  %s6950_s1 = inlined_call_operand.hbm [shape: bf16[5,9], index: 1, kind: input, shape index: {}]   ;;  %s6951_s2 = inlined_call_operand.hbm [shape: bf16[5,45], index: 2, kind: input, shape index: {}]   ;;  %s6952_s3 = inlined_call_operand.hbm [shape: bf16[5,45], index: 3, kind: input, shape index: {}]   ;;  %s6953_s4 = inlined_call_operand.hbm [shape: bf16[15,45], index: 4, kind: input, shape index: {}]   ;;  %s6954_s5 = inlined_call_operand.hbm [shape: bf16[15,135], index: 5, kind: input, shape index: {}]   ;;  %s6955_s6 = inlined_call_operand.hbm [shape: bf16[15,135], index: 6, kind: input, shape index: {}]   ;;  %s6956_s7 = inlined_call_operand.hbm [shape: bf16[25,135], index: 7, kind: input, shape index: {}]   ;;  %s6957_s8 = inlined_call_operand.hbm [shape: bf16[25,225], index: 8, kind: input, shape index: {}]   ;;  %s6958_s9 = inlined_call_operand.hbm [shape: bf16[25,225], index: 9, kind: input, shape index: {}]   ;;  %s6959_s10 = inlined_call_operand.vmem [shape: f32[5,1], index: 10, kind: input, shape index: {}]   ;;  %s6960_s11 = inlined_call_operand.vmem [shape: f32[5,1], index: 11, kind: input, shape index: {}]   ;;  %s6961_s12 = inlined_call_operand.vmem [shape: f32[5,1], index: 12, kind: input, shape index: {}]   ;;  %s6962_s13 = inlined_call_operand.vmem [shape: f32[15,1], index: 13, kind: input, shape index: {}]   ;;  %s6963_s14 = inlined_call_operand.vmem [shape: f32[15,1], index: 14, kind: input, shape index: {}]   ;;  %s6964_s15 = inlined_call_operand.vmem [shape: f32[15,1], index: 15, kind: input, shape index: {}]   ;;  %s6965_s16 = inlined_call_operand.vmem [shape: f32[25,1], index: 16, kind: input, shape index: {}]   ;;  %s6966_s17 = inlined_call_operand.vmem [shape: f32[25,1], index: 17, kind: input, shape index: {}]   ;;  %s6967_s18 = inlined_call_operand.vmem [shape: f32[25,1], index: 18, kind: input, shape index: {}]   ;;  %s6968_s19 = inlined_call_operand.hbm [shape: f32[1,610], index: 19, kind: input, shape index: {}]   ;;  %s6969_s20 = inlined_call_operand.hbm [shape: f32[1,178], index: 20, kind: input, shape index: {}]   ;;  %s6970_s21 = inlined_call_operand.hbm [shape: f32[1,58], index: 21, kind: input, shape index: {}]   ;;  %s6971_s22 = inlined_call_operand.hbm [shape: f32[629,200], index: 22, kind: input, shape index: {}]   ;;  %s6972_s23 = inlined_call_operand.hbm [shape: f32[189,72], index: 23, kind: input, shape index: {}]   ;;  %s6973_s24 = inlined_call_operand.hbm [shape: f32[65,8], index: 24, kind: input, shape index: {}]   ;;  %s6974_s25 = inlined_call_operand.vmem [shape: f32[25,8], index: 25, kind: output, shape index: {}]  }
   0x1   :  { %7024 = sst [smem:[#allocation39_spill]] %s6949_s0 }
   0x2   :  { %7025 = sst [smem:[#allocation40_spill]] %s6950_s1 }
   0x3   :  { %7026 = sst [smem:[#allocation41_spill]] %s6951_s2 }
   0x4   :  { %7027 = sst [smem:[#allocation42_spill]] %s6952_s3 }
   0x5   :  { %7028 = sst [smem:[#allocation43_spill]] %s6953_s4 }
   0x6   :  { %7029 = sst [smem:[#allocation44_spill]] %s6954_s5 }
   0x7   :  { %7030 = sst [smem:[#allocation45_spill]] %s6955_s6 }
   0x8   :  { %7031 = sst [smem:[#allocation46_spill]] %s6956_s7 }
   0x9   :  { %7032 = sst [smem:[#allocation47_spill]] %s6957_s8 }
   0xa   :  { %7033 = sst [smem:[#allocation48_spill]] %s6958_s9 }
   0xb   :  { %7034 = sst [smem:[#allocation49_spill]] %s6966_s17 }
   0xc   :  { %7035 = sst [smem:[#allocation50_spill]] %s6967_s18 }
   0xd   :  { %7036 = sst [smem:[#allocation51_spill]] %s6974_s25 }
   0xe   :  { %30 = vsyncpa [#allocation9], 0 }
   0xf   :  { %31 = vsyncpa [#allocation11], 0 }
  0x10   :  { %32 = vsyncpa [#allocation14], 0 }
  0x11   :  { %33 = vsyncpa [#allocation17], 0 }
  0x12   :  { %34 = vsyncpa [#allocation20], 0 }
  0x13   :  { %35 = vsyncpa [#allocation23], 0 }
  0x14   :  { %36 = vsyncpa [#allocation26], 0 }
  0x15   :  { %37 = vsyncpa [#allocation29], 0  ;;  %s5249_s29 = smov [#allocation10]   ;;  %s5250_s6 = smov [#allocation13]  }
  0x16   :  { %s56_s2 = sshll.u32 %s5249_s29, 4  ;;  %s75_s30 = sshll.u32 %s5250_s6, 4  ;;  %s57_s2 = int_to_ptr.vmem [resolvable:$true] %s56_s2  ;;  %s5427_s30 = int_to_ptr.vmem [resolvable:$true] %s75_s30 }
  0x17   :  { %s7037_s26 = sld [smem:[#allocation41_spill]] }
  0x1d   :  { %s4903_s1 = scalar_lea.hbm %s7037_s26, 64 }
  0x1e   :  { %p4904_p0 = scmp.ne.s32.totalorder %s7037_s26, %s4903_s1  ;;  %p4907_p1 = scmp.lt.u32.totalorder %s4903_s1, %s7037_s26 }
  0x20   :  { %p4909_p2 = pnand %p4907_p1, %p4904_p0 }
  0x22   :  { %4912 = shalt.err (!%p4909_p2)
}
  0x23   :  { %s4913_s9 = scalar_lea.vmem %s57_s2, 64  ;;  %p4918_p4 = scmp.lt.s32.totalorder %s57_s2, %s57_s2 }
  0x24   :  { %p4914_p3 = scmp.ne.s32.totalorder %s57_s2, %s4913_s9  ;;  %p4919_p5 = scmp.lt.s32.totalorder %s4913_s9, %s4913_s9 }
  0x26   :  { %p4920_p6 = por %p4919_p5, %p4918_p4 }
  0x28   :  { %p4921_p7 = pnand %p4920_p6, %p4914_p3 }
  0x2a   :  { %4924 = shalt.err (!%p4921_p7)
}
  0x2b   :  { %59 = dma.hbm_to_vmem [thread:$0]  %s7037_s26, 64, %s57_s2, [#allocation11]  }
  0x2c   :  { %s7038_s7 = sld [smem:[#allocation43_spill]] }
  0x32   :  { %s4925_s3 = scalar_lea.hbm %s7038_s7, 128 }
  0x33   :  { %p4926_p8 = scmp.ne.s32.totalorder %s7038_s7, %s4925_s3  ;;  %p4929_p9 = scmp.lt.u32.totalorder %s4925_s3, %s7038_s7 }
  0x35   :  { %p4931_p10 = pnand %p4929_p9, %p4926_p8 }
  0x37   :  { %4934 = shalt.err (!%p4931_p10)
}
  0x38   :  { %s4935_s28 = scalar_lea.vmem %s5427_s30, 128  ;;  %p4940_p12 = scmp.lt.s32.totalorder %s5427_s30, %s5427_s30 }
  0x39   :  { %p4936_p11 = scmp.ne.s32.totalorder %s5427_s30, %s4935_s28  ;;  %p4941_p13 = scmp.lt.s32.totalorder %s4935_s28, %s4935_s28 }
  0x3b   :  { %p4942_p0 = por %p4941_p13, %p4940_p12 }
  0x3d   :  { %p4943_p1 = pnand %p4942_p0, %p4936_p11 }
  0x3f   :  { %4946 = shalt.err (!%p4943_p1)
}
  0x40   :  { %s5251_s2 = smov 64   ;;  %s5252_s26 = smov 4  }
  0x41   :  { %81 = dma.hbm_to_vmem [thread:$0]  %s7038_s7, 128, %s5427_s30, [#allocation14], %s5251_s2, %s5251_s2, %s5252_s26  }
  0x42   :  { %s5253_s0 = smov [#allocation16]   ;;  %s5254_s6 = smov [#allocation19]  }
  0x43   :  { %s99_s29 = sshll.u32 %s5253_s0, 4  ;;  %s123_s3 = sshll.u32 %s5254_s6, 4  ;;  %s100_s29 = int_to_ptr.vmem [resolvable:$true] %s99_s29  ;;  %s5458_s3 = int_to_ptr.vmem [resolvable:$true] %s123_s3 }
  0x44   :  { %s7039_s1 = sld [smem:[#allocation45_spill]] }
  0x4a   :  { %s4947_s4 = scalar_lea.hbm %s7039_s1, 256 }
  0x4b   :  { %p4948_p2 = scmp.ne.s32.totalorder %s7039_s1, %s4947_s4  ;;  %p4951_p3 = scmp.lt.u32.totalorder %s4947_s4, %s7039_s1 }
  0x4d   :  { %p4953_p4 = pnand %p4951_p3, %p4948_p2 }
  0x4f   :  { %4956 = shalt.err (!%p4953_p4)
}
  0x50   :  { %s4957_s30 = scalar_lea.vmem %s100_s29, 256  ;;  %p4962_p6 = scmp.lt.s32.totalorder %s100_s29, %s100_s29 }
  0x51   :  { %p4958_p5 = scmp.ne.s32.totalorder %s100_s29, %s4957_s30  ;;  %p4963_p7 = scmp.lt.s32.totalorder %s4957_s30, %s4957_s30 }
  0x53   :  { %p4964_p8 = por %p4963_p7, %p4962_p6 }
  0x55   :  { %p4965_p9 = pnand %p4964_p8, %p4958_p5 }
  0x57   :  { %4968 = shalt.err (!%p4965_p9)
}
  0x58   :  { %s5255_s7 = smov 128   ;;  %s5256_s2 = smov 8  }
  0x59   :  { %105 = dma.hbm_to_vmem [thread:$0]  %s7039_s1, 256, %s100_s29, [#allocation17], %s5255_s7, %s5255_s7, %s5256_s2  }
  0x5a   :  { %s7040_s9 = sld [smem:[#allocation47_spill]] }
  0x60   :  { %s4969_s5 = scalar_lea.hbm %s7040_s9, 512 }
  0x61   :  { %p4970_p10 = scmp.ne.s32.totalorder %s7040_s9, %s4969_s5  ;;  %p4973_p11 = scmp.lt.u32.totalorder %s4969_s5, %s7040_s9 }
  0x63   :  { %p4975_p12 = pnand %p4973_p11, %p4970_p10 }
  0x65   :  { %4978 = shalt.err (!%p4975_p12)
}
  0x66   :  { %s4979_s4 = scalar_lea.vmem %s5458_s3, 512  ;;  %p4984_p0 = scmp.lt.s32.totalorder %s5458_s3, %s5458_s3 }
  0x67   :  { %p4980_p13 = scmp.ne.s32.totalorder %s5458_s3, %s4979_s4  ;;  %p4985_p1 = scmp.lt.s32.totalorder %s4979_s4, %s4979_s4 }
  0x69   :  { %p4986_p2 = por %p4985_p1, %p4984_p0 }
  0x6b   :  { %p4987_p3 = pnand %p4986_p2, %p4980_p13 }
  0x6d   :  { %4990 = shalt.err (!%p4987_p3)
}
  0x6e   :  { %129 = dma.hbm_to_vmem [thread:$0]  %s7040_s9, 512, %s5458_s3, [#allocation20], %s5255_s7, %s5255_s7, %s5256_s2  }
  0x6f   :  { %s5257_s28 = smov [#allocation22]   ;;  %s5258_s25 = smov [#allocation25]  }
  0x70   :  { %s166_s30 = sshll.u32 %s5257_s28, 4  ;;  %s186_s26 = sshll.u32 %s5258_s25, 4  ;;  %s167_s30 = int_to_ptr.vmem [resolvable:$true] %s166_s30  ;;  %s187_s26 = int_to_ptr.vmem [resolvable:$true] %s186_s26 }
  0x71   :  { %s4991_s5 = scalar_lea.hbm %s6968_s19, 80 }
  0x72   :  { %p4992_p4 = scmp.ne.s32.totalorder %s6968_s19, %s4991_s5  ;;  %p4995_p5 = scmp.lt.u32.totalorder %s4991_s5, %s6968_s19 }
  0x74   :  { %p4997_p6 = pnand %p4995_p5, %p4992_p4 }
  0x76   :  { %5000 = shalt.err (!%p4997_p6)
}
  0x77   :  { %s5001_s3 = scalar_lea.vmem %s167_s30, 80  ;;  %s5005_s9 = scalar_lea.vmem %s167_s30, 96 }
  0x78   :  { %p5002_p7 = scmp.ne.s32.totalorder %s167_s30, %s5001_s3  ;;  %p5006_p8 = scmp.lt.s32.totalorder %s167_s30, %s167_s30 }
  0x79   :  { %p5007_p9 = scmp.lt.s32.totalorder %s5005_s9, %s5001_s3 }
  0x7b   :  { %p5008_p10 = por %p5007_p9, %p5006_p8 }
  0x7d   :  { %p5009_p11 = pnand %p5008_p10, %p5002_p7 }
  0x7f   :  { %5012 = shalt.err (!%p5009_p11)
}
  0x80   :  { %169 = dma.hbm_to_vmem [thread:$0]  %s6968_s19, 80, %s167_s30, [#allocation23]  }
  0x81   :  { %s5013_s25 = scalar_lea.hbm %s6970_s21, 16 }
  0x82   :  { %p5014_p12 = scmp.ne.s32.totalorder %s6970_s21, %s5013_s25  ;;  %p5017_p13 = scmp.lt.u32.totalorder %s5013_s25, %s6970_s21 }
  0x84   :  { %p5019_p0 = pnand %p5017_p13, %p5014_p12 }
  0x86   :  { %5022 = shalt.err (!%p5019_p0)
}
  0x87   :  { %s5023_s6 = scalar_lea.vmem %s187_s26, 16  ;;  %s5027_s8 = scalar_lea.vmem %s187_s26, 32 }
  0x88   :  { %p5024_p1 = scmp.ne.s32.totalorder %s187_s26, %s5023_s6  ;;  %p5028_p2 = scmp.lt.s32.totalorder %s187_s26, %s187_s26 }
  0x89   :  { %p5029_p3 = scmp.lt.s32.totalorder %s5027_s8, %s5023_s6 }
  0x8b   :  { %p5030_p4 = por %p5029_p3, %p5028_p2 }
  0x8d   :  { %p5031_p5 = pnand %p5030_p4, %p5024_p1 }
  0x8f   :  { %5034 = shalt.err (!%p5031_p5)
}
  0x90   :  { %189 = dma.hbm_to_vmem [thread:$0]  %s6970_s21, 16, %s187_s26, [#allocation26]  }
  0x91   :  { %s5259_s27 = smov [#allocation28]   ;;  %s5260_s9 = smov [#allocation8]  }
  0x92   :  { %s207_s3 = sshll.u32 %s5259_s27, 4  ;;  %s46_s4 = sshll.u32 %s5260_s9, 4  ;;  %s208_s3 = int_to_ptr.vmem [resolvable:$true] %s207_s3  ;;  %s47_s4 = int_to_ptr.vmem [resolvable:$true] %s46_s4 }
  0x93   :  { %s5035_s28 = scalar_lea.hbm %s6972_s23, 3072 }
  0x94   :  { %p5036_p6 = scmp.ne.s32.totalorder %s6972_s23, %s5035_s28  ;;  %p5039_p7 = scmp.lt.u32.totalorder %s5035_s28, %s6972_s23 }
  0x96   :  { %p5041_p8 = pnand %p5039_p7, %p5036_p6 }
  0x98   :  { %5044 = shalt.err (!%p5041_p8)
}
  0x99   :  { %s5045_s21 = scalar_lea.vmem %s208_s3, 3072  ;;  %p5050_p10 = scmp.lt.s32.totalorder %s208_s3, %s208_s3 }
  0x9a   :  { %p5046_p9 = scmp.ne.s32.totalorder %s208_s3, %s5045_s21  ;;  %p5051_p11 = scmp.lt.s32.totalorder %s5045_s21, %s5045_s21 }
  0x9c   :  { %p5052_p12 = por %p5051_p11, %p5050_p10 }
  0x9e   :  { %p5053_p13 = pnand %p5052_p12, %p5046_p9 }
  0xa0   :  { %5056 = shalt.err (!%p5053_p13)
}
  0xa1   :  { %213 = dma.hbm_to_vmem [thread:$0]  %s6972_s23, 3072, %s208_s3, [#allocation29], %s5255_s7, %s5255_s7, %s5256_s2  }
  0xa2   :  { %s7041_s19 = sld [smem:[#allocation40_spill]] }
  0xa8   :  { %s5057_s30 = scalar_lea.hbm %s7041_s19, 64 }
  0xa9   :  { %p5058_p0 = scmp.ne.s32.totalorder %s7041_s19, %s5057_s30  ;;  %p5061_p1 = scmp.lt.u32.totalorder %s5057_s30, %s7041_s19 }
  0xab   :  { %p5063_p2 = pnand %p5061_p1, %p5058_p0 }
  0xad   :  { %5066 = shalt.err (!%p5063_p2)
}
  0xae   :  { %s5067_s28 = scalar_lea.vmem %s47_s4, 64  ;;  %p5072_p4 = scmp.lt.s32.totalorder %s47_s4, %s47_s4 }
  0xaf   :  { %p5068_p3 = scmp.ne.s32.totalorder %s47_s4, %s5067_s28  ;;  %p5073_p5 = scmp.lt.s32.totalorder %s5067_s28, %s5067_s28 }
  0xb1   :  { %p5074_p6 = por %p5073_p5, %p5072_p4 }
  0xb3   :  { %p5075_p7 = pnand %p5074_p6, %p5068_p3 }
  0xb5   :  { %5078 = shalt.err (!%p5075_p7)
}
  0xb6   :  { %49 = dma.hbm_to_vmem [thread:$0]  %s7041_s19, 64, %s47_s4, [#allocation9]  }
  0xb7   :  { %s5261_s25 = smov [#allocation12]   ;;  %s5262_s18 = smov [#allocation15]  }
  0xb8   :  { %s66_s17 = sshll.u32 %s5261_s25, 4  ;;  %s87_s5 = sshll.u32 %s5262_s18, 4  ;;  %s67_s17 = int_to_ptr.vmem [resolvable:$true] %s66_s17  ;;  %s5546_s5 = int_to_ptr.vmem [resolvable:$true] %s87_s5 }
  0xb9   :  { %s7042_s0 = sld [smem:[#allocation42_spill]] }
  0xbf   :  { %s5079_s6 = scalar_lea.hbm %s7042_s0, 64 }
  0xc0   :  { %p5080_p8 = scmp.ne.s32.totalorder %s7042_s0, %s5079_s6  ;;  %p5083_p9 = scmp.lt.u32.totalorder %s5079_s6, %s7042_s0 }
  0xc2   :  { %p5085_p10 = pnand %p5083_p9, %p5080_p8 }
  0xc4   :  { %5088 = shalt.err (!%p5085_p10)
}
  0xc5   :  { %s5089_s4 = scalar_lea.vmem %s67_s17, 64  ;;  %p5094_p12 = scmp.lt.s32.totalorder %s67_s17, %s67_s17 }
  0xc6   :  { %p5090_p11 = scmp.ne.s32.totalorder %s67_s17, %s5089_s4  ;;  %p5095_p13 = scmp.lt.s32.totalorder %s5089_s4, %s5089_s4 }
  0xc8   :  { %p5096_p0 = por %p5095_p13, %p5094_p12 }
  0xca   :  { %p5097_p1 = pnand %p5096_p0, %p5090_p11 }
  0xcc   :  { %5100 = shalt.err (!%p5097_p1)
}
  0xcd   :  { %69 = dma.hbm_to_vmem [thread:$0]  %s7042_s0, 64, %s67_s17, [#allocation11]  }
  0xce   :  { %s7043_s23 = sld [smem:[#allocation44_spill]] }
  0xd4   :  { %s5101_s3 = scalar_lea.hbm %s7043_s23, 256 }
  0xd5   :  { %p5102_p2 = scmp.ne.s32.totalorder %s7043_s23, %s5101_s3  ;;  %p5105_p3 = scmp.lt.u32.totalorder %s5101_s3, %s7043_s23 }
  0xd7   :  { %p5107_p4 = pnand %p5105_p3, %p5102_p2 }
  0xd9   :  { %5110 = shalt.err (!%p5107_p4)
}
  0xda   :  { %s5111_s6 = scalar_lea.vmem %s5546_s5, 256  ;;  %p5116_p6 = scmp.lt.s32.totalorder %s5546_s5, %s5546_s5 }
  0xdb   :  { %p5112_p5 = scmp.ne.s32.totalorder %s5546_s5, %s5111_s6  ;;  %p5117_p7 = scmp.lt.s32.totalorder %s5111_s6, %s5111_s6 }
  0xdd   :  { %p5118_p8 = por %p5117_p7, %p5116_p6 }
  0xdf   :  { %p5119_p9 = pnand %p5118_p8, %p5112_p5 }
  0xe1   :  { %5122 = shalt.err (!%p5119_p9)
}
  0xe2   :  { %93 = dma.hbm_to_vmem [thread:$0]  %s7043_s23, 256, %s5546_s5, [#allocation14], %s5255_s7, %s5255_s7, %s5256_s2  }
  0xe3   :  { %s5263_s8 = smov [#allocation18]   ;;  %s5264_s27 = smov [#allocation21]  }
  0xe4   :  { %s111_s30 = sshll.u32 %s5263_s8, 4  ;;  %s135_s9 = sshll.u32 %s5264_s27, 4  ;;  %s112_s30 = int_to_ptr.vmem [resolvable:$true] %s111_s30  ;;  %s5580_s9 = int_to_ptr.vmem [resolvable:$true] %s135_s9 }
  0xe5   :  { %s7044_s29 = sld [smem:[#allocation46_spill]] }
  0xeb   :  { %s5123_s1 = scalar_lea.hbm %s7044_s29, 512 }
  0xec   :  { %p5124_p10 = scmp.ne.s32.totalorder %s7044_s29, %s5123_s1  ;;  %p5127_p11 = scmp.lt.u32.totalorder %s5123_s1, %s7044_s29 }
  0xee   :  { %p5129_p12 = pnand %p5127_p11, %p5124_p10 }
  0xf0   :  { %5132 = shalt.err (!%p5129_p12)
}
  0xf1   :  { %s5133_s5 = scalar_lea.vmem %s112_s30, 512  ;;  %p5138_p0 = scmp.lt.s32.totalorder %s112_s30, %s112_s30 }
  0xf2   :  { %p5134_p13 = scmp.ne.s32.totalorder %s112_s30, %s5133_s5  ;;  %p5139_p1 = scmp.lt.s32.totalorder %s5133_s5, %s5133_s5 }
  0xf4   :  { %p5140_p2 = por %p5139_p1, %p5138_p0 }
  0xf6   :  { %p5141_p3 = pnand %p5140_p2, %p5134_p13 }
  0xf8   :  { %5144 = shalt.err (!%p5141_p3)
}
  0xf9   :  { %117 = dma.hbm_to_vmem [thread:$0]  %s7044_s29, 512, %s112_s30, [#allocation17], %s5255_s7, %s5255_s7, %s5256_s2  }
  0xfa   :  { %s7045_s17 = sld [smem:[#allocation48_spill]] }
 0x100   :  { %s5145_s0 = scalar_lea.hbm %s7045_s17, 512 }
 0x101   :  { %p5146_p4 = scmp.ne.s32.totalorder %s7045_s17, %s5145_s0  ;;  %p5149_p5 = scmp.lt.u32.totalorder %s5145_s0, %s7045_s17 }
 0x103   :  { %p5151_p6 = pnand %p5149_p5, %p5146_p4 }
 0x105   :  { %5154 = shalt.err (!%p5151_p6)
}
 0x106   :  { %s5155_s1 = scalar_lea.vmem %s5580_s9, 512  ;;  %p5160_p8 = scmp.lt.s32.totalorder %s5580_s9, %s5580_s9 }
 0x107   :  { %p5156_p7 = scmp.ne.s32.totalorder %s5580_s9, %s5155_s1  ;;  %p5161_p9 = scmp.lt.s32.totalorder %s5155_s1, %s5155_s1 }
 0x109   :  { %p5162_p10 = por %p5161_p9, %p5160_p8 }
 0x10b   :  { %p5163_p11 = pnand %p5162_p10, %p5156_p7 }
 0x10d   :  { %5166 = shalt.err (!%p5163_p11)
}
 0x10e   :  { %141 = dma.hbm_to_vmem [thread:$0]  %s7045_s17, 512, %s5580_s9, [#allocation20], %s5255_s7, %s5255_s7, %s5256_s2  }
 0x10f   :  { %s5265_s28 = smov [#allocation24]   ;;  %s5266_s25 = smov [#allocation27]  }
 0x110   :  { %s176_s3 = sshll.u32 %s5265_s28, 4  ;;  %s195_s18 = sshll.u32 %s5266_s25, 4  ;;  %s177_s3 = int_to_ptr.vmem [resolvable:$true] %s176_s3  ;;  %s5617_s18 = int_to_ptr.vmem [resolvable:$true] %s195_s18 }
 0x111   :  { %s5167_s21 = scalar_lea.hbm %s6969_s20, 32 }
 0x112   :  { %p5168_p12 = scmp.ne.s32.totalorder %s6969_s20, %s5167_s21  ;;  %p5171_p13 = scmp.lt.u32.totalorder %s5167_s21, %s6969_s20 }
 0x114   :  { %p5173_p0 = pnand %p5171_p13, %p5168_p12 }
 0x116   :  { %5176 = shalt.err (!%p5173_p0)
}
 0x117   :  { %s5177_s9 = scalar_lea.vmem %s177_s3, 32  ;;  %p5182_p2 = scmp.lt.s32.totalorder %s177_s3, %s177_s3 }
 0x118   :  { %p5178_p1 = scmp.ne.s32.totalorder %s177_s3, %s5177_s9  ;;  %p5183_p3 = scmp.lt.s32.totalorder %s5177_s9, %s5177_s9 }
 0x11a   :  { %p5184_p4 = por %p5183_p3, %p5182_p2 }
 0x11c   :  { %p5185_p5 = pnand %p5184_p4, %p5178_p1 }
 0x11e   :  { %5188 = shalt.err (!%p5185_p5)
}
 0x11f   :  { %179 = dma.hbm_to_vmem [thread:$0]  %s6969_s20, 32, %s177_s3, [#allocation23]  }
 0x120   :  { %s5189_s1 = scalar_lea.hbm %s6971_s22, 20224 }
 0x121   :  { %p5190_p6 = scmp.ne.s32.totalorder %s6971_s22, %s5189_s1  ;;  %p5193_p7 = scmp.lt.u32.totalorder %s5189_s1, %s6971_s22 }
 0x123   :  { %p5195_p8 = pnand %p5193_p7, %p5190_p6 }
 0x125   :  { %5198 = shalt.err (!%p5195_p8)
}
 0x126   :  { %s5199_s5 = scalar_lea.vmem %s5617_s18, 20224  ;;  %p5204_p10 = scmp.lt.s32.totalorder %s5617_s18, %s5617_s18 }
 0x127   :  { %p5200_p9 = scmp.ne.s32.totalorder %s5617_s18, %s5199_s5  ;;  %p5205_p11 = scmp.lt.s32.totalorder %s5199_s5, %s5199_s5 }
 0x129   :  { %p5206_p12 = por %p5205_p11, %p5204_p10 }
 0x12b   :  { %p5207_p13 = pnand %p5206_p12, %p5200_p9 }
 0x12d   :  { %5210 = shalt.err (!%p5207_p13)
}
 0x12e   :  { %s5267_s20 = smov 256   ;;  %s5268_s3 = smov 16  }
 0x12f   :  { %201 = dma.hbm_to_vmem [thread:$0]  %s6971_s22, 20224, %s5617_s18, [#allocation26], %s5267_s20, %s5267_s20, %s5268_s3  }
 0x130   :  { %s5269_s26 = smov [#allocation30]   ;;  %s5211_s9 = scalar_lea.hbm %s6973_s24, 1152 }
 0x131   :  { %s219_s6 = sshll.u32 %s5269_s26, 4  ;;  %p5212_p0 = scmp.ne.s32.totalorder %s6973_s24, %s5211_s9  ;;  %s220_s6 = int_to_ptr.vmem [resolvable:$true] %s219_s6 }
 0x132   :  { %p5215_p1 = scmp.lt.u32.totalorder %s5211_s9, %s6973_s24 }
 0x134   :  { %p5217_p2 = pnand %p5215_p1, %p5212_p0 }
 0x136   :  { %5220 = shalt.err (!%p5217_p2)
}
 0x137   :  { %s5221_s1 = scalar_lea.vmem %s220_s6, 1152  ;;  %p5226_p4 = scmp.lt.s32.totalorder %s220_s6, %s220_s6 }
 0x138   :  { %p5222_p3 = scmp.ne.s32.totalorder %s220_s6, %s5221_s1  ;;  %p5227_p5 = scmp.lt.s32.totalorder %s5221_s1, %s5221_s1 }
 0x13a   :  { %p5228_p6 = por %p5227_p5, %p5226_p4 }
 0x13c   :  { %p5229_p7 = pnand %p5228_p6, %p5222_p3 }
 0x13e   :  { %5232 = shalt.err (!%p5229_p7)
}
 0x13f   :  { %225 = dma.hbm_to_vmem [thread:$0]  %s6973_s24, 1152, %s220_s6, [#allocation29], %s5255_s7, %s5255_s7, %s5256_s2  }
 0x140   :  { %5233 = dma.done.wait [#allocation9], 64  }
 0x141   :  { %5234 = vsyncadd [#allocation9], 4294967232 }
 0x142   :  { %5235 = dma.done.wait [#allocation11], 128  }
 0x143   :  { %5236 = vsyncadd [#allocation11], 4294967168 }
 0x144   :  { %5237 = dma.done.wait [#allocation14], 384  }
 0x145   :  { %5238 = vsyncadd [#allocation14], 4294966912 }
 0x146   :  { %5239 = dma.done.wait [#allocation17], 768  }
 0x147   :  { %5240 = vsyncadd [#allocation17], 4294966528 }
 0x148   :  { %5241 = dma.done.wait [#allocation20], 1024  }
 0x149   :  { %5242 = vsyncadd [#allocation20], 4294966272 }
 0x14a   :  { %5243 = dma.done.wait [#allocation23], 112  }
 0x14b   :  { %5244 = vsyncadd [#allocation23], 4294967184 }
 0x14c   :  { %5245 = dma.done.wait [#allocation26], 20240  }
 0x14d   :  { %5246 = vsyncadd [#allocation26], 4294947056 }
 0x14e   :  { %5247 = dma.done.wait [#allocation29], 4224  }
 0x14f   :  { %5248 = vsyncadd [#allocation29], 4294963072  ;;  %v294_v0 = vlaneseq  ;;  %s7048_s2 = sld [smem:[#allocation39_spill]]  ;;  %s5270_s30 = smov 110   ;;  %v5278_v3 = vmov 0   ;;  %v5279_v4 = vmov 0.0  }
 0x150   :  { %s5271_s29 = smov 127   ;;  %s5272_s28 = smov 109   ;;  %448 = vmatprep.mubr.bf16.mxu0 %v5278_v3  ;;  %489 = vmatprep.mubr.bf16.mxu1 %v5278_v3  ;;  %272 = vst [vmem:[#allocation2] sm:$0x1f] %v5279_v4  ;;  %273 = vst [vmem:[#allocation2 + $0x8] sm:$0x1f] %v5279_v4 }
 0x151   :  { %vm5664_vm0 = vcmp.lt.s32.totalorder %v294_v0, 610  ;;  %s5273_s25 = smov 126   ;;  %s5274_s5 = smov 92   ;;  %4773 = vset.pattern.permute.xlu0 %v5278_v3  ;;  %4774 = vset.pattern.permute.xlu1 %v5278_v3  ;;  %274 = vst [vmem:[#allocation2 + $0x10] sm:$0x1f] %v5279_v4  ;;  %279 = vst [vmem:[#allocation3] sm:$0xff] %v5279_v4 }
 0x152   :  { %s5275_s20 = smov 108   ;;  %s5276_s3 = smov 90   ;;  %275 = vst [vmem:[#allocation2 + $0x18] sm:$0x1f] %v5279_v4  ;;  %276 = vst [vmem:[#allocation2 + $0x20] sm:$0x1f] %v5279_v4 }
 0x153   :  { %s5277_s23 = smov 91   ;;  %282 = vst [vmem:[#allocation3 + $0x10] sm:$0x7f] %v5279_v4  ;;  %v293_v5 = vld [vmem:[%s6959_s10] sm:$0x1f]  ;;  %vm322_vm1 = vcmask 900096  }
 0x154   :  { %vm304_vm2 = vcmask 1039360   ;;  %vm331_vm3 = vcmask 891904   ;;  %vm6995_vm4 = vcmask 1031168   ;;  %vm349_vm5 = vcmask 752640   ;;  %v292_v52 = vld [vmem:[#allocation8] sm:$0x7] }
 0x155   :  { %v290_v2 = vld [vmem:[%s7048_s2] sm:$0x3f]  ;;  %vm7016_vm6 = vcmask 883712   ;;  %vm367_vm7 = vcmask 736256   ;;  %vm358_vm8 = vcmask 744448   ;;  %vm6987_vm9 = vcmask 1043456  }
 0x156   :  { %319 = vrot.lane.b32.xlu1 %v290_v2, %s5270_s30  ;;  %301 = vrot.lane.b32.xlu0 %v290_v2, %s5271_s29  ;;  %298 = vst.msk [vmem:[#allocation5] ss:$8 sm:$0xf] %vm5664_vm0, %v290_v2  ;;  %299 = vst.msk [vmem:[#allocation5] ss:$8 sm:$0x10] %vm5664_vm0, %v290_v2 }
 0x157   :  { %vm6988_vm10 = vcmask 1044480   ;;  %v5280_v30 = vmov 65535   ;;  %vm393_vm11 = vcmask 72704   ;;  %vm6997_vm12 = vmmov 0   ;;  %s5282_s10 = smov 19   ;;  %s5284_s9 = smov 117  }
 0x158   :  { %v399_v31 = vsel %vm6987_vm9, 4294967295, %v5280_v30  ;;  %vm277_vm13 = vcmask 61440   ;;  %vm7000_vm14 = vcmask 1044632   ;;  %vm7001_vm15 = vcmask 154624   ;;  %s5285_s17 = smov 116   ;;  %s5286_s27 = smov 107  }
 0x159   :  { %v400_v34 = vsel %vm6988_vm10, %v399_v31, 0  ;;  %278 = vst.msk [vmem:[#allocation2 + $0x28] sm:$0x1f] %vm277_vm13, %v5279_v4  ;;  %vm6990_vm13 = vcmask 1045504   ;;  %vm6993_vm9 = vcmask 801797   ;;  %vm6992_vm10 = vcmask 795648  }
 0x15a   :  { %328 = vrot.lane.b32.xlu1 %v290_v2, %s5272_s28  ;;  %310 = vrot.lane.b32.xlu0 %v290_v2, %s5273_s25  ;;  %s5287_s4 = smov 106   ;;  %s5294_s21 = smov 115  }
 0x15b   :  { %s5295_s26 = smov 114   ;;  %s7144_s1 = sld [smem:[#allocation49_spill]] }
 0x15e   :  { %346 = vrot.lane.b32.xlu1 %v290_v2, %s5274_s5  ;;  %337 = vrot.lane.b32.xlu0 %v290_v2, %s5275_s20 }
 0x160   :  { %v5746_v54 = vld [vmem:[#allocation2 + $0x28] sm:$0x1f] }
 0x161   :  { %v799_v55 = vrot.slane %v5746_v54, 2 }
 0x162   :  { %364 = vrot.lane.b32.xlu1 %v290_v2, %s5276_s3  ;;  %355 = vrot.lane.b32.xlu0 %v290_v2, %s5277_s23  ;;  %v5751_v2 = vshrl.u32 %v294_v0, 7 }
 0x166   :  { %390 = vperm.xlu0 %4773, %v293_v5   ;;  %810 = vrot.lane.b32.xlu1 %v799_v55, %s5274_s5 }
 0x1c8   :  { %v320_v6 = vpop.permute.xlu1 %319  ;;  %v302_v7 = vpop.permute.xlu0 %301 }
 0x1c9   :  { %v321_v8 = vrot.slane %v320_v6, 1  ;;  %v303_v9 = vrot.slane %v302_v7, 1 }
 0x1cb   :  { %v323_v10 = vsel %vm322_vm1, %v320_v6, %v321_v8  ;;  %v305_v11 = vsel %vm304_vm2, %v302_v7, %v303_v9  ;;  %v546_v9 = vsub.s32 0, %v5751_v2 }
 0x1cc   :  { %326 = vst.msk [vmem:[#allocation5 + $0x3] ss:$8 sm:$0xf] %vm5664_vm0, %v323_v10  ;;  %327 = vst.msk [vmem:[#allocation5 + $0x3] ss:$8 sm:$0x10] %vm5664_vm0, %v323_v10  ;;  %v329_v12 = vpop.permute.xlu1 %328  ;;  %v311_v13 = vpop.permute.xlu0 %310 }
 0x1cd   :  { %308 = vst.msk [vmem:[#allocation5 + $0x1] ss:$8 sm:$0xf] %vm5664_vm0, %v305_v11  ;;  %309 = vst.msk [vmem:[#allocation5 + $0x1] ss:$8 sm:$0x10] %vm5664_vm0, %v305_v11 }
 0x1ce   :  { %v330_v14 = vrot.slane %v329_v12, 1  ;;  %v312_v15 = vrot.slane %v311_v13, 1  ;;  %v291_v10 = vld [vmem:[#allocation22] sm:$0x1f]  ;;  %v554_v11 = vsub.s32 2, %v5751_v2 }
 0x1cf   :  { %v5757_v0 = vrot.slane %v291_v10, %v546_v9 }
 0x1d0   :  { %v332_v16 = vsel %vm331_vm3, %v329_v12, %v330_v14  ;;  %v314_v17 = vsel %vm6995_vm4, %v311_v13, %v312_v15  ;;  %v347_v18 = vpop.permute.xlu1 %346  ;;  %v338_v19 = vpop.permute.xlu0 %337  ;;  %v550_v15 = vsub.s32 1, %v5751_v2 }
 0x1d1   :  { %335 = vst.msk [vmem:[#allocation5 + $0x4] ss:$8 sm:$0xf] %vm5664_vm0, %v332_v16  ;;  %336 = vst.msk [vmem:[#allocation5 + $0x4] ss:$8 sm:$0x10] %vm5664_vm0, %v332_v16 }
 0x1d2   :  { %317 = vst.msk [vmem:[#allocation5 + $0x2] ss:$8 sm:$0xf] %vm5664_vm0, %v314_v17  ;;  %318 = vst.msk [vmem:[#allocation5 + $0x2] ss:$8 sm:$0x10] %vm5664_vm0, %v314_v17  ;;  %v5760_v17 = vrot.slane %v291_v10, %v554_v11 }
 0x1d3   :  { %v348_v20 = vrot.slane %v347_v18, 1  ;;  %v339_v21 = vrot.slane %v338_v19, 1 }
 0x1d4   :  { %v365_v24 = vpop.permute.xlu1 %364  ;;  %v356_v25 = vpop.permute.xlu0 %355 }
 0x1d5   :  { %v350_v22 = vsel %vm349_vm5, %v347_v18, %v348_v20  ;;  %v341_v23 = vsel %vm7016_vm6, %v338_v19, %v339_v21  ;;  %v366_v26 = vrot.slane %v365_v24, 1  ;;  %v357_v27 = vrot.slane %v356_v25, 1 }
 0x1d6   :  { %353 = vst.msk [vmem:[#allocation5 + $0x6] ss:$8 sm:$0xf] %vm5664_vm0, %v350_v22  ;;  %354 = vst.msk [vmem:[#allocation5 + $0x6] ss:$8 sm:$0x10] %vm5664_vm0, %v350_v22  ;;  %v5765_v22 = vrot.slane %v291_v10, %v550_v15 }
 0x1d7   :  { %344 = vst.msk [vmem:[#allocation5 + $0x5] ss:$8 sm:$0xf] %vm5664_vm0, %v341_v23  ;;  %345 = vst.msk [vmem:[#allocation5 + $0x5] ss:$8 sm:$0x10] %vm5664_vm0, %v341_v23  ;;  %v368_v28 = vsel %vm367_vm7, %v365_v24, %v366_v26  ;;  %v359_v29 = vsel %vm358_vm8, %v356_v25, %v357_v27 }
 0x1d8   :  { %371 = vst.msk [vmem:[#allocation5 + $0x28] ss:$8 sm:$0xf] %vm5664_vm0, %v368_v28  ;;  %372 = vst.msk [vmem:[#allocation5 + $0x28] ss:$8 sm:$0x10] %vm5664_vm0, %v368_v28 }
 0x1d9   :  { %362 = vst.msk [vmem:[#allocation5 + $0x7] ss:$8 sm:$0xf] %vm5664_vm0, %v359_v29  ;;  %363 = vst.msk [vmem:[#allocation5 + $0x7] ss:$8 sm:$0x10] %vm5664_vm0, %v359_v29 }
 0x1da   :  { %v562_v23 = vsub.s32 4, %v5751_v2  ;;  %v558_v24 = vsub.s32 3, %v5751_v2  ;;  %vm6989_vm0 = vcmask 954368  }
 0x1dc   :  { %v5773_v28 = vrot.slane %v291_v10, %v562_v23  ;;  %v5775_v29 = vrot.slane %v291_v10, %v558_v24 }
 0x1df   :  { %v379_v33 = vld [vmem:[#allocation5 + $0x30] sm:$0x1]  ;;  %v381_v37 = vld [vmem:[#allocation5 + $0x40] sm:$0x1]  ;;  %v378_v39 = vld [vmem:[#allocation5 + $0x28] sm:$0x1] }
 0x1e0   :  { %v374_v32 = vld [vmem:[#allocation5 + $0x8] sm:$0xff]  ;;  %v376_v35 = vld [vmem:[#allocation5 + $0x18] sm:$0xff]  ;;  %v373_v38 = vld [vmem:[#allocation5] sm:$0xff] }
 0x1e1   :  { %v384_v36 = vpack.c.bf16 %v379_v33, %v374_v32  ;;  %v386_v40 = vpack.c.bf16 %v381_v37, %v376_v35  ;;  %v383_v41 = vpack.c.bf16 %v378_v39, %v373_v38  ;;  %v375_v42 = vld [vmem:[#allocation5 + $0x10] sm:$0xff]  ;;  %v380_v43 = vld [vmem:[#allocation5 + $0x38] sm:$0x1]  ;;  %v377_v44 = vld [vmem:[#allocation5 + $0x20] sm:$0xff]  ;;  %v5782_v35 = vpop.permute.xlu1 %810 }
 0x1e2   :  { %v385_v46 = vpack.c.bf16 %v380_v43, %v375_v42  ;;  %v382_v47 = vld [vmem:[#allocation5 + $0x48] sm:$0x1] }
 0x1e3   :  { %v405_v45 = vand.u32 %v400_v34, %v384_v36  ;;  %v411_v48 = vand.u32 %v400_v34, %v386_v40  ;;  %v402_v49 = vand.u32 %v400_v34, %v383_v41  ;;  %v387_v50 = vpack.c.bf16 %v382_v47, %v377_v44 }
 0x1e4   :  { %v408_v51 = vand.u32 %v400_v34, %v385_v46 }
 0x1e5   :  { %416 = vmatprep.subr.bf16.mxu0 %v405_v45  ;;  %457 = vmatprep.subr.bf16.mxu1 %v411_v48  ;;  %v414_v53 = vand.u32 %v400_v34, %v387_v50  ;;  %v391_v56 = vpop.permute.xlu0 %390 }
 0x1e6   :  { %417 = vmatpush1.bf16.msra.mxu0 %v402_v49  ;;  %458 = vmatpush1.bf16.msra.mxu1 %v408_v51 }
 0x1e7   :  { %4462 = vmatprep.subr.bf16.mxu0 %v5279_v4 }
 0x1e9   :  { %4392 = vmatmul.mubr.msk.bf16.vlgmr.msra.gmra.mrb[0].mxu0 %vm393_vm11, %v292_v52  ;;  %4393 = vmatmul.mubr.msk.bf16.vlgmr.msra.gmra.mrb[0].mxu1 %vm393_vm11, %v292_v52 }
 0x1ea   :  { %4463 = vmatpush3.bf16.msra.mxu0 %v414_v53  ;;  %4464 = vmatprep.mubr.msk.bf16.mxu0 %vm6997_vm12, %v5279_v4 }
 0x1eb   :  { %1000 = vmatprep.mubr.bf16.mxu1 %v5278_v3 }
 0x1f1   :  { %4465 = vmatmul.mubr.msk.bf16.vlgmr.msra.gmra.mrb[4].mxu0 %vm393_vm11, %v292_v52  ;;  %vm618_vm11 = vcmask 798720  }
 0x1f2   :  { %1041 = vmatprep.mubr.bf16.mxu0 %v5278_v3 }
 0x2bc   :  { %v450_v57 = vpop.f32.mrb[0].mxu0  ;;  %v491_v59 = vpop.f32.mrb[0].mxu1 }
 0x2bd   :  { %v451_v58 = vadd.f32 %v450_v57, %v391_v56  ;;  %v452_v60 = vpop.f32.mrb[1].mxu0  ;;  %v492_v61 = vadd.f32 %v491_v59, %v391_v56  ;;  %v493_v63 = vpop.f32.mrb[1].mxu1 }
 0x2be   :  { %v453_v62 = vadd.f32 %v452_v60, %v391_v56  ;;  %v454_v1 = vpop.f32.mrb[2].mxu0  ;;  %v495_v6 = vpop.f32.mrb[2].mxu1  ;;  %v494_v8 = vadd.f32 %v493_v63, %v391_v56 }
 0x2bf   :  { %4815 = vtanh.f32 %v451_v58  ;;  %v455_v5 = vpop.f32.mrb[3].mxu0  ;;  %v496_v7 = vpop.f32.mrb[3].mxu1 }
 0x2c0   :  { %4817 = vtanh.f32 %v492_v61 }
 0x2c1   :  { %4819 = vtanh.f32 %v453_v62 }
 0x2c2   :  { %4821 = vtanh.f32 %v494_v8 }
 0x2c4   :  { %v532_v12 = vpop.f32.mrb[4].mxu0 }
 0x2c5   :  { %v533_v13 = vadd.f32 %v532_v12, %v391_v56  ;;  %v4466_v14 = vpop.f32.mrb[5].mxu0 }
 0x2c6   :  { %v535_v16 = vpop.f32.mrb[6].mxu0 }
 0x2c7   :  { %4823 = vtanh.f32 %v533_v13  ;;  %v4467_v18 = vpop.f32.mrb[7].mxu0 }
 0x2c9   :  { %v4816_v19 = vpop.eup %4815 }
 0x2ca   :  { %v4818_v20 = vpop.eup %4817  ;;  %v569_v21 = vmul.f32 %v4816_v19, %v5757_v0 }
 0x2cb   :  { %v4820_v25 = vpop.eup %4819  ;;  %v571_v26 = vmul.f32 %v4818_v20, %v5760_v17 }
 0x2cc   :  { %579 = vrot.lane.b32.xlu1 %v569_v21, %s5282_s10  ;;  %v570_v27 = vmul.f32 %v4820_v25, %v5765_v22  ;;  %v4822_v31 = vpop.eup %4821 }
 0x2cd   :  { %583 = vrot.lane.b32.xlu0 %v571_v26, %s5282_s10  ;;  %v572_v34 = vmul.f32 %v4822_v31, %v5775_v29 }
 0x2d0   :  { %581 = vrot.lane.b32.xlu1 %v570_v27, %s5282_s10 }
 0x2d1   :  { %v4824_v32 = vpop.eup %4823 }
 0x2d2   :  { %v573_v33 = vmul.f32 %v4824_v32, %v5773_v28 }
 0x2d4   :  { %587 = vrot.lane.b32.xlu0 %v573_v33, %s5282_s10  ;;  %585 = vrot.lane.b32.xlu1 %v572_v34, %s5282_s10  ;;  %v839_v33 = vrot.slane %v5746_v54, 5  ;;  %v613_v34 = vld [vmem:[%s6960_s11] sm:$0x1f] }
 0x33e   :  { %v580_v36 = vpop.permute.xlu1 %579 }
 0x33f   :  { %600 = vst.msk [vmem:[#allocation2] sm:$0x1f] %vm7000_vm14, %v580_v36  ;;  %v584_v37 = vpop.permute.xlu0 %583 }
 0x342   :  { %v582_v38 = vpop.permute.xlu1 %581 }
 0x343   :  { %v590_v39 = vsel %vm7001_vm15, %v580_v36, %v582_v38  ;;  %v591_v40 = vsel %vm7001_vm15, %v582_v38, %v584_v37 }
 0x344   :  { %601 = vst [vmem:[#allocation2 + $0x8] sm:$0x1f] %v590_v39  ;;  %602 = vst [vmem:[#allocation2 + $0x10] sm:$0x1f] %v591_v40 }
 0x346   :  { %v588_v41 = vpop.permute.xlu0 %587  ;;  %v586_v42 = vpop.permute.xlu1 %585  ;;  %v606_v43 = vld [vmem:[#allocation2] sm:$0x1f] }
 0x347   :  { %v592_v44 = vsel %vm7001_vm15, %v584_v37, %v586_v42  ;;  %v593_v45 = vsel %vm7001_vm15, %v586_v42, %v588_v41  ;;  %868 = vrot.lane.b32.xlu0 %v606_v43, %s5276_s3  ;;  %614 = vst [vmem:[#allocation5] sm:$0x1f] %v606_v43  ;;  %v625_v46 = vrot.slane %v606_v43, 3  ;;  %v661_v47 = vrot.slane %v606_v43, 6 }
 0x348   :  { %603 = vst [vmem:[#allocation2 + $0x18] sm:$0x1f] %v592_v44  ;;  %605 = vst.msk [vmem:[#allocation2 + $0x20] sm:$0x1f] %vm6989_vm0, %v593_v45  ;;  %v691_v48 = vrot.slane %v606_v43, 1  ;;  %v727_v51 = vrot.slane %v606_v43, 4 }
 0x349   :  { %630 = vrot.lane.b32.xlu1 %v625_v46, %s5271_s29  ;;  %v763_v52 = vrot.slane %v606_v43, 7  ;;  %v794_v56 = vrot.slane %v606_v43, 2  ;;  %v834_v57 = vrot.slane %v606_v43, 5  ;;  %vm6991_vm0 = vcmask 1046528  }
 0x34b   :  { %666 = vrot.lane.b32.xlu0 %v661_v47, %s5273_s25  ;;  %v607_v49 = vld [vmem:[#allocation2 + $0x8] sm:$0x1f]  ;;  %v608_v50 = vld [vmem:[#allocation2 + $0x10] sm:$0x1f] }
 0x34c   :  { %615 = vst [vmem:[#allocation5 + $0x8] sm:$0x1f] %v607_v49  ;;  %616 = vst [vmem:[#allocation5 + $0x10] sm:$0x1f] %v608_v50  ;;  %v626_v58 = vrot.slane %v607_v49, 3  ;;  %v627_v59 = vrot.slane %v608_v50, 3 }
 0x34d   :  { %696 = vrot.lane.b32.xlu1 %v691_v48, %s5270_s30  ;;  %v662_v60 = vrot.slane %v607_v49, 6  ;;  %v663_v61 = vrot.slane %v608_v50, 6  ;;  %v692_v62 = vrot.slane %v607_v49, 1  ;;  %v693_v63 = vrot.slane %v608_v50, 1 }
 0x34e   :  { %v729_v1 = vrot.slane %v608_v50, 4  ;;  %v728_v5 = vrot.slane %v607_v49, 4  ;;  %v765_v6 = vrot.slane %v608_v50, 7  ;;  %v764_v7 = vrot.slane %v607_v49, 7 }
 0x34f   :  { %732 = vrot.lane.b32.xlu0 %v727_v51, %s5272_s28  ;;  %v609_v53 = vld [vmem:[#allocation2 + $0x18] sm:$0x1f]  ;;  %v5795_v55 = vld [vmem:[#allocation2 + $0x20] sm:$0x1f]  ;;  %v796_v8 = vrot.slane %v608_v50, 2  ;;  %v795_v10 = vrot.slane %v607_v49, 2 }
 0x350   :  { %617 = vst [vmem:[#allocation5 + $0x18] sm:$0x1f] %v609_v53  ;;  %619 = vst.msk [vmem:[#allocation5 + $0x20] sm:$0x1f] %vm618_vm11, %v5795_v55  ;;  %v835_v11 = vrot.slane %v607_v49, 5  ;;  %v836_v12 = vrot.slane %v608_v50, 5 }
 0x351   :  { %768 = vrot.lane.b32.xlu1 %v763_v52, %s5275_s20  ;;  %v628_v13 = vrot.slane %v609_v53, 3  ;;  %v837_v14 = vrot.slane %v609_v53, 5  ;;  %v664_v16 = vrot.slane %v609_v53, 6  ;;  %v629_v18 = vrot.slane %v5795_v55, 3 }
 0x352   :  { %v694_v19 = vrot.slane %v609_v53, 1  ;;  %v665_v20 = vrot.slane %v5795_v55, 6  ;;  %v730_v21 = vrot.slane %v609_v53, 4  ;;  %v695_v23 = vrot.slane %v5795_v55, 1 }
 0x353   :  { %800 = vrot.lane.b32.xlu0 %v794_v56, %s5274_s5  ;;  %v766_v24 = vrot.slane %v609_v53, 7  ;;  %v731_v25 = vrot.slane %v5795_v55, 4  ;;  %v797_v26 = vrot.slane %v609_v53, 2  ;;  %v767_v27 = vrot.slane %v5795_v55, 7 }
 0x354   :  { %v798_v31 = vrot.slane %v5795_v55, 2  ;;  %v838_v32 = vrot.slane %v5795_v55, 5 }
 0x355   :  { %870 = vrot.lane.b32.xlu1 %v607_v49, %s5276_s3 }
 0x357   :  { %872 = vrot.lane.b32.xlu0 %v608_v50, %s5276_s3 }
 0x359   :  { %840 = vrot.lane.b32.xlu1 %v834_v57, %s5277_s23 }
 0x35b   :  { %874 = vrot.lane.b32.xlu0 %v609_v53, %s5276_s3 }
 0x35d   :  { %632 = vrot.lane.b32.xlu1 %v626_v58, %s5271_s29 }
 0x35f   :  { %634 = vrot.lane.b32.xlu0 %v627_v59, %s5271_s29 }
 0x361   :  { %668 = vrot.lane.b32.xlu1 %v662_v60, %s5273_s25 }
 0x363   :  { %670 = vrot.lane.b32.xlu0 %v663_v61, %s5273_s25 }
 0x365   :  { %698 = vrot.lane.b32.xlu1 %v692_v62, %s5270_s30 }
 0x367   :  { %700 = vrot.lane.b32.xlu0 %v693_v63, %s5270_s30 }
 0x369   :  { %736 = vrot.lane.b32.xlu1 %v729_v1, %s5272_s28 }
 0x36b   :  { %734 = vrot.lane.b32.xlu0 %v728_v5, %s5272_s28 }
 0x36d   :  { %772 = vrot.lane.b32.xlu1 %v765_v6, %s5275_s20 }
 0x36f   :  { %770 = vrot.lane.b32.xlu0 %v764_v7, %s5275_s20 }
 0x371   :  { %804 = vrot.lane.b32.xlu1 %v796_v8, %s5274_s5 }
 0x373   :  { %802 = vrot.lane.b32.xlu0 %v795_v10, %s5274_s5 }
 0x375   :  { %842 = vrot.lane.b32.xlu1 %v835_v11, %s5277_s23 }
 0x377   :  { %844 = vrot.lane.b32.xlu0 %v836_v12, %s5277_s23 }
 0x379   :  { %636 = vrot.lane.b32.xlu1 %v628_v13, %s5271_s29 }
 0x37b   :  { %846 = vrot.lane.b32.xlu0 %v837_v14, %s5277_s23 }
 0x37d   :  { %672 = vrot.lane.b32.xlu1 %v664_v16, %s5273_s25 }
 0x37f   :  { %638 = vrot.lane.b32.xlu0 %v629_v18, %s5271_s29 }
 0x381   :  { %702 = vrot.lane.b32.xlu1 %v694_v19, %s5270_s30 }
 0x383   :  { %674 = vrot.lane.b32.xlu0 %v665_v20, %s5273_s25 }
 0x385   :  { %738 = vrot.lane.b32.xlu1 %v730_v21, %s5272_s28 }
 0x387   :  { %704 = vrot.lane.b32.xlu0 %v695_v23, %s5270_s30 }
 0x389   :  { %774 = vrot.lane.b32.xlu1 %v766_v24, %s5275_s20 }
 0x38b   :  { %740 = vrot.lane.b32.xlu0 %v731_v25, %s5272_s28 }
 0x38d   :  { %806 = vrot.lane.b32.xlu1 %v797_v26, %s5274_s5 }
 0x38f   :  { %776 = vrot.lane.b32.xlu0 %v767_v27, %s5275_s20 }
 0x391   :  { %876 = vrot.lane.b32.xlu1 %v5795_v55, %s5276_s3 }
 0x393   :  { %808 = vrot.lane.b32.xlu0 %v798_v31, %s5274_s5 }
 0x395   :  { %848 = vrot.lane.b32.xlu1 %v838_v32, %s5277_s23 }
 0x397   :  { %850 = vrot.lane.b32.xlu0 %v839_v33, %s5277_s23 }
 0x399   :  { %878 = vrot.lane.b32.xlu1 %v5746_v54, %s5276_s3 }
 0x39b   :  { %942 = vperm.xlu0 %4773, %v613_v34  }
 0x3b9   :  { %v869_v36 = vpop.permute.xlu0 %868 }
 0x3bb   :  { %v631_v37 = vpop.permute.xlu1 %630 }
 0x3bd   :  { %v667_v38 = vpop.permute.xlu0 %666 }
 0x3bf   :  { %v697_v39 = vpop.permute.xlu1 %696 }
 0x3c1   :  { %v733_v40 = vpop.permute.xlu0 %732 }
 0x3c3   :  { %v769_v41 = vpop.permute.xlu1 %768 }
 0x3c5   :  { %v801_v42 = vpop.permute.xlu0 %800 }
 0x3c7   :  { %v871_v43 = vpop.permute.xlu1 %870 }
 0x3c8   :  { %v880_v44 = vsel %vm367_vm7, %v869_v36, %v871_v43 }
 0x3c9   :  { %890 = vst [vmem:[#allocation5 + $0xc8] sm:$0x1f] %v880_v44  ;;  %v873_v45 = vpop.permute.xlu0 %872 }
 0x3ca   :  { %v881_v46 = vsel %vm367_vm7, %v871_v43, %v873_v45  ;;  %v951_v43 = vsel %vm6990_vm13, 4294967295, %v5280_v30  ;;  %vm6994_vm13 = vcmask 800770  }
 0x3cb   :  { %891 = vst [vmem:[#allocation5 + $0xd0] sm:$0x1f] %v881_v46  ;;  %v841_v47 = vpop.permute.xlu1 %840 }
 0x3cd   :  { %v5851_v48 = vpop.permute.xlu0 %874 }
 0x3ce   :  { %v882_v54 = vsel %vm367_vm7, %v873_v45, %v5851_v48 }
 0x3cf   :  { %892 = vst [vmem:[#allocation5 + $0xd8] sm:$0x1f] %v882_v54  ;;  %v633_v49 = vpop.permute.xlu1 %632 }
 0x3d0   :  { %v640_v50 = vsel %vm304_vm2, %v631_v37, %v633_v49 }
 0x3d1   :  { %649 = vst [vmem:[#allocation5 + $0x28] ss:$-36 sps:$4 sm:$0xe3] %v640_v50   ;;  %v635_v51 = vpop.permute.xlu0 %634 }
 0x3d2   :  { %v641_v52 = vsel %vm304_vm2, %v633_v49, %v635_v51  ;;  %v921_v50 = vld [vmem:[#allocation5 + $0xd0] sm:$0x1f] }
 0x3d3   :  { %650 = vst [vmem:[#allocation5 + $0x30] ss:$-36 sps:$4 sm:$0xe3] %v641_v52   ;;  %v669_v53 = vpop.permute.xlu1 %668  ;;  %v5893_v52 = vsel %vm6991_vm0, %v951_v43, 0  ;;  %vm6998_vm0 = vcmask 801799  }
 0x3d4   :  { %v676_v55 = vsel %vm6995_vm4, %v667_v38, %v669_v53 }
 0x3d5   :  { %685 = vst [vmem:[#allocation5 + $0x28] sm:$0x7c] %v676_v55  ;;  %v671_v56 = vpop.permute.xlu0 %670 }
 0x3d6   :  { %v677_v57 = vsel %vm6995_vm4, %v669_v53, %v671_v56 }
 0x3d7   :  { %686 = vst [vmem:[#allocation5 + $0x30] sm:$0x7c] %v677_v57  ;;  %v699_v58 = vpop.permute.xlu1 %698 }
 0x3d8   :  { %v706_v59 = vsel %vm322_vm1, %v697_v39, %v699_v58  ;;  %v895_v18 = vld [vmem:[#allocation5] sm:$0xff] }
 0x3d9   :  { %715 = vst [vmem:[#allocation5 + $0x50] ss:$-36 sps:$4 sm:$0x8f] %v706_v59   ;;  %v5860_v60 = vpop.permute.xlu0 %700 }
 0x3da   :  { %v707_v61 = vsel %vm322_vm1, %v699_v58, %v5860_v60  ;;  %v896_v12 = vld [vmem:[#allocation5 + $0x8] sm:$0xff] }
 0x3db   :  { %716 = vst [vmem:[#allocation5 + $0x58] ss:$-36 sps:$4 sm:$0x8f] %v707_v61   ;;  %v5864_v62 = vpop.permute.xlu1 %736 }
 0x3dd   :  { %v735_v63 = vpop.permute.xlu0 %734 }
 0x3de   :  { %v742_v1 = vsel %vm331_vm3, %v733_v40, %v735_v63  ;;  %v743_v5 = vsel %vm331_vm3, %v735_v63, %v5864_v62 }
 0x3df   :  { %751 = vst [vmem:[#allocation5 + $0x78] ss:$-36 sps:$4 sm:$0xf1] %v742_v1   ;;  %752 = vst [vmem:[#allocation5 + $0x80] ss:$-36 sps:$4 sm:$0xf1] %v743_v5   ;;  %v5869_v6 = vpop.permute.xlu1 %772 }
 0x3e0   :  { %v900_v8 = vld [vmem:[#allocation5 + $0x28] sm:$0xff] }
 0x3e1   :  { %v771_v7 = vpop.permute.xlu0 %770  ;;  %v925_v19 = vpack.c.bf16 %v900_v8, %v895_v18 }
 0x3e2   :  { %v778_v10 = vsel %vm7016_vm6, %v769_v41, %v771_v7  ;;  %v779_v11 = vsel %vm7016_vm6, %v771_v7, %v5869_v6  ;;  %v901_v13 = vld [vmem:[#allocation5 + $0x30] sm:$0xff] }
 0x3e3   :  { %787 = vst [vmem:[#allocation5 + $0x78] sm:$0x3e] %v778_v10  ;;  %788 = vst [vmem:[#allocation5 + $0x80] sm:$0x3e] %v779_v11  ;;  %v5874_v14 = vpop.permute.xlu1 %804  ;;  %v926_v16 = vpack.c.bf16 %v901_v13, %v896_v12 }
 0x3e5   :  { %v803_v20 = vpop.permute.xlu0 %802  ;;  %968 = vmatprep.subr.bf16.mxu1 %v926_v16 }
 0x3e6   :  { %v812_v21 = vsel %vm349_vm5, %v801_v42, %v803_v20  ;;  %v813_v23 = vsel %vm349_vm5, %v803_v20, %v5874_v14  ;;  %969 = vmatpush1.bf16.msra.mxu1 %v925_v19  ;;  %v906_v34 = vld [vmem:[#allocation5 + $0x58] sm:$0xff]  ;;  %v905_v38 = vld [vmem:[#allocation5 + $0x50] sm:$0xff] }
 0x3e7   :  { %822 = vst [vmem:[#allocation5 + $0xa0] ss:$-36 sps:$4 sm:$0xc7] %v812_v21   ;;  %823 = vst [vmem:[#allocation5 + $0xa8] ss:$-36 sps:$4 sm:$0xc7] %v813_v23   ;;  %v843_v24 = vpop.permute.xlu1 %842 }
 0x3e8   :  { %v852_v25 = vsel %vm358_vm8, %v841_v47, %v843_v24  ;;  %v920_v47 = vld [vmem:[#allocation5 + $0xc8] sm:$0x1f] }
 0x3e9   :  { %862 = vst [vmem:[#allocation5 + $0xa0] sm:$0xf8] %v852_v25  ;;  %v845_v26 = vpop.permute.xlu0 %844 }
 0x3ea   :  { %v853_v27 = vsel %vm358_vm8, %v843_v24, %v845_v26 }
 0x3eb   :  { %863 = vst [vmem:[#allocation5 + $0xa8] sm:$0xf8] %v853_v27  ;;  %v637_v31 = vpop.permute.xlu1 %636 }
 0x3ec   :  { %v642_v32 = vsel %vm304_vm2, %v635_v51, %v637_v31 }
 0x3ed   :  { %651 = vst [vmem:[#allocation5 + $0x38] ss:$-36 sps:$4 sm:$0xe3] %v642_v32   ;;  %v5882_v33 = vpop.permute.xlu0 %846 }
 0x3ee   :  { %v854_v36 = vsel %vm358_vm8, %v845_v26, %v5882_v33  ;;  %v911_v37 = vld [vmem:[#allocation5 + $0x80] sm:$0xff]  ;;  %v910_v39 = vld [vmem:[#allocation5 + $0x78] sm:$0xff] }
 0x3ef   :  { %864 = vst [vmem:[#allocation5 + $0xb0] sm:$0xf8] %v854_v36  ;;  %v673_v40 = vpop.permute.xlu1 %672  ;;  %v931_v41 = vpack.c.bf16 %v911_v37, %v906_v34  ;;  %v930_v42 = vpack.c.bf16 %v910_v39, %v905_v38 }
 0x3f0   :  { %v678_v44 = vsel %vm6995_vm4, %v671_v56, %v673_v40  ;;  %v915_v45 = vld [vmem:[#allocation5 + $0xa0] sm:$0xff] }
 0x3f1   :  { %687 = vst [vmem:[#allocation5 + $0x38] sm:$0x7c] %v678_v44  ;;  %v639_v46 = vpop.permute.xlu0 %638  ;;  %970 = vmatprep.subr.bf16.mxu1 %v931_v41  ;;  %v935_v51 = vpack.c.bf16 %v920_v47, %v915_v45 }
 0x3f2   :  { %v643_v54 = vsel %vm304_vm2, %v637_v31, %v639_v46  ;;  %654 = vst.msk [vmem:[#allocation5 + $0x20] sm:$0xe0] %vm6993_vm9, %v639_v46  ;;  %971 = vmatpush1.bf16.msra.mxu1 %v930_v42  ;;  %v916_v49 = vld [vmem:[#allocation5 + $0xa8] sm:$0xff]  ;;  %vm7002_vm9 = vcmask 367616  }
 0x3f3   :  { %660 = vst.msk [vmem:[#allocation5 + $0x48] sm:$0x3] %vm6992_vm10, %v639_v46  ;;  %652 = vst [vmem:[#allocation5 + $0x40] ss:$-36 sps:$4 sm:$0xe3] %v643_v54   ;;  %v703_v53 = vpop.permute.xlu1 %702  ;;  %v936_v55 = vpack.c.bf16 %v921_v50, %v916_v49  ;;  %v954_v61 = vand.u32 %v5893_v52, %v935_v51  ;;  %vm6996_vm10 = vcmask 797696  }
 0x3f4   :  { %v708_v56 = vsel %vm322_vm1, %v5860_v60, %v703_v53  ;;  %v5903_v60 = vld [vmem:[#allocation10] sm:$0x7]  ;;  %v897_v27 = vld [vmem:[#allocation5 + $0x10] sm:$0xff]  ;;  %v922_v49 = vld [vmem:[#allocation5 + $0xd8] sm:$0x1f] }
 0x3f5   :  { %717 = vst [vmem:[#allocation5 + $0x60] ss:$-36 sps:$4 sm:$0x8f] %v708_v56   ;;  %v675_v57 = vpop.permute.xlu0 %674  ;;  %v957_v58 = vand.u32 %v5893_v52, %v936_v55 }
 0x3f6   :  { %v679_v59 = vsel %vm6995_vm4, %v673_v40, %v675_v57  ;;  %690 = vst.msk [vmem:[#allocation5 + $0x48] sm:$0x7c] %vm6994_vm13, %v675_v57  ;;  %vm755_vm13 = vcmask 801796   ;;  %vm761_vm4 = vcmask 794624  }
 0x3f7   :  { %688 = vst [vmem:[#allocation5 + $0x40] sm:$0x7c] %v679_v59  ;;  %v739_v63 = vpop.permute.xlu1 %738  ;;  %972 = vmatprep.subr.bf16.mxu1 %v957_v58 }
 0x3f8   :  { %v744_v1 = vsel %vm331_vm3, %v5864_v62, %v739_v63  ;;  %973 = vmatpush1.bf16.msra.mxu1 %v954_v61 }
 0x3f9   :  { %753 = vst [vmem:[#allocation5 + $0x88] ss:$-36 sps:$4 sm:$0xf1] %v744_v1   ;;  %v705_v5 = vpop.permute.xlu0 %704  ;;  %4468 = vmatprep.subr.bf16.mxu1 %v5279_v4 }
 0x3fa   :  { %v709_v7 = vsel %vm322_vm1, %v703_v53, %v705_v5  ;;  %720 = vst.msk [vmem:[#allocation5 + $0x48] sm:$0x80] %vm6998_vm0, %v705_v5  ;;  %v898_v23 = vld [vmem:[#allocation5 + $0x18] sm:$0xff]  ;;  %vm832_vm0 = vcmask 796672  }
 0x3fb   :  { %726 = vst.msk [vmem:[#allocation5 + $0x70] sm:$0xf] %vm6996_vm10, %v705_v5  ;;  %718 = vst [vmem:[#allocation5 + $0x68] ss:$-36 sps:$4 sm:$0x8f] %v709_v7   ;;  %v775_v8 = vpop.permute.xlu1 %774  ;;  %4395 = vmatmul.mubr.msk.bf16.vlgmr.msra.gmra.mrb[4].mxu1 %vm7002_vm9, %v5903_v60  ;;  %vm6999_vm10 = vcmask 799745  }
 0x3fc   :  { %v780_v62 = vsel %vm7016_vm6, %v5869_v6, %v775_v8  ;;  %4474 = vmatprep.mubr.msk.bf16.mxu1 %vm6997_vm12, %v5279_v4  ;;  %v899_v6 = vld [vmem:[#allocation5 + $0x20] sm:$0xff]  ;;  %v902_v19 = vld [vmem:[#allocation5 + $0x38] sm:$0xff]  ;;  %vm826_vm12 = vcmask 801798  }
 0x3fd   :  { %789 = vst [vmem:[#allocation5 + $0x88] sm:$0x3e] %v780_v62  ;;  %v741_v10 = vpop.permute.xlu0 %740 }
 0x3fe   :  { %v745_v11 = vsel %vm331_vm3, %v739_v63, %v741_v10  ;;  %756 = vst.msk [vmem:[#allocation5 + $0x70] sm:$0xf0] %vm755_vm13, %v741_v10 }
 0x3ff   :  { %762 = vst.msk [vmem:[#allocation5 + $0x98] sm:$0x1] %vm761_vm4, %v741_v10  ;;  %754 = vst [vmem:[#allocation5 + $0x90] ss:$-36 sps:$4 sm:$0xf1] %v745_v11   ;;  %v807_v12 = vpop.permute.xlu1 %806 }
 0x400   :  { %v814_v13 = vsel %vm349_vm5, %v5874_v14, %v807_v12  ;;  %v927_v14 = vpack.c.bf16 %v902_v19, %v897_v27  ;;  %v907_v54 = vld [vmem:[#allocation5 + $0x60] sm:$0xff] }
 0x401   :  { %824 = vst [vmem:[#allocation5 + $0xb0] ss:$-36 sps:$4 sm:$0xc7] %v814_v13   ;;  %v777_v16 = vpop.permute.xlu0 %776  ;;  %v904_v18 = vld [vmem:[#allocation5 + $0x48] sm:$0xff] }
 0x402   :  { %v781_v20 = vsel %vm7016_vm6, %v775_v8, %v777_v16  ;;  %792 = vst.msk [vmem:[#allocation5 + $0x98] sm:$0x3e] %vm6999_vm10, %v777_v16  ;;  %v929_v21 = vpack.c.bf16 %v904_v18, %v899_v6  ;;  %v903_v24 = vld [vmem:[#allocation5 + $0x40] sm:$0xff]  ;;  %vm866_vm10 = vcmask 801795  }
 0x403   :  { %790 = vst [vmem:[#allocation5 + $0x90] sm:$0x3e] %v781_v20  ;;  %v877_v25 = vpop.permute.xlu1 %876  ;;  %v928_v26 = vpack.c.bf16 %v903_v24, %v898_v23 }
 0x404   :  { %v883_v31 = vsel %vm367_vm7, %v5851_v48, %v877_v25  ;;  %4469 = vmatpush3.bf16.msra.mxu1 %v929_v21 }
 0x405   :  { %893 = vst [vmem:[#allocation5 + $0xe0] sm:$0x1f] %v883_v31  ;;  %v809_v32 = vpop.permute.xlu0 %808  ;;  %1009 = vmatprep.subr.bf16.mxu0 %v928_v26  ;;  %4470 = vmatprep.subr.bf16.mxu1 %v5279_v4  ;;  %v909_v41 = vld [vmem:[#allocation5 + $0x70] sm:$0xff] }
 0x406   :  { %v815_v34 = vsel %vm349_vm5, %v807_v12, %v809_v32  ;;  %v816_v36 = vsel %vm349_vm5, %v809_v32, %v5782_v35  ;;  %1010 = vmatpush1.bf16.msra.mxu0 %v927_v14  ;;  %v908_v44 = vld [vmem:[#allocation5 + $0x68] sm:$0xff] }
 0x407   :  { %825 = vst [vmem:[#allocation5 + $0xb8] ss:$-36 sps:$4 sm:$0xc7] %v815_v34   ;;  %827 = vst.msk [vmem:[#allocation5 + $0x98] sm:$0xc0] %vm826_vm12, %v816_v36  ;;  %v849_v48 = vpop.permute.xlu1 %848 }
 0x408   :  { %833 = vst.msk [vmem:[#allocation5 + $0xc0] sm:$0x7] %vm832_vm0, %v816_v36  ;;  %v855_v37 = vsel %vm358_vm8, %v5882_v33, %v849_v48  ;;  %v912_v42 = vld [vmem:[#allocation5 + $0x88] sm:$0xff]  ;;  %v917_v43 = vld [vmem:[#allocation5 + $0xb0] sm:$0xff] }
 0x409   :  { %865 = vst [vmem:[#allocation5 + $0xb8] sm:$0xf8] %v855_v37  ;;  %v851_v38 = vpop.permute.xlu0 %850  ;;  %v932_v50 = vpack.c.bf16 %v912_v42, %v907_v54  ;;  %v937_v55 = vpack.c.bf16 %v922_v49, %v917_v43 }
 0x40a   :  { %v856_v39 = vsel %vm358_vm8, %v849_v48, %v851_v38 }
 0x40b   :  { %867 = vst.msk [vmem:[#allocation5 + $0xc0] sm:$0xf8] %vm866_vm10, %v856_v39  ;;  %v879_v40 = vpop.permute.xlu1 %878  ;;  %v960_v58 = vand.u32 %v5893_v52, %v937_v55 }
 0x40c   :  { %v884_v35 = vsel %vm367_vm7, %v877_v25, %v879_v40  ;;  %v923_v53 = vld [vmem:[#allocation5 + $0xe0] sm:$0x1f] }
 0x40d   :  { %894 = vst.msk [vmem:[#allocation5 + $0xe8] sm:$0x1f] %vm618_vm11, %v884_v35 }
 0x40e   :  { %v913_v45 = vld [vmem:[#allocation5 + $0x90] sm:$0xff]  ;;  %v914_v46 = vld [vmem:[#allocation5 + $0x98] sm:$0xff] }
 0x40f   :  { %v933_v47 = vpack.c.bf16 %v913_v45, %v908_v44  ;;  %v934_v33 = vpack.c.bf16 %v914_v46, %v909_v41 }
 0x410   :  { %v918_v51 = vld [vmem:[#allocation5 + $0xb8] sm:$0xff] }
 0x411   :  { %1011 = vmatprep.subr.bf16.mxu0 %v933_v47  ;;  %4471 = vmatpush3.bf16.msra.mxu1 %v934_v33  ;;  %v938_v56 = vpack.c.bf16 %v923_v53, %v918_v51 }
 0x412   :  { %1012 = vmatpush1.bf16.msra.mxu0 %v932_v50  ;;  %4472 = vmatprep.subr.bf16.mxu1 %v5279_v4  ;;  %v919_v59 = vld [vmem:[#allocation5 + $0xc0] sm:$0xff] }
 0x413   :  { %v963_v57 = vand.u32 %v5893_v52, %v938_v56 }
 0x414   :  { %v924_v61 = vld [vmem:[#allocation5 + $0xe8] sm:$0x1f] }
 0x415   :  { %1013 = vmatprep.subr.bf16.mxu0 %v963_v57  ;;  %v939_v63 = vpack.c.bf16 %v924_v61, %v919_v59 }
 0x416   :  { %1014 = vmatpush1.bf16.msra.mxu0 %v960_v58 }
 0x417   :  { %v966_v1 = vand.u32 %v5893_v52, %v939_v63 }
 0x419   :  { %4396 = vmatmul.mubr.msk.bf16.vlgmr.msra.gmra.mrb[8].mxu0 %vm7002_vm9, %v5903_v60  ;;  %4473 = vmatpush3.bf16.msra.mxu1 %v966_v1 }
 0x41a   :  { %1506 = vmatprep.mubr.bf16.mxu0 %v5278_v3  ;;  %v943_v4 = vpop.permute.xlu0 %942 }
 0x41c   :  { %4475 = vmatmul.mubr.msk.bf16.vlgmr.msra.gmra.mrb[8].mxu1 %vm7002_vm9, %v5903_v60  ;;  %vm7053_vm9 = vcmask 799745  }
 0x41d   :  { %1547 = vmatprep.mubr.bf16.mxu1 %v5278_v3 }
 0x4ce   :  { %v1002_v5 = vpop.f32.mrb[4].mxu1 }
 0x4cf   :  { %v1003_v7 = vadd.f32 %v1002_v5, %v943_v4  ;;  %v1004_v8 = vpop.f32.mrb[5].mxu1 }
 0x4d0   :  { %v1005_v62 = vadd.f32 %v1004_v8, %v943_v4  ;;  %v1006_v10 = vpop.f32.mrb[6].mxu1 }
 0x4d1   :  { %4825 = vtanh.f32 %v1003_v7  ;;  %v1007_v11 = vpop.f32.mrb[7].mxu1 }
 0x4d2   :  { %4827 = vtanh.f32 %v1005_v62 }
 0x4db   :  { %v4826_v12 = vpop.eup %4825 }
 0x4dc   :  { %v4828_v13 = vpop.eup %4827  ;;  %v1095_v16 = vmul.f32 %v4826_v12, %v5757_v0 }
 0x4dd   :  { %v1096_v6 = vmul.f32 %v4828_v13, %v5765_v22 }
 0x4de   :  { %1105 = vrot.lane.b32.xlu1 %v1095_v16, %s5282_s10 }
 0x4df   :  { %1107 = vrot.lane.b32.xlu0 %v1096_v6, %s5282_s10 }
 0x4ec   :  { %v1043_v60 = vpop.f32.mrb[8].mxu0 }
 0x4ed   :  { %v1044_v18 = vadd.f32 %v1043_v60, %v943_v4  ;;  %v1045_v19 = vpop.f32.mrb[9].mxu0 }
 0x4ee   :  { %v1046_v20 = vadd.f32 %v1045_v19, %v943_v4  ;;  %v1047_v21 = vpop.f32.mrb[10].mxu0 }
 0x4ef   :  { %4829 = vtanh.f32 %v1044_v18  ;;  %v1048_v23 = vpop.f32.mrb[11].mxu0  ;;  %v1084_v24 = vpop.f32.mrb[8].mxu1 }
 0x4f0   :  { %4831 = vtanh.f32 %v1046_v20  ;;  %v1085_v25 = vadd.f32 %v1084_v24, %v943_v4  ;;  %v4476_v26 = vpop.f32.mrb[9].mxu1 }
 0x4f1   :  { %v1087_v27 = vpop.f32.mrb[10].mxu1 }
 0x4f2   :  { %4833 = vtanh.f32 %v1085_v25  ;;  %v4477_v31 = vpop.f32.mrb[11].mxu1 }
 0x4f9   :  { %v4830_v14 = vpop.eup %4829 }
 0x4fa   :  { %v4832_v32 = vpop.eup %4831  ;;  %v1097_v34 = vmul.f32 %v4830_v14, %v5760_v17  ;;  %v1134_v14 = vld [vmem:[#allocation2 + $0x28] sm:$0x1f] }
 0x4fb   :  { %v1098_v36 = vmul.f32 %v4832_v32, %v5775_v29 }
 0x4fc   :  { %v4834_v48 = vpop.eup %4833  ;;  %1109 = vrot.lane.b32.xlu1 %v1097_v34, %s5282_s10 }
 0x4fd   :  { %1111 = vrot.lane.b32.xlu0 %v1098_v36, %s5282_s10  ;;  %v1099_v37 = vmul.f32 %v4834_v48, %v5773_v28  ;;  %v1313_v36 = vrot.slane %v1134_v14, 2  ;;  %v1351_v48 = vrot.slane %v1134_v14, 5 }
 0x500   :  { %1113 = vrot.lane.b32.xlu1 %v1099_v37, %s5282_s10  ;;  %v1136_v37 = vld [vmem:[%s6961_s12] sm:$0x1f]  ;;  %s5283_s12 = smov 118  }
 0x550   :  { %v1106_v38 = vpop.permute.xlu1 %1105 }
 0x551   :  { %1124 = vst.msk [vmem:[#allocation2] sm:$0x1f] %vm7000_vm14, %v1106_v38  ;;  %v1108_v39 = vpop.permute.xlu0 %1107  ;;  %vm7049_vm14 = vcmask 954368  }
 0x552   :  { %v1115_v40 = vsel %vm7001_vm15, %v1106_v38, %v1108_v39 }
 0x553   :  { %1125 = vst [vmem:[#allocation2 + $0x8] sm:$0x1f] %v1115_v40 }
 0x558   :  { %v5958_v35 = vld [vmem:[#allocation2] sm:$0x1f] }
 0x559   :  { %v1181_v41 = vrot.slane %v5958_v35, 6  ;;  %1137 = vst [vmem:[#allocation5] sm:$0x1f] %v5958_v35  ;;  %v1147_v42 = vrot.slane %v5958_v35, 3  ;;  %v1244_v44 = vrot.slane %v5958_v35, 4  ;;  %v1210_v45 = vrot.slane %v5958_v35, 1 }
 0x55a   :  { %v1130_v43 = vld [vmem:[#allocation2 + $0x8] sm:$0x1f]  ;;  %v1308_v46 = vrot.slane %v5958_v35, 2  ;;  %v1278_v47 = vrot.slane %v5958_v35, 7  ;;  %v1346_v32 = vrot.slane %v5958_v35, 5 }
 0x55b   :  { %1186 = vrot.lane.b32.xlu1 %v1181_v41, %s5273_s25  ;;  %1152 = vrot.lane.b32.xlu0 %v1147_v42, %s5271_s29  ;;  %1138 = vst [vmem:[#allocation5 + $0x8] sm:$0x1f] %v1130_v43  ;;  %v1245_v33 = vrot.slane %v1130_v43, 4  ;;  %v1279_v54 = vrot.slane %v1130_v43, 7  ;;  %v1148_v49 = vrot.slane %v1130_v43, 3  ;;  %v1309_v50 = vrot.slane %v1130_v43, 2 }
 0x55c   :  { %v1182_v51 = vrot.slane %v1130_v43, 6  ;;  %v1211_v58 = vrot.slane %v1130_v43, 1  ;;  %v1347_v63 = vrot.slane %v1130_v43, 5 }
 0x55f   :  { %1249 = vrot.lane.b32.xlu1 %v1244_v44, %s5272_s28  ;;  %1215 = vrot.lane.b32.xlu0 %v1210_v45, %s5270_s30 }
 0x563   :  { %1314 = vrot.lane.b32.xlu1 %v1308_v46, %s5274_s5  ;;  %1283 = vrot.lane.b32.xlu0 %v1278_v47, %s5275_s20 }
 0x567   :  { %1381 = vrot.lane.b32.xlu0 %v1130_v43, %s5276_s3  ;;  %1251 = vrot.lane.b32.xlu1 %v1245_v33, %s5272_s28 }
 0x56b   :  { %1285 = vrot.lane.b32.xlu1 %v1279_v54, %s5275_s20  ;;  %1154 = vrot.lane.b32.xlu0 %v1148_v49, %s5271_s29 }
 0x56e   :  { %v1110_v53 = vpop.permute.xlu1 %1109 }
 0x56f   :  { %v1116_v55 = vsel %vm7001_vm15, %v1108_v39, %v1110_v53  ;;  %v1112_v56 = vpop.permute.xlu0 %1111  ;;  %1316 = vrot.lane.b32.xlu1 %v1309_v50, %s5274_s5  ;;  %1188 = vrot.lane.b32.xlu0 %v1182_v51, %s5273_s25 }
 0x570   :  { %1126 = vst [vmem:[#allocation2 + $0x10] sm:$0x1f] %v1116_v55  ;;  %v1117_v57 = vsel %vm7001_vm15, %v1110_v53, %v1112_v56 }
 0x571   :  { %1127 = vst [vmem:[#allocation2 + $0x18] sm:$0x1f] %v1117_v57 }
 0x572   :  { %v1114_v59 = vpop.permute.xlu1 %1113 }
 0x573   :  { %v1118_v61 = vsel %vm7001_vm15, %v1112_v56, %v1114_v59  ;;  %1217 = vrot.lane.b32.xlu0 %v1211_v58, %s5270_s30  ;;  %vm7052_vm15 = vcmask 795648  }
 0x574   :  { %1128 = vst.msk [vmem:[#allocation2 + $0x20] sm:$0x1f] %vm7049_vm14, %v1118_v61  ;;  %vm7050_vm14 = vcmask 1031168  }
 0x577   :  { %1354 = vrot.lane.b32.xlu0 %v1347_v63, %s5277_s23  ;;  %v1131_v1 = vld [vmem:[#allocation2 + $0x10] sm:$0x1f] }
 0x578   :  { %1383 = vrot.lane.b32.xlu1 %v1131_v1, %s5276_s3  ;;  %1139 = vst [vmem:[#allocation5 + $0x10] sm:$0x1f] %v1131_v1  ;;  %v1132_v4 = vld [vmem:[#allocation2 + $0x18] sm:$0x1f]  ;;  %v1149_v5 = vrot.slane %v1131_v1, 3  ;;  %v1246_v8 = vrot.slane %v1131_v1, 4 }
 0x579   :  { %1140 = vst [vmem:[#allocation5 + $0x18] sm:$0x1f] %v1132_v4  ;;  %v1183_v62 = vrot.slane %v1131_v1, 6  ;;  %v1280_v10 = vrot.slane %v1131_v1, 7  ;;  %v1212_v11 = vrot.slane %v1131_v1, 1  ;;  %v1310_v12 = vrot.slane %v1131_v1, 2 }
 0x57a   :  { %v1348_v13 = vrot.slane %v1131_v1, 5  ;;  %v1150_v16 = vrot.slane %v1132_v4, 3  ;;  %v1247_v6 = vrot.slane %v1132_v4, 4  ;;  %v1184_v60 = vrot.slane %v1132_v4, 6 }
 0x57b   :  { %1385 = vrot.lane.b32.xlu0 %v1132_v4, %s5276_s3  ;;  %v1133_v7 = vld [vmem:[#allocation2 + $0x20] sm:$0x1f]  ;;  %v1281_v18 = vrot.slane %v1132_v4, 7  ;;  %v1213_v19 = vrot.slane %v1132_v4, 1  ;;  %v1311_v20 = vrot.slane %v1132_v4, 2  ;;  %v1349_v21 = vrot.slane %v1132_v4, 5 }
 0x57c   :  { %1156 = vrot.lane.b32.xlu1 %v1149_v5, %s5271_s29  ;;  %1141 = vst.msk [vmem:[#allocation5 + $0x20] sm:$0x1f] %vm618_vm11, %v1133_v7  ;;  %v1248_v23 = vrot.slane %v1133_v7, 4  ;;  %v1151_v24 = vrot.slane %v1133_v7, 3  ;;  %v1282_v25 = vrot.slane %v1133_v7, 7  ;;  %v1185_v26 = vrot.slane %v1133_v7, 6 }
 0x57d   :  { %v1312_v27 = vrot.slane %v1133_v7, 2  ;;  %v1214_v31 = vrot.slane %v1133_v7, 1  ;;  %v1350_v34 = vrot.slane %v1133_v7, 5 }
 0x57f   :  { %1253 = vrot.lane.b32.xlu0 %v1246_v8, %s5272_s28 }
 0x580   :  { %1190 = vrot.lane.b32.xlu1 %v1183_v62, %s5273_s25 }
 0x583   :  { %1287 = vrot.lane.b32.xlu0 %v1280_v10, %s5275_s20 }
 0x584   :  { %1219 = vrot.lane.b32.xlu1 %v1212_v11, %s5270_s30 }
 0x587   :  { %1318 = vrot.lane.b32.xlu0 %v1310_v12, %s5274_s5 }
 0x588   :  { %1356 = vrot.lane.b32.xlu1 %v1348_v13, %s5277_s23 }
 0x58b   :  { %1158 = vrot.lane.b32.xlu0 %v1150_v16, %s5271_s29 }
 0x58c   :  { %1255 = vrot.lane.b32.xlu1 %v1247_v6, %s5272_s28 }
 0x58f   :  { %1192 = vrot.lane.b32.xlu0 %v1184_v60, %s5273_s25 }
 0x590   :  { %1289 = vrot.lane.b32.xlu1 %v1281_v18, %s5275_s20 }
 0x593   :  { %1221 = vrot.lane.b32.xlu0 %v1213_v19, %s5270_s30 }
 0x594   :  { %1320 = vrot.lane.b32.xlu1 %v1311_v20, %s5274_s5 }
 0x597   :  { %1358 = vrot.lane.b32.xlu0 %v1349_v21, %s5277_s23 }
 0x598   :  { %1387 = vrot.lane.b32.xlu1 %v1133_v7, %s5276_s3 }
 0x59b   :  { %1257 = vrot.lane.b32.xlu0 %v1248_v23, %s5272_s28 }
 0x59c   :  { %1160 = vrot.lane.b32.xlu1 %v1151_v24, %s5271_s29 }
 0x59f   :  { %1291 = vrot.lane.b32.xlu0 %v1282_v25, %s5275_s20 }
 0x5a0   :  { %1194 = vrot.lane.b32.xlu1 %v1185_v26, %s5273_s25 }
 0x5a3   :  { %1322 = vrot.lane.b32.xlu0 %v1312_v27, %s5274_s5 }
 0x5a4   :  { %1223 = vrot.lane.b32.xlu1 %v1214_v31, %s5270_s30 }
 0x5a7   :  { %1352 = vrot.lane.b32.xlu0 %v1346_v32, %s5277_s23 }
 0x5a8   :  { %1360 = vrot.lane.b32.xlu1 %v1350_v34, %s5277_s23 }
 0x5ab   :  { %1324 = vrot.lane.b32.xlu0 %v1313_v36, %s5274_s5 }
 0x5ac   :  { %1379 = vrot.lane.b32.xlu1 %v5958_v35, %s5276_s3 }
 0x5af   :  { %1389 = vrot.lane.b32.xlu0 %v1134_v14, %s5276_s3  ;;  %s5292_s3 = smov 121  }
 0x5b0   :  { %1362 = vrot.lane.b32.xlu1 %v1351_v48, %s5277_s23  ;;  %s5293_s23 = smov 120  }
 0x5b4   :  { %1453 = vperm.xlu1 %4774, %v1136_v37  }
 0x5cd   :  { %v1153_v38 = vpop.permute.xlu0 %1152  ;;  %v1187_v39 = vpop.permute.xlu1 %1186 }
 0x5d1   :  { %v1216_v40 = vpop.permute.xlu0 %1215  ;;  %v1250_v41 = vpop.permute.xlu1 %1249 }
 0x5d5   :  { %v1284_v42 = vpop.permute.xlu0 %1283  ;;  %v1315_v43 = vpop.permute.xlu1 %1314 }
 0x5d9   :  { %v6020_v44 = vpop.permute.xlu0 %1381  ;;  %v1252_v45 = vpop.permute.xlu1 %1251 }
 0x5da   :  { %v1259_v35 = vsel %vm331_vm3, %v1250_v41, %v1252_v45 }
 0x5db   :  { %1268 = vst [vmem:[#allocation5 + $0x78] ss:$-36 sps:$4 sm:$0xf1] %v1259_v35  }
 0x5dd   :  { %v1155_v46 = vpop.permute.xlu0 %1154  ;;  %v1286_v47 = vpop.permute.xlu1 %1285 }
 0x5de   :  { %v1162_v33 = vsel %vm304_vm2, %v1153_v38, %v1155_v46  ;;  %v1293_v54 = vsel %vm7016_vm6, %v1284_v42, %v1286_v47 }
 0x5df   :  { %1171 = vst [vmem:[#allocation5 + $0x28] ss:$-36 sps:$4 sm:$0xe3] %v1162_v33   ;;  %1302 = vst [vmem:[#allocation5 + $0x78] sm:$0x3e] %v1293_v54 }
 0x5e1   :  { %v1189_v49 = vpop.permute.xlu0 %1188  ;;  %v1317_v50 = vpop.permute.xlu1 %1316 }
 0x5e2   :  { %v1196_v51 = vsel %vm7050_vm14, %v1187_v39, %v1189_v49  ;;  %v1326_v53 = vsel %vm349_vm5, %v1315_v43, %v1317_v50 }
 0x5e3   :  { %1205 = vst [vmem:[#allocation5 + $0x28] sm:$0x7c] %v1196_v51  ;;  %1336 = vst [vmem:[#allocation5 + $0xa0] ss:$-36 sps:$4 sm:$0xc7] %v1326_v53  }
 0x5e5   :  { %v1218_v55 = vpop.permute.xlu0 %1217 }
 0x5e6   :  { %v1225_v56 = vsel %vm322_vm1, %v1216_v40, %v1218_v55  ;;  %v1406_v31 = vld [vmem:[#allocation5] sm:$0xff] }
 0x5e7   :  { %1234 = vst [vmem:[#allocation5 + $0x50] ss:$-36 sps:$4 sm:$0x8f] %v1225_v56  }
 0x5e9   :  { %v6028_v57 = vpop.permute.xlu0 %1354 }
 0x5ea   :  { %v1384_v58 = vpop.permute.xlu1 %1383  ;;  %v1421_v43 = vld [vmem:[#allocation5 + $0x78] sm:$0xff] }
 0x5eb   :  { %v1392_v59 = vsel %vm367_vm7, %v6020_v44, %v1384_v58 }
 0x5ec   :  { %1402 = vst [vmem:[#allocation5 + $0xd0] sm:$0x1f] %v1392_v59 }
 0x5ed   :  { %v6032_v61 = vpop.permute.xlu0 %1385 }
 0x5ee   :  { %v1393_v63 = vsel %vm367_vm7, %v1384_v58, %v6032_v61  ;;  %v1157_v1 = vpop.permute.xlu1 %1156  ;;  %v1411_v23 = vld [vmem:[#allocation5 + $0x28] sm:$0xff]  ;;  %v1416_v38 = vld [vmem:[#allocation5 + $0x50] sm:$0xff] }
 0x5ef   :  { %1403 = vst [vmem:[#allocation5 + $0xd8] sm:$0x1f] %v1393_v63  ;;  %v1163_v4 = vsel %vm304_vm2, %v1155_v46, %v1157_v1  ;;  %v1436_v32 = vpack.c.bf16 %v1411_v23, %v1406_v31  ;;  %v1441_v46 = vpack.c.bf16 %v1421_v43, %v1416_v38 }
 0x5f0   :  { %1172 = vst [vmem:[#allocation5 + $0x30] ss:$-36 sps:$4 sm:$0xe3] %v1163_v4  }
 0x5f1   :  { %v1254_v5 = vpop.permute.xlu0 %1253 }
 0x5f2   :  { %v1260_v7 = vsel %vm331_vm3, %v1252_v45, %v1254_v5  ;;  %v1191_v8 = vpop.permute.xlu1 %1190 }
 0x5f3   :  { %1269 = vst [vmem:[#allocation5 + $0x80] ss:$-36 sps:$4 sm:$0xf1] %v1260_v7   ;;  %v1197_v62 = vsel %vm7050_vm14, %v1189_v49, %v1191_v8  ;;  %v1432_v42 = vld [vmem:[#allocation5 + $0xd0] sm:$0x1f] }
 0x5f4   :  { %1206 = vst [vmem:[#allocation5 + $0x30] sm:$0x7c] %v1197_v62 }
 0x5f5   :  { %v1288_v10 = vpop.permute.xlu0 %1287 }
 0x5f6   :  { %v1294_v11 = vsel %vm7016_vm6, %v1286_v47, %v1288_v10  ;;  %v1220_v12 = vpop.permute.xlu1 %1219 }
 0x5f7   :  { %1303 = vst [vmem:[#allocation5 + $0x80] sm:$0x3e] %v1294_v11  ;;  %v1226_v13 = vsel %vm322_vm1, %v1218_v55, %v1220_v12  ;;  %v1407_v25 = vld [vmem:[#allocation5 + $0x8] sm:$0xff] }
 0x5f8   :  { %1235 = vst [vmem:[#allocation5 + $0x58] ss:$-36 sps:$4 sm:$0x8f] %v1226_v13  }
 0x5f9   :  { %v1319_v16 = vpop.permute.xlu0 %1318 }
 0x5fa   :  { %v1327_v6 = vsel %vm349_vm5, %v1317_v50, %v1319_v16  ;;  %v1357_v60 = vpop.permute.xlu1 %1356 }
 0x5fb   :  { %1337 = vst [vmem:[#allocation5 + $0xa8] ss:$-36 sps:$4 sm:$0xc7] %v1327_v6   ;;  %v1365_v18 = vsel %vm358_vm8, %v6028_v57, %v1357_v60 }
 0x5fc   :  { %1375 = vst [vmem:[#allocation5 + $0xa8] sm:$0xf8] %v1365_v18 }
 0x5fd   :  { %v1159_v19 = vpop.permute.xlu0 %1158 }
 0x5fe   :  { %v1164_v20 = vsel %vm304_vm2, %v1157_v1, %v1159_v19  ;;  %v1256_v21 = vpop.permute.xlu1 %1255 }
 0x5ff   :  { %1173 = vst [vmem:[#allocation5 + $0x38] ss:$-36 sps:$4 sm:$0xe3] %v1164_v20   ;;  %v1261_v24 = vsel %vm331_vm3, %v1254_v5, %v1256_v21  ;;  %v1412_v26 = vld [vmem:[#allocation5 + $0x30] sm:$0xff]  ;;  %v1417_v48 = vld [vmem:[#allocation5 + $0x58] sm:$0xff] }
 0x600   :  { %1270 = vst [vmem:[#allocation5 + $0x88] ss:$-36 sps:$4 sm:$0xf1] %v1261_v24   ;;  %v1437_v27 = vpack.c.bf16 %v1412_v26, %v1407_v25 }
 0x601   :  { %v1193_v14 = vpop.permute.xlu0 %1192 }
 0x602   :  { %v1198_v34 = vsel %vm7050_vm14, %v1191_v8, %v1193_v14  ;;  %1474 = vmatprep.subr.bf16.mxu0 %v1437_v27  ;;  %v1290_v36 = vpop.permute.xlu1 %1289  ;;  %v1422_v37 = vld [vmem:[#allocation5 + $0x80] sm:$0xff]  ;;  %vm7051_vm14 = vcmask 801797  }
 0x603   :  { %1207 = vst [vmem:[#allocation5 + $0x38] sm:$0x7c] %v1198_v34  ;;  %v1295_v39 = vsel %vm7016_vm6, %v1288_v10, %v1290_v36  ;;  %1475 = vmatpush1.bf16.msra.mxu0 %v1436_v32  ;;  %v1442_v40 = vpack.c.bf16 %v1422_v37, %v1417_v48  ;;  %v1427_v41 = vld [vmem:[#allocation5 + $0xa8] sm:$0xff] }
 0x604   :  { %1304 = vst [vmem:[#allocation5 + $0x88] sm:$0x3e] %v1295_v39  ;;  %v1447_v45 = vpack.c.bf16 %v1432_v42, %v1427_v41  ;;  %v1433_v41 = vld [vmem:[#allocation5 + $0xd8] sm:$0x1f] }
 0x605   :  { %v1222_v35 = vpop.permute.xlu0 %1221  ;;  %1476 = vmatprep.subr.bf16.mxu0 %v1442_v40 }
 0x606   :  { %v1227_v47 = vsel %vm322_vm1, %v1220_v12, %v1222_v35  ;;  %v1321_v33 = vpop.permute.xlu1 %1320  ;;  %v1463_v54 = vand.u32 %v1447_v45, %v5893_v52  ;;  %v1408_v26 = vld [vmem:[#allocation5 + $0x10] sm:$0xff] }
 0x607   :  { %1236 = vst [vmem:[#allocation5 + $0x60] ss:$-36 sps:$4 sm:$0x8f] %v1227_v47   ;;  %v1328_v49 = vsel %vm349_vm5, %v1319_v16, %v1321_v33  ;;  %1477 = vmatpush1.bf16.msra.mxu0 %v1441_v46 }
 0x608   :  { %1338 = vst [vmem:[#allocation5 + $0xb0] ss:$-36 sps:$4 sm:$0xc7] %v1328_v49   ;;  %1478 = vmatprep.subr.bf16.mxu0 %v1463_v54  ;;  %v1135_v49 = vld [vmem:[#allocation12] sm:$0x7] }
 0x609   :  { %v1359_v50 = vpop.permute.xlu0 %1358 }
 0x60a   :  { %v1366_v51 = vsel %vm358_vm8, %v1357_v60, %v1359_v50  ;;  %v1388_v53 = vpop.permute.xlu1 %1387 }
 0x60b   :  { %1376 = vst [vmem:[#allocation5 + $0xb0] sm:$0xf8] %v1366_v51  ;;  %v1394_v55 = vsel %vm367_vm7, %v6032_v61, %v1388_v53  ;;  %v6083_v51 = vld [vmem:[#allocation3] sm:$0xff] }
 0x60c   :  { %1404 = vst [vmem:[#allocation5 + $0xe0] sm:$0x1f] %v1394_v55 }
 0x60d   :  { %v1258_v56 = vpop.permute.xlu0 %1257 }
 0x60e   :  { %v1262_v58 = vsel %vm331_vm3, %v1256_v21, %v1258_v56  ;;  %1272 = vst.msk [vmem:[#allocation5 + $0x70] sm:$0xf0] %vm755_vm13, %v1258_v56  ;;  %v1161_v59 = vpop.permute.xlu1 %1160  ;;  %vm7054_vm3 = vcmask 1031168   ;;  %vm7055_vm13 = vcmask 800770   ;;  %v1413_v20 = vld [vmem:[#allocation5 + $0x38] sm:$0xff] }
 0x60f   :  { %1277 = vst.msk [vmem:[#allocation5 + $0x98] sm:$0x1] %vm761_vm4, %v1258_v56  ;;  %1271 = vst [vmem:[#allocation5 + $0x90] ss:$-36 sps:$4 sm:$0xf1] %v1262_v58   ;;  %v1165_v63 = vsel %vm304_vm2, %v1159_v19, %v1161_v59  ;;  %vm7056_vm4 = vcmask 801799   ;;  %v1438_v31 = vpack.c.bf16 %v1413_v20, %v1408_v26 }
 0x610   :  { %1175 = vst.msk [vmem:[#allocation5 + $0x20] sm:$0xe0] %vm7051_vm14, %v1161_v59  ;;  %1174 = vst [vmem:[#allocation5 + $0x40] ss:$-36 sps:$4 sm:$0xe3] %v1165_v63   ;;  %v1423_v48 = vld [vmem:[#allocation5 + $0x88] sm:$0xff] }
 0x611   :  { %1180 = vst.msk [vmem:[#allocation5 + $0x48] sm:$0x3] %vm7052_vm15, %v1161_v59  ;;  %v1292_v1 = vpop.permute.xlu0 %1291  ;;  %vm7057_vm15 = vcmask 797696  }
 0x612   :  { %v1296_v61 = vsel %vm7016_vm6, %v1290_v36, %v1292_v1  ;;  %1306 = vst.msk [vmem:[#allocation5 + $0x98] sm:$0x3e] %vm7053_vm9, %v1292_v1  ;;  %v1195_v4 = vpop.permute.xlu1 %1194  ;;  %v1418_v36 = vld [vmem:[#allocation5 + $0x60] sm:$0xff]  ;;  %v1428_v37 = vld [vmem:[#allocation5 + $0xb0] sm:$0xff] }
 0x613   :  { %1305 = vst [vmem:[#allocation5 + $0x90] sm:$0x3e] %v1296_v61  ;;  %v1199_v5 = vsel %vm7054_vm3, %v1193_v14, %v1195_v4  ;;  %1209 = vst.msk [vmem:[#allocation5 + $0x48] sm:$0x7c] %vm7055_vm13, %v1195_v4  ;;  %v1434_v39 = vld [vmem:[#allocation5 + $0xe0] sm:$0x1f]  ;;  %v1443_v42 = vpack.c.bf16 %v1423_v48, %v1418_v36  ;;  %v1448_v43 = vpack.c.bf16 %v1433_v41, %v1428_v37 }
 0x614   :  { %1208 = vst [vmem:[#allocation5 + $0x40] sm:$0x7c] %v1199_v5  ;;  %vm7067_vm3 = vcmask 954368   ;;  %vm7068_vm13 = vcmask 1044480  }
 0x615   :  { %v1323_v7 = vpop.permute.xlu0 %1322 }
 0x616   :  { %v1329_v8 = vsel %vm349_vm5, %v1321_v33, %v1323_v7  ;;  %v1224_v62 = vpop.permute.xlu1 %1223  ;;  %v1466_v33 = vand.u32 %v1448_v43, %v5893_v52 }
 0x617   :  { %1339 = vst [vmem:[#allocation5 + $0xb8] ss:$-36 sps:$4 sm:$0xc7] %v1329_v8   ;;  %v1228_v10 = vsel %vm322_vm1, %v1222_v35, %v1224_v62  ;;  %1238 = vst.msk [vmem:[#allocation5 + $0x48] sm:$0x80] %vm7056_vm4, %v1224_v62  ;;  %v1409_v19 = vld [vmem:[#allocation5 + $0x18] sm:$0xff] }
 0x618   :  { %1243 = vst.msk [vmem:[#allocation5 + $0x70] sm:$0xf] %vm7057_vm15, %v1224_v62  ;;  %1237 = vst [vmem:[#allocation5 + $0x68] ss:$-36 sps:$4 sm:$0x8f] %v1228_v10   ;;  %vm1869_vm4 = vcmask 957440  }
 0x619   :  { %v1353_v11 = vpop.permute.xlu0 %1352  ;;  %vm7069_vm15 = vmmov %vm7068_vm13 }
 0x61a   :  { %v1364_v12 = vsel %vm358_vm8, %v1353_v11, %v6028_v57  ;;  %v1361_v13 = vpop.permute.xlu1 %1360 }
 0x61b   :  { %1374 = vst [vmem:[#allocation5 + $0xa0] sm:$0xf8] %v1364_v12  ;;  %v1367_v16 = vsel %vm358_vm8, %v1359_v50, %v1361_v13 }
 0x61c   :  { %1377 = vst [vmem:[#allocation5 + $0xb8] sm:$0xf8] %v1367_v16 }
 0x61d   :  { %v1325_v6 = vpop.permute.xlu0 %1324 }
 0x61e   :  { %v1330_v60 = vsel %vm349_vm5, %v1323_v7, %v1325_v6  ;;  %v1380_v18 = vpop.permute.xlu1 %1379  ;;  %v1424_v24 = vld [vmem:[#allocation5 + $0x90] sm:$0xff]  ;;  %v1415_v50 = vld [vmem:[#allocation5 + $0x48] sm:$0xff]  ;;  %vm7058_vm5 = vcmask 367616  }
 0x61f   :  { %1340 = vst.msk [vmem:[#allocation5 + $0x98] sm:$0xc0] %vm826_vm12, %v1330_v60  ;;  %v1391_v21 = vsel %vm367_vm7, %v1380_v18, %v6020_v44  ;;  %v1414_v23 = vld [vmem:[#allocation5 + $0x40] sm:$0xff]  ;;  %v1419_v57 = vld [vmem:[#allocation5 + $0x68] sm:$0xff]  ;;  %v1420_v63 = vld [vmem:[#allocation5 + $0x70] sm:$0xff]  ;;  %vm7063_vm12 = vcmask 154624  }
 0x620   :  { %1345 = vst.msk [vmem:[#allocation5 + $0xc0] sm:$0x7] %vm832_vm0, %v1330_v60  ;;  %1401 = vst [vmem:[#allocation5 + $0xc8] sm:$0x1f] %v1391_v21  ;;  %v1439_v25 = vpack.c.bf16 %v1414_v23, %v1409_v19  ;;  %v1444_v34 = vpack.c.bf16 %v1424_v24, %v1419_v57 }
 0x621   :  { %v1390_v27 = vpop.permute.xlu0 %1389  ;;  %vm7061_vm9 = vmmov %vm7058_vm5 }
 0x622   :  { %v1395_v14 = vsel %vm367_vm7, %v1388_v53, %v1390_v27  ;;  %1515 = vmatprep.subr.bf16.mxu1 %v1439_v25  ;;  %v1363_v32 = vpop.permute.xlu1 %1362  ;;  %v1426_v35 = vld [vmem:[#allocation5 + $0xa0] sm:$0xff]  ;;  %vm7059_vm7 = vmmov %vm7058_vm5 }
 0x623   :  { %1405 = vst.msk [vmem:[#allocation5 + $0xe8] sm:$0x1f] %vm618_vm11, %v1395_v14  ;;  %v1368_v44 = vsel %vm358_vm8, %v1361_v13, %v1363_v32  ;;  %1516 = vmatpush1.bf16.msra.mxu1 %v1438_v31  ;;  %v1429_v38 = vld [vmem:[#allocation5 + $0xb8] sm:$0xff]  ;;  %v1410_v53 = vld [vmem:[#allocation5 + $0x20] sm:$0xff]  ;;  %vm7060_vm8 = vmmov 0   ;;  %vm7064_vm0 = vmmov %vm7063_vm12 }
 0x624   :  { %1378 = vst.msk [vmem:[#allocation5 + $0xc0] sm:$0xf8] %vm866_vm10, %v1368_v44  ;;  %1517 = vmatprep.subr.bf16.mxu1 %v1444_v34  ;;  %v1449_v40 = vpack.c.bf16 %v1434_v39, %v1429_v38  ;;  %v1440_v55 = vpack.c.bf16 %v1415_v50, %v1410_v53  ;;  %vm7062_vm10 = vcmask 1044632   ;;  %vm7065_vm11 = vmmov %vm7064_vm0  ;;  %v1643_v50 = vld [vmem:[#allocation27 + $0x10] sm:$0xff]  ;;  %v1646_v53 = vld [vmem:[#allocation27 + $0x28] sm:$0xff] }
 0x625   :  { %vm7066_vm14 = vmmov %vm7064_vm0 }
 0x626   :  { %v1469_v45 = vand.u32 %v1449_v40, %v5893_v52  ;;  %v1425_v56 = vld [vmem:[#allocation5 + $0x98] sm:$0xff] }
 0x627   :  { %1518 = vmatpush1.bf16.msra.mxu1 %v1443_v42  ;;  %v1431_v46 = vld [vmem:[#allocation5 + $0xc8] sm:$0x1f]  ;;  %v1445_v1 = vpack.c.bf16 %v1425_v56, %v1420_v63  ;;  %v1647_v63 = vld [vmem:[#allocation27 + $0x30] sm:$0xff] }
 0x628   :  { %1519 = vmatprep.subr.bf16.mxu1 %v1469_v45  ;;  %v1446_v47 = vpack.c.bf16 %v1431_v46, %v1426_v35 }
 0x62a   :  { %v1460_v54 = vand.u32 %v1446_v47, %v5893_v52  ;;  %v1435_v59 = vld [vmem:[#allocation5 + $0xe8] sm:$0x1f]  ;;  %v1642_v47 = vld [vmem:[#allocation27 + $0x8] sm:$0xff] }
 0x62b   :  { %1520 = vmatpush1.bf16.msra.mxu1 %v1466_v33  ;;  %v1430_v58 = vld [vmem:[#allocation5 + $0xc0] sm:$0xff] }
 0x62c   :  { %1479 = vmatpush1.bf16.msra.mxu0 %v1460_v54  ;;  %v1450_v61 = vpack.c.bf16 %v1435_v59, %v1430_v58  ;;  %v1644_v33 = vld [vmem:[#allocation27 + $0x18] sm:$0xff]  ;;  %v1641_v54 = vld [vmem:[#allocation27] sm:$0xff] }
 0x62d   :  { %4478 = vmatprep.subr.bf16.mxu0 %v6083_v51  ;;  %v4514_v56 = vpack.c.bf16 %v1643_v50, %v1641_v54  ;;  %v1645_v59 = vld [vmem:[#allocation27 + $0x20] sm:$0xff] }
 0x62e   :  { %4399 = vmatmul.mubr.msk.bf16.vlgmr.msra.gmra.mrb[12].mxu1 %vm7058_vm5, %v1135_v49  ;;  %v1472_v4 = vand.u32 %v1450_v61, %v5893_v52  ;;  %v1652_v61 = vld [vmem:[#allocation27 + $0x58] sm:$0xff]  ;;  %v1677_v50 = vld [vmem:[#allocation27 + $0x120] sm:$0xff]  ;;  %vm7008_vm5 = vcmask 405504  }
 0x62f   :  { %4398 = vmatmul.mubr.msk.bf16.vlgmr.msra.gmra.mrb[12].mxu0 %vm7059_vm7, %v1135_v49  ;;  %vm7005_vm7 = vcmask 402432  }
 0x630   :  { %4479 = vmatpush3.bf16.msra.mxu0 %v1440_v55  ;;  %4484 = vmatprep.mubr.msk.bf16.mxu0 %vm7060_vm8, %v6083_v51  ;;  %v1648_v55 = vld [vmem:[#allocation27 + $0x38] sm:$0xff]  ;;  %vm2127_vm8 = vcmask 407554  }
 0x631   :  { %4480 = vmatprep.subr.bf16.mxu0 %v6083_v51  ;;  %v4516_v58 = vpack.c.bf16 %v1648_v55, %v1646_v53  ;;  %v1679_v53 = vld [vmem:[#allocation27 + $0x130] sm:$0xff]  ;;  %v1682_v55 = vld [vmem:[#allocation27 + $0x148] sm:$0xff] }
 0x633   :  { %v1454_v5 = vpop.permute.xlu1 %1453 }
 0x634   :  { %4481 = vmatpush3.bf16.msra.mxu0 %v1445_v1  ;;  %v1650_v1 = vld [vmem:[#allocation27 + $0x48] sm:$0xff] }
 0x635   :  { %4482 = vmatprep.subr.bf16.mxu0 %v6083_v51 }
 0x638   :  { %4483 = vmatpush3.bf16.msra.mxu0 %v1472_v4  ;;  %v4518_v4 = vpack.c.bf16 %v1647_v63, %v1645_v59  ;;  %v1681_v63 = vld [vmem:[#allocation27 + $0x140] sm:$0xff] }
 0x63b   :  { %4485 = vmatmul.mubr.msk.bf16.vlgmr.msra.gmra.mrb[16].mxu0 %vm7061_vm9, %v1135_v49  ;;  %v4512_v49 = vpack.c.bf16 %v1644_v33, %v1642_v47  ;;  %v1678_v47 = vld [vmem:[#allocation27 + $0x128] sm:$0xff]  ;;  %v1680_v33 = vld [vmem:[#allocation27 + $0x138] sm:$0xff]  ;;  %vm7070_vm9 = vcmask 1031168  }
 0x63c   :  { %2285 = vmatprep.mubr.bf16.mxu0 %v5278_v3 }
 0x63d   :  { %4513 = vmatprep.subr.bf16.mxu1 %v4512_v49  ;;  %v4548_v49 = vpack.c.bf16 %v1680_v33, %v1678_v47 }
 0x63e   :  { %4515 = vmatpush1.bf16.msra.mxu1 %v4514_v56  ;;  %v1684_v56 = vld [vmem:[#allocation27 + $0x158] sm:$0xff] }
 0x63f   :  { %4517 = vmatprep.subr.bf16.mxu1 %v4516_v58  ;;  %v4550_v58 = vpack.c.bf16 %v1679_v53, %v1677_v50  ;;  %v4552_v59 = vpack.c.bf16 %v1684_v56, %v1682_v55  ;;  %v1708_v50 = vld [vmem:[#allocation27 + $0x218] sm:$0xff]  ;;  %v1640_v53 = vld [vmem:[#allocation2 + $0x28] sm:$0x1f] }
 0x642   :  { %4519 = vmatpush1.bf16.msra.mxu1 %v4518_v4  ;;  %v1688_v4 = vld [vmem:[#allocation27 + $0x178] sm:$0xff] }
 0x701   :  { %v1549_v7 = vpop.f32.mrb[12].mxu1 }
 0x702   :  { %v1508_v8 = vpop.f32.mrb[12].mxu0  ;;  %v1551_v62 = vpop.f32.mrb[13].mxu1  ;;  %v1550_v11 = vadd.f32 %v1549_v7, %v1454_v5  ;;  %v1649_v7 = vld [vmem:[#allocation27 + $0x40] sm:$0xff] }
 0x703   :  { %v1509_v10 = vadd.f32 %v1508_v8, %v1454_v5  ;;  %v1510_v12 = vpop.f32.mrb[13].mxu0  ;;  %v1553_v13 = vpop.f32.mrb[14].mxu1  ;;  %v1552_v6 = vadd.f32 %v1551_v62, %v1454_v5  ;;  %v1651_v8 = vld [vmem:[#allocation27 + $0x50] sm:$0xff]  ;;  %v1654_v62 = vld [vmem:[#allocation27 + $0x68] sm:$0xff] }
 0x704   :  { %v1511_v16 = vadd.f32 %v1510_v12, %v1454_v5  ;;  %v1512_v60 = vpop.f32.mrb[14].mxu0  ;;  %v1554_v18 = vpop.f32.mrb[15].mxu1  ;;  %v1653_v13 = vld [vmem:[#allocation27 + $0x60] sm:$0xff] }
 0x705   :  { %4835 = vtanh.f32 %v1509_v10  ;;  %v1513_v19 = vpop.f32.mrb[15].mxu0  ;;  %v1656_v10 = vld [vmem:[#allocation27 + $0x78] sm:$0xff] }
 0x706   :  { %4837 = vtanh.f32 %v1511_v16  ;;  %v4524_v12 = vpack.c.bf16 %v1656_v10, %v1654_v62  ;;  %v1655_v16 = vld [vmem:[#allocation27 + $0x70] sm:$0xff]  ;;  %v1660_v60 = vld [vmem:[#allocation27 + $0x98] sm:$0xff]  ;;  %v1690_v10 = vld [vmem:[#allocation27 + $0x188] sm:$0xff] }
 0x707   :  { %4839 = vtanh.f32 %v1550_v11  ;;  %v4522_v11 = vpack.c.bf16 %v1651_v8, %v1649_v7  ;;  %v4526_v18 = vpack.c.bf16 %v1655_v16, %v1653_v13  ;;  %v1685_v8 = vld [vmem:[#allocation27 + $0x160] sm:$0xff]  ;;  %v1687_v62 = vld [vmem:[#allocation27 + $0x170] sm:$0xff] }
 0x708   :  { %4841 = vtanh.f32 %v1552_v6  ;;  %v1658_v6 = vld [vmem:[#allocation27 + $0x88] sm:$0xff]  ;;  %v1689_v16 = vld [vmem:[#allocation27 + $0x180] sm:$0xff] }
 0x709   :  { %v4528_v19 = vpack.c.bf16 %v1660_v60, %v1658_v6  ;;  %v1691_v6 = vld [vmem:[#allocation27 + $0x190] sm:$0xff]  ;;  %v1694_v60 = vld [vmem:[#allocation27 + $0x1a8] sm:$0xff] }
 0x70e   :  { %v1590_v20 = vpop.f32.mrb[16].mxu0 }
 0x70f   :  { %v4836_v21 = vpop.eup %4835  ;;  %v1591_v23 = vadd.f32 %v1590_v20, %v1454_v5  ;;  %v4486_v57 = vpop.f32.mrb[17].mxu0  ;;  %v4520_v5 = vpack.c.bf16 %v1652_v61, %v1650_v1  ;;  %v1657_v20 = vld [vmem:[#allocation27 + $0x80] sm:$0xff]  ;;  %v1683_v1 = vld [vmem:[#allocation27 + $0x150] sm:$0xff]  ;;  %v1686_v61 = vld [vmem:[#allocation27 + $0x168] sm:$0xff] }
 0x710   :  { %v4838_v24 = vpop.eup %4837  ;;  %v1601_v25 = vmul.f32 %v4836_v21, %v5757_v0  ;;  %v1593_v26 = vpop.f32.mrb[18].mxu0  ;;  %v1659_v21 = vld [vmem:[#allocation27 + $0x90] sm:$0xff]  ;;  %v1664_v57 = vld [vmem:[#allocation27 + $0xb8] sm:$0xff]  ;;  %v4556_v7 = vpack.c.bf16 %v1688_v4, %v1686_v61 }
 0x711   :  { %v4840_v27 = vpop.eup %4839  ;;  %4843 = vtanh.f32 %v1591_v23  ;;  %v1602_v31 = vmul.f32 %v4838_v24, %v5765_v22  ;;  %v4487_v14 = vpop.f32.mrb[19].mxu0  ;;  %4521 = vmatprep.subr.bf16.mxu1 %v4520_v5  ;;  %v1662_v23 = vld [vmem:[#allocation27 + $0xa8] sm:$0xff]  ;;  %v4530_v24 = vpack.c.bf16 %v1659_v21, %v1657_v20  ;;  %v1661_v26 = vld [vmem:[#allocation27 + $0xa0] sm:$0xff]  ;;  %v4554_v5 = vpack.c.bf16 %v1683_v1, %v1681_v63  ;;  %v1707_v1 = vld [vmem:[#allocation27 + $0x210] sm:$0xff] }
 0x712   :  { %v4842_v32 = vpop.eup %4841  ;;  %1611 = vrot.lane.b32.xlu0 %v1601_v25, %s5282_s10  ;;  %v1603_v34 = vmul.f32 %v4840_v27, %v5760_v17  ;;  %4523 = vmatpush1.bf16.msra.mxu1 %v4522_v11  ;;  %v4532_v25 = vpack.c.bf16 %v1664_v57, %v1662_v23  ;;  %v1663_v27 = vld [vmem:[#allocation27 + $0xb0] sm:$0xff]  ;;  %v1668_v14 = vld [vmem:[#allocation27 + $0xd8] sm:$0xff]  ;;  %v1693_v21 = vld [vmem:[#allocation27 + $0x1a0] sm:$0xff] }
 0x713   :  { %1613 = vrot.lane.b32.xlu1 %v1602_v31, %s5282_s10  ;;  %v1604_v36 = vmul.f32 %v4842_v32, %v5775_v29  ;;  %4525 = vmatprep.subr.bf16.mxu1 %v4524_v12  ;;  %v1666_v31 = vld [vmem:[#allocation27 + $0xc8] sm:$0xff]  ;;  %v4534_v32 = vpack.c.bf16 %v1663_v27, %v1661_v26  ;;  %v1692_v11 = vld [vmem:[#allocation27 + $0x198] sm:$0xff]  ;;  %v4558_v12 = vpack.c.bf16 %v1687_v62, %v1685_v8  ;;  %v1695_v23 = vld [vmem:[#allocation27 + $0x1b0] sm:$0xff] }
 0x714   :  { %v4560_v13 = vpack.c.bf16 %v1692_v11, %v1690_v10  ;;  %v4566_v57 = vpack.c.bf16 %v1695_v23, %v1693_v21  ;;  %v1697_v26 = vld [vmem:[#allocation27 + $0x1c0] sm:$0xff]  ;;  %v1716_v21 = vld [vmem:[#allocation27 + $0x258] sm:$0xff] }
 0x715   :  { %v1705_v63 = vld [vmem:[#allocation27 + $0x200] sm:$0xff] }
 0x716   :  { %1615 = vrot.lane.b32.xlu0 %v1603_v34, %s5282_s10  ;;  %4527 = vmatpush1.bf16.msra.mxu1 %v4526_v18  ;;  %v4536_v34 = vpack.c.bf16 %v1668_v14, %v1666_v31  ;;  %v1696_v18 = vld [vmem:[#allocation27 + $0x1b8] sm:$0xff]  ;;  %v1699_v31 = vld [vmem:[#allocation27 + $0x1d0] sm:$0xff] }
 0x717   :  { %1617 = vrot.lane.b32.xlu1 %v1604_v36, %s5282_s10  ;;  %4529 = vmatprep.subr.bf16.mxu1 %v4528_v19  ;;  %v1665_v36 = vld [vmem:[#allocation27 + $0xc0] sm:$0xff]  ;;  %v4562_v19 = vpack.c.bf16 %v1691_v6, %v1689_v16  ;;  %v4564_v20 = vpack.c.bf16 %v1696_v18, %v1694_v60  ;;  %v4570_v14 = vpack.c.bf16 %v1699_v31, %v1697_v26  ;;  %v1718_v26 = vld [vmem:[#allocation27 + $0x268] sm:$0xff] }
 0x718   :  { %v1709_v18 = vld [vmem:[#allocation27 + $0x220] sm:$0xff] }
 0x71a   :  { %4531 = vmatpush1.bf16.msra.mxu1 %v4530_v24  ;;  %v1698_v24 = vld [vmem:[#allocation27 + $0x1c8] sm:$0xff] }
 0x71b   :  { %v4844_v0 = vpop.eup %4843  ;;  %4533 = vmatprep.subr.bf16.mxu1 %v4532_v25  ;;  %v1700_v25 = vld [vmem:[#allocation27 + $0x1d8] sm:$0xff] }
 0x71c   :  { %v1605_v48 = vmul.f32 %v4844_v0, %v5773_v28  ;;  %v1667_v0 = vld [vmem:[#allocation27 + $0xd0] sm:$0xff]  ;;  %v4568_v27 = vpack.c.bf16 %v1700_v25, %v1698_v24  ;;  %v1713_v24 = vld [vmem:[#allocation27 + $0x240] sm:$0xff] }
 0x71d   :  { %v1715_v25 = vld [vmem:[#allocation27 + $0x250] sm:$0xff] }
 0x71e   :  { %1619 = vrot.lane.b32.xlu0 %v1605_v48, %s5282_s10  ;;  %v1670_v48 = vld [vmem:[#allocation27 + $0xe8] sm:$0xff]  ;;  %4535 = vmatpush1.bf16.msra.mxu1 %v4534_v32  ;;  %v4586_v31 = vpack.c.bf16 %v1715_v25, %v1713_v24  ;;  %v1752_v24 = vld [vmem:[#allocation27 + $0x378] sm:$0xff] }
 0x71f   :  { %4537 = vmatprep.subr.bf16.mxu1 %v4536_v34  ;;  %v1702_v32 = vld [vmem:[#allocation27 + $0x1e8] sm:$0xff]  ;;  %v1704_v34 = vld [vmem:[#allocation27 + $0x1f8] sm:$0xff] }
 0x784   :  { %v1612_v22 = vpop.permute.xlu0 %1611 }
 0x785   :  { %1630 = vst.msk [vmem:[#allocation2] sm:$0x1f] %vm7062_vm10, %v1612_v22  ;;  %v1614_v37 = vpop.permute.xlu1 %1613  ;;  %vm2135_vm10 = vcmask 965632  }
 0x786   :  { %v1621_v44 = vsel %vm7063_vm12, %v1612_v22, %v1614_v37  ;;  %v1672_v22 = vld [vmem:[#allocation27 + $0xf8] sm:$0xff]  ;;  %vm2140_vm12 = vcmask 408583  }
 0x787   :  { %1631 = vst [vmem:[#allocation2 + $0x8] sm:$0x1f] %v1621_v44  ;;  %v4540_v44 = vpack.c.bf16 %v1672_v22, %v1670_v48  ;;  %v1703_v48 = vld [vmem:[#allocation27 + $0x1f0] sm:$0xff] }
 0x788   :  { %v1616_v38 = vpop.permute.xlu0 %1615 }
 0x789   :  { %v1622_v17 = vsel %vm7064_vm0, %v1614_v37, %v1616_v38  ;;  %v1618_v29 = vpop.permute.xlu1 %1617  ;;  %v4538_v37 = vpack.c.bf16 %v1667_v0, %v1665_v36  ;;  %v1701_v36 = vld [vmem:[#allocation27 + $0x1e0] sm:$0xff]  ;;  %v4572_v0 = vpack.c.bf16 %v1704_v34, %v1702_v32  ;;  %v1719_v34 = vld [vmem:[#allocation27 + $0x270] sm:$0xff]  ;;  %vm7007_vm0 = vcmask 404480  }
 0x78a   :  { %1632 = vst [vmem:[#allocation2 + $0x10] sm:$0x1f] %v1622_v17  ;;  %v1623_v39 = vsel %vm7065_vm11, %v1616_v38, %v1618_v29  ;;  %v1669_v38 = vld [vmem:[#allocation27 + $0xe0] sm:$0xff]  ;;  %v1671_v17 = vld [vmem:[#allocation27 + $0xf0] sm:$0xff]  ;;  %vm7018_vm11 = vcmask 408580  }
 0x78b   :  { %1633 = vst [vmem:[#allocation2 + $0x18] sm:$0x1f] %v1623_v39  ;;  %v1676_v39 = vld [vmem:[#allocation27 + $0x118] sm:$0xff]  ;;  %4539 = vmatpush1.bf16.msra.mxu1 %v4538_v37  ;;  %v4574_v37 = vpack.c.bf16 %v1703_v48, %v1701_v36  ;;  %v1717_v32 = vld [vmem:[#allocation27 + $0x260] sm:$0xff]  ;;  %v1722_v36 = vld [vmem:[#allocation27 + $0x288] sm:$0xff] }
 0x78c   :  { %v6117_v45 = vld [vmem:[#allocation2] sm:$0x1f]  ;;  %4541 = vmatprep.subr.bf16.mxu1 %v4540_v44  ;;  %v4590_v48 = vpack.c.bf16 %v1719_v34, %v1717_v32  ;;  %v1756_v32 = vld [vmem:[#allocation27 + $0x398] sm:$0xff] }
 0x78e   :  { %v6110_v41 = vld [vmem:[#allocation2 + $0x8] sm:$0x1f] }
 0x790   :  { %v1620_v40 = vpop.permute.xlu0 %1619 }
 0x791   :  { %v1624_v28 = vsel %vm7066_vm14, %v1618_v29, %v1620_v40  ;;  %v6112_v42 = vld [vmem:[#allocation2 + $0x10] sm:$0x1f]  ;;  %v1674_v29 = vld [vmem:[#allocation27 + $0x108] sm:$0xff]  ;;  %v4542_v40 = vpack.c.bf16 %v1671_v17, %v1669_v38  ;;  %vm7003_vm14 = vcmask 401408  }
 0x792   :  { %1634 = vst.msk [vmem:[#allocation2 + $0x20] sm:$0x1f] %vm7067_vm3, %v1624_v28  ;;  %v4775_v43 = vpack.i.bf16 %v6112_v42, %v6110_v41  ;;  %v6119_v35 = vld [vmem:[#allocation2 + $0x18] sm:$0x1f]  ;;  %v4544_v28 = vpack.c.bf16 %v1676_v39, %v1674_v29  ;;  %vm2166_vm3 = vcmask 949248  }
 0x793   :  { %v4780_v46 = vpack.i.bf16 %v6117_v45, %v6119_v35  ;;  %4543 = vmatpush1.bf16.msra.mxu1 %v4542_v40 }
 0x794   :  { %4776 = vrot.lane.b32.xlu1 %v4775_v43, %s5271_s29  ;;  %v1673_v43 = vld [vmem:[#allocation27 + $0x100] sm:$0xff]  ;;  %4545 = vmatprep.subr.bf16.mxu1 %v4544_v28 }
 0x795   :  { %4781 = vrot.lane.b32.xlu0 %v4780_v46, %s5271_s29  ;;  %v1675_v46 = vld [vmem:[#allocation27 + $0x110] sm:$0xff] }
 0x796   :  { %v4546_v54 = vpack.c.bf16 %v1675_v46, %v1673_v43 }
 0x798   :  { %4547 = vmatpush1.bf16.msra.mxu1 %v4546_v54 }
 0x799   :  { %4549 = vmatprep.subr.bf16.mxu1 %v4548_v49  ;;  %v1706_v49 = vld [vmem:[#allocation27 + $0x208] sm:$0xff] }
 0x79a   :  { %v4576_v55 = vpack.c.bf16 %v1708_v50, %v1706_v49  ;;  %v1729_v49 = vld [vmem:[#allocation27 + $0x2c0] sm:$0xff]  ;;  %v1731_v50 = vld [vmem:[#allocation27 + $0x2d0] sm:$0xff] }
 0x79c   :  { %4551 = vmatpush1.bf16.msra.mxu1 %v4550_v58 }
 0x79d   :  { %4553 = vmatprep.subr.bf16.mxu1 %v4552_v59 }
 0x7a0   :  { %4555 = vmatpush1.bf16.msra.mxu1 %v4554_v5  ;;  %v1710_v5 = vld [vmem:[#allocation27 + $0x228] sm:$0xff] }
 0x7a1   :  { %4557 = vmatprep.subr.bf16.mxu1 %v4556_v7  ;;  %v1712_v7 = vld [vmem:[#allocation27 + $0x238] sm:$0xff] }
 0x7a2   :  { %v4580_v60 = vpack.c.bf16 %v1712_v7, %v1710_v5  ;;  %v1737_v7 = vld [vmem:[#allocation27 + $0x300] sm:$0xff] }
 0x7a4   :  { %4559 = vmatpush1.bf16.msra.mxu1 %v4558_v12 }
 0x7a5   :  { %4561 = vmatprep.subr.bf16.mxu1 %v4560_v13  ;;  %v4578_v13 = vpack.c.bf16 %v1707_v1, %v1705_v63  ;;  %v1735_v63 = vld [vmem:[#allocation27 + $0x2f0] sm:$0xff]  ;;  %v1738_v1 = vld [vmem:[#allocation27 + $0x308] sm:$0xff] }
 0x7a8   :  { %4563 = vmatpush1.bf16.msra.mxu1 %v4562_v19  ;;  %v1711_v19 = vld [vmem:[#allocation27 + $0x230] sm:$0xff] }
 0x7a9   :  { %4565 = vmatprep.subr.bf16.mxu1 %v4564_v20  ;;  %v1714_v20 = vld [vmem:[#allocation27 + $0x248] sm:$0xff]  ;;  %v4582_v23 = vpack.c.bf16 %v1711_v19, %v1709_v18  ;;  %v1748_v19 = vld [vmem:[#allocation27 + $0x358] sm:$0xff] }
 0x7aa   :  { %v1746_v18 = vld [vmem:[#allocation27 + $0x348] sm:$0xff] }
 0x7ac   :  { %4567 = vmatpush1.bf16.msra.mxu1 %v4566_v57 }
 0x7ad   :  { %4569 = vmatprep.subr.bf16.mxu1 %v4568_v27  ;;  %v1720_v27 = vld [vmem:[#allocation27 + $0x278] sm:$0xff] }
 0x7b0   :  { %4571 = vmatpush1.bf16.msra.mxu1 %v4570_v14  ;;  %v4588_v14 = vpack.c.bf16 %v1720_v27, %v1718_v26  ;;  %v1749_v27 = vld [vmem:[#allocation27 + $0x360] sm:$0xff] }
 0x7b1   :  { %4573 = vmatprep.subr.bf16.mxu1 %v4572_v0  ;;  %v1724_v0 = vld [vmem:[#allocation27 + $0x298] sm:$0xff] }
 0x7b4   :  { %4575 = vmatpush1.bf16.msra.mxu1 %v4574_v37  ;;  %v1721_v37 = vld [vmem:[#allocation27 + $0x280] sm:$0xff] }
 0x7b5   :  { %4577 = vmatprep.subr.bf16.mxu1 %v4576_v55  ;;  %v1736_v55 = vld [vmem:[#allocation27 + $0x2f8] sm:$0xff] }
 0x806   :  { %v4777_v22 = vpop.permute.xlu1 %4776 }
 0x807   :  { %v4779_v44 = vunpack.i.h.bf16 %v4777_v22  ;;  %v4778_v38 = vunpack.i.l.bf16 %v4777_v22  ;;  %v4782_v17 = vpop.permute.xlu0 %4781  ;;  %v4592_v22 = vpack.c.bf16 %v1724_v0, %v1722_v36  ;;  %v1753_v0 = vld [vmem:[#allocation27 + $0x380] sm:$0xff] }
 0x808   :  { %v4784_v29 = vunpack.i.h.bf16 %v4782_v17  ;;  %v4783_v39 = vunpack.i.l.bf16 %v4782_v17  ;;  %v1728_v17 = vld [vmem:[#allocation27 + $0x2b8] sm:$0xff] }
 0x809   :  { %v1815_v40 = vsel %vm304_vm2, %v4778_v38, %v4779_v44 }
 0x80a   :  { %v1824_v28 = vmax.f32 %v6110_v41, %v1815_v40  ;;  %v1814_v43 = vsel %vm304_vm2, %v4784_v29, %v4778_v38  ;;  %v1816_v46 = vsel %vm304_vm2, %v4779_v44, %v4783_v39  ;;  %v6137_v41 = vld [vmem:[#allocation2 + $0x20] sm:$0x1f]  ;;  %v1723_v44 = vld [vmem:[#allocation27 + $0x290] sm:$0xff]  ;;  %v1725_v40 = vld [vmem:[#allocation27 + $0x2a0] sm:$0xff] }
 0x80b   :  { %v6130_v47 = vmax.f32 %v6112_v42, %v1816_v46  ;;  %v1823_v33 = vmax.f32 %v6117_v45, %v1814_v43  ;;  %v1726_v38 = vld [vmem:[#allocation27 + $0x2a8] sm:$0xff]  ;;  %v4594_v29 = vpack.c.bf16 %v1723_v44, %v1721_v37  ;;  %v1732_v46 = vld [vmem:[#allocation27 + $0x2d8] sm:$0xff] }
 0x80c   :  { %v1730_v43 = vld [vmem:[#allocation27 + $0x2c8] sm:$0xff]  ;;  %v1760_v37 = vld [vmem:[#allocation27 + $0x3b8] sm:$0xff] }
 0x80d   :  { %1842 = vrot.lane.b32.xlu0 %v1823_v33, %s5270_s30  ;;  %v4785_v54 = vpack.i.bf16 %v6130_v47, %v1824_v28 }
 0x80f   :  { %4786 = vrot.lane.b32.xlu1 %v4785_v54, %s5270_s30  ;;  %v4600_v54 = vpack.c.bf16 %v1732_v46, %v1730_v43  ;;  %v1761_v46 = vld [vmem:[#allocation27 + $0x3c0] sm:$0xff] }
 0x811   :  { %1829 = vrot.lane.b32.xlu0 %v1640_v53, %s5271_s29 }
 0x813   :  { %1812 = vrot.lane.b32.xlu1 %v6137_v41, %s5271_s29 }
 0x87f   :  { %v1843_v42 = vpop.permute.xlu0 %1842 }
 0x881   :  { %v6141_v45 = vpop.permute.xlu1 %4786 }
 0x882   :  { %v4789_v56 = vunpack.i.h.bf16 %v6141_v45  ;;  %v4788_v58 = vunpack.i.l.bf16 %v6141_v45 }
 0x883   :  { %v1830_v59 = vpop.permute.xlu0 %1829 }
 0x884   :  { %v1854_v61 = vsel %vm322_vm1, %v1843_v42, %v4788_v58  ;;  %v1855_v4 = vsel %vm322_vm1, %v4788_v58, %v4789_v56  ;;  %v1835_v57 = vmax.f32 %v1640_v53, %v1830_v59  ;;  %v1734_v53 = vld [vmem:[#allocation27 + $0x2e8] sm:$0xff]  ;;  %v4602_v42 = vpack.c.bf16 %v1731_v50, %v1729_v49  ;;  %v1768_v49 = vld [vmem:[#allocation27 + $0x3f8] sm:$0xff] }
 0x885   :  { %v6149_v8 = vpop.permute.xlu1 %1812  ;;  %v1865_v62 = vmax.f32 %v1824_v28, %v1855_v4  ;;  %v1864_v10 = vmax.f32 %v1823_v33, %v1854_v61  ;;  %v1727_v28 = vld [vmem:[#allocation27 + $0x2b0] sm:$0xff]  ;;  %v4604_v58 = vpack.c.bf16 %v1736_v55, %v1734_v53  ;;  %v1740_v61 = vld [vmem:[#allocation27 + $0x318] sm:$0xff]  ;;  %v1765_v55 = vld [vmem:[#allocation27 + $0x3e0] sm:$0xff] }
 0x886   :  { %v1817_v11 = vsel %vm304_vm2, %v4783_v39, %v6149_v8  ;;  %v1831_v12 = vsel %vm304_vm2, %v6149_v8, %v1830_v59  ;;  %v4596_v39 = vpack.c.bf16 %v1728_v17, %v1726_v38  ;;  %v4598_v33 = vpack.c.bf16 %v1727_v28, %v1725_v40  ;;  %v1733_v59 = vld [vmem:[#allocation27 + $0x2e0] sm:$0xff]  ;;  %v1764_v40 = vld [vmem:[#allocation27 + $0x3d8] sm:$0xff] }
 0x887   :  { %v6156_v16 = vmax.f32 %v6119_v35, %v1817_v11  ;;  %v1834_v6 = vmax.f32 %v6137_v41, %v1831_v12  ;;  %1943 = vmatprep.mubr.f32.mxu1 %v1865_v62  ;;  %v4584_v35 = vpack.c.bf16 %v1716_v21, %v1714_v20  ;;  %v4606_v4 = vpack.c.bf16 %v1735_v63, %v1733_v59  ;;  %v1739_v62 = vld [vmem:[#allocation27 + $0x310] sm:$0xff]  ;;  %v1744_v11 = vld [vmem:[#allocation27 + $0x338] sm:$0xff]  ;;  %v1757_v17 = vld [vmem:[#allocation27 + $0x3a0] sm:$0xff] }
 0x888   :  { %1944 = vmatmul.mubr.f32.vlgmr.msra.gmra.mrb[16].mxu1 %v1864_v10  ;;  %v4608_v5 = vpack.c.bf16 %v1740_v61, %v1738_v1  ;;  %v1742_v10 = vld [vmem:[#allocation27 + $0x328] sm:$0xff]  ;;  %v4610_v12 = vpack.c.bf16 %v1739_v62, %v1737_v7  ;;  %v4616_v21 = vpack.c.bf16 %v1748_v19, %v1746_v18  ;;  %v1772_v59 = vld [vmem:[#allocation27 + $0x418] sm:$0xff]  ;;  %v1769_v61 = vld [vmem:[#allocation27 + $0x400] sm:$0xff] }
 0x889   :  { %1850 = vrot.lane.b32.xlu0 %v1834_v6, %s5270_s30  ;;  %1848 = vrot.lane.b32.xlu1 %v6156_v16, %s5270_s30  ;;  %v1741_v6 = vld [vmem:[#allocation27 + $0x320] sm:$0xff]  ;;  %v1774_v62 = vld [vmem:[#allocation27 + $0x428] sm:$0xff] }
 0x88a   :  { %4579 = vmatpush1.bf16.msra.mxu1 %v4578_v13  ;;  %v4612_v13 = vpack.c.bf16 %v1744_v11, %v1742_v10  ;;  %v1776_v10 = vld [vmem:[#allocation27 + $0x438] sm:$0xff]  ;;  %v1773_v19 = vld [vmem:[#allocation27 + $0x420] sm:$0xff] }
 0x88b   :  { %4581 = vmatprep.subr.bf16.mxu1 %v4580_v60  ;;  %v1743_v60 = vld [vmem:[#allocation27 + $0x330] sm:$0xff]  ;;  %v4644_v18 = vpack.c.bf16 %v1776_v10, %v1774_v62 }
 0x88c   :  { %v4614_v20 = vpack.c.bf16 %v1743_v60, %v1741_v6 }
 0x88d   :  { %1852 = vrot.lane.b32.xlu1 %v1835_v57, %s5270_s30  ;;  %v1747_v57 = vld [vmem:[#allocation27 + $0x350] sm:$0xff] }
 0x88e   :  { %4583 = vmatpush1.bf16.msra.mxu1 %v4582_v23  ;;  %v1745_v23 = vld [vmem:[#allocation27 + $0x340] sm:$0xff] }
 0x88f   :  { %4585 = vmatprep.subr.bf16.mxu1 %v4584_v35  ;;  %v1750_v35 = vld [vmem:[#allocation27 + $0x368] sm:$0xff]  ;;  %v4618_v25 = vpack.c.bf16 %v1747_v57, %v1745_v23  ;;  %v1780_v23 = vld [vmem:[#allocation27 + $0x458] sm:$0xff] }
 0x890   :  { %v4620_v26 = vpack.c.bf16 %v1752_v24, %v1750_v35  ;;  %v1779_v35 = vld [vmem:[#allocation27 + $0x450] sm:$0xff]  ;;  %v1782_v24 = vld [vmem:[#allocation27 + $0x468] sm:$0xff] }
 0x892   :  { %4587 = vmatpush1.bf16.msra.mxu1 %v4586_v31  ;;  %v1751_v31 = vld [vmem:[#allocation27 + $0x370] sm:$0xff] }
 0x893   :  { %4589 = vmatprep.subr.bf16.mxu1 %v4588_v14  ;;  %v1754_v14 = vld [vmem:[#allocation27 + $0x388] sm:$0xff]  ;;  %v4622_v34 = vpack.c.bf16 %v1751_v31, %v1749_v27  ;;  %v1783_v27 = vld [vmem:[#allocation27 + $0x470] sm:$0xff] }
 0x894   :  { %v4624_v36 = vpack.c.bf16 %v1756_v32, %v1754_v14  ;;  %v1786_v31 = vld [vmem:[#allocation27 + $0x488] sm:$0xff]  ;;  %v1788_v14 = vld [vmem:[#allocation27 + $0x498] sm:$0xff] }
 0x896   :  { %4591 = vmatpush1.bf16.msra.mxu1 %v4590_v48  ;;  %v1755_v48 = vld [vmem:[#allocation27 + $0x390] sm:$0xff] }
 0x897   :  { %4593 = vmatprep.subr.bf16.mxu1 %v4592_v22  ;;  %v1758_v22 = vld [vmem:[#allocation27 + $0x3a8] sm:$0xff]  ;;  %v4626_v44 = vpack.c.bf16 %v1755_v48, %v1753_v0  ;;  %v1792_v48 = vld [vmem:[#allocation27 + $0x4b8] sm:$0xff] }
 0x898   :  { %v4628_v38 = vpack.c.bf16 %v1760_v37, %v1758_v22  ;;  %v1790_v0 = vld [vmem:[#allocation27 + $0x4a8] sm:$0xff] }
 0x899   :  { %v4660_v37 = vpack.c.bf16 %v1792_v48, %v1790_v0 }
 0x89a   :  { %4595 = vmatpush1.bf16.msra.mxu1 %v4594_v29  ;;  %v1759_v29 = vld [vmem:[#allocation27 + $0x3b0] sm:$0xff] }
 0x89b   :  { %4597 = vmatprep.subr.bf16.mxu1 %v4596_v39  ;;  %v1762_v39 = vld [vmem:[#allocation27 + $0x3c8] sm:$0xff]  ;;  %v4630_v28 = vpack.c.bf16 %v1759_v29, %v1757_v17  ;;  %v1796_v29 = vld [vmem:[#allocation27 + $0x4d8] sm:$0xff] }
 0x89c   :  { %v4632_v43 = vpack.c.bf16 %v1764_v40, %v1762_v39  ;;  %v1794_v17 = vld [vmem:[#allocation27 + $0x4c8] sm:$0xff] }
 0x89d   :  { %v4664_v40 = vpack.c.bf16 %v1796_v29, %v1794_v17 }
 0x89e   :  { %4599 = vmatpush1.bf16.msra.mxu1 %v4598_v33  ;;  %v1763_v33 = vld [vmem:[#allocation27 + $0x3d0] sm:$0xff] }
 0x89f   :  { %4601 = vmatprep.subr.bf16.mxu1 %v4600_v54  ;;  %v1766_v54 = vld [vmem:[#allocation27 + $0x3e8] sm:$0xff]  ;;  %v4634_v50 = vpack.c.bf16 %v1763_v33, %v1761_v46 }
 0x8a0   :  { %v4636_v53 = vpack.c.bf16 %v1768_v49, %v1766_v54  ;;  %v1798_v54 = vld [vmem:[#allocation27 + $0x4e8] sm:$0x1f] }
 0x8a2   :  { %4603 = vmatpush1.bf16.msra.mxu1 %v4602_v42  ;;  %v1767_v42 = vld [vmem:[#allocation27 + $0x3f0] sm:$0xff] }
 0x8a3   :  { %4605 = vmatprep.subr.bf16.mxu1 %v4604_v58  ;;  %v1770_v58 = vld [vmem:[#allocation27 + $0x408] sm:$0xff]  ;;  %v4638_v63 = vpack.c.bf16 %v1767_v42, %v1765_v55 }
 0x8a4   :  { %v4640_v1 = vpack.c.bf16 %v1772_v59, %v1770_v58 }
 0x8a6   :  { %4607 = vmatpush1.bf16.msra.mxu1 %v4606_v4  ;;  %v1771_v4 = vld [vmem:[#allocation27 + $0x410] sm:$0xff] }
 0x8a7   :  { %4609 = vmatprep.subr.bf16.mxu1 %v4608_v5  ;;  %v4642_v60 = vpack.c.bf16 %v1771_v4, %v1769_v61 }
 0x8aa   :  { %4611 = vmatpush1.bf16.msra.mxu1 %v4610_v12 }
 0x8ab   :  { %4613 = vmatprep.subr.bf16.mxu1 %v4612_v13 }
 0x8ae   :  { %4615 = vmatpush1.bf16.msra.mxu1 %v4614_v20  ;;  %v1775_v20 = vld [vmem:[#allocation27 + $0x430] sm:$0xff] }
 0x8af   :  { %4617 = vmatprep.subr.bf16.mxu1 %v4616_v21  ;;  %v1778_v21 = vld [vmem:[#allocation27 + $0x448] sm:$0xff]  ;;  %v4646_v57 = vpack.c.bf16 %v1775_v20, %v1773_v19 }
 0x8b0   :  { %v4648_v45 = vpack.c.bf16 %v1780_v23, %v1778_v21 }
 0x8b2   :  { %4619 = vmatpush1.bf16.msra.mxu1 %v4618_v25 }
 0x8b3   :  { %4621 = vmatprep.subr.bf16.mxu1 %v4620_v26  ;;  %v1781_v26 = vld [vmem:[#allocation27 + $0x460] sm:$0xff] }
 0x8b4   :  { %v4654_v32 = vpack.c.bf16 %v1783_v27, %v1781_v26 }
 0x8b6   :  { %4623 = vmatpush1.bf16.msra.mxu1 %v4622_v34  ;;  %v4656_v34 = vpack.c.bf16 %v1788_v14, %v1786_v31 }
 0x8b7   :  { %4625 = vmatprep.subr.bf16.mxu1 %v4624_v36  ;;  %v1785_v36 = vld [vmem:[#allocation27 + $0x480] sm:$0xff] }
 0x8ba   :  { %4627 = vmatpush1.bf16.msra.mxu1 %v4626_v44  ;;  %v1789_v44 = vld [vmem:[#allocation27 + $0x4a0] sm:$0xff] }
 0x8bb   :  { %4629 = vmatprep.subr.bf16.mxu1 %v4628_v38  ;;  %v1791_v38 = vld [vmem:[#allocation27 + $0x4b0] sm:$0xff] }
 0x8bc   :  { %v4662_v39 = vpack.c.bf16 %v1791_v38, %v1789_v44 }
 0x8be   :  { %4631 = vmatpush1.bf16.msra.mxu1 %v4630_v28  ;;  %v1793_v28 = vld [vmem:[#allocation27 + $0x4c0] sm:$0xff] }
 0x8bf   :  { %4633 = vmatprep.subr.bf16.mxu1 %v4632_v43  ;;  %v1795_v43 = vld [vmem:[#allocation27 + $0x4d0] sm:$0xff] }
 0x8c0   :  { %v4666_v46 = vpack.c.bf16 %v1795_v43, %v1793_v28 }
 0x8c2   :  { %4635 = vmatpush1.bf16.msra.mxu1 %v4634_v50  ;;  %v1827_v50 = vmax.f32 %v6137_v41, %v6149_v8 }
 0x8c3   :  { %4637 = vmatprep.subr.bf16.mxu1 %v4636_v53  ;;  %v1797_v53 = vld [vmem:[#allocation27 + $0x4e0] sm:$0x1f] }
 0x8c6   :  { %4639 = vmatpush1.bf16.msra.mxu1 %v4638_v63 }
 0x8c7   :  { %4641 = vmatprep.subr.bf16.mxu1 %v4640_v1 }
 0x8fb   :  { %v1851_v5 = vpop.permute.xlu0 %1850  ;;  %v1849_v7 = vpop.permute.xlu1 %1848 }
 0x8fc   :  { %v1856_v11 = vsel %vm322_vm1, %v4789_v56, %v1849_v7  ;;  %v1857_v12 = vsel %vm322_vm1, %v1849_v7, %v1851_v5  ;;  %v1777_v56 = vld [vmem:[#allocation27 + $0x440] sm:$0xff] }
 0x8fd   :  { %v1866_v13 = vmax.f32 %v6130_v47, %v1856_v11  ;;  %v1867_v6 = vmax.f32 %v6156_v16, %v1857_v12  ;;  %v1784_v47 = vld [vmem:[#allocation27 + $0x478] sm:$0xff]  ;;  %v4650_v16 = vpack.c.bf16 %v1779_v35, %v1777_v56 }
 0x8fe   :  { %v4652_v25 = vpack.c.bf16 %v1784_v47, %v1782_v24 }
 0x8ff   :  { %2014 = vmatprep.mubr.f32.mxu1 %v1867_v6  ;;  %v1853_v33 = vpop.permute.xlu1 %1852  ;;  %v2095_v6 = vld [vmem:[%s6962_s13] sm:$0xff] }
 0x900   :  { %2015 = vmatmul.mubr.f32.vlgmr.msra.gmra.mrb[16].mxu1 %v1866_v13  ;;  %v1858_v49 = vsel %vm322_vm1, %v1851_v5, %v1853_v33  ;;  %vm7017_vm1 = vcmask 408581  }
 0x901   :  { %4643 = vmatpush1.bf16.msra.mxu1 %v4642_v60  ;;  %2085 = vmatprep.mubr.f32.mxu1 %v6083_v51  ;;  %v1787_v51 = vld [vmem:[#allocation27 + $0x490] sm:$0xff]  ;;  %v1868_v55 = vmax.f32 %v1827_v50, %v1858_v49 }
 0x902   :  { %4645 = vmatprep.subr.bf16.mxu1 %v4644_v18  ;;  %v4658_v22 = vpack.c.bf16 %v1787_v51, %v1785_v36  ;;  %v2096_v60 = vld [vmem:[%s6962_s13 + $0x8] sm:$0x7f]  ;;  %s5288_s13 = smov 11  }
 0x905   :  { %4647 = vmatpush1.bf16.msra.mxu1 %v4646_v57 }
 0x906   :  { %4649 = vmatprep.subr.bf16.mxu1 %v4648_v45 }
 0x909   :  { %4651 = vmatpush1.bf16.msra.mxu1 %v4650_v16 }
 0x90a   :  { %4653 = vmatprep.subr.bf16.mxu1 %v4652_v25 }
 0x90d   :  { %4655 = vmatpush1.bf16.msra.mxu1 %v4654_v32 }
 0x90e   :  { %4657 = vmatprep.subr.bf16.mxu1 %v4656_v34 }
 0x911   :  { %4659 = vmatpush1.bf16.msra.mxu1 %v4658_v22 }
 0x912   :  { %4661 = vmatprep.subr.bf16.mxu1 %v4660_v37 }
 0x915   :  { %4663 = vmatpush1.bf16.msra.mxu1 %v4662_v39 }
 0x916   :  { %4665 = vmatprep.subr.bf16.mxu1 %v4664_v40 }
 0x919   :  { %4667 = vmatpush1.bf16.msra.mxu1 %v4666_v46 }
 0x91a   :  { %4401 = vmatprep.subr.msk.mxu1 %vm7068_vm13, %v1798_v54  ;;  %vm2171_vm13 = vcmask 406529  }
 0x91d   :  { %4402 = vmatpush1.msk.msra.mxu1 %vm7069_vm15, %v1797_v53  ;;  %vm7019_vm15 = vcmask 408582  }
 0x91e   :  { %4403 = vmatmul.mubr.msk.f32.vlgmr.msra.gmra.mrb[16].mxu1 %vm1869_vm4, %v1868_v55  ;;  %3807 = vmatprep.subr.bf16.mxu1 %v5278_v3 }
 0x9f1   :  { %v2087_v42 = vpop.f32.mrb[16].mxu1 }
 0x9f2   :  { %2097 = vst [vmem:[#allocation6] sm:$0x1f] %v2087_v42  ;;  %v2089_v58 = vpop.f32.mrb[17].mxu1  ;;  %v2102_v59 = vrot.slane %v2087_v42, 3  ;;  %v2117_v41 = vrot.slane %v2087_v42, 6  ;;  %v2129_v1 = vrot.slane %v2087_v42, 1 }
 0x9f3   :  { %2099 = vst.msk [vmem:[#allocation6 + $0x8] sm:$0x1f] %vm7008_vm5, %v2089_v58  ;;  %v2103_v63 = vrot.slane %v2089_v58, 3  ;;  %v2118_v8 = vrot.slane %v2089_v58, 6  ;;  %v2130_v61 = vrot.slane %v2089_v58, 1  ;;  %v2145_v4 = vrot.slane %v2087_v42, 4 }
 0x9f4   :  { %2104 = vrot.lane.b32.xlu0 %v2102_v59, %s5271_s29  ;;  %v2146_v5 = vrot.slane %v2089_v58, 4  ;;  %v2160_v7 = vrot.slane %v2087_v42, 7  ;;  %v2161_v62 = vrot.slane %v2089_v58, 7  ;;  %v2173_v10 = vrot.slane %v2087_v42, 2 }
 0x9f5   :  { %2106 = vrot.lane.b32.xlu1 %v2103_v63, %s5271_s29  ;;  %v2174_v11 = vrot.slane %v2089_v58, 2  ;;  %v2188_v12 = vrot.slane %v2087_v42, 5  ;;  %v2189_v13 = vrot.slane %v2089_v58, 5 }
 0x9f8   :  { %2119 = vrot.lane.b32.xlu0 %v2117_v41, %s5273_s25  ;;  %v4790_v41 = vld [vmem:[#allocation13] sm:$0xff]  }
 0x9f9   :  { %2121 = vrot.lane.b32.xlu1 %v2118_v8, %s5273_s25 }
 0x9fc   :  { %2131 = vrot.lane.b32.xlu0 %v2129_v1, %s5283_s12 }
 0x9fd   :  { %2133 = vrot.lane.b32.xlu1 %v2130_v61, %s5283_s12 }
 0xa00   :  { %2147 = vrot.lane.b32.xlu0 %v2145_v4, %s5284_s9 }
 0xa01   :  { %2149 = vrot.lane.b32.xlu1 %v2146_v5, %s5284_s9 }
 0xa04   :  { %2162 = vrot.lane.b32.xlu0 %v2160_v7, %s5285_s17 }
 0xa05   :  { %2164 = vrot.lane.b32.xlu1 %v2161_v62, %s5285_s17 }
 0xa08   :  { %2175 = vrot.lane.b32.xlu0 %v2173_v10, %s5275_s20 }
 0xa09   :  { %2177 = vrot.lane.b32.xlu1 %v2174_v11, %s5275_s20 }
 0xa0c   :  { %2190 = vrot.lane.b32.xlu0 %v2188_v12, %s5286_s27 }
 0xa0d   :  { %2192 = vrot.lane.b32.xlu1 %v2189_v13, %s5286_s27  ;;  %v6221_v13 = vld [vmem:[#allocation3] sm:$0xff] }
 0xa10   :  { %2201 = vrot.lane.b32.xlu0 %v2087_v42, %s5287_s4 }
 0xa11   :  { %2203 = vrot.lane.b32.xlu1 %v2089_v58, %s5287_s4 }
 0xa14   :  { %2231 = vperm.xlu0 %4773, %v2095_v6  }
 0xa15   :  { %2236 = vperm.xlu1 %4774, %v2096_v60  }
 0xa66   :  { %v2105_v18 = vpop.permute.xlu0 %2104 }
 0xa67   :  { %v2107_v19 = vpop.permute.xlu1 %2106 }
 0xa68   :  { %v2108_v20 = vsel %vm304_vm2, %v2105_v18, %v2107_v19  ;;  %2113 = vst.msk [vmem:[#allocation6 + $0x8] sm:$0xe0] %vm7017_vm1, %v2107_v19 }
 0xa69   :  { %2116 = vst.msk [vmem:[#allocation6 + $0x18] sm:$0x3] %vm7005_vm7, %v2107_v19  ;;  %2111 = vst [vmem:[#allocation6 + $0x10] ss:$-12 sps:$4 sm:$0xe3] %v2108_v20   ;;  %vm280_vm7 = vcmask 588800  }
 0xa6a   :  { %v2120_v21 = vpop.permute.xlu0 %2119  ;;  %281 = vst.msk [vmem:[#allocation3 + $0x8] sm:$0xff] %vm280_vm7, %v6221_v13  ;;  %285 = vst.msk [vmem:[#allocation4] sm:$0xff] %vm280_vm7, %v6221_v13 }
 0xa6b   :  { %v2122_v23 = vpop.permute.xlu1 %2121  ;;  %286 = vst.msk [vmem:[#allocation4 + $0x8] sm:$0xff] %vm280_vm7, %v6221_v13  ;;  %287 = vst.msk [vmem:[#allocation4 + $0x10] sm:$0xff] %vm280_vm7, %v6221_v13  ;;  %vm7014_vm7 = vcmask 1047640  }
 0xa6c   :  { %v2123_v57 = vsel %vm7070_vm9, %v2120_v21, %v2122_v23  ;;  %2128 = vst.msk [vmem:[#allocation6 + $0x18] sm:$0x7c] %vm2127_vm8, %v2122_v23  ;;  %vm7006_vm8 = vcmask 403456   ;;  %vm7009_vm9 = vcmask 875520  }
 0xa6d   :  { %2126 = vst [vmem:[#allocation6 + $0x10] sm:$0x7c] %v2123_v57 }
 0xa6e   :  { %v2132_v45 = vpop.permute.xlu0 %2131 }
 0xa6f   :  { %v2134_v56 = vpop.permute.xlu1 %2133  ;;  %v2212_v27 = vld [vmem:[#allocation6 + $0x8] sm:$0xff] }
 0xa70   :  { %v2136_v35 = vsel %vm2135_vm10, %v2132_v45, %v2134_v56  ;;  %2141 = vst.msk [vmem:[#allocation6 + $0x18] sm:$0x80] %vm2140_vm12, %v2134_v56  ;;  %v2211_v34 = vld [vmem:[#allocation6] sm:$0xff] }
 0xa71   :  { %2144 = vst.msk [vmem:[#allocation6 + $0x28] sm:$0xf] %vm7007_vm0, %v2134_v56  ;;  %2139 = vst [vmem:[#allocation6 + $0x20] ss:$-12 sps:$4 sm:$0x8f] %v2136_v35   ;;  %vm7010_vm0 = vcmask 1046616  }
 0xa72   :  { %v2148_v24 = vpop.permute.xlu0 %2147 }
 0xa73   :  { %v2150_v47 = vpop.permute.xlu1 %2149 }
 0xa74   :  { %v2151_v16 = vsel %vm1869_vm4, %v2148_v24, %v2150_v47  ;;  %2156 = vst.msk [vmem:[#allocation6 + $0x28] sm:$0xf0] %vm7018_vm11, %v2150_v47 }
 0xa75   :  { %2159 = vst.msk [vmem:[#allocation6 + $0x38] sm:$0x1] %vm7003_vm14, %v2150_v47  ;;  %2154 = vst [vmem:[#allocation6 + $0x30] ss:$-12 sps:$4 sm:$0xf1] %v2151_v16   ;;  %vm7004_vm14 = vcmask 867328  }
 0xa76   :  { %v2163_v25 = vpop.permute.xlu0 %2162 }
 0xa77   :  { %v2165_v26 = vpop.permute.xlu1 %2164  ;;  %v2214_v31 = vld [vmem:[#allocation6 + $0x18] sm:$0xff] }
 0xa78   :  { %v2167_v14 = vsel %vm2166_vm3, %v2163_v25, %v2165_v26  ;;  %2172 = vst.msk [vmem:[#allocation6 + $0x38] sm:$0x3e] %vm2171_vm13, %v2165_v26  ;;  %v2224_v32 = vpack.c.bf16 %v2214_v31, %v2212_v27  ;;  %v2213_v36 = vld [vmem:[#allocation6 + $0x10] sm:$0xff]  ;;  %vm7023_vm13 = vcmask 408579  }
 0xa79   :  { %2170 = vst [vmem:[#allocation6 + $0x30] sm:$0x3e] %v2167_v14  ;;  %v2223_v51 = vpack.c.bf16 %v2213_v36, %v2211_v34 }
 0xa7a   :  { %v2176_v0 = vpop.permute.xlu0 %2175  ;;  %2253 = vmatprep.subr.bf16.mxu0 %v2224_v32 }
 0xa7b   :  { %v2178_v48 = vpop.permute.xlu1 %2177  ;;  %2254 = vmatpush1.bf16.msra.mxu0 %v2223_v51  ;;  %v2216_v39 = vld [vmem:[#allocation6 + $0x28] sm:$0xff] }
 0xa7c   :  { %v2179_v22 = vsel %vm7016_vm6, %v2176_v0, %v2178_v48  ;;  %2184 = vst.msk [vmem:[#allocation6 + $0x38] sm:$0xc0] %vm7019_vm15, %v2178_v48  ;;  %v2215_v46 = vld [vmem:[#allocation6 + $0x20] sm:$0xff] }
 0xa7d   :  { %2187 = vst.msk [vmem:[#allocation6 + $0x48] sm:$0x7] %vm7006_vm8, %v2178_v48  ;;  %2182 = vst [vmem:[#allocation6 + $0x40] ss:$-12 sps:$4 sm:$0xc7] %v2179_v22   ;;  %vm7012_vm8 = vcmask 498688  }
 0xa7e   :  { %v2191_v37 = vpop.permute.xlu0 %2190 }
 0xa7f   :  { %v2193_v44 = vpop.permute.xlu1 %2192 }
 0xa80   :  { %v2195_v38 = vsel %vm7009_vm9, %v2191_v37, %v2193_v44  ;;  %2200 = vst.msk [vmem:[#allocation6 + $0x48] sm:$0xf8] %vm7023_vm13, %v2193_v44  ;;  %vm2351_vm9 = vcmask 408576  }
 0xa81   :  { %2198 = vst [vmem:[#allocation6 + $0x40] sm:$0xf8] %v2195_v38 }
 0xa82   :  { %v2202_v17 = vpop.permute.xlu0 %2201 }
 0xa83   :  { %v2204_v29 = vpop.permute.xlu1 %2203  ;;  %v2218_v40 = vld [vmem:[#allocation6 + $0x38] sm:$0xff] }
 0xa84   :  { %v2206_v28 = vsel %vm7004_vm14, %v2202_v17, %v2204_v29  ;;  %2210 = vst.msk [vmem:[#allocation6 + $0x58] sm:$0x1f] %vm7008_vm5, %v2204_v29  ;;  %v2226_v43 = vpack.c.bf16 %v2218_v40, %v2216_v39  ;;  %v2217_v33 = vld [vmem:[#allocation6 + $0x30] sm:$0xff]  ;;  %vm7071_vm14 = vcmask 367616   ;;  %vm7011_vm5 = vcmask 497664  }
 0xa85   :  { %2209 = vst [vmem:[#allocation6 + $0x50] sm:$0x1f] %v2206_v28  ;;  %v2225_v54 = vpack.c.bf16 %v2217_v33, %v2215_v46 }
 0xa86   :  { %2255 = vmatprep.subr.bf16.mxu0 %v2226_v43 }
 0xa87   :  { %2256 = vmatpush1.bf16.msra.mxu0 %v2225_v54  ;;  %v2220_v49 = vld [vmem:[#allocation6 + $0x48] sm:$0xff] }
 0xa88   :  { %v2219_v55 = vld [vmem:[#allocation6 + $0x40] sm:$0xff] }
 0xa8b   :  { %v2222_v50 = vld [vmem:[#allocation6 + $0x58] sm:$0x1f] }
 0xa8c   :  { %v2228_v53 = vpack.c.bf16 %v2222_v50, %v2220_v49  ;;  %v2221_v42 = vld [vmem:[#allocation6 + $0x50] sm:$0x1f] }
 0xa8d   :  { %v2227_v58 = vpack.c.bf16 %v2221_v42, %v2219_v55 }
 0xa8e   :  { %v2251_v59 = vand.u32 %v2228_v53, %v5893_v52 }
 0xa8f   :  { %v2248_v63 = vand.u32 %v2227_v58, %v5893_v52  ;;  %v2092_v52 = vld [vmem:[#allocation24] sm:$0x3] }
 0xa90   :  { %2257 = vmatprep.subr.bf16.mxu0 %v2251_v59  ;;  %v6229_v6 = vrot.slane %v2092_v52, %v546_v9  ;;  %v6233_v60 = vrot.slane %v2092_v52, %v550_v15 }
 0xa91   :  { %2258 = vmatpush1.bf16.msra.mxu0 %v2248_v63 }
 0xa93   :  { %v2232_v8 = vpop.permute.xlu0 %2231 }
 0xa94   :  { %4405 = vmatmul.mubr.msk.bf16.vlgmr.msra.gmra.mrb[20].mxu0 %vm7071_vm14, %v4790_v41  ;;  %v2237_v5 = vpop.permute.xlu1 %2236  ;;  %vm283_vm14 = vcmask 587776  }
 0xa95   :  { %284 = vst.msk [vmem:[#allocation3 + $0x18] sm:$0x7f] %vm283_vm14, %v6221_v13  ;;  %vm7013_vm14 = vcmask 89088  }
 0xb67   :  { %v2287_v1 = vpop.f32.mrb[20].mxu0 }
 0xb68   :  { %v2288_v61 = vadd.f32 %v2287_v1, %v2232_v8  ;;  %v2289_v4 = vpop.f32.mrb[21].mxu0 }
 0xb69   :  { %v2290_v7 = vadd.f32 %v2289_v4, %v2232_v8  ;;  %v2291_v62 = vpop.f32.mrb[22].mxu0 }
 0xb6a   :  { %4845 = vtanh.f32 %v2288_v61  ;;  %v2292_v10 = vadd.f32 %v2291_v62, %v2237_v5  ;;  %v2293_v11 = vpop.f32.mrb[23].mxu0 }
 0xb6b   :  { %4847 = vtanh.f32 %v2290_v7  ;;  %v2294_v12 = vadd.f32 %v2293_v11, %v2237_v5 }
 0xb6c   :  { %4849 = vtanh.f32 %v2292_v10 }
 0xb6d   :  { %4851 = vtanh.f32 %v2294_v12 }
 0xb74   :  { %v4846_v18 = vpop.eup %4845 }
 0xb75   :  { %v4848_v19 = vpop.eup %4847  ;;  %v2311_v20 = vmul.f32 %v4846_v18, %v6229_v6 }
 0xb76   :  { %v4850_v21 = vpop.eup %4849  ;;  %v2312_v23 = vmul.f32 %v4848_v19, %v6233_v60  ;;  %v2348_v19 = vld [vmem:[%s6963_s14] sm:$0xff] }
 0xb77   :  { %v4852_v57 = vpop.eup %4851  ;;  %2319 = vrot.lane.b32.xlu0 %v2311_v20, %s5288_s13  ;;  %v2313_v9 = vmul.f32 %v4850_v21, %v6229_v6  ;;  %v2349_v20 = vld [vmem:[%s6963_s14 + $0x8] sm:$0x7f]  ;;  %v4791_v21 = vld [vmem:[#allocation15 + $0x4] ss:$8 sps:$4 sm:$0xff]   ;;  %s7145_s14 = sld [smem:[#allocation50_spill]] }
 0xb78   :  { %2321 = vrot.lane.b32.xlu1 %v2312_v23, %s5288_s13  ;;  %v2314_v2 = vmul.f32 %v4852_v57, %v6233_v60 }
 0xb7b   :  { %2323 = vrot.lane.b32.xlu0 %v2313_v9, %s5288_s13 }
 0xb7c   :  { %2325 = vrot.lane.b32.xlu1 %v2314_v2, %s5288_s13 }
 0xbe9   :  { %v2320_v15 = vpop.permute.xlu0 %2319 }
 0xbea   :  { %2335 = vst.msk [vmem:[#allocation3] sm:$0xff] %vm7014_vm7, %v2320_v15  ;;  %v2322_v45 = vpop.permute.xlu1 %2321 }
 0xbeb   :  { %v2328_v56 = vsel %vm7013_vm14, %v2320_v15, %v2322_v45 }
 0xbec   :  { %2337 = vst.msk [vmem:[#allocation3 + $0x8] sm:$0xff] %vm7012_vm8, %v2328_v56 }
 0xbed   :  { %v2324_v35 = vpop.permute.xlu0 %2323 }
 0xbee   :  { %2339 = vst.msk [vmem:[#allocation3 + $0x10] sm:$0x7f] %vm7010_vm0, %v2324_v35  ;;  %v2326_v24 = vpop.permute.xlu1 %2325  ;;  %vm7015_vm0 = vcmask 407552  }
 0xbef   :  { %v2329_v47 = vsel %vm7013_vm14, %v2324_v35, %v2326_v24  ;;  %vm7074_vm14 = vcmask 1045504  }
 0xbf0   :  { %2341 = vst.msk [vmem:[#allocation3 + $0x18] sm:$0x7f] %vm7011_vm5, %v2329_v47  ;;  %vm7072_vm5 = vcmask 1046528   ;;  %vm7075_vm7 = vmmov %vm7074_vm14 }
 0xbf1   :  { %v6250_v16 = vld [vmem:[#allocation3] sm:$0xff]  ;;  %vm7073_vm8 = vmmov %vm7072_vm5 }
 0xbf2   :  { %2588 = vrot.lane.b32.xlu0 %v6250_v16, %s5287_s4  ;;  %v2360_v26 = vrot.slane %v6250_v16, 1  ;;  %v2394_v32 = vrot.slane %v6250_v16, 2  ;;  %v2427_v36 = vrot.slane %v6250_v16, 3  ;;  %v2460_v0 = vrot.slane %v6250_v16, 4 }
 0xbf3   :  { %v6254_v25 = vld [vmem:[#allocation3 + $0x8] sm:$0xff]  ;;  %v2494_v22 = vrot.slane %v6250_v16, 5  ;;  %v2528_v44 = vrot.slane %v6250_v16, 6  ;;  %v2563_v17 = vrot.slane %v6250_v16, 7 }
 0xbf4   :  { %2590 = vrot.lane.b32.xlu1 %v6254_v25, %s5287_s4  ;;  %2352 = vst.msk [vmem:[#allocation6 + $0x8] sm:$0xff] %vm2351_vm9, %v6254_v25  ;;  %v2361_v31 = vrot.slane %v6254_v25, 1  ;;  %v2395_v34 = vrot.slane %v6254_v25, 2  ;;  %v2428_v51 = vrot.slane %v6254_v25, 3  ;;  %v2461_v48 = vrot.slane %v6254_v25, 4 }
 0xbf5   :  { %v6261_v27 = vld [vmem:[#allocation3 + $0x10] sm:$0x7f]  ;;  %v2495_v37 = vrot.slane %v6254_v25, 5  ;;  %v2529_v38 = vrot.slane %v6254_v25, 6  ;;  %v2564_v29 = vrot.slane %v6254_v25, 7 }
 0xbf6   :  { %2353 = vst [vmem:[#allocation6 + $0x10] sm:$0x7f] %v6261_v27  ;;  %2366 = vrot.lane.b32.xlu0 %v2360_v26, %s5271_s29  ;;  %v2362_v39 = vrot.slane %v6261_v27, 1  ;;  %v2396_v28 = vrot.slane %v6261_v27, 2  ;;  %v2429_v46 = vrot.slane %v6261_v27, 3  ;;  %v2462_v54 = vrot.slane %v6261_v27, 4 }
 0xbf7   :  { %v6266_v14 = vld [vmem:[#allocation3 + $0x18] sm:$0x7f]  ;;  %v2496_v50 = vrot.slane %v6261_v27, 5  ;;  %v2530_v55 = vrot.slane %v6261_v27, 6  ;;  %v2565_v10 = vrot.slane %v6261_v27, 7 }
 0xbf8   :  { %2368 = vrot.lane.b32.xlu1 %v2361_v31, %s5271_s29  ;;  %2355 = vst.msk [vmem:[#allocation6 + $0x18] sm:$0x7f] %vm7015_vm0, %v6266_v14  ;;  %v2364_v40 = vrot.slane %v6266_v14, 1  ;;  %v2398_v43 = vrot.slane %v6266_v14, 2  ;;  %v2431_v33 = vrot.slane %v6266_v14, 3  ;;  %v2464_v49 = vrot.slane %v6266_v14, 4 }
 0xbf9   :  { %v2498_v53 = vrot.slane %v6266_v14, 5  ;;  %v2532_v42 = vrot.slane %v6266_v14, 6  ;;  %v2363_v58 = vsel %vm7072_vm5, %v2360_v26, %v2362_v39  ;;  %v2397_v63 = vsel %vm7074_vm14, %v2394_v32, %v2396_v28 }
 0xbfa   :  { %2400 = vrot.lane.b32.xlu0 %v2394_v32, %s5273_s25  ;;  %v2365_v59 = vsel %vm7073_vm8, %v2361_v31, %v2364_v40  ;;  %v2399_v41 = vsel %vm7075_vm7, %v2395_v34, %v2398_v43  ;;  %vm7076_vm0 = vcmask 1044480   ;;  %vm7078_vm5 = vcmask 1043456  }
 0xbfb   :  { %v2430_v8 = vsel %vm7076_vm0, %v2427_v36, %v2429_v46  ;;  %vm7077_vm6 = vmmov %vm7076_vm0  ;;  %v2463_v61 = vsel %vm7078_vm5, %v2460_v0, %v2462_v54  ;;  %vm2493_vm8 = vcmask 1042432   ;;  %vm2527_vm0 = vcmask 1041408   ;;  %v2607_v25 = vld [vmem:[#allocation6 + $0x8] sm:$0xff] }
 0xbfc   :  { %2402 = vrot.lane.b32.xlu1 %v2395_v34, %s5273_s25  ;;  %v2432_v1 = vsel %vm7077_vm6, %v2428_v51, %v2431_v33  ;;  %vm7079_vm14 = vmmov %vm7078_vm5  ;;  %v2497_v5 = vsel %vm2493_vm8, %v2494_v22, %v2496_v50  ;;  %v2499_v7 = vsel %vm2493_vm8, %v2495_v37, %v2498_v53  ;;  %v2531_v62 = vsel %vm2527_vm0, %v2528_v44, %v2530_v55 }
 0xbfd   :  { %v2465_v4 = vsel %vm7079_vm14, %v2461_v48, %v2464_v49  ;;  %vm2562_vm6 = vcmask 1040384   ;;  %v2533_v11 = vsel %vm2527_vm0, %v2529_v38, %v2532_v42  ;;  %v2567_v12 = vrot.slane %v6266_v14, 7 }
 0xbfe   :  { %2433 = vrot.lane.b32.xlu0 %v2427_v36, %s5283_s12  ;;  %v2566_v52 = vsel %vm2562_vm6, %v2563_v17, %v2565_v10  ;;  %vm2677_vm7 = vcmask 56320   ;;  %vm7080_vm5 = vcmask 1031168   ;;  %vm7020_vm14 = vcmask 408578  }
 0xbff   :  { %v2568_v18 = vsel %vm2562_vm6, %v2564_v29, %v2567_v12  ;;  %4408 = vmatprep.mubr.msk.bf16.mxu0 %vm2677_vm7, %v4791_v21 }
 0xc00   :  { %2435 = vrot.lane.b32.xlu1 %v2428_v51, %s5283_s12 }
 0xc02   :  { %2466 = vrot.lane.b32.xlu0 %v2460_v0, %s5284_s9 }
 0xc04   :  { %2468 = vrot.lane.b32.xlu1 %v2461_v48, %s5284_s9 }
 0xc06   :  { %2500 = vrot.lane.b32.xlu0 %v2494_v22, %s5285_s17 }
 0xc08   :  { %2502 = vrot.lane.b32.xlu1 %v2495_v37, %s5285_s17 }
 0xc0a   :  { %2534 = vrot.lane.b32.xlu0 %v2528_v44, %s5275_s20 }
 0xc0c   :  { %2536 = vrot.lane.b32.xlu1 %v2529_v38, %s5275_s20 }
 0xc0e   :  { %2569 = vrot.lane.b32.xlu0 %v2563_v17, %s5286_s27 }
 0xc10   :  { %2571 = vrot.lane.b32.xlu1 %v2564_v29, %s5286_s27 }
 0xc12   :  { %2374 = vrot.lane.b32.xlu0 %v2362_v39, %s5271_s29 }
 0xc14   :  { %2376 = vrot.lane.b32.xlu1 %v2364_v40, %s5271_s29 }
 0xc16   :  { %2408 = vrot.lane.b32.xlu0 %v2396_v28, %s5273_s25 }
 0xc18   :  { %2410 = vrot.lane.b32.xlu1 %v2398_v43, %s5273_s25 }
 0xc1a   :  { %2441 = vrot.lane.b32.xlu0 %v2429_v46, %s5283_s12 }
 0xc1c   :  { %2443 = vrot.lane.b32.xlu1 %v2431_v33, %s5283_s12 }
 0xc1e   :  { %2474 = vrot.lane.b32.xlu0 %v2462_v54, %s5284_s9 }
 0xc20   :  { %2476 = vrot.lane.b32.xlu1 %v2464_v49, %s5284_s9 }
 0xc22   :  { %2508 = vrot.lane.b32.xlu0 %v2496_v50, %s5285_s17 }
 0xc24   :  { %2510 = vrot.lane.b32.xlu1 %v2498_v53, %s5285_s17 }
 0xc26   :  { %2542 = vrot.lane.b32.xlu0 %v2530_v55, %s5275_s20 }
 0xc28   :  { %2544 = vrot.lane.b32.xlu1 %v2532_v42, %s5275_s20 }
 0xc2a   :  { %2370 = vrot.lane.b32.xlu0 %v2363_v58, %s5271_s29 }
 0xc2c   :  { %2372 = vrot.lane.b32.xlu1 %v2365_v59, %s5271_s29 }
 0xc2e   :  { %2404 = vrot.lane.b32.xlu0 %v2397_v63, %s5273_s25 }
 0xc30   :  { %2406 = vrot.lane.b32.xlu1 %v2399_v41, %s5273_s25 }
 0xc32   :  { %2437 = vrot.lane.b32.xlu0 %v2430_v8, %s5283_s12 }
 0xc34   :  { %2439 = vrot.lane.b32.xlu1 %v2432_v1, %s5283_s12 }
 0xc36   :  { %2470 = vrot.lane.b32.xlu0 %v2463_v61, %s5284_s9 }
 0xc38   :  { %2472 = vrot.lane.b32.xlu1 %v2465_v4, %s5284_s9 }
 0xc3a   :  { %2504 = vrot.lane.b32.xlu0 %v2497_v5, %s5285_s17 }
 0xc3c   :  { %2506 = vrot.lane.b32.xlu1 %v2499_v7, %s5285_s17 }
 0xc3e   :  { %2538 = vrot.lane.b32.xlu0 %v2531_v62, %s5275_s20 }
 0xc40   :  { %2540 = vrot.lane.b32.xlu1 %v2533_v11, %s5275_s20 }
 0xc42   :  { %2573 = vrot.lane.b32.xlu0 %v2566_v52, %s5286_s27 }
 0xc44   :  { %2575 = vrot.lane.b32.xlu1 %v2568_v18, %s5286_s27 }
 0xc46   :  { %2592 = vrot.lane.b32.xlu0 %v6261_v27, %s5287_s4 }
 0xc48   :  { %2594 = vrot.lane.b32.xlu1 %v6266_v14, %s5287_s4 }
 0xc4a   :  { %2660 = vperm.xlu0 %4773, %v2348_v19  }
 0xc4c   :  { %2665 = vperm.xlu1 %4774, %v2349_v20  }
 0xc64   :  { %v6360_v23 = vpop.permute.xlu0 %2588 }
 0xc66   :  { %v6362_v57 = vpop.permute.xlu1 %2590 }
 0xc67   :  { %2603 = vst.msk [vmem:[#allocation6 + $0xf8] sm:$0xff] %vm2351_vm9, %v6362_v57 }
 0xc68   :  { %v2367_v9 = vpop.permute.xlu0 %2366 }
 0xc6a   :  { %v2369_v2 = vpop.permute.xlu1 %2368 }
 0xc6b   :  { %v2378_v15 = vsel %vm304_vm2, %v2367_v9, %v2369_v2  ;;  %2388 = vst.msk [vmem:[#allocation6 + $0x18] sm:$0x80] %vm2140_vm12, %v2369_v2 }
 0xc6c   :  { %2387 = vst [vmem:[#allocation6 + $0x10] sm:$0x80] %v2378_v15  ;;  %v2401_v45 = vpop.permute.xlu0 %2400 }
 0xc6e   :  { %v2403_v56 = vpop.permute.xlu1 %2402 }
 0xc6f   :  { %v2412_v35 = vsel %vm7080_vm5, %v2401_v45, %v2403_v56  ;;  %2422 = vst.msk [vmem:[#allocation6 + $0x38] sm:$0xc0] %vm7019_vm15, %v2403_v56  ;;  %vm7081_vm5 = vcmask 883712   ;;  %vm7021_vm15 = vcmask 406528  }
 0xc70   :  { %2421 = vst [vmem:[#allocation6 + $0x30] sm:$0xc0] %v2412_v35  ;;  %v2434_v24 = vpop.permute.xlu0 %2433 }
 0xc72   :  { %v2436_v47 = vpop.permute.xlu1 %2435  ;;  %v2609_v26 = vld [vmem:[#allocation6 + $0x18] sm:$0xff] }
 0xc73   :  { %v2445_v27 = vsel %vm2135_vm10, %v2434_v24, %v2436_v47  ;;  %2455 = vst.msk [vmem:[#allocation6 + $0x58] sm:$0xe0] %vm7017_vm1, %v2436_v47  ;;  %v2641_v31 = vpack.c.bf16 %v2609_v26, %v2607_v25  ;;  %v2608_v14 = vld [vmem:[#allocation6 + $0x10] sm:$0xff]  ;;  %vm7022_vm1 = vcmask 408577  }
 0xc74   :  { %2454 = vst [vmem:[#allocation6 + $0x50] sm:$0xe0] %v2445_v27  ;;  %v2467_v32 = vpop.permute.xlu0 %2466  ;;  %v2640_v34 = vpack.c.bf16 %v2608_v14, %v6250_v16 }
 0xc75   :  { %2689 = vmatprep.subr.bf16.mxu0 %v2641_v31 }
 0xc76   :  { %v2469_v36 = vpop.permute.xlu1 %2468  ;;  %2690 = vmatpush1.bf16.msra.mxu0 %v2640_v34 }
 0xc77   :  { %v2478_v51 = vsel %vm1869_vm4, %v2467_v32, %v2469_v36  ;;  %2488 = vst.msk [vmem:[#allocation6 + $0x78] sm:$0xf0] %vm7018_vm11, %v2469_v36  ;;  %vm7082_vm11 = vcmask 875520  }
 0xc78   :  { %2487 = vst [vmem:[#allocation6 + $0x70] sm:$0xf0] %v2478_v51  ;;  %v2501_v0 = vpop.permute.xlu0 %2500 }
 0xc7a   :  { %v2503_v48 = vpop.permute.xlu1 %2502 }
 0xc7b   :  { %v2512_v22 = vsel %vm2166_vm3, %v2501_v0, %v2503_v48  ;;  %2522 = vst.msk [vmem:[#allocation6 + $0x98] sm:$0xf8] %vm7023_vm13, %v2503_v48  ;;  %vm7102_vm13 = vcmask 497664  }
 0xc7c   :  { %2521 = vst [vmem:[#allocation6 + $0x90] sm:$0xf8] %v2512_v22  ;;  %v2535_v37 = vpop.permute.xlu0 %2534 }
 0xc7e   :  { %v2537_v44 = vpop.permute.xlu1 %2536 }
 0xc7f   :  { %v2546_v16 = vsel %vm7081_vm5, %v2535_v37, %v2537_v44  ;;  %2557 = vst.msk [vmem:[#allocation6 + $0xb8] sm:$0xfc] %vm7020_vm14, %v2537_v44  ;;  %vm7083_vm5 = vcmask 1031168   ;;  %vm7084_vm14 = vcmask 405504  }
 0xc80   :  { %2555 = vst [vmem:[#allocation6 + $0xb0] sm:$0xfc] %v2546_v16  ;;  %v2570_v38 = vpop.permute.xlu0 %2569 }
 0xc82   :  { %v2572_v17 = vpop.permute.xlu1 %2571 }
 0xc83   :  { %v2577_v29 = vsel %vm7082_vm11, %v2570_v38, %v2572_v17  ;;  %2585 = vst.msk [vmem:[#allocation6 + $0xd8] sm:$0xfe] %vm7022_vm1, %v2572_v17  ;;  %vm7085_vm11 = vcmask 404480  }
 0xc84   :  { %2583 = vst [vmem:[#allocation6 + $0xd0] sm:$0xfe] %v2577_v29  ;;  %v2375_v39 = vpop.permute.xlu0 %2374 }
 0xc86   :  { %v2377_v40 = vpop.permute.xlu1 %2376 }
 0xc87   :  { %v2380_v28 = vsel %vm304_vm2, %v2375_v39, %v2377_v40  ;;  %2393 = vst.msk [vmem:[#allocation6 + $0x38] sm:$0x3f] %vm7021_vm15, %v2377_v40  ;;  %vm7086_vm15 = vcmask 403456  }
 0xc88   :  { %2391 = vst [vmem:[#allocation6 + $0x30] sm:$0x3f] %v2380_v28  ;;  %v2409_v43 = vpop.permute.xlu0 %2408 }
 0xc8a   :  { %v2411_v46 = vpop.permute.xlu1 %2410 }
 0xc8b   :  { %v2414_v33 = vsel %vm7083_vm5, %v2409_v43, %v2411_v46  ;;  %2426 = vst.msk [vmem:[#allocation6 + $0x58] sm:$0x1f] %vm7084_vm14, %v2411_v46  ;;  %vm7087_vm14 = vcmask 402432   ;;  %vm7088_vm5 = vcmask 883712  }
 0xc8c   :  { %2425 = vst [vmem:[#allocation6 + $0x50] sm:$0x1f] %v2414_v33  ;;  %v2442_v54 = vpop.permute.xlu0 %2441 }
 0xc8e   :  { %v2444_v49 = vpop.permute.xlu1 %2443  ;;  %v2613_v52 = vld [vmem:[#allocation6 + $0x38] sm:$0xff] }
 0xc8f   :  { %v2447_v50 = vsel %vm2135_vm10, %v2442_v54, %v2444_v49  ;;  %2459 = vst.msk [vmem:[#allocation6 + $0x78] sm:$0xf] %vm7085_vm11, %v2444_v49  ;;  %vm7089_vm11 = vcmask 401408   ;;  %v2612_v19 = vld [vmem:[#allocation6 + $0x30] sm:$0xff] }
 0xc90   :  { %2458 = vst [vmem:[#allocation6 + $0x70] sm:$0xf] %v2447_v50  ;;  %v2475_v53 = vpop.permute.xlu0 %2474 }
 0xc92   :  { %v2477_v55 = vpop.permute.xlu1 %2476  ;;  %v2617_v45 = vld [vmem:[#allocation6 + $0x58] sm:$0xff] }
 0xc93   :  { %v2480_v42 = vsel %vm1869_vm4, %v2475_v53, %v2477_v55  ;;  %2492 = vst.msk [vmem:[#allocation6 + $0x98] sm:$0x7] %vm7086_vm15, %v2477_v55  ;;  %vm7090_vm15 = vcmask 1031168   ;;  %v2616_v35 = vld [vmem:[#allocation6 + $0x50] sm:$0xff] }
 0xc94   :  { %2491 = vst [vmem:[#allocation6 + $0x90] sm:$0x7] %v2480_v42  ;;  %v2509_v58 = vpop.permute.xlu0 %2508 }
 0xc96   :  { %v2511_v59 = vpop.permute.xlu1 %2510  ;;  %v2621_v31 = vld [vmem:[#allocation6 + $0x78] sm:$0xff] }
 0xc97   :  { %v2514_v63 = vsel %vm2166_vm3, %v2509_v58, %v2511_v59  ;;  %2526 = vst.msk [vmem:[#allocation6 + $0xb8] sm:$0x3] %vm7087_vm14, %v2511_v59  ;;  %v2620_v32 = vld [vmem:[#allocation6 + $0x70] sm:$0xff]  ;;  %vm7091_vm14 = vmmov %vm7088_vm5 }
 0xc98   :  { %2525 = vst [vmem:[#allocation6 + $0xb0] sm:$0x3] %v2514_v63  ;;  %v2543_v41 = vpop.permute.xlu0 %2542 }
 0xc9a   :  { %v2545_v8 = vpop.permute.xlu1 %2544  ;;  %v2625_v22 = vld [vmem:[#allocation6 + $0x98] sm:$0xff] }
 0xc9b   :  { %v2548_v1 = vsel %vm7088_vm5, %v2543_v41, %v2545_v8  ;;  %2561 = vst.msk [vmem:[#allocation6 + $0xd8] sm:$0x1] %vm7089_vm11, %v2545_v8  ;;  %v2624_v44 = vld [vmem:[#allocation6 + $0x90] sm:$0xff]  ;;  %vm7092_vm5 = vcmask 867328   ;;  %vm7093_vm11 = vcmask 407552   ;;  %v2637_v8 = vld [vmem:[#allocation6 + $0xf8] sm:$0xff] }
 0xc9c   :  { %2560 = vst [vmem:[#allocation6 + $0xd0] sm:$0x1] %v2548_v1  ;;  %v2371_v61 = vpop.permute.xlu0 %2370 }
 0xc9e   :  { %v2373_v4 = vpop.permute.xlu1 %2372  ;;  %v2629_v40 = vld [vmem:[#allocation6 + $0xb8] sm:$0xff] }
 0xc9f   :  { %2390 = vst.msk [vmem:[#allocation6 + $0x28] sm:$0xff] %vm2351_vm9, %v2373_v4  ;;  %v2379_v10 = vsel %vm304_vm2, %v2371_v61, %v2373_v4  ;;  %v2628_v43 = vld [vmem:[#allocation6 + $0xb0] sm:$0xff]  ;;  %v2681_v4 = vsel %vm2493_vm8, 4294967295, %v5280_v30 }
 0xca0   :  { %v2405_v5 = vpop.permute.xlu0 %2404  ;;  %v2642_v21 = vpack.c.bf16 %v2612_v19, %v2379_v10 }
 0xca2   :  { %v2407_v7 = vpop.permute.xlu1 %2406  ;;  %v2633_v53 = vld [vmem:[#allocation6 + $0xd8] sm:$0xff] }
 0xca3   :  { %2424 = vst.msk [vmem:[#allocation6 + $0x48] sm:$0xff] %vm2351_vm9, %v2407_v7  ;;  %v2413_v9 = vsel %vm7090_vm15, %v2405_v5, %v2407_v7  ;;  %v2632_v58 = vld [vmem:[#allocation6 + $0xd0] sm:$0xff]  ;;  %vm7094_vm15 = vcmask 875520  }
 0xca4   :  { %v2438_v62 = vpop.permute.xlu0 %2437  ;;  %v2644_v47 = vpack.c.bf16 %v2616_v35, %v2413_v9 }
 0xca6   :  { %v2440_v11 = vpop.permute.xlu1 %2439  ;;  %v2611_v12 = vld [vmem:[#allocation6 + $0x28] sm:$0xff] }
 0xca7   :  { %2457 = vst.msk [vmem:[#allocation6 + $0x68] sm:$0xff] %vm2351_vm9, %v2440_v11  ;;  %v2643_v18 = vpack.c.bf16 %v2613_v52, %v2611_v12  ;;  %v2446_v25 = vsel %vm2135_vm10, %v2438_v62, %v2440_v11 }
 0xca8   :  { %v2471_v20 = vpop.permute.xlu0 %2470  ;;  %v2646_v36 = vpack.c.bf16 %v2620_v32, %v2446_v25 }
 0xca9   :  { %2691 = vmatprep.subr.bf16.mxu0 %v2643_v18 }
 0xcaa   :  { %v2473_v2 = vpop.permute.xlu1 %2472  ;;  %2692 = vmatpush1.bf16.msra.mxu0 %v2642_v21  ;;  %v2615_v15 = vld [vmem:[#allocation6 + $0x48] sm:$0xff] }
 0xcab   :  { %2490 = vst.msk [vmem:[#allocation6 + $0x88] sm:$0xff] %vm2351_vm9, %v2473_v2  ;;  %v2645_v56 = vpack.c.bf16 %v2617_v45, %v2615_v15  ;;  %v2479_v51 = vsel %vm1869_vm4, %v2471_v20, %v2473_v2 }
 0xcac   :  { %v2505_v24 = vpop.permute.xlu0 %2504  ;;  %v2648_v38 = vpack.c.bf16 %v2624_v44, %v2479_v51 }
 0xcad   :  { %2693 = vmatprep.subr.bf16.mxu0 %v2645_v56 }
 0xcae   :  { %v2507_v26 = vpop.permute.xlu1 %2506  ;;  %2694 = vmatpush1.bf16.msra.mxu0 %v2644_v47  ;;  %v2619_v27 = vld [vmem:[#allocation6 + $0x68] sm:$0xff] }
 0xcaf   :  { %2524 = vst.msk [vmem:[#allocation6 + $0xa8] sm:$0xff] %vm2351_vm9, %v2507_v26  ;;  %v2647_v14 = vpack.c.bf16 %v2621_v31, %v2619_v27  ;;  %v2513_v17 = vsel %vm2166_vm3, %v2505_v24, %v2507_v26 }
 0xcb0   :  { %v2539_v34 = vpop.permute.xlu0 %2538  ;;  %v2650_v46 = vpack.c.bf16 %v2628_v43, %v2513_v17 }
 0xcb1   :  { %2695 = vmatprep.subr.bf16.mxu0 %v2647_v14 }
 0xcb2   :  { %v2541_v0 = vpop.permute.xlu1 %2540  ;;  %2696 = vmatpush1.bf16.msra.mxu0 %v2646_v36  ;;  %v2623_v48 = vld [vmem:[#allocation6 + $0x88] sm:$0xff] }
 0xcb3   :  { %2559 = vst.msk [vmem:[#allocation6 + $0xc8] sm:$0xff] %vm2351_vm9, %v2541_v0  ;;  %v2649_v37 = vpack.c.bf16 %v2625_v22, %v2623_v48  ;;  %v2547_v33 = vsel %vm7091_vm14, %v2539_v34, %v2541_v0  ;;  %vm7095_vm14 = vmmov %vm7092_vm5 }
 0xcb4   :  { %v2574_v16 = vpop.permute.xlu0 %2573  ;;  %v2652_v59 = vpack.c.bf16 %v2632_v58, %v2547_v33  ;;  %v2596_v1 = vsel %vm7095_vm14, %v6360_v23, %v6362_v57  ;;  %v4793_v23 = vld [vmem:[#allocation15] ss:$8 sps:$4 sm:$0xff]   ;;  %vm7099_vm14 = vcmask 498688  }
 0xcb5   :  { %2697 = vmatprep.subr.bf16.mxu0 %v2649_v37 }
 0xcb6   :  { %v2576_v29 = vpop.permute.xlu1 %2575  ;;  %2698 = vmatpush1.bf16.msra.mxu0 %v2648_v38  ;;  %v2627_v39 = vld [vmem:[#allocation6 + $0xa8] sm:$0xff] }
 0xcb7   :  { %2587 = vst.msk [vmem:[#allocation6 + $0xe8] sm:$0xff] %vm2351_vm9, %v2576_v29  ;;  %v2651_v28 = vpack.c.bf16 %v2629_v40, %v2627_v39  ;;  %v2578_v63 = vsel %vm7094_vm15, %v2574_v16, %v2576_v29  ;;  %vm7098_vm15 = vcmask 89088  }
 0xcb8   :  { %v2593_v54 = vpop.permute.xlu0 %2592  ;;  %v2654_v5 = vpack.c.bf16 %v2596_v1, %v2578_v63  ;;  %vm7101_vm1 = vmmov %vm7098_vm15 }
 0xcb9   :  { %2699 = vmatprep.subr.bf16.mxu0 %v2651_v28 }
 0xcba   :  { %v2595_v49 = vpop.permute.xlu1 %2594  ;;  %2700 = vmatpush1.bf16.msra.mxu0 %v2650_v46  ;;  %v2631_v50 = vld [vmem:[#allocation6 + $0xc8] sm:$0xff] }
 0xcbb   :  { %v2597_v55 = vsel %vm7092_vm5, %v2593_v54, %v2595_v49  ;;  %2605 = vst.msk [vmem:[#allocation6 + $0x108] sm:$0x7f] %vm7093_vm11, %v2595_v49  ;;  %v2653_v42 = vpack.c.bf16 %v2633_v53, %v2631_v50  ;;  %vm7096_vm5 = vcmask 1043456   ;;  %vm7097_vm11 = vcmask 1047640  }
 0xcbc   :  { %2604 = vst [vmem:[#allocation6 + $0x100] sm:$0x7f] %v2597_v55  ;;  %v6415_v62 = vsel %vm7096_vm5, %v2681_v4, 0  ;;  %vm7100_vm5 = vcmask 1046616  }
 0xcbd   :  { %2701 = vmatprep.subr.bf16.mxu0 %v2653_v42 }
 0xcbe   :  { %2702 = vmatpush1.bf16.msra.mxu0 %v2652_v59  ;;  %v2635_v41 = vld [vmem:[#allocation6 + $0xe8] sm:$0xff] }
 0xcbf   :  { %v2655_v61 = vpack.c.bf16 %v2637_v8, %v2635_v41 }
 0xcc1   :  { %2703 = vmatprep.subr.bf16.mxu0 %v2655_v61 }
 0xcc2   :  { %2704 = vmatpush1.bf16.msra.mxu0 %v2654_v5  ;;  %v2639_v7 = vld [vmem:[#allocation6 + $0x108] sm:$0x7f] }
 0xcc3   :  { %v2657_v10 = vpack.c.bf16 %v2639_v7, %v2639_v7  ;;  %v2638_v11 = vld [vmem:[#allocation6 + $0x100] sm:$0x7f] }
 0xcc4   :  { %v2656_v12 = vpack.c.bf16 %v2638_v11, %v2638_v11 }
 0xcc5   :  { %v2687_v52 = vand.u32 %v6415_v62, %v2657_v10 }
 0xcc6   :  { %v2684_v18 = vand.u32 %v6415_v62, %v2656_v12 }
 0xcc7   :  { %2705 = vmatprep.subr.bf16.mxu0 %v2687_v52 }
 0xcc8   :  { %2706 = vmatpush1.bf16.msra.mxu0 %v2684_v18 }
 0xcc9   :  { %v2661_v57 = vpop.permute.xlu0 %2660 }
 0xccb   :  { %2722 = vmatmul.mubr.bf16.vlgmr.msra.gmra.mrb[24].mxu0 %v4793_v23  ;;  %v2666_v21 = vpop.permute.xlu1 %2665 }
 0xd9e   :  { %v2723_v30 = vpop.f32.mrb[24].mxu0 }
 0xd9f   :  { %v2724_v19 = vadd.f32 %v2723_v30, %v2661_v57  ;;  %v2725_v20 = vpop.f32.mrb[25].mxu0 }
 0xda0   :  { %v2726_v9 = vadd.f32 %v2725_v20, %v2661_v57  ;;  %v2727_v2 = vpop.f32.mrb[26].mxu0 }
 0xda1   :  { %4853 = vtanh.f32 %v2724_v19  ;;  %v2728_v15 = vadd.f32 %v2727_v2, %v2666_v21  ;;  %v2729_v45 = vpop.f32.mrb[27].mxu0 }
 0xda2   :  { %4855 = vtanh.f32 %v2726_v9  ;;  %v2730_v56 = vadd.f32 %v2729_v45, %v2666_v21 }
 0xda3   :  { %4857 = vtanh.f32 %v2728_v15 }
 0xda4   :  { %4859 = vtanh.f32 %v2730_v56 }
 0xdab   :  { %v4854_v35 = vpop.eup %4853 }
 0xdac   :  { %v4856_v24 = vpop.eup %4855  ;;  %v2736_v47 = vmul.f32 %v4854_v35, %v6229_v6 }
 0xdad   :  { %v4858_v25 = vpop.eup %4857  ;;  %v2737_v26 = vmul.f32 %v4856_v24, %v6233_v60  ;;  %v2768_v24 = vld [vmem:[%s6964_s15] sm:$0xff] }
 0xdae   :  { %v4860_v27 = vpop.eup %4859  ;;  %2744 = vrot.lane.b32.xlu0 %v2736_v47, %s5288_s13  ;;  %v2738_v31 = vmul.f32 %v4858_v25, %v6229_v6  ;;  %v2769_v47 = vld [vmem:[%s6964_s15 + $0x8] sm:$0x7f]  ;;  %s5291_s15 = smov 122  }
 0xdaf   :  { %2746 = vrot.lane.b32.xlu1 %v2737_v26, %s5288_s13  ;;  %v2739_v14 = vmul.f32 %v4860_v27, %v6233_v60  ;;  %v4794_v25 = vld [vmem:[#allocation16 + $0x4] ss:$8 sps:$4 sm:$0xff]  }
 0xdb0   :  { %4411 = vmatprep.mubr.msk.bf16.mxu0 %vm2677_vm7, %v4794_v25 }
 0xdb2   :  { %2748 = vrot.lane.b32.xlu0 %v2738_v31, %s5288_s13 }
 0xdb3   :  { %2750 = vrot.lane.b32.xlu1 %v2739_v14, %s5288_s13 }
 0xe20   :  { %v2745_v32 = vpop.permute.xlu0 %2744 }
 0xe21   :  { %2758 = vst.msk [vmem:[#allocation3] sm:$0xff] %vm7097_vm11, %v2745_v32  ;;  %v2747_v34 = vpop.permute.xlu1 %2746 }
 0xe22   :  { %v2752_v36 = vsel %vm7098_vm15, %v2745_v32, %v2747_v34  ;;  %vm7106_vm15 = vcmask 1045504  }
 0xe23   :  { %2759 = vst.msk [vmem:[#allocation3 + $0x8] sm:$0xff] %vm7099_vm14, %v2752_v36  ;;  %vm7107_vm14 = vmmov %vm7106_vm15 }
 0xe24   :  { %v2749_v51 = vpop.permute.xlu0 %2748 }
 0xe25   :  { %2760 = vst.msk [vmem:[#allocation3 + $0x10] sm:$0x7f] %vm7100_vm5, %v2749_v51  ;;  %v2751_v0 = vpop.permute.xlu1 %2750  ;;  %vm7108_vm5 = vcmask 1044480  }
 0xe26   :  { %v2753_v48 = vsel %vm7101_vm1, %v2749_v51, %v2751_v0  ;;  %vm7103_vm1 = vcmask 407552  }
 0xe27   :  { %2761 = vst.msk [vmem:[#allocation3 + $0x18] sm:$0x7f] %vm7102_vm13, %v2753_v48  ;;  %vm7104_vm13 = vcmask 1046528  }
 0xe28   :  { %v6433_v22 = vld [vmem:[#allocation3] sm:$0xff]  ;;  %vm7105_vm11 = vmmov %vm7104_vm13 }
 0xe29   :  { %3000 = vrot.lane.b32.xlu0 %v6433_v22, %s5287_s4  ;;  %2770 = vst [vmem:[#allocation6] sm:$0xff] %v6433_v22  ;;  %v2778_v44 = vrot.slane %v6433_v22, 1  ;;  %v2811_v29 = vrot.slane %v6433_v22, 2  ;;  %v2844_v40 = vrot.slane %v6433_v22, 3  ;;  %v2877_v43 = vrot.slane %v6433_v22, 4 }
 0xe2a   :  { %v6438_v37 = vld [vmem:[#allocation3 + $0x8] sm:$0xff]  ;;  %v2910_v33 = vrot.slane %v6433_v22, 5  ;;  %v2943_v49 = vrot.slane %v6433_v22, 6  ;;  %v2976_v53 = vrot.slane %v6433_v22, 7 }
 0xe2b   :  { %3002 = vrot.lane.b32.xlu1 %v6438_v37, %s5287_s4  ;;  %2771 = vst.msk [vmem:[#allocation6 + $0x8] sm:$0xff] %vm2351_vm9, %v6438_v37  ;;  %v2779_v38 = vrot.slane %v6438_v37, 1  ;;  %v2812_v39 = vrot.slane %v6438_v37, 2  ;;  %v2845_v28 = vrot.slane %v6438_v37, 3  ;;  %v2878_v46 = vrot.slane %v6438_v37, 4 }
 0xe2c   :  { %v6445_v16 = vld [vmem:[#allocation3 + $0x10] sm:$0x7f]  ;;  %v2911_v54 = vrot.slane %v6438_v37, 5  ;;  %v2944_v50 = vrot.slane %v6438_v37, 6  ;;  %v2977_v55 = vrot.slane %v6438_v37, 7 }
 0xe2d   :  { %2784 = vrot.lane.b32.xlu0 %v2778_v44, %s5271_s29  ;;  %2772 = vst [vmem:[#allocation6 + $0x10] sm:$0x7f] %v6445_v16  ;;  %v2780_v42 = vrot.slane %v6445_v16, 1  ;;  %v2813_v59 = vrot.slane %v6445_v16, 2  ;;  %v2846_v41 = vrot.slane %v6445_v16, 3  ;;  %v2879_v1 = vrot.slane %v6445_v16, 4 }
 0xe2e   :  { %v6450_v17 = vld [vmem:[#allocation3 + $0x18] sm:$0x7f]  ;;  %v2912_v4 = vrot.slane %v6445_v16, 5  ;;  %v2945_v7 = vrot.slane %v6445_v16, 6  ;;  %v2978_v2 = vrot.slane %v6445_v16, 7 }
 0xe2f   :  { %2786 = vrot.lane.b32.xlu1 %v2779_v38, %s5271_s29  ;;  %2773 = vst.msk [vmem:[#allocation6 + $0x18] sm:$0x7f] %vm7103_vm1, %v6450_v17  ;;  %v2782_v58 = vrot.slane %v6450_v17, 1  ;;  %v2815_v63 = vrot.slane %v6450_v17, 2  ;;  %v2848_v8 = vrot.slane %v6450_v17, 3  ;;  %v2881_v61 = vrot.slane %v6450_v17, 4  ;;  %vm7109_vm1 = vmmov %vm7108_vm5 }
 0xe30   :  { %v2914_v5 = vrot.slane %v6450_v17, 5  ;;  %v2947_v10 = vrot.slane %v6450_v17, 6  ;;  %v2781_v11 = vsel %vm7104_vm13, %v2778_v44, %v2780_v42  ;;  %v2814_v52 = vsel %vm7106_vm15, %v2811_v29, %v2813_v59 }
 0xe31   :  { %2817 = vrot.lane.b32.xlu0 %v2811_v29, %s5273_s25  ;;  %v2783_v12 = vsel %vm7105_vm11, %v2779_v38, %v2782_v58  ;;  %v2816_v18 = vsel %vm7107_vm14, %v2812_v39, %v2815_v63  ;;  %v2847_v23 = vsel %vm7108_vm5, %v2844_v40, %v2846_v41  ;;  %v2849_v57 = vsel %vm7109_vm1, %v2845_v28, %v2848_v8 }
 0xe32   :  { %vm7110_vm13 = vcmask 1043456   ;;  %v2913_v20 = vsel %vm2493_vm8, %v2910_v33, %v2912_v4  ;;  %v2915_v21 = vsel %vm2493_vm8, %v2911_v54, %v2914_v5  ;;  %v2946_v9 = vsel %vm2527_vm0, %v2943_v49, %v2945_v7  ;;  %v3019_v44 = vld [vmem:[#allocation6 + $0x8] sm:$0xff] }
 0xe33   :  { %2819 = vrot.lane.b32.xlu1 %v2812_v39, %s5273_s25  ;;  %v2880_v30 = vsel %vm7110_vm13, %v2877_v43, %v2879_v1  ;;  %vm7111_vm11 = vmmov %vm7110_vm13  ;;  %v2948_v15 = vsel %vm2527_vm0, %v2944_v50, %v2947_v10  ;;  %v2980_v45 = vrot.slane %v6450_v17, 7  ;;  %v2979_v56 = vsel %vm2562_vm6, %v2976_v53, %v2978_v2 }
 0xe34   :  { %v2882_v19 = vsel %vm7111_vm11, %v2878_v46, %v2881_v61  ;;  %vm7112_vm8 = vcmask 867328   ;;  %vm7113_vm0 = vcmask 1031168   ;;  %vm7114_vm15 = vcmask 408582  }
 0xe35   :  { %2850 = vrot.lane.b32.xlu0 %v2844_v40, %s5283_s12  ;;  %v2981_v35 = vsel %vm2562_vm6, %v2977_v55, %v2980_v45  ;;  %vm7115_vm14 = vcmask 408581   ;;  %vm7117_vm5 = vcmask 408579   ;;  %vm7118_vm1 = vcmask 883712  }
 0xe36   :  { %vm7119_vm13 = vcmask 408578   ;;  %vm7120_vm11 = vcmask 875520  }
 0xe37   :  { %2852 = vrot.lane.b32.xlu1 %v2845_v28, %s5283_s12 }
 0xe39   :  { %2883 = vrot.lane.b32.xlu0 %v2877_v43, %s5284_s9 }
 0xe3b   :  { %2885 = vrot.lane.b32.xlu1 %v2878_v46, %s5284_s9 }
 0xe3d   :  { %2916 = vrot.lane.b32.xlu0 %v2910_v33, %s5285_s17 }
 0xe3f   :  { %2918 = vrot.lane.b32.xlu1 %v2911_v54, %s5285_s17 }
 0xe41   :  { %2949 = vrot.lane.b32.xlu0 %v2943_v49, %s5275_s20 }
 0xe43   :  { %2951 = vrot.lane.b32.xlu1 %v2944_v50, %s5275_s20 }
 0xe45   :  { %2982 = vrot.lane.b32.xlu0 %v2976_v53, %s5286_s27 }
 0xe47   :  { %2984 = vrot.lane.b32.xlu1 %v2977_v55, %s5286_s27 }
 0xe49   :  { %2792 = vrot.lane.b32.xlu0 %v2780_v42, %s5271_s29 }
 0xe4b   :  { %2794 = vrot.lane.b32.xlu1 %v2782_v58, %s5271_s29 }
 0xe4d   :  { %2825 = vrot.lane.b32.xlu0 %v2813_v59, %s5273_s25 }
 0xe4f   :  { %2827 = vrot.lane.b32.xlu1 %v2815_v63, %s5273_s25 }
 0xe51   :  { %2858 = vrot.lane.b32.xlu0 %v2846_v41, %s5283_s12 }
 0xe53   :  { %2860 = vrot.lane.b32.xlu1 %v2848_v8, %s5283_s12 }
 0xe55   :  { %2891 = vrot.lane.b32.xlu0 %v2879_v1, %s5284_s9 }
 0xe57   :  { %2893 = vrot.lane.b32.xlu1 %v2881_v61, %s5284_s9 }
 0xe59   :  { %2924 = vrot.lane.b32.xlu0 %v2912_v4, %s5285_s17 }
 0xe5b   :  { %2926 = vrot.lane.b32.xlu1 %v2914_v5, %s5285_s17 }
 0xe5d   :  { %2957 = vrot.lane.b32.xlu0 %v2945_v7, %s5275_s20 }
 0xe5f   :  { %2959 = vrot.lane.b32.xlu1 %v2947_v10, %s5275_s20 }
 0xe61   :  { %2788 = vrot.lane.b32.xlu0 %v2781_v11, %s5271_s29 }
 0xe63   :  { %2790 = vrot.lane.b32.xlu1 %v2783_v12, %s5271_s29 }
 0xe65   :  { %2821 = vrot.lane.b32.xlu0 %v2814_v52, %s5273_s25 }
 0xe67   :  { %2823 = vrot.lane.b32.xlu1 %v2816_v18, %s5273_s25 }
 0xe69   :  { %2854 = vrot.lane.b32.xlu0 %v2847_v23, %s5283_s12 }
 0xe6b   :  { %2856 = vrot.lane.b32.xlu1 %v2849_v57, %s5283_s12 }
 0xe6d   :  { %2887 = vrot.lane.b32.xlu0 %v2880_v30, %s5284_s9 }
 0xe6f   :  { %2889 = vrot.lane.b32.xlu1 %v2882_v19, %s5284_s9 }
 0xe71   :  { %2920 = vrot.lane.b32.xlu0 %v2913_v20, %s5285_s17 }
 0xe73   :  { %2922 = vrot.lane.b32.xlu1 %v2915_v21, %s5285_s17 }
 0xe75   :  { %2953 = vrot.lane.b32.xlu0 %v2946_v9, %s5275_s20 }
 0xe77   :  { %2955 = vrot.lane.b32.xlu1 %v2948_v15, %s5275_s20 }
 0xe79   :  { %2986 = vrot.lane.b32.xlu0 %v2979_v56, %s5286_s27 }
 0xe7b   :  { %2988 = vrot.lane.b32.xlu1 %v2981_v35, %s5286_s27 }
 0xe7d   :  { %3004 = vrot.lane.b32.xlu0 %v6445_v16, %s5287_s4 }
 0xe7f   :  { %3006 = vrot.lane.b32.xlu1 %v6450_v17, %s5287_s4 }
 0xe81   :  { %3072 = vperm.xlu0 %4773, %v2768_v24  }
 0xe83   :  { %3077 = vperm.xlu1 %4774, %v2769_v47  }
 0xe9b   :  { %v3001_v26 = vpop.permute.xlu0 %3000 }
 0xe9d   :  { %v3003_v27 = vpop.permute.xlu1 %3002 }
 0xe9e   :  { %v6545_v31 = vsel %vm7112_vm8, %v3001_v26, %v3003_v27  ;;  %3015 = vst.msk [vmem:[#allocation6 + $0xf8] sm:$0xff] %vm2351_vm9, %v3003_v27  ;;  %vm7121_vm8 = vcmask 408577  }
 0xe9f   :  { %v2785_v14 = vpop.permute.xlu0 %2784 }
 0xea1   :  { %v2787_v32 = vpop.permute.xlu1 %2786 }
 0xea2   :  { %v2796_v34 = vsel %vm304_vm2, %v2785_v14, %v2787_v32  ;;  %2806 = vst.msk [vmem:[#allocation6 + $0x18] sm:$0x80] %vm2140_vm12, %v2787_v32  ;;  %vm7116_vm12 = vcmask 408580  }
 0xea3   :  { %2805 = vst [vmem:[#allocation6 + $0x10] sm:$0x80] %v2796_v34  ;;  %v2818_v36 = vpop.permute.xlu0 %2817 }
 0xea5   :  { %v2820_v51 = vpop.permute.xlu1 %2819 }
 0xea6   :  { %v2829_v0 = vsel %vm7113_vm0, %v2818_v36, %v2820_v51  ;;  %2839 = vst.msk [vmem:[#allocation6 + $0x38] sm:$0xc0] %vm7114_vm15, %v2820_v51  ;;  %vm7122_vm0 = vcmask 406528   ;;  %vm7123_vm15 = vcmask 1031168  }
 0xea7   :  { %2838 = vst [vmem:[#allocation6 + $0x30] sm:$0xc0] %v2829_v0  ;;  %v2851_v48 = vpop.permute.xlu0 %2850 }
 0xea9   :  { %v2853_v37 = vpop.permute.xlu1 %2852  ;;  %v3021_v16 = vld [vmem:[#allocation6 + $0x18] sm:$0xff] }
 0xeaa   :  { %v2862_v38 = vsel %vm2135_vm10, %v2851_v48, %v2853_v37  ;;  %2872 = vst.msk [vmem:[#allocation6 + $0x58] sm:$0xe0] %vm7115_vm14, %v2853_v37  ;;  %v3053_v17 = vpack.c.bf16 %v3021_v16, %v3019_v44  ;;  %v3020_v29 = vld [vmem:[#allocation6 + $0x10] sm:$0xff]  ;;  %vm7124_vm14 = vcmask 405504  }
 0xeab   :  { %2871 = vst [vmem:[#allocation6 + $0x50] sm:$0xe0] %v2862_v38  ;;  %v2884_v39 = vpop.permute.xlu0 %2883  ;;  %v3052_v40 = vpack.c.bf16 %v3020_v29, %v6433_v22 }
 0xeac   :  { %3098 = vmatprep.subr.bf16.mxu0 %v3053_v17 }
 0xead   :  { %v2886_v28 = vpop.permute.xlu1 %2885  ;;  %3099 = vmatpush1.bf16.msra.mxu0 %v3052_v40 }
 0xeae   :  { %v2895_v43 = vsel %vm1869_vm4, %v2884_v39, %v2886_v28  ;;  %2905 = vst.msk [vmem:[#allocation6 + $0x78] sm:$0xf0] %vm7116_vm12, %v2886_v28  ;;  %vm7125_vm12 = vcmask 404480  }
 0xeaf   :  { %2904 = vst [vmem:[#allocation6 + $0x70] sm:$0xf0] %v2895_v43  ;;  %v2917_v46 = vpop.permute.xlu0 %2916 }
 0xeb1   :  { %v2919_v33 = vpop.permute.xlu1 %2918 }
 0xeb2   :  { %v2928_v54 = vsel %vm2166_vm3, %v2917_v46, %v2919_v33  ;;  %2938 = vst.msk [vmem:[#allocation6 + $0x98] sm:$0xf8] %vm7117_vm5, %v2919_v33  ;;  %vm7126_vm5 = vcmask 403456  }
 0xeb3   :  { %2937 = vst [vmem:[#allocation6 + $0x90] sm:$0xf8] %v2928_v54  ;;  %v2950_v49 = vpop.permute.xlu0 %2949 }
 0xeb5   :  { %v2952_v50 = vpop.permute.xlu1 %2951 }
 0xeb6   :  { %v2961_v53 = vsel %vm7118_vm1, %v2950_v49, %v2952_v50  ;;  %2971 = vst.msk [vmem:[#allocation6 + $0xb8] sm:$0xfc] %vm7119_vm13, %v2952_v50  ;;  %vm7127_vm1 = vcmask 402432   ;;  %vm7128_vm13 = vcmask 883712  }
 0xeb7   :  { %2970 = vst [vmem:[#allocation6 + $0xb0] sm:$0xfc] %v2961_v53  ;;  %v2983_v22 = vpop.permute.xlu0 %2982 }
 0xeb9   :  { %v2985_v55 = vpop.permute.xlu1 %2984 }
 0xeba   :  { %v2990_v42 = vsel %vm7120_vm11, %v2983_v22, %v2985_v55  ;;  %2997 = vst.msk [vmem:[#allocation6 + $0xd8] sm:$0xfe] %vm7121_vm8, %v2985_v55  ;;  %vm7129_vm11 = vcmask 401408   ;;  %vm7130_vm8 = vmmov %vm7123_vm15 }
 0xebb   :  { %2996 = vst [vmem:[#allocation6 + $0xd0] sm:$0xfe] %v2990_v42  ;;  %v2793_v58 = vpop.permute.xlu0 %2792 }
 0xebd   :  { %v2795_v59 = vpop.permute.xlu1 %2794 }
 0xebe   :  { %v2798_v63 = vsel %vm304_vm2, %v2793_v58, %v2795_v59  ;;  %2810 = vst.msk [vmem:[#allocation6 + $0x38] sm:$0x3f] %vm7122_vm0, %v2795_v59  ;;  %vm7133_vm0 = vcmask 867328  }
 0xebf   :  { %2809 = vst [vmem:[#allocation6 + $0x30] sm:$0x3f] %v2798_v63  ;;  %v2826_v41 = vpop.permute.xlu0 %2825 }
 0xec1   :  { %v2828_v8 = vpop.permute.xlu1 %2827 }
 0xec2   :  { %v2831_v1 = vsel %vm7123_vm15, %v2826_v41, %v2828_v8  ;;  %2843 = vst.msk [vmem:[#allocation6 + $0x58] sm:$0x1f] %vm7124_vm14, %v2828_v8  ;;  %vm7134_vm15 = vcmask 407552   ;;  %vm7136_vm14 = vcmask 89088  }
 0xec3   :  { %2842 = vst [vmem:[#allocation6 + $0x50] sm:$0x1f] %v2831_v1  ;;  %v2859_v61 = vpop.permute.xlu0 %2858 }
 0xec5   :  { %v2861_v4 = vpop.permute.xlu1 %2860  ;;  %v3025_v24 = vld [vmem:[#allocation6 + $0x38] sm:$0xff] }
 0xec6   :  { %v2864_v5 = vsel %vm2135_vm10, %v2859_v61, %v2861_v4  ;;  %2876 = vst.msk [vmem:[#allocation6 + $0x78] sm:$0xf] %vm7125_vm12, %v2861_v4  ;;  %v3024_v26 = vld [vmem:[#allocation6 + $0x30] sm:$0xff]  ;;  %vm7137_vm12 = vcmask 498688  }
 0xec7   :  { %2875 = vst [vmem:[#allocation6 + $0x70] sm:$0xf] %v2864_v5  ;;  %v2892_v7 = vpop.permute.xlu0 %2891 }
 0xec9   :  { %v2894_v10 = vpop.permute.xlu1 %2893  ;;  %v3029_v36 = vld [vmem:[#allocation6 + $0x58] sm:$0xff] }
 0xeca   :  { %v2897_v11 = vsel %vm1869_vm4, %v2892_v7, %v2894_v10  ;;  %2909 = vst.msk [vmem:[#allocation6 + $0x98] sm:$0x7] %vm7126_vm5, %v2894_v10  ;;  %v3028_v48 = vld [vmem:[#allocation6 + $0x50] sm:$0xff]  ;;  %vm7138_vm5 = vcmask 1046616  }
 0xecb   :  { %2908 = vst [vmem:[#allocation6 + $0x90] sm:$0x7] %v2897_v11  ;;  %v2925_v12 = vpop.permute.xlu0 %2924 }
 0xecd   :  { %v2927_v52 = vpop.permute.xlu1 %2926  ;;  %v3033_v17 = vld [vmem:[#allocation6 + $0x78] sm:$0xff] }
 0xece   :  { %v2930_v18 = vsel %vm2166_vm3, %v2925_v12, %v2927_v52  ;;  %2942 = vst.msk [vmem:[#allocation6 + $0xb8] sm:$0x3] %vm7127_vm1, %v2927_v52  ;;  %v3032_v40 = vld [vmem:[#allocation6 + $0x70] sm:$0xff]  ;;  %vm7139_vm1 = vmmov %vm7136_vm14 }
 0xecf   :  { %2941 = vst [vmem:[#allocation6 + $0xb0] sm:$0x3] %v2930_v18  ;;  %v2958_v23 = vpop.permute.xlu0 %2957 }
 0xed1   :  { %v2960_v57 = vpop.permute.xlu1 %2959  ;;  %v3037_v54 = vld [vmem:[#allocation6 + $0x98] sm:$0xff] }
 0xed2   :  { %v2963_v30 = vsel %vm7128_vm13, %v2958_v23, %v2960_v57  ;;  %2975 = vst.msk [vmem:[#allocation6 + $0xd8] sm:$0x1] %vm7129_vm11, %v2960_v57  ;;  %v3036_v53 = vld [vmem:[#allocation6 + $0x90] sm:$0xff]  ;;  %v3049_v23 = vld [vmem:[#allocation6 + $0xf8] sm:$0xff]  ;;  %vm5290_vm11 = vmmov 1  }
 0xed3   :  { %2974 = vst [vmem:[#allocation6 + $0xd0] sm:$0x1] %v2963_v30  ;;  %v2789_v19 = vpop.permute.xlu0 %2788 }
 0xed5   :  { %v2791_v20 = vpop.permute.xlu1 %2790  ;;  %v3041_v59 = vld [vmem:[#allocation6 + $0xb8] sm:$0xff] }
 0xed6   :  { %v2797_v21 = vsel %vm304_vm2, %v2789_v19, %v2791_v20  ;;  %2808 = vst.msk [vmem:[#allocation6 + $0x28] sm:$0xff] %vm2351_vm9, %v2791_v20  ;;  %v3040_v8 = vld [vmem:[#allocation6 + $0xb0] sm:$0xff] }
 0xed7   :  { %2807 = vst [vmem:[#allocation6 + $0x20] sm:$0xff] %v2797_v21  ;;  %v2822_v9 = vpop.permute.xlu0 %2821  ;;  %v3054_v14 = vpack.c.bf16 %v3024_v26, %v2797_v21 }
 0xed9   :  { %v2824_v2 = vpop.permute.xlu1 %2823  ;;  %v3045_v7 = vld [vmem:[#allocation6 + $0xd8] sm:$0xff] }
 0xeda   :  { %v2830_v15 = vsel %vm7130_vm8, %v2822_v9, %v2824_v2  ;;  %2841 = vst.msk [vmem:[#allocation6 + $0x48] sm:$0xff] %vm2351_vm9, %v2824_v2  ;;  %v3044_v12 = vld [vmem:[#allocation6 + $0xd0] sm:$0xff]  ;;  %vm7141_vm8 = vcmask 1044480  }
 0xedb   :  { %2840 = vst [vmem:[#allocation6 + $0x40] sm:$0xff] %v2830_v15  ;;  %v2855_v45 = vpop.permute.xlu0 %2854  ;;  %v3056_v44 = vpack.c.bf16 %v3028_v48, %v2830_v15 }
 0xedd   :  { %v2857_v56 = vpop.permute.xlu1 %2856  ;;  %v3023_v35 = vld [vmem:[#allocation6 + $0x28] sm:$0xff] }
 0xede   :  { %v2863_v47 = vsel %vm2135_vm10, %v2855_v45, %v2857_v56  ;;  %2874 = vst.msk [vmem:[#allocation6 + $0x68] sm:$0xff] %vm2351_vm9, %v2857_v56  ;;  %v3055_v25 = vpack.c.bf16 %v3025_v24, %v3023_v35  ;;  %v4796_v45 = vld [vmem:[#allocation16] ss:$8 sps:$4 sm:$0xff]  }
 0xedf   :  { %v2888_v27 = vpop.permute.xlu0 %2887  ;;  %v3058_v43 = vpack.c.bf16 %v3032_v40, %v2863_v47 }
 0xee0   :  { %3100 = vmatprep.subr.bf16.mxu0 %v3055_v25 }
 0xee1   :  { %v2890_v32 = vpop.permute.xlu1 %2889  ;;  %3101 = vmatpush1.bf16.msra.mxu0 %v3054_v14  ;;  %v3027_v34 = vld [vmem:[#allocation6 + $0x48] sm:$0xff] }
 0xee2   :  { %v2896_v51 = vsel %vm1869_vm4, %v2888_v27, %v2890_v32  ;;  %2907 = vst.msk [vmem:[#allocation6 + $0x88] sm:$0xff] %vm2351_vm9, %v2890_v32  ;;  %v3057_v0 = vpack.c.bf16 %v3029_v36, %v3027_v34  ;;  %vm7131_vm4 = vmmov %vm7128_vm13  ;;  %vm7140_vm13 = vcmask 497664  }
 0xee3   :  { %v2921_v37 = vpop.permute.xlu0 %2920  ;;  %v3060_v55 = vpack.c.bf16 %v3036_v53, %v2896_v51  ;;  %v3179_v53 = vld [vmem:[#allocation28 + $0x20] sm:$0xff] }
 0xee4   :  { %3102 = vmatprep.subr.bf16.mxu0 %v3057_v0 }
 0xee5   :  { %v2923_v16 = vpop.permute.xlu1 %2922  ;;  %3103 = vmatpush1.bf16.msra.mxu0 %v3056_v44  ;;  %v3031_v38 = vld [vmem:[#allocation6 + $0x68] sm:$0xff] }
 0xee6   :  { %v2929_v29 = vsel %vm2166_vm3, %v2921_v37, %v2923_v16  ;;  %2940 = vst.msk [vmem:[#allocation6 + $0xa8] sm:$0xff] %vm2351_vm9, %v2923_v16  ;;  %v3059_v39 = vpack.c.bf16 %v3033_v17, %v3031_v38  ;;  %vm7132_vm3 = vcmask 875520  }
 0xee7   :  { %v2954_v28 = vpop.permute.xlu0 %2953  ;;  %v3062_v1 = vpack.c.bf16 %v3040_v8, %v2929_v29 }
 0xee8   :  { %3104 = vmatprep.subr.bf16.mxu0 %v3059_v39 }
 0xee9   :  { %v2956_v46 = vpop.permute.xlu1 %2955  ;;  %3105 = vmatpush1.bf16.msra.mxu0 %v3058_v43  ;;  %v3035_v33 = vld [vmem:[#allocation6 + $0x88] sm:$0xff]  ;;  %v3177_v43 = vld [vmem:[#allocation28 + $0x10] sm:$0xff] }
 0xeea   :  { %v2962_v49 = vsel %vm7131_vm4, %v2954_v28, %v2956_v46  ;;  %2973 = vst.msk [vmem:[#allocation6 + $0xc8] sm:$0xff] %vm2351_vm9, %v2956_v46  ;;  %v3061_v50 = vpack.c.bf16 %v3037_v54, %v3035_v33  ;;  %v3175_v28 = vld [vmem:[#allocation28] sm:$0xff]  ;;  %v5289_v46 = vmov 0.0|0.0   ;;  %v3178_v54 = vld [vmem:[#allocation28 + $0x18] sm:$0xff]  ;;  %vm4703_vm4 = vmpackc.low %vm7141_vm8, %vm5290_vm11 }
 0xeeb   :  { %v2987_v22 = vpop.permute.xlu0 %2986  ;;  %v3064_v52 = vpack.c.bf16 %v3044_v12, %v2962_v49  ;;  %v3188_v12 = vld [vmem:[#allocation28 + $0x68] sm:$0xff] }
 0xeec   :  { %3106 = vmatprep.subr.bf16.mxu0 %v3061_v50  ;;  %v4672_v50 = vpack.c.bf16 %v3178_v54, %v3177_v43  ;;  %v4799_v54 = vld [vmem:[#allocation18 + $0x4] ss:$8 sps:$4 sm:$0xff]  }
 0xeed   :  { %v2989_v42 = vpop.permute.xlu1 %2988  ;;  %3107 = vmatpush1.bf16.msra.mxu0 %v3060_v55  ;;  %v3039_v58 = vld [vmem:[#allocation6 + $0xa8] sm:$0xff] }
 0xeee   :  { %v2991_v63 = vsel %vm7132_vm3, %v2987_v22, %v2989_v42  ;;  %2999 = vst.msk [vmem:[#allocation6 + $0xe8] sm:$0xff] %vm2351_vm9, %v2989_v42  ;;  %v3063_v41 = vpack.c.bf16 %v3041_v59, %v3039_v58  ;;  %vm7135_vm9 = vcmask 1047640   ;;  %v3180_v22 = vld [vmem:[#allocation28 + $0x28] sm:$0xff]  ;;  %v3181_v59 = vld [vmem:[#allocation28 + $0x30] sm:$0xff]  ;;  %vm7142_vm3 = vmmov %vm7137_vm12 }
 0xeef   :  { %v3005_v61 = vpop.permute.xlu0 %3004  ;;  %v3066_v30 = vpack.c.bf16 %v6545_v31, %v2991_v63  ;;  %v4675_v58 = vpack.c.bf16 %v3180_v22, %v3179_v53  ;;  %v3182_v63 = vld [vmem:[#allocation28 + $0x38] sm:$0xff]  ;;  %v3335_v53 = vld [vmem:[%s6965_s16 + $0x18] sm:$0x1] }
 0xef0   :  { %3108 = vmatprep.subr.bf16.mxu0 %v3063_v41  ;;  %v4678_v8 = vpack.c.bf16 %v3182_v63, %v3181_v59 }
 0xef1   :  { %v3007_v4 = vpop.permute.xlu1 %3006  ;;  %3109 = vmatpush1.bf16.msra.mxu0 %v3062_v1  ;;  %v3043_v5 = vld [vmem:[#allocation6 + $0xc8] sm:$0xff] }
 0xef2   :  { %v3009_v10 = vsel %vm7133_vm0, %v3005_v61, %v3007_v4  ;;  %3017 = vst.msk [vmem:[#allocation6 + $0x108] sm:$0x7f] %vm7134_vm15, %v3007_v4  ;;  %v3065_v11 = vpack.c.bf16 %v3045_v7, %v3043_v5  ;;  %v3183_v1 = vld [vmem:[#allocation28 + $0x40] sm:$0xff]  ;;  %v3184_v61 = vld [vmem:[#allocation28 + $0x48] sm:$0xff]  ;;  %v3185_v5 = vld [vmem:[#allocation28 + $0x50] sm:$0xff]  ;;  %vm3336_vm0 = vcmask 474112  }
 0xef3   :  { %3016 = vst [vmem:[#allocation6 + $0x100] sm:$0x7f] %v3009_v10  ;;  %v4681_v4 = vpack.c.bf16 %v3184_v61, %v3183_v1  ;;  %v3186_v7 = vld [vmem:[#allocation28 + $0x58] sm:$0xff]  ;;  %vm3338_vm15 = vcmask 473088  }
 0xef4   :  { %3110 = vmatprep.subr.bf16.mxu0 %v3065_v11  ;;  %v4684_v10 = vpack.c.bf16 %v3186_v7, %v3185_v5  ;;  %v3187_v11 = vld [vmem:[#allocation28 + $0x60] sm:$0xff] }
 0xef5   :  { %3111 = vmatpush1.bf16.msra.mxu0 %v3064_v52  ;;  %v3047_v18 = vld [vmem:[#allocation6 + $0xe8] sm:$0xff]  ;;  %v4687_v52 = vpack.c.bf16 %v3188_v12, %v3187_v11 }
 0xef6   :  { %v3067_v57 = vpack.c.bf16 %v3049_v23, %v3047_v18  ;;  %v3189_v18 = vld [vmem:[#allocation28 + $0x70] sm:$0xff]  ;;  %v3190_v23 = vld [vmem:[#allocation28 + $0x78] sm:$0xff] }
 0xef8   :  { %3112 = vmatprep.subr.bf16.mxu0 %v3067_v57  ;;  %v4690_v57 = vpack.c.bf16 %v3190_v23, %v3189_v18 }
 0xef9   :  { %3113 = vmatpush1.bf16.msra.mxu0 %v3066_v30  ;;  %v3051_v19 = vld [vmem:[#allocation6 + $0x108] sm:$0x7f] }
 0xefa   :  { %v3069_v20 = vpack.c.bf16 %v3051_v19, %v3051_v19  ;;  %v3050_v21 = vld [vmem:[#allocation6 + $0x100] sm:$0x7f]  ;;  %v3192_v19 = vld [vmem:[#allocation28 + $0x88] sm:$0xff] }
 0xefb   :  { %v3068_v9 = vpack.c.bf16 %v3050_v21, %v3050_v21  ;;  %v3191_v30 = vld [vmem:[#allocation28 + $0x80] sm:$0xff]  ;;  %v3193_v21 = vld [vmem:[#allocation28 + $0x90] sm:$0xff] }
 0xefc   :  { %v3096_v2 = vand.u32 %v3069_v20, %v6415_v62  ;;  %v4693_v20 = vpack.c.bf16 %v3192_v19, %v3191_v30 }
 0xefd   :  { %v3093_v15 = vand.u32 %v3068_v9, %v6415_v62  ;;  %v3194_v9 = vld [vmem:[#allocation28 + $0x98] sm:$0xff] }
 0xefe   :  { %3114 = vmatprep.subr.bf16.mxu0 %v3096_v2  ;;  %v4696_v2 = vpack.c.bf16 %v3194_v9, %v3193_v21 }
 0xeff   :  { %3115 = vmatpush1.bf16.msra.mxu0 %v3093_v15  ;;  %v3195_v15 = vld [vmem:[#allocation28 + $0xa0] sm:$0xff] }
 0xf00   :  { %v3073_v56 = vpop.permute.xlu0 %3072  ;;  %4668 = vmatprep.subr.bf16.mxu0 %v5289_v46 }
 0xf02   :  { %3131 = vmatmul.mubr.bf16.vlgmr.msra.gmra.mrb[28].mxu0 %v4796_v45  ;;  %v3078_v25 = vpop.permute.xlu1 %3077  ;;  %v3196_v45 = vld [vmem:[#allocation28 + $0xa8] sm:$0xff] }
 0xfd5   :  { %v3132_v35 = vpop.f32.mrb[28].mxu0 }
 0xfd6   :  { %v3133_v24 = vadd.f32 %v3132_v35, %v3073_v56  ;;  %v3134_v47 = vpop.f32.mrb[29].mxu0  ;;  %v3197_v35 = vld [vmem:[#allocation28 + $0xb0] sm:$0xff] }
 0xfd7   :  { %v3135_v31 = vadd.f32 %v3134_v47, %v3073_v56  ;;  %v3136_v26 = vpop.f32.mrb[30].mxu0  ;;  %v4699_v56 = vpack.c.bf16 %v3196_v45, %v3195_v15 }
 0xfd8   :  { %4861 = vtanh.f32 %v3133_v24  ;;  %v3137_v27 = vadd.f32 %v3136_v26, %v3078_v25  ;;  %v3138_v14 = vpop.f32.mrb[31].mxu0  ;;  %v3198_v24 = vld [vmem:[#allocation28 + $0xb8] sm:$0x1f] }
 0xfd9   :  { %4863 = vtanh.f32 %v3135_v31  ;;  %v3139_v32 = vadd.f32 %v3138_v14, %v3078_v25  ;;  %v4702_v47 = vpack.c.bf16 %v3198_v24, %v3197_v35 }
 0xfda   :  { %4865 = vtanh.f32 %v3137_v27 }
 0xfdb   :  { %4867 = vtanh.f32 %v3139_v32 }
 0xfe2   :  { %v4862_v34 = vpop.eup %4861 }
 0xfe3   :  { %v4864_v36 = vpop.eup %4863  ;;  %v3145_v51 = vmul.f32 %v4862_v34, %v6229_v6 }
 0xfe4   :  { %v4866_v0 = vpop.eup %4865  ;;  %v3146_v48 = vmul.f32 %v4864_v36, %v6233_v60 }
 0xfe5   :  { %v4868_v37 = vpop.eup %4867  ;;  %3153 = vrot.lane.b32.xlu0 %v3145_v51, %s5288_s13  ;;  %v3147_v44 = vmul.f32 %v4866_v0, %v6229_v6  ;;  %v3176_v6 = vld [vmem:[#allocation28 + $0x8] sm:$0xff] }
 0xfe6   :  { %3155 = vrot.lane.b32.xlu1 %v3146_v48, %s5288_s13  ;;  %v3148_v16 = vmul.f32 %v4868_v37, %v6233_v60  ;;  %v4669_v33 = vpack.c.bf16 %v3176_v6, %v3175_v28 }
 0xfe8   :  { %4670 = vmatpush1.bf16.msra.mxu0 %v4669_v33  ;;  %v3332_v33 = vld [vmem:[%s6965_s16] sm:$0xff] }
 0xfe9   :  { %3157 = vrot.lane.b32.xlu0 %v3147_v44, %s5288_s13  ;;  %4671 = vmatprep.subr.bf16.mxu0 %v5289_v46 }
 0xfea   :  { %3159 = vrot.lane.b32.xlu1 %v3148_v16, %s5288_s13 }
 0xfec   :  { %4673 = vmatpush1.bf16.msra.mxu0 %v4672_v50  ;;  %v3333_v50 = vld [vmem:[%s6965_s16 + $0x8] sm:$0xff] }
 0xfed   :  { %4674 = vmatprep.subr.bf16.mxu0 %v5289_v46 }
 0xff0   :  { %4676 = vmatpush1.bf16.msra.mxu0 %v4675_v58 }
 0xff1   :  { %4677 = vmatprep.subr.bf16.mxu0 %v5289_v46 }
 0xff4   :  { %4679 = vmatpush1.bf16.msra.mxu0 %v4678_v8 }
 0xff5   :  { %4680 = vmatprep.subr.bf16.mxu0 %v5289_v46 }
 0xff8   :  { %4682 = vmatpush1.bf16.msra.mxu0 %v4681_v4 }
 0xff9   :  { %4683 = vmatprep.subr.bf16.mxu0 %v5289_v46 }
 0xffc   :  { %4685 = vmatpush1.bf16.msra.mxu0 %v4684_v10 }
 0xffd   :  { %4686 = vmatprep.subr.bf16.mxu0 %v5289_v46 }
0x1000   :  { %4688 = vmatpush1.bf16.msra.mxu0 %v4687_v52 }
0x1001   :  { %4689 = vmatprep.subr.bf16.mxu0 %v5289_v46 }
0x1004   :  { %4691 = vmatpush1.bf16.msra.mxu0 %v4690_v57 }
0x1005   :  { %4692 = vmatprep.subr.bf16.mxu0 %v5289_v46 }
0x1008   :  { %4694 = vmatpush1.bf16.msra.mxu0 %v4693_v20 }
0x1009   :  { %4695 = vmatprep.subr.bf16.mxu0 %v5289_v46 }
0x100c   :  { %4697 = vmatpush1.bf16.msra.mxu0 %v4696_v2 }
0x100d   :  { %4698 = vmatprep.subr.bf16.mxu0 %v5289_v46 }
0x1010   :  { %4700 = vmatpush1.bf16.msra.mxu0 %v4699_v56 }
0x1011   :  { %4701 = vmatprep.subr.bf16.mxu0 %v5289_v46 }
0x1014   :  { %4704 = vmatpush1.bf16.msk.msra.mxu0 %vm4703_vm4, %v4702_v47 }
0x1015   :  { %3479 = vmatprep.subr.bf16.mxu0 %v5278_v3 }
0x1057   :  { %v3154_v38 = vpop.permute.xlu0 %3153 }
0x1058   :  { %3167 = vst.msk [vmem:[#allocation3] sm:$0xff] %vm7135_vm9, %v3154_v38  ;;  %v3156_v17 = vpop.permute.xlu1 %3155  ;;  %vm3562_vm9 = vcmask 524344  }
0x1059   :  { %v3161_v29 = vsel %vm7136_vm14, %v3154_v38, %v3156_v17  ;;  %vm3579_vm14 = vcmask 466944  }
0x105a   :  { %3168 = vst.msk [vmem:[#allocation3 + $0x8] sm:$0xff] %vm7137_vm12, %v3161_v29  ;;  %vm3795_vm12 = vcmask 793600  }
0x105b   :  { %v3158_v39 = vpop.permute.xlu0 %3157 }
0x105c   :  { %3169 = vst.msk [vmem:[#allocation3 + $0x10] sm:$0x7f] %vm7138_vm5, %v3158_v39  ;;  %v3160_v40 = vpop.permute.xlu1 %3159  ;;  %vm4273_vm5 = vcmask 531456  }
0x105d   :  { %v3162_v60 = vsel %vm7139_vm1, %v3158_v39, %v3160_v40  ;;  %vm4378_vm1 = vcmask 57344  }
0x105e   :  { %3170 = vst.msk [vmem:[#allocation3 + $0x18] sm:$0x7f] %vm7140_vm13, %v3162_v60 }
0x105f   :  { %v6608_v49 = vld [vmem:[#allocation3] sm:$0xff] }
0x1060   :  { %3203 = vrot.lane.b32.xlu0 %v6608_v49, %s5271_s29 }
0x1061   :  { %v3172_v55 = vld [vmem:[#allocation3 + $0x8] sm:$0xff] }
0x1062   :  { %3205 = vrot.lane.b32.xlu1 %v3172_v55, %s5271_s29 }
0x1063   :  { %v6613_v42 = vld [vmem:[#allocation3 + $0x10] sm:$0x7f] }
0x1064   :  { %3207 = vrot.lane.b32.xlu0 %v6613_v42, %s5271_s29 }
0x1065   :  { %v3174_v41 = vld [vmem:[#allocation3 + $0x18] sm:$0x7f] }
0x1066   :  { %3209 = vrot.lane.b32.xlu1 %v3174_v41, %s5271_s29 }
0x10d2   :  { %v3204_v25 = vpop.permute.xlu0 %3203 }
0x10d4   :  { %v3206_v31 = vpop.permute.xlu1 %3205 }
0x10d5   :  { %v3211_v26 = vsel %vm304_vm2, %v3204_v25, %v3206_v31  ;;  %v3218_v27 = vmax.f32 %v3172_v55, %v3206_v31 }
0x10d6   :  { %v3217_v14 = vmax.f32 %v6608_v49, %v3211_v26  ;;  %v3208_v32 = vpop.permute.xlu0 %3207  ;;  %v3334_v49 = vld [vmem:[%s6965_s16 + $0x10] sm:$0xff]  ;;  %s5296_s16 = smov 7  }
0x10d7   :  { %3227 = vrot.lane.b32.xlu1 %v3218_v27, %s5283_s12 }
0x10d8   :  { %v3210_v34 = vpop.permute.xlu1 %3209  ;;  %3225 = vrot.lane.b32.xlu0 %v3217_v14, %s5283_s12 }
0x10d9   :  { %v3212_v36 = vsel %vm304_vm2, %v3208_v32, %v3210_v34  ;;  %v3220_v51 = vmax.f32 %v3174_v41, %v3210_v34  ;;  %vm7143_vm2 = vmmov %vm7142_vm3 }
0x10da   :  { %v3219_v0 = vmax.f32 %v6613_v42, %v3212_v36 }
0x10db   :  { %3231 = vrot.lane.b32.xlu1 %v3220_v51, %s5283_s12 }
0x10dc   :  { %3229 = vrot.lane.b32.xlu0 %v3219_v0, %s5283_s12 }
0x1149   :  { %v3228_v48 = vpop.permute.xlu1 %3227 }
0x114a   :  { %v3240_v37 = vmax.f32 %v3218_v27, %v3228_v48  ;;  %v3226_v44 = vpop.permute.xlu0 %3225 }
0x114b   :  { %v3233_v16 = vsel %vm2135_vm10, %v3226_v44, %v3228_v48  ;;  %v4800_v44 = vld [vmem:[#allocation18 + $0x14] ss:$8 sps:$4 sm:$0x1f]  }
0x114c   :  { %v3239_v38 = vmax.f32 %v3217_v14, %v3233_v16  ;;  %4413 = vmatprep.mubr.msk.f32.mxu0 %vm7142_vm3, %v3240_v37  ;;  %v4797_v37 = vld [vmem:[#allocation18] ss:$8 sps:$4 sm:$0xff]   ;;  %v4802_v16 = vld [vmem:[#allocation18 + $0x10] ss:$8 sps:$4 sm:$0x1f]  }
0x114d   :  { %v3232_v17 = vpop.permute.xlu1 %3231 }
0x114e   :  { %v3242_v29 = vmax.f32 %v3220_v51, %v3232_v17  ;;  %3317 = vmatmul.mubr.f32.vlgmr.msra.gmra.mrb[32].mxu0 %v3239_v38  ;;  %v3230_v39 = vpop.permute.xlu0 %3229 }
0x114f   :  { %v3234_v40 = vsel %vm2135_vm10, %v3230_v39, %v3232_v17  ;;  %vm288_vm10 = vcmask 581632  }
0x1150   :  { %v3241_v28 = vmax.f32 %v3219_v0, %v3234_v40  ;;  %4414 = vmatprep.mubr.msk.f32.mxu0 %vm7143_vm2, %v3242_v29  ;;  %289 = vst.msk [vmem:[#allocation4 + $0x18] sm:$0x1] %vm288_vm10, %v6221_v13 }
0x1152   :  { %3322 = vmatmul.mubr.f32.gmra.mrb[34].mxu0 %v3241_v28 }
0x1153   :  { %4419 = vmatprep.mubr.msk.bf16.mxu0 %vm2677_vm7, %v4799_v54 }
0x1221   :  { %v3318_v6 = vpop.f32.mrb[32].mxu0 }
0x1222   :  { %3337 = vst.msk [vmem:[#allocation7] sm:$0xff] %vm3336_vm0, %v3318_v6  ;;  %3342 = vrot.lane.b32.xlu0 %v3318_v6, %s5271_s29  ;;  %v3320_v43 = vpop.f32.mrb[33].mxu0 }
0x1225   :  { %v3323_v60 = vpop.f32.mrb[34].mxu0 }
0x1226   :  { %3350 = vrot.lane.b32.xlu0 %v3318_v6, %s5273_s25  ;;  %3344 = vrot.lane.b32.xlu1 %v3323_v60, %s5271_s29  ;;  %v3325_v46 = vpop.f32.mrb[35].mxu0  ;;  %3339 = vst.msk [vmem:[#allocation7 + $0x8] sm:$0x7f] %vm3338_vm15, %v3323_v60 }
0x1229   :  { %v3406_v63 = vld [vmem:[#allocation7] sm:$0xff] }
0x122a   :  { %3358 = vrot.lane.b32.xlu0 %v3318_v6, %s5291_s15  ;;  %3352 = vrot.lane.b32.xlu1 %v3323_v60, %s5273_s25 }
0x122e   :  { %3366 = vrot.lane.b32.xlu0 %v3318_v6, %s5292_s3  ;;  %3360 = vrot.lane.b32.xlu1 %v3323_v60, %s5291_s15 }
0x1232   :  { %3374 = vrot.lane.b32.xlu0 %v3318_v6, %s5293_s23  ;;  %3368 = vrot.lane.b32.xlu1 %v3323_v60, %s5292_s3 }
0x1236   :  { %3382 = vrot.lane.b32.xlu0 %v3318_v6, %s5285_s17  ;;  %3376 = vrot.lane.b32.xlu1 %v3323_v60, %s5293_s23 }
0x123a   :  { %3390 = vrot.lane.b32.xlu0 %v3318_v6, %s5294_s21  ;;  %3384 = vrot.lane.b32.xlu1 %v3323_v60, %s5285_s17 }
0x123e   :  { %3398 = vrot.lane.b32.xlu0 %v3318_v6, %s5295_s26  ;;  %3392 = vrot.lane.b32.xlu1 %v3323_v60, %s5294_s21 }
0x1242   :  { %3434 = vperm.xlu0 %4773, %v3332_v33   ;;  %3400 = vrot.lane.b32.xlu1 %v3323_v60, %s5295_s26 }
0x1246   :  { %3444 = vperm.xlu0 %4773, %v3334_v49   ;;  %3439 = vperm.xlu1 %4774, %v3333_v50  }
0x124a   :  { %3449 = vperm.xlu1 %4774, %v3335_v53  }
0x1294   :  { %v3343_v22 = vpop.permute.xlu0 %3342 }
0x1295   :  { %3348 = vst.msk [vmem:[#allocation7 + $0xf] sm:$0xff] %vm3336_vm0, %v3343_v22  ;;  %v6690_v22 = vld [vmem:[#allocation25] ss:$0 sm:$0xff] }
0x1298   :  { %v3345_v55 = vpop.permute.xlu1 %3344  ;;  %v3351_v42 = vpop.permute.xlu0 %3350 }
0x1299   :  { %3349 = vst.msk [vmem:[#allocation7 + $0x17] sm:$0x7f] %vm3338_vm15, %v3345_v55 }
0x129a   :  { %3356 = vst.msk [vmem:[#allocation7 + $0x1e] sm:$0xff] %vm3336_vm0, %v3351_v42 }
0x129c   :  { %v3353_v58 = vpop.permute.xlu1 %3352  ;;  %v3359_v59 = vpop.permute.xlu0 %3358  ;;  %v3407_v41 = vld [vmem:[#allocation7 + $0x8] sm:$0xff] }
0x129d   :  { %3357 = vst.msk [vmem:[#allocation7 + $0x26] sm:$0x7f] %vm3338_vm15, %v3353_v58  ;;  %v3423_v8 = vpack.c.bf16 %v3407_v41, %v3406_v63 }
0x129e   :  { %3364 = vst.msk [vmem:[#allocation7 + $0x2d] sm:$0xff] %vm3336_vm0, %v3359_v59 }
0x129f   :  { %3480 = vmatpush1.bf16.msra.mxu0 %v3423_v8 }
0x12a0   :  { %v3361_v1 = vpop.permute.xlu1 %3360  ;;  %v3367_v61 = vpop.permute.xlu0 %3366  ;;  %3481 = vmatprep.subr.bf16.mxu0 %v5278_v3  ;;  %v3408_v4 = vld [vmem:[#allocation7 + $0x10] sm:$0xff] }
0x12a1   :  { %v3409_v5 = vld [vmem:[#allocation7 + $0x18] sm:$0xff]  ;;  %3365 = vst.msk [vmem:[#allocation7 + $0x35] sm:$0x7f] %vm3338_vm15, %v3361_v1 }
0x12a2   :  { %3372 = vst.msk [vmem:[#allocation7 + $0x3c] sm:$0xff] %vm3336_vm0, %v3367_v61  ;;  %v3424_v7 = vpack.c.bf16 %v3409_v5, %v3408_v4 }
0x12a4   :  { %3482 = vmatpush1.bf16.msra.mxu0 %v3424_v7  ;;  %v3369_v10 = vpop.permute.xlu1 %3368  ;;  %v3375_v11 = vpop.permute.xlu0 %3374  ;;  %v3410_v12 = vld [vmem:[#allocation7 + $0x20] sm:$0xff] }
0x12a5   :  { %3483 = vmatprep.subr.bf16.mxu0 %v5278_v3  ;;  %v3411_v52 = vld [vmem:[#allocation7 + $0x28] sm:$0xff]  ;;  %3373 = vst.msk [vmem:[#allocation7 + $0x44] sm:$0x7f] %vm3338_vm15, %v3369_v10 }
0x12a6   :  { %3380 = vst.msk [vmem:[#allocation7 + $0x4b] sm:$0xff] %vm3336_vm0, %v3375_v11  ;;  %v3425_v18 = vpack.c.bf16 %v3411_v52, %v3410_v12 }
0x12a8   :  { %3484 = vmatpush1.bf16.msra.mxu0 %v3425_v18  ;;  %v3377_v23 = vpop.permute.xlu1 %3376  ;;  %v3383_v57 = vpop.permute.xlu0 %3382  ;;  %v3412_v30 = vld [vmem:[#allocation7 + $0x30] sm:$0xff] }
0x12a9   :  { %3485 = vmatprep.subr.bf16.mxu0 %v5278_v3  ;;  %v3413_v19 = vld [vmem:[#allocation7 + $0x38] sm:$0xff]  ;;  %3381 = vst.msk [vmem:[#allocation7 + $0x53] sm:$0x7f] %vm3338_vm15, %v3377_v23 }
0x12aa   :  { %3388 = vst.msk [vmem:[#allocation7 + $0x5a] sm:$0xff] %vm3336_vm0, %v3383_v57  ;;  %v3426_v20 = vpack.c.bf16 %v3413_v19, %v3412_v30  ;;  %v3572_v57 = vld [vmem:[%s7144_s1] sm:$0xff]  ;;  %v4803_v30 = vld [vmem:[#allocation19 + $0x4] ss:$8 sps:$4 sm:$0xff]   ;;  %v3573_v19 = vld [vmem:[%s7144_s1 + $0x8] sm:$0xff] }
0x12ab   :  { %4426 = vmatprep.mubr.msk.bf16.mxu1 %vm3795_vm12, %v4803_v30 }
0x12ac   :  { %3486 = vmatpush1.bf16.msra.mxu0 %v3426_v20  ;;  %v3385_v21 = vpop.permute.xlu1 %3384  ;;  %v3391_v9 = vpop.permute.xlu0 %3390  ;;  %v3414_v2 = vld [vmem:[#allocation7 + $0x40] sm:$0xff] }
0x12ad   :  { %3487 = vmatprep.subr.bf16.mxu0 %v5278_v3  ;;  %v3415_v15 = vld [vmem:[#allocation7 + $0x48] sm:$0xff]  ;;  %3389 = vst.msk [vmem:[#allocation7 + $0x62] sm:$0x7f] %vm3338_vm15, %v3385_v21  ;;  %v3574_v20 = vld [vmem:[%s7144_s1 + $0x10] sm:$0xff] }
0x12ae   :  { %3396 = vst.msk [vmem:[#allocation7 + $0x69] sm:$0xff] %vm3336_vm0, %v3391_v9  ;;  %v3427_v45 = vpack.c.bf16 %v3415_v15, %v3414_v2  ;;  %v3575_v21 = vld [vmem:[%s7144_s1 + $0x18] sm:$0x1] }
0x12b0   :  { %3488 = vmatpush1.bf16.msra.mxu0 %v3427_v45  ;;  %v3393_v56 = vpop.permute.xlu1 %3392  ;;  %v3399_v35 = vpop.permute.xlu0 %3398  ;;  %v3416_v24 = vld [vmem:[#allocation7 + $0x50] sm:$0xff] }
0x12b1   :  { %3489 = vmatprep.subr.bf16.mxu0 %v5278_v3  ;;  %v3417_v47 = vld [vmem:[#allocation7 + $0x58] sm:$0xff]  ;;  %3397 = vst.msk [vmem:[#allocation7 + $0x71] sm:$0x7f] %vm3338_vm15, %v3393_v56 }
0x12b2   :  { %3404 = vst.msk [vmem:[#allocation7 + $0x78] sm:$0xff] %vm3336_vm0, %v3399_v35  ;;  %v3428_v25 = vpack.c.bf16 %v3417_v47, %v3416_v24 }
0x12b4   :  { %3490 = vmatpush1.bf16.msra.mxu0 %v3428_v25  ;;  %v3401_v31 = vpop.permute.xlu1 %3400  ;;  %v3418_v26 = vld [vmem:[#allocation7 + $0x60] sm:$0xff] }
0x12b5   :  { %3491 = vmatprep.subr.bf16.mxu0 %v5278_v3  ;;  %v3419_v27 = vld [vmem:[#allocation7 + $0x68] sm:$0xff]  ;;  %3405 = vst.msk [vmem:[#allocation7 + $0x80] sm:$0x7f] %vm3338_vm15, %v3401_v31 }
0x12b6   :  { %v3429_v14 = vpack.c.bf16 %v3419_v27, %v3418_v26 }
0x12b8   :  { %3492 = vmatpush1.bf16.msra.mxu0 %v3429_v14  ;;  %v3420_v32 = vld [vmem:[#allocation7 + $0x70] sm:$0xff] }
0x12b9   :  { %3493 = vmatprep.subr.bf16.mxu0 %v5278_v3  ;;  %v3421_v34 = vld [vmem:[#allocation7 + $0x78] sm:$0xff] }
0x12ba   :  { %v3430_v36 = vpack.c.bf16 %v3421_v34, %v3420_v32 }
0x12bc   :  { %3494 = vmatpush1.bf16.msra.mxu0 %v3430_v36  ;;  %v3422_v51 = vld [vmem:[#allocation7 + $0x80] sm:$0x7f] }
0x12bd   :  { %3495 = vmatprep.subr.bf16.mxu0 %v5278_v3  ;;  %v3431_v0 = vpack.c.bf16 %v3422_v51, %v3422_v51 }
0x12bf   :  { %v3477_v48 = vand.u32 %v3431_v0, %v6415_v62 }
0x12c1   :  { %3496 = vmatpush1.bf16.msra.mxu0 %v3477_v48  ;;  %v3435_v38 = vpop.permute.xlu0 %3434 }
0x12c2   :  { %4123 = vmatprep.subr.bf16.mxu0 %v5278_v3 }
0x12c4   :  { %3512 = vmatmul.mubr.bf16.vlgmr.msra.gmra.mrb[36].mxu0 %v4797_v37 }
0x12c5   :  { %4420 = vmatprep.mubr.msk.bf16.mxu0 %vm2677_vm7, %v4800_v44  ;;  %v3440_v40 = vpop.permute.xlu1 %3439  ;;  %v3445_v62 = vpop.permute.xlu0 %3444  ;;  %vm3558_vm7 = vcmask 531512  }
0x12c9   :  { %v3450_v54 = vpop.permute.xlu1 %3449 }
0x12cc   :  { %3520 = vmatmul.mubr.bf16.gmra.mrb[40].mxu0 %v4802_v16 }
0x1397   :  { %v3513_v17 = vpop.f32.mrb[36].mxu0 }
0x1398   :  { %v3514_v29 = vadd.f32 %v3513_v17, %v3435_v38  ;;  %v3515_v39 = vpop.f32.mrb[37].mxu0 }
0x1399   :  { %v3516_v28 = vpop.f32.mrb[38].mxu0 }
0x139a   :  { %4869 = vtanh.f32 %v3514_v29  ;;  %v3517_v6 = vadd.f32 %v3516_v28, %v3440_v40  ;;  %v3518_v43 = vpop.f32.mrb[39].mxu0 }
0x139c   :  { %4871 = vtanh.f32 %v3517_v6 }
0x139f   :  { %v3521_v60 = vpop.f32.mrb[40].mxu0 }
0x13a0   :  { %v3522_v46 = vadd.f32 %v3521_v60, %v3445_v62  ;;  %v3523_v33 = vpop.f32.mrb[41].mxu0 }
0x13a1   :  { %v3524_v49 = vpop.f32.mrb[42].mxu0 }
0x13a2   :  { %4873 = vtanh.f32 %v3522_v46  ;;  %v3525_v50 = vadd.f32 %v3524_v49, %v3450_v54  ;;  %v3526_v53 = vpop.f32.mrb[43].mxu0 }
0x13a4   :  { %v4870_v55 = vpop.eup %4869  ;;  %4875 = vtanh.f32 %v3525_v50 }
0x13a5   :  { %v3538_v42 = vmul.f32 %v4870_v55, %v6690_v22 }
0x13a6   :  { %v4872_v58 = vpop.eup %4871 }
0x13a7   :  { %3546 = vrot.lane.b32.xlu0 %v3538_v42, %s5296_s16  ;;  %v3539_v59 = vmul.f32 %v4872_v58, %v6690_v22 }
0x13a9   :  { %3548 = vrot.lane.b32.xlu1 %v3539_v59, %s5296_s16 }
0x13ac   :  { %v4874_v63 = vpop.eup %4873 }
0x13ad   :  { %v3540_v41 = vmul.f32 %v4874_v63, %v6690_v22 }
0x13ae   :  { %v4876_v8 = vpop.eup %4875 }
0x13af   :  { %3550 = vrot.lane.b32.xlu0 %v3540_v41, %s5296_s16  ;;  %v3541_v13 = vmul.f32 %v4876_v8, %v6690_v22 }
0x13b1   :  { %3552 = vrot.lane.b32.xlu1 %v3541_v13, %s5296_s16 }
0x1419   :  { %v3547_v1 = vpop.permute.xlu0 %3546 }
0x141a   :  { %3559 = vst.msk [vmem:[#allocation4] sm:$0xff] %vm3558_vm7, %v3547_v1 }
0x141b   :  { %v3549_v61 = vpop.permute.xlu1 %3548 }
0x141c   :  { %3560 = vst.msk [vmem:[#allocation4 + $0x8] sm:$0xff] %vm3558_vm7, %v3549_v61 }
0x1421   :  { %v3551_v4 = vpop.permute.xlu0 %3550  ;;  %v3564_v5 = vld [vmem:[#allocation4] sm:$0xff] }
0x1422   :  { %3561 = vst.msk [vmem:[#allocation4 + $0x10] sm:$0xff] %vm3558_vm7, %v3551_v4  ;;  %3585 = vrot.lane.b32.xlu0 %v3564_v5, %s5271_s29 }
0x1423   :  { %3576 = vst.msk [vmem:[#allocation7] sm:$0xff] %vm3336_vm0, %v3564_v5  ;;  %v3553_v7 = vpop.permute.xlu1 %3552  ;;  %v3565_v10 = vld [vmem:[#allocation4 + $0x8] sm:$0xff] }
0x1424   :  { %3563 = vst.msk [vmem:[#allocation4 + $0x18] sm:$0x1] %vm3562_vm9, %v3553_v7  ;;  %3587 = vrot.lane.b32.xlu1 %v3565_v10, %s5271_s29 }
0x1425   :  { %3577 = vst.msk [vmem:[#allocation7 + $0x8] sm:$0xff] %vm3336_vm0, %v3565_v10 }
0x1426   :  { %3601 = vrot.lane.b32.xlu0 %v3564_v5, %s5273_s25 }
0x1428   :  { %3603 = vrot.lane.b32.xlu1 %v3565_v10, %s5273_s25 }
0x1429   :  { %v3566_v11 = vld [vmem:[#allocation4 + $0x10] sm:$0xff] }
0x142a   :  { %3617 = vrot.lane.b32.xlu0 %v3564_v5, %s5291_s15  ;;  %3578 = vst.msk [vmem:[#allocation7 + $0x10] sm:$0xff] %vm3336_vm0, %v3566_v11  ;;  %v3713_v12 = vld [vmem:[#allocation7] sm:$0xff] }
0x142b   :  { %v3567_v18 = vld [vmem:[#allocation4 + $0x18] sm:$0x1] }
0x142c   :  { %v3714_v52 = vld [vmem:[#allocation7 + $0x8] sm:$0xff]  ;;  %3619 = vrot.lane.b32.xlu1 %v3565_v10, %s5291_s15  ;;  %3580 = vst.msk [vmem:[#allocation7 + $0x18] sm:$0x1] %vm3579_vm14, %v3567_v18 }
0x142d   :  { %v3742_v23 = vpack.c.bf16 %v3714_v52, %v3713_v12 }
0x142e   :  { %3633 = vrot.lane.b32.xlu0 %v3564_v5, %s5292_s3 }
0x142f   :  { %3808 = vmatpush1.bf16.msra.mxu1 %v3742_v23 }
0x1430   :  { %3809 = vmatprep.subr.bf16.mxu1 %v5278_v3  ;;  %3635 = vrot.lane.b32.xlu1 %v3565_v10, %s5292_s3 }
0x1431   :  { %v3715_v35 = vld [vmem:[#allocation7 + $0x10] sm:$0xff] }
0x1432   :  { %3589 = vrot.lane.b32.xlu0 %v3566_v11, %s5271_s29 }
0x1434   :  { %3591 = vrot.lane.b32.xlu1 %v3567_v18, %s5271_s29 }
0x1436   :  { %3649 = vrot.lane.b32.xlu0 %v3564_v5, %s5293_s23 }
0x1438   :  { %3607 = vrot.lane.b32.xlu1 %v3567_v18, %s5273_s25 }
0x143a   :  { %3605 = vrot.lane.b32.xlu0 %v3566_v11, %s5273_s25 }
0x143c   :  { %3651 = vrot.lane.b32.xlu1 %v3565_v10, %s5293_s23 }
0x143e   :  { %3621 = vrot.lane.b32.xlu0 %v3566_v11, %s5291_s15 }
0x1440   :  { %3623 = vrot.lane.b32.xlu1 %v3567_v18, %s5291_s15 }
0x1442   :  { %3637 = vrot.lane.b32.xlu0 %v3566_v11, %s5292_s3 }
0x1444   :  { %3639 = vrot.lane.b32.xlu1 %v3567_v18, %s5292_s3 }
0x1446   :  { %3653 = vrot.lane.b32.xlu0 %v3566_v11, %s5293_s23 }
0x1448   :  { %3667 = vrot.lane.b32.xlu1 %v3565_v10, %s5285_s17 }
0x144a   :  { %3665 = vrot.lane.b32.xlu0 %v3564_v5, %s5285_s17 }
0x144c   :  { %3655 = vrot.lane.b32.xlu1 %v3567_v18, %s5293_s23 }
0x144e   :  { %3669 = vrot.lane.b32.xlu0 %v3566_v11, %s5285_s17 }
0x1450   :  { %3671 = vrot.lane.b32.xlu1 %v3567_v18, %s5285_s17 }
0x1452   :  { %3681 = vrot.lane.b32.xlu0 %v3564_v5, %s5294_s21 }
0x1454   :  { %3683 = vrot.lane.b32.xlu1 %v3565_v10, %s5294_s21 }
0x1456   :  { %3685 = vrot.lane.b32.xlu0 %v3566_v11, %s5294_s21 }
0x1458   :  { %3687 = vrot.lane.b32.xlu1 %v3567_v18, %s5294_s21 }
0x145a   :  { %3697 = vrot.lane.b32.xlu0 %v3564_v5, %s5295_s26 }
0x145c   :  { %3699 = vrot.lane.b32.xlu1 %v3565_v10, %s5295_s26 }
0x145e   :  { %3701 = vrot.lane.b32.xlu0 %v3566_v11, %s5295_s26 }
0x1460   :  { %3703 = vrot.lane.b32.xlu1 %v3567_v18, %s5295_s26 }
0x1462   :  { %3759 = vperm.xlu0 %4773, %v3572_v57  }
0x1464   :  { %3764 = vperm.xlu1 %4774, %v3573_v19  }
0x1466   :  { %3769 = vperm.xlu0 %4773, %v3574_v20  }
0x1468   :  { %3774 = vperm.xlu1 %4774, %v3575_v21  }
0x1494   :  { %v3586_v9 = vpop.permute.xlu0 %3585 }
0x1495   :  { %3597 = vst.msk [vmem:[#allocation7 + $0x19] sm:$0xff] %vm3336_vm0, %v3586_v9 }
0x1496   :  { %v3588_v2 = vpop.permute.xlu1 %3587 }
0x1497   :  { %3598 = vst.msk [vmem:[#allocation7 + $0x21] sm:$0xff] %vm3336_vm0, %v3588_v2 }
0x1498   :  { %v3602_v15 = vpop.permute.xlu0 %3601 }
0x1499   :  { %3613 = vst.msk [vmem:[#allocation7 + $0x32] sm:$0xff] %vm3336_vm0, %v3602_v15 }
0x149a   :  { %v3604_v45 = vpop.permute.xlu1 %3603 }
0x149b   :  { %3614 = vst.msk [vmem:[#allocation7 + $0x3a] sm:$0xff] %vm3336_vm0, %v3604_v45 }
0x149c   :  { %v3618_v56 = vpop.permute.xlu0 %3617  ;;  %v3716_v24 = vld [vmem:[#allocation7 + $0x18] sm:$0xff] }
0x149d   :  { %3629 = vst.msk [vmem:[#allocation7 + $0x4b] sm:$0xff] %vm3336_vm0, %v3618_v56  ;;  %v3743_v47 = vpack.c.bf16 %v3716_v24, %v3715_v35 }
0x149e   :  { %v3620_v25 = vpop.permute.xlu1 %3619  ;;  %v3717_v51 = vld [vmem:[#allocation7 + $0x20] sm:$0xff] }
0x149f   :  { %3630 = vst.msk [vmem:[#allocation7 + $0x53] sm:$0xff] %vm3336_vm0, %v3620_v25  ;;  %3810 = vmatpush1.bf16.msra.mxu1 %v3743_v47 }
0x14a0   :  { %v3634_v31 = vpop.permute.xlu0 %3633  ;;  %3811 = vmatprep.subr.bf16.mxu1 %v5278_v3 }
0x14a1   :  { %3645 = vst.msk [vmem:[#allocation7 + $0x64] sm:$0xff] %vm3336_vm0, %v3634_v31 }
0x14a2   :  { %v3636_v26 = vpop.permute.xlu1 %3635  ;;  %v3720_v38 = vld [vmem:[#allocation7 + $0x38] sm:$0xff] }
0x14a3   :  { %3646 = vst.msk [vmem:[#allocation7 + $0x6c] sm:$0xff] %vm3336_vm0, %v3636_v26  ;;  %v6801_v26 = vsel %vm2562_vm6, 65535, %v5278_v3 }
0x14a4   :  { %v3590_v27 = vpop.permute.xlu0 %3589 }
0x14a5   :  { %3599 = vst.msk [vmem:[#allocation7 + $0x29] sm:$0xff] %vm3336_vm0, %v3590_v27 }
0x14a6   :  { %v3592_v14 = vpop.permute.xlu1 %3591  ;;  %v3723_v60 = vld [vmem:[#allocation7 + $0x50] sm:$0xff] }
0x14a7   :  { %3600 = vst.msk [vmem:[#allocation7 + $0x31] sm:$0x1] %vm3579_vm14, %v3592_v14 }
0x14a8   :  { %v3650_v32 = vpop.permute.xlu0 %3649 }
0x14a9   :  { %3661 = vst.msk [vmem:[#allocation7 + $0x7d] sm:$0xff] %vm3336_vm0, %v3650_v32  ;;  %v4805_v32 = vld [vmem:[#allocation19] ss:$8 sps:$4 sm:$0xff]  }
0x14aa   :  { %v3608_v34 = vpop.permute.xlu1 %3607  ;;  %v3726_v53 = vld [vmem:[#allocation7 + $0x68] sm:$0xff] }
0x14ab   :  { %3616 = vst.msk [vmem:[#allocation7 + $0x4a] sm:$0x1] %vm3579_vm14, %v3608_v34  ;;  %v4806_v34 = vld [vmem:[#allocation19 + $0x14] ss:$8 sps:$4 sm:$0x1f]  }
0x14ac   :  { %v3606_v36 = vpop.permute.xlu0 %3605  ;;  %v3718_v0 = vld [vmem:[#allocation7 + $0x28] sm:$0xff] }
0x14ad   :  { %3615 = vst.msk [vmem:[#allocation7 + $0x42] sm:$0xff] %vm3336_vm0, %v3606_v36  ;;  %v3744_v48 = vpack.c.bf16 %v3718_v0, %v3717_v51  ;;  %v4808_v36 = vld [vmem:[#allocation19 + $0x10] ss:$8 sps:$4 sm:$0x1f]  }
0x14ae   :  { %v3652_v37 = vpop.permute.xlu1 %3651  ;;  %v3719_v44 = vld [vmem:[#allocation7 + $0x30] sm:$0xff] }
0x14af   :  { %3662 = vst.msk [vmem:[#allocation7 + $0x85] sm:$0xff] %vm3336_vm0, %v3652_v37  ;;  %3812 = vmatpush1.bf16.msra.mxu1 %v3744_v48  ;;  %v3745_v17 = vpack.c.bf16 %v3720_v38, %v3719_v44 }
0x14b0   :  { %v3622_v16 = vpop.permute.xlu0 %3621  ;;  %3813 = vmatprep.subr.bf16.mxu1 %v5278_v3 }
0x14b1   :  { %3631 = vst.msk [vmem:[#allocation7 + $0x5b] sm:$0xff] %vm3336_vm0, %v3622_v16 }
0x14b2   :  { %v3624_v29 = vpop.permute.xlu1 %3623 }
0x14b3   :  { %3632 = vst.msk [vmem:[#allocation7 + $0x63] sm:$0x1] %vm3579_vm14, %v3624_v29  ;;  %3814 = vmatpush1.bf16.msra.mxu1 %v3745_v17 }
0x14b4   :  { %v3638_v39 = vpop.permute.xlu0 %3637  ;;  %3815 = vmatprep.subr.bf16.mxu1 %v5278_v3  ;;  %v3721_v40 = vld [vmem:[#allocation7 + $0x40] sm:$0xff]  ;;  %v3722_v28 = vld [vmem:[#allocation7 + $0x48] sm:$0xff] }
0x14b5   :  { %3647 = vst.msk [vmem:[#allocation7 + $0x74] sm:$0xff] %vm3336_vm0, %v3638_v39  ;;  %v3746_v6 = vpack.c.bf16 %v3722_v28, %v3721_v40 }
0x14b6   :  { %v3640_v43 = vpop.permute.xlu1 %3639  ;;  %v3729_v61 = vld [vmem:[#allocation7 + $0x80] sm:$0xff] }
0x14b7   :  { %3648 = vst.msk [vmem:[#allocation7 + $0x7c] sm:$0x1] %vm3579_vm14, %v3640_v43  ;;  %3816 = vmatpush1.bf16.msra.mxu1 %v3746_v6 }
0x14b8   :  { %v3654_v62 = vpop.permute.xlu0 %3653  ;;  %3817 = vmatprep.subr.bf16.mxu1 %v5278_v3  ;;  %v3724_v46 = vld [vmem:[#allocation7 + $0x58] sm:$0xff] }
0x14b9   :  { %3663 = vst.msk [vmem:[#allocation7 + $0x8d] sm:$0xff] %vm3336_vm0, %v3654_v62  ;;  %v3747_v33 = vpack.c.bf16 %v3724_v46, %v3723_v60 }
0x14ba   :  { %v3668_v54 = vpop.permute.xlu1 %3667  ;;  %v3725_v49 = vld [vmem:[#allocation7 + $0x60] sm:$0xff] }
0x14bb   :  { %3678 = vst.msk [vmem:[#allocation7 + $0x9e] sm:$0xff] %vm3336_vm0, %v3668_v54  ;;  %3818 = vmatpush1.bf16.msra.mxu1 %v3747_v33  ;;  %v3748_v55 = vpack.c.bf16 %v3726_v53, %v3725_v49 }
0x14bc   :  { %v3666_v50 = vpop.permute.xlu0 %3665  ;;  %3819 = vmatprep.subr.bf16.mxu1 %v5278_v3  ;;  %v3727_v63 = vld [vmem:[#allocation7 + $0x70] sm:$0xff] }
0x14bd   :  { %3677 = vst.msk [vmem:[#allocation7 + $0x96] sm:$0xff] %vm3336_vm0, %v3666_v50 }
0x14be   :  { %v3656_v42 = vpop.permute.xlu1 %3655  ;;  %v3728_v58 = vld [vmem:[#allocation7 + $0x78] sm:$0xff] }
0x14bf   :  { %3664 = vst.msk [vmem:[#allocation7 + $0x95] sm:$0x1] %vm3579_vm14, %v3656_v42  ;;  %3820 = vmatpush1.bf16.msra.mxu1 %v3748_v55  ;;  %v3749_v41 = vpack.c.bf16 %v3728_v58, %v3727_v63 }
0x14c0   :  { %v3670_v59 = vpop.permute.xlu0 %3669  ;;  %3821 = vmatprep.subr.bf16.mxu1 %v5278_v3  ;;  %v3730_v13 = vld [vmem:[#allocation7 + $0x88] sm:$0xff] }
0x14c1   :  { %3679 = vst.msk [vmem:[#allocation7 + $0xa6] sm:$0xff] %vm3336_vm0, %v3670_v59  ;;  %v3750_v4 = vpack.c.bf16 %v3730_v13, %v3729_v61 }
0x14c2   :  { %v3672_v8 = vpop.permute.xlu1 %3671 }
0x14c3   :  { %3680 = vst.msk [vmem:[#allocation7 + $0xae] sm:$0x1] %vm3579_vm14, %v3672_v8  ;;  %3822 = vmatpush1.bf16.msra.mxu1 %v3749_v41 }
0x14c4   :  { %v3682_v1 = vpop.permute.xlu0 %3681  ;;  %3823 = vmatprep.subr.bf16.mxu1 %v5278_v3  ;;  %v3732_v11 = vld [vmem:[#allocation7 + $0x98] sm:$0xff] }
0x14c5   :  { %3693 = vst.msk [vmem:[#allocation7 + $0xaf] sm:$0xff] %vm3336_vm0, %v3682_v1 }
0x14c6   :  { %v3684_v5 = vpop.permute.xlu1 %3683  ;;  %v3731_v7 = vld [vmem:[#allocation7 + $0x90] sm:$0xff] }
0x14c7   :  { %3694 = vst.msk [vmem:[#allocation7 + $0xb7] sm:$0xff] %vm3336_vm0, %v3684_v5  ;;  %3824 = vmatpush1.bf16.msra.mxu1 %v3750_v4  ;;  %v3751_v12 = vpack.c.bf16 %v3732_v11, %v3731_v7  ;;  %v4811_v11 = vld [vmem:[#allocation21 + $0x4] ss:$8 sps:$4 sm:$0xff]  }
0x14c8   :  { %v3686_v10 = vpop.permute.xlu0 %3685  ;;  %3825 = vmatprep.subr.bf16.mxu1 %v5278_v3  ;;  %v3733_v23 = vld [vmem:[#allocation7 + $0xa0] sm:$0xff]  ;;  %4432 = vmatprep.mubr.msk.bf16.mxu0 %vm3795_vm12, %v4811_v11 }
0x14c9   :  { %3695 = vst.msk [vmem:[#allocation7 + $0xbf] sm:$0xff] %vm3336_vm0, %v3686_v10  ;;  %v3892_v10 = vld [vmem:[%s7145_s14] sm:$0xff] }
0x14ca   :  { %v3688_v52 = vpop.permute.xlu1 %3687 }
0x14cb   :  { %3696 = vst.msk [vmem:[#allocation7 + $0xc7] sm:$0x1] %vm3579_vm14, %v3688_v52  ;;  %3826 = vmatpush1.bf16.msra.mxu1 %v3751_v12  ;;  %v3893_v12 = vld [vmem:[%s7145_s14 + $0x8] sm:$0xff]  ;;  %v3894_v52 = vld [vmem:[%s7145_s14 + $0x10] sm:$0xff] }
0x14cc   :  { %v3698_v18 = vpop.permute.xlu0 %3697  ;;  %3827 = vmatprep.subr.bf16.mxu1 %v5278_v3  ;;  %v3734_v57 = vld [vmem:[#allocation7 + $0xa8] sm:$0xff] }
0x14cd   :  { %3709 = vst.msk [vmem:[#allocation7 + $0xc8] sm:$0xff] %vm3336_vm0, %v3698_v18  ;;  %v3752_v30 = vpack.c.bf16 %v3734_v57, %v3733_v23  ;;  %v3895_v18 = vld [vmem:[%s7145_s14 + $0x18] sm:$0x1] }
0x14ce   :  { %v3700_v19 = vpop.permute.xlu1 %3699  ;;  %v3735_v21 = vld [vmem:[#allocation7 + $0xb0] sm:$0xff] }
0x14cf   :  { %3710 = vst.msk [vmem:[#allocation7 + $0xd0] sm:$0xff] %vm3336_vm0, %v3700_v19  ;;  %3828 = vmatpush1.bf16.msra.mxu1 %v3752_v30 }
0x14d0   :  { %v3702_v20 = vpop.permute.xlu0 %3701  ;;  %3829 = vmatprep.subr.bf16.mxu1 %v5278_v3  ;;  %v3736_v9 = vld [vmem:[#allocation7 + $0xb8] sm:$0xff] }
0x14d1   :  { %3711 = vst.msk [vmem:[#allocation7 + $0xd8] sm:$0xff] %vm3336_vm0, %v3702_v20  ;;  %v3753_v2 = vpack.c.bf16 %v3736_v9, %v3735_v21 }
0x14d2   :  { %v3704_v15 = vpop.permute.xlu1 %3703  ;;  %v3737_v45 = vld [vmem:[#allocation7 + $0xc0] sm:$0xff] }
0x14d3   :  { %3712 = vst.msk [vmem:[#allocation7 + $0xe0] sm:$0x1] %vm3579_vm14, %v3704_v15  ;;  %3830 = vmatpush1.bf16.msra.mxu1 %v3753_v2 }
0x14d4   :  { %3831 = vmatprep.subr.bf16.mxu1 %v5278_v3  ;;  %v3738_v56 = vld [vmem:[#allocation7 + $0xc8] sm:$0xff] }
0x14d5   :  { %v3754_v35 = vpack.c.bf16 %v3738_v56, %v3737_v45 }
0x14d6   :  { %v3739_v24 = vld [vmem:[#allocation7 + $0xd0] sm:$0xff] }
0x14d7   :  { %3832 = vmatpush1.bf16.msra.mxu1 %v3754_v35 }
0x14d8   :  { %3833 = vmatprep.subr.bf16.mxu1 %v5278_v3  ;;  %v3740_v47 = vld [vmem:[#allocation7 + $0xd8] sm:$0xff] }
0x14d9   :  { %v3755_v25 = vpack.c.bf16 %v3740_v47, %v3739_v24 }
0x14da   :  { %v3741_v31 = vld [vmem:[#allocation7 + $0xe0] sm:$0x1] }
0x14db   :  { %3834 = vmatpush1.bf16.msra.mxu1 %v3755_v25  ;;  %v3756_v27 = vpack.c.bf16 %v3741_v31, %v3741_v31 }
0x14dc   :  { %3835 = vmatprep.subr.bf16.mxu1 %v5278_v3 }
0x14dd   :  { %v3805_v14 = vand.u32 %v6801_v26, %v3756_v27 }
0x14df   :  { %3836 = vmatpush1.bf16.msra.mxu1 %v3805_v14 }
0x14e1   :  { %v3760_v51 = vpop.permute.xlu0 %3759 }
0x14e2   :  { %3840 = vmatmul.mubr.bf16.vlgmr.msra.gmra.mrb[20].mxu1 %v4805_v32 }
0x14e3   :  { %4427 = vmatprep.mubr.msk.bf16.mxu1 %vm3795_vm12, %v4806_v34  ;;  %v3765_v44 = vpop.permute.xlu1 %3764 }
0x14e5   :  { %v3770_v29 = vpop.permute.xlu0 %3769 }
0x14e7   :  { %v3775_v6 = vpop.permute.xlu1 %3774 }
0x14ea   :  { %3848 = vmatmul.mubr.bf16.gmra.mrb[24].mxu1 %v4808_v36 }
0x15b5   :  { %v3841_v0 = vpop.f32.mrb[20].mxu1 }
0x15b6   :  { %v3842_v48 = vadd.f32 %v3841_v0, %v3760_v51  ;;  %v3843_v37 = vpop.f32.mrb[21].mxu1 }
0x15b7   :  { %v3844_v16 = vpop.f32.mrb[22].mxu1 }
0x15b8   :  { %4877 = vtanh.f32 %v3842_v48  ;;  %v3845_v38 = vadd.f32 %v3844_v16, %v3765_v44  ;;  %v3846_v17 = vpop.f32.mrb[23].mxu1 }
0x15ba   :  { %4879 = vtanh.f32 %v3845_v38 }
0x15bd   :  { %v3849_v39 = vpop.f32.mrb[24].mxu1 }
0x15be   :  { %v3850_v40 = vadd.f32 %v3849_v39, %v3770_v29  ;;  %v3851_v28 = vpop.f32.mrb[25].mxu1 }
0x15bf   :  { %v3852_v43 = vpop.f32.mrb[26].mxu1 }
0x15c0   :  { %4881 = vtanh.f32 %v3850_v40  ;;  %v3853_v62 = vadd.f32 %v3852_v43, %v3775_v6  ;;  %v3854_v60 = vpop.f32.mrb[27].mxu1 }
0x15c2   :  { %v4878_v46 = vpop.eup %4877  ;;  %4883 = vtanh.f32 %v3853_v62 }
0x15c3   :  { %v3860_v33 = vmul.f32 %v4878_v46, %v6690_v22 }
0x15c4   :  { %v4880_v54 = vpop.eup %4879 }
0x15c5   :  { %3868 = vrot.lane.b32.xlu0 %v3860_v33, %s5296_s16  ;;  %v3861_v49 = vmul.f32 %v4880_v54, %v6690_v22 }
0x15c7   :  { %3870 = vrot.lane.b32.xlu1 %v3861_v49, %s5296_s16 }
0x15ca   :  { %v4882_v50 = vpop.eup %4881 }
0x15cb   :  { %v3862_v53 = vmul.f32 %v4882_v50, %v6690_v22 }
0x15cc   :  { %v4884_v55 = vpop.eup %4883 }
0x15cd   :  { %3872 = vrot.lane.b32.xlu0 %v3862_v53, %s5296_s16  ;;  %v3863_v42 = vmul.f32 %v4884_v55, %v6690_v22 }
0x15cf   :  { %3874 = vrot.lane.b32.xlu1 %v3863_v42, %s5296_s16 }
0x1637   :  { %v3869_v58 = vpop.permute.xlu0 %3868 }
0x1638   :  { %3880 = vst.msk [vmem:[#allocation4] sm:$0xff] %vm3558_vm7, %v3869_v58 }
0x1639   :  { %v3871_v59 = vpop.permute.xlu1 %3870 }
0x163a   :  { %3881 = vst.msk [vmem:[#allocation4 + $0x8] sm:$0xff] %vm3558_vm7, %v3871_v59 }
0x163f   :  { %v3873_v63 = vpop.permute.xlu0 %3872  ;;  %v3884_v41 = vld [vmem:[#allocation4] sm:$0xff] }
0x1640   :  { %3882 = vst.msk [vmem:[#allocation4 + $0x10] sm:$0xff] %vm3558_vm7, %v3873_v63  ;;  %3904 = vrot.lane.b32.xlu0 %v3884_v41, %s5271_s29 }
0x1641   :  { %3896 = vst.msk [vmem:[#allocation7] sm:$0xff] %vm3336_vm0, %v3884_v41  ;;  %v3875_v8 = vpop.permute.xlu1 %3874  ;;  %v3885_v13 = vld [vmem:[#allocation4 + $0x8] sm:$0xff] }
0x1642   :  { %3883 = vst.msk [vmem:[#allocation4 + $0x18] sm:$0x1] %vm3562_vm9, %v3875_v8  ;;  %3906 = vrot.lane.b32.xlu1 %v3885_v13, %s5271_s29 }
0x1643   :  { %3897 = vst.msk [vmem:[#allocation7 + $0x8] sm:$0xff] %vm3336_vm0, %v3885_v13 }
0x1644   :  { %3920 = vrot.lane.b32.xlu0 %v3884_v41, %s5273_s25 }
0x1646   :  { %3922 = vrot.lane.b32.xlu1 %v3885_v13, %s5273_s25 }
0x1647   :  { %v3886_v1 = vld [vmem:[#allocation4 + $0x10] sm:$0xff] }
0x1648   :  { %3936 = vrot.lane.b32.xlu0 %v3884_v41, %s5291_s15  ;;  %3898 = vst.msk [vmem:[#allocation7 + $0x10] sm:$0xff] %vm3336_vm0, %v3886_v1  ;;  %v4032_v61 = vld [vmem:[#allocation7] sm:$0xff] }
0x1649   :  { %v3887_v5 = vld [vmem:[#allocation4 + $0x18] sm:$0x1] }
0x164a   :  { %v4033_v4 = vld [vmem:[#allocation7 + $0x8] sm:$0xff]  ;;  %3938 = vrot.lane.b32.xlu1 %v3885_v13, %s5291_s15  ;;  %3899 = vst.msk [vmem:[#allocation7 + $0x18] sm:$0x1] %vm3579_vm14, %v3887_v5 }
0x164b   :  { %v4061_v7 = vpack.c.bf16 %v4033_v4, %v4032_v61 }
0x164c   :  { %3952 = vrot.lane.b32.xlu0 %v3884_v41, %s5292_s3 }
0x164d   :  { %4124 = vmatpush1.bf16.msra.mxu0 %v4061_v7 }
0x164e   :  { %4125 = vmatprep.subr.bf16.mxu0 %v5278_v3  ;;  %3954 = vrot.lane.b32.xlu1 %v3885_v13, %s5292_s3 }
0x164f   :  { %v4034_v21 = vld [vmem:[#allocation7 + $0x10] sm:$0xff] }
0x1650   :  { %3908 = vrot.lane.b32.xlu0 %v3886_v1, %s5271_s29 }
0x1652   :  { %3910 = vrot.lane.b32.xlu1 %v3887_v5, %s5271_s29 }
0x1654   :  { %3968 = vrot.lane.b32.xlu0 %v3884_v41, %s5293_s23 }
0x1656   :  { %3926 = vrot.lane.b32.xlu1 %v3887_v5, %s5273_s25 }
0x1658   :  { %3924 = vrot.lane.b32.xlu0 %v3886_v1, %s5273_s25 }
0x165a   :  { %3970 = vrot.lane.b32.xlu1 %v3885_v13, %s5293_s23 }
0x165c   :  { %3940 = vrot.lane.b32.xlu0 %v3886_v1, %s5291_s15 }
0x165e   :  { %3942 = vrot.lane.b32.xlu1 %v3887_v5, %s5291_s15 }
0x1660   :  { %3956 = vrot.lane.b32.xlu0 %v3886_v1, %s5292_s3 }
0x1662   :  { %3958 = vrot.lane.b32.xlu1 %v3887_v5, %s5292_s3 }
0x1664   :  { %3972 = vrot.lane.b32.xlu0 %v3886_v1, %s5293_s23 }
0x1666   :  { %3986 = vrot.lane.b32.xlu1 %v3885_v13, %s5285_s17 }
0x1668   :  { %3984 = vrot.lane.b32.xlu0 %v3884_v41, %s5285_s17 }
0x166a   :  { %3974 = vrot.lane.b32.xlu1 %v3887_v5, %s5293_s23 }
0x166c   :  { %3988 = vrot.lane.b32.xlu0 %v3886_v1, %s5285_s17 }
0x166e   :  { %3990 = vrot.lane.b32.xlu1 %v3887_v5, %s5285_s17 }
0x1670   :  { %4000 = vrot.lane.b32.xlu0 %v3884_v41, %s5294_s21 }
0x1672   :  { %4002 = vrot.lane.b32.xlu1 %v3885_v13, %s5294_s21 }
0x1674   :  { %4004 = vrot.lane.b32.xlu0 %v3886_v1, %s5294_s21 }
0x1676   :  { %4006 = vrot.lane.b32.xlu1 %v3887_v5, %s5294_s21 }
0x1678   :  { %4016 = vrot.lane.b32.xlu0 %v3884_v41, %s5295_s26 }
0x167a   :  { %4018 = vrot.lane.b32.xlu1 %v3885_v13, %s5295_s26 }
0x167c   :  { %4020 = vrot.lane.b32.xlu0 %v3886_v1, %s5295_s26 }
0x167e   :  { %4022 = vrot.lane.b32.xlu1 %v3887_v5, %s5295_s26  ;;  %s7146_s26 = sld [smem:[#allocation51_spill]] }
0x1680   :  { %4078 = vperm.xlu0 %4773, %v3892_v10  }
0x1682   :  { %4083 = vperm.xlu1 %4774, %v3893_v12  }
0x1684   :  { %4088 = vperm.xlu0 %4773, %v3894_v52  }
0x1686   :  { %4093 = vperm.xlu1 %4774, %v3895_v18  }
0x16b2   :  { %v3905_v23 = vpop.permute.xlu0 %3904 }
0x16b3   :  { %3916 = vst.msk [vmem:[#allocation7 + $0x19] sm:$0xff] %vm3336_vm0, %v3905_v23 }
0x16b4   :  { %v3907_v57 = vpop.permute.xlu1 %3906 }
0x16b5   :  { %3917 = vst.msk [vmem:[#allocation7 + $0x21] sm:$0xff] %vm3336_vm0, %v3907_v57 }
0x16b6   :  { %v3921_v30 = vpop.permute.xlu0 %3920 }
0x16b7   :  { %3932 = vst.msk [vmem:[#allocation7 + $0x32] sm:$0xff] %vm3336_vm0, %v3921_v30 }
0x16b8   :  { %v3923_v19 = vpop.permute.xlu1 %3922 }
0x16b9   :  { %3933 = vst.msk [vmem:[#allocation7 + $0x3a] sm:$0xff] %vm3336_vm0, %v3923_v19 }
0x16ba   :  { %v3937_v20 = vpop.permute.xlu0 %3936  ;;  %v4035_v9 = vld [vmem:[#allocation7 + $0x18] sm:$0xff] }
0x16bb   :  { %3948 = vst.msk [vmem:[#allocation7 + $0x4b] sm:$0xff] %vm3336_vm0, %v3937_v20  ;;  %v4062_v2 = vpack.c.bf16 %v4035_v9, %v4034_v21 }
0x16bc   :  { %v3939_v15 = vpop.permute.xlu1 %3938  ;;  %v4036_v27 = vld [vmem:[#allocation7 + $0x20] sm:$0xff] }
0x16bd   :  { %3949 = vst.msk [vmem:[#allocation7 + $0x53] sm:$0xff] %vm3336_vm0, %v3939_v15  ;;  %4126 = vmatpush1.bf16.msra.mxu0 %v4062_v2 }
0x16be   :  { %v3953_v45 = vpop.permute.xlu0 %3952  ;;  %4127 = vmatprep.subr.bf16.mxu0 %v5278_v3 }
0x16bf   :  { %3964 = vst.msk [vmem:[#allocation7 + $0x64] sm:$0xff] %vm3336_vm0, %v3953_v45 }
0x16c0   :  { %v3955_v56 = vpop.permute.xlu1 %3954  ;;  %v4039_v0 = vld [vmem:[#allocation7 + $0x38] sm:$0xff] }
0x16c1   :  { %3965 = vst.msk [vmem:[#allocation7 + $0x6c] sm:$0xff] %vm3336_vm0, %v3955_v56 }
0x16c2   :  { %v3909_v35 = vpop.permute.xlu0 %3908 }
0x16c3   :  { %3918 = vst.msk [vmem:[#allocation7 + $0x29] sm:$0xff] %vm3336_vm0, %v3909_v35 }
0x16c4   :  { %v3911_v24 = vpop.permute.xlu1 %3910  ;;  %v4042_v40 = vld [vmem:[#allocation7 + $0x50] sm:$0xff] }
0x16c5   :  { %3919 = vst.msk [vmem:[#allocation7 + $0x31] sm:$0x1] %vm3579_vm14, %v3911_v24 }
0x16c6   :  { %v3969_v47 = vpop.permute.xlu0 %3968 }
0x16c7   :  { %3980 = vst.msk [vmem:[#allocation7 + $0x7d] sm:$0xff] %vm3336_vm0, %v3969_v47  ;;  %v4809_v47 = vld [vmem:[#allocation21] ss:$8 sps:$4 sm:$0xff]  }
0x16c8   :  { %v3927_v25 = vpop.permute.xlu1 %3926  ;;  %v4045_v46 = vld [vmem:[#allocation7 + $0x68] sm:$0xff] }
0x16c9   :  { %3935 = vst.msk [vmem:[#allocation7 + $0x4a] sm:$0x1] %vm3579_vm14, %v3927_v25  ;;  %v4812_v25 = vld [vmem:[#allocation21 + $0x14] ss:$8 sps:$4 sm:$0x1f]  }
0x16ca   :  { %v3925_v31 = vpop.permute.xlu0 %3924  ;;  %v4037_v14 = vld [vmem:[#allocation7 + $0x28] sm:$0xff] }
0x16cb   :  { %3934 = vst.msk [vmem:[#allocation7 + $0x42] sm:$0xff] %vm3336_vm0, %v3925_v31  ;;  %v4063_v32 = vpack.c.bf16 %v4037_v14, %v4036_v27  ;;  %v4814_v31 = vld [vmem:[#allocation21 + $0x10] ss:$8 sps:$4 sm:$0x1f]  }
0x16cc   :  { %v3971_v34 = vpop.permute.xlu1 %3970  ;;  %v4038_v36 = vld [vmem:[#allocation7 + $0x30] sm:$0xff] }
0x16cd   :  { %3981 = vst.msk [vmem:[#allocation7 + $0x85] sm:$0xff] %vm3336_vm0, %v3971_v34  ;;  %4128 = vmatpush1.bf16.msra.mxu0 %v4063_v32  ;;  %v4064_v48 = vpack.c.bf16 %v4039_v0, %v4038_v36 }
0x16ce   :  { %v3941_v51 = vpop.permute.xlu0 %3940  ;;  %4129 = vmatprep.subr.bf16.mxu0 %v5278_v3 }
0x16cf   :  { %3950 = vst.msk [vmem:[#allocation7 + $0x5b] sm:$0xff] %vm3336_vm0, %v3941_v51 }
0x16d0   :  { %v3943_v37 = vpop.permute.xlu1 %3942 }
0x16d1   :  { %3951 = vst.msk [vmem:[#allocation7 + $0x63] sm:$0x1] %vm3579_vm14, %v3943_v37  ;;  %4130 = vmatpush1.bf16.msra.mxu0 %v4064_v48 }
0x16d2   :  { %v3957_v44 = vpop.permute.xlu0 %3956  ;;  %4131 = vmatprep.subr.bf16.mxu0 %v5278_v3  ;;  %v4040_v16 = vld [vmem:[#allocation7 + $0x40] sm:$0xff]  ;;  %v4041_v38 = vld [vmem:[#allocation7 + $0x48] sm:$0xff] }
0x16d3   :  { %3966 = vst.msk [vmem:[#allocation7 + $0x74] sm:$0xff] %vm3336_vm0, %v3957_v44  ;;  %v4065_v17 = vpack.c.bf16 %v4041_v38, %v4040_v16 }
0x16d4   :  { %v3959_v29 = vpop.permute.xlu1 %3958  ;;  %v4048_v63 = vld [vmem:[#allocation7 + $0x80] sm:$0xff] }
0x16d5   :  { %3967 = vst.msk [vmem:[#allocation7 + $0x7c] sm:$0x1] %vm3579_vm14, %v3959_v29  ;;  %4132 = vmatpush1.bf16.msra.mxu0 %v4065_v17 }
0x16d6   :  { %v3973_v39 = vpop.permute.xlu0 %3972  ;;  %4133 = vmatprep.subr.bf16.mxu0 %v5278_v3  ;;  %v4043_v28 = vld [vmem:[#allocation7 + $0x58] sm:$0xff] }
0x16d7   :  { %3982 = vst.msk [vmem:[#allocation7 + $0x8d] sm:$0xff] %vm3336_vm0, %v3973_v39  ;;  %v4066_v6 = vpack.c.bf16 %v4043_v28, %v4042_v40 }
0x16d8   :  { %v3987_v43 = vpop.permute.xlu1 %3986  ;;  %v4044_v62 = vld [vmem:[#allocation7 + $0x60] sm:$0xff] }
0x16d9   :  { %3997 = vst.msk [vmem:[#allocation7 + $0x9e] sm:$0xff] %vm3336_vm0, %v3987_v43  ;;  %4134 = vmatpush1.bf16.msra.mxu0 %v4066_v6  ;;  %v4067_v33 = vpack.c.bf16 %v4045_v46, %v4044_v62 }
0x16da   :  { %v3985_v60 = vpop.permute.xlu0 %3984  ;;  %4135 = vmatprep.subr.bf16.mxu0 %v5278_v3  ;;  %v4046_v53 = vld [vmem:[#allocation7 + $0x70] sm:$0xff] }
0x16db   :  { %3996 = vst.msk [vmem:[#allocation7 + $0x96] sm:$0xff] %vm3336_vm0, %v3985_v60 }
0x16dc   :  { %v3975_v54 = vpop.permute.xlu1 %3974  ;;  %v4047_v49 = vld [vmem:[#allocation7 + $0x78] sm:$0xff] }
0x16dd   :  { %3983 = vst.msk [vmem:[#allocation7 + $0x95] sm:$0x1] %vm3579_vm14, %v3975_v54  ;;  %4136 = vmatpush1.bf16.msra.mxu0 %v4067_v33  ;;  %v4068_v55 = vpack.c.bf16 %v4047_v49, %v4046_v53 }
0x16de   :  { %v3989_v50 = vpop.permute.xlu0 %3988  ;;  %4137 = vmatprep.subr.bf16.mxu0 %v5278_v3  ;;  %v4049_v58 = vld [vmem:[#allocation7 + $0x88] sm:$0xff] }
0x16df   :  { %3998 = vst.msk [vmem:[#allocation7 + $0xa6] sm:$0xff] %vm3336_vm0, %v3989_v50  ;;  %v4069_v41 = vpack.c.bf16 %v4049_v58, %v4048_v63 }
0x16e0   :  { %v3991_v42 = vpop.permute.xlu1 %3990 }
0x16e1   :  { %3999 = vst.msk [vmem:[#allocation7 + $0xae] sm:$0x1] %vm3579_vm14, %v3991_v42  ;;  %4138 = vmatpush1.bf16.msra.mxu0 %v4068_v55 }
0x16e2   :  { %v4001_v59 = vpop.permute.xlu0 %4000  ;;  %4139 = vmatprep.subr.bf16.mxu0 %v5278_v3  ;;  %v4051_v61 = vld [vmem:[#allocation7 + $0x98] sm:$0xff] }
0x16e3   :  { %4012 = vst.msk [vmem:[#allocation7 + $0xaf] sm:$0xff] %vm3336_vm0, %v4001_v59 }
0x16e4   :  { %v4003_v8 = vpop.permute.xlu1 %4002  ;;  %v4050_v13 = vld [vmem:[#allocation7 + $0x90] sm:$0xff] }
0x16e5   :  { %4013 = vst.msk [vmem:[#allocation7 + $0xb7] sm:$0xff] %vm3336_vm0, %v4003_v8  ;;  %4140 = vmatpush1.bf16.msra.mxu0 %v4069_v41  ;;  %v4070_v4 = vpack.c.bf16 %v4051_v61, %v4050_v13 }
0x16e6   :  { %v4005_v1 = vpop.permute.xlu0 %4004  ;;  %4141 = vmatprep.subr.bf16.mxu0 %v5278_v3  ;;  %v4052_v10 = vld [vmem:[#allocation7 + $0xa0] sm:$0xff] }
0x16e7   :  { %4014 = vst.msk [vmem:[#allocation7 + $0xbf] sm:$0xff] %vm3336_vm0, %v4005_v1 }
0x16e8   :  { %v4007_v5 = vpop.permute.xlu1 %4006 }
0x16e9   :  { %4015 = vst.msk [vmem:[#allocation7 + $0xc7] sm:$0x1] %vm3579_vm14, %v4007_v5  ;;  %4142 = vmatpush1.bf16.msra.mxu0 %v4070_v4 }
0x16ea   :  { %v4017_v7 = vpop.permute.xlu0 %4016  ;;  %4143 = vmatprep.subr.bf16.mxu0 %v5278_v3  ;;  %v4053_v11 = vld [vmem:[#allocation7 + $0xa8] sm:$0xff] }
0x16eb   :  { %4028 = vst.msk [vmem:[#allocation7 + $0xc8] sm:$0xff] %vm3336_vm0, %v4017_v7  ;;  %v4071_v12 = vpack.c.bf16 %v4053_v11, %v4052_v10 }
0x16ec   :  { %v4019_v52 = vpop.permute.xlu1 %4018  ;;  %v4054_v23 = vld [vmem:[#allocation7 + $0xb0] sm:$0xff] }
0x16ed   :  { %4029 = vst.msk [vmem:[#allocation7 + $0xd0] sm:$0xff] %vm3336_vm0, %v4019_v52  ;;  %4144 = vmatpush1.bf16.msra.mxu0 %v4071_v12  ;;  %v4224_v12 = vld [vmem:[#allocation30] sm:$0xff]  ;;  %v4225_v52 = vld [vmem:[#allocation30 + $0x8] sm:$0xff] }
0x16ee   :  { %v4021_v18 = vpop.permute.xlu0 %4020  ;;  %4145 = vmatprep.subr.bf16.mxu0 %v5278_v3  ;;  %v4055_v57 = vld [vmem:[#allocation7 + $0xb8] sm:$0xff] }
0x16ef   :  { %4030 = vst.msk [vmem:[#allocation7 + $0xd8] sm:$0xff] %vm3336_vm0, %v4021_v18  ;;  %v4072_v30 = vpack.c.bf16 %v4055_v57, %v4054_v23  ;;  %v4705_v18 = vpack.c.bf16 %v4225_v52, %v4224_v12  ;;  %v4226_v23 = vld [vmem:[#allocation30 + $0x10] sm:$0xff]  ;;  %v4227_v57 = vld [vmem:[#allocation30 + $0x18] sm:$0xff] }
0x16f0   :  { %v4023_v19 = vpop.permute.xlu1 %4022  ;;  %v4056_v20 = vld [vmem:[#allocation7 + $0xc0] sm:$0xff] }
0x16f1   :  { %4031 = vst.msk [vmem:[#allocation7 + $0xe0] sm:$0x1] %vm3579_vm14, %v4023_v19  ;;  %4146 = vmatpush1.bf16.msra.mxu0 %v4072_v30  ;;  %v4709_v19 = vpack.c.bf16 %v4227_v57, %v4226_v23  ;;  %4706 = vmatprep.subr.bf16.mxu1 %v4705_v18 }
0x16f2   :  { %4147 = vmatprep.subr.bf16.mxu0 %v5278_v3  ;;  %v4057_v21 = vld [vmem:[#allocation7 + $0xc8] sm:$0xff]  ;;  %4708 = vmatpush3.bf16.msra.mxu1 %v4705_v18 }
0x16f3   :  { %v4073_v9 = vpack.c.bf16 %v4057_v21, %v4056_v20  ;;  %v4228_v20 = vld [vmem:[#allocation30 + $0x20] sm:$0xff]  ;;  %v4229_v21 = vld [vmem:[#allocation30 + $0x28] sm:$0xff]  ;;  %4710 = vmatprep.subr.bf16.mxu1 %v4709_v19 }
0x16f4   :  { %v4058_v2 = vld [vmem:[#allocation7 + $0xd0] sm:$0xff] }
0x16f5   :  { %4148 = vmatpush1.bf16.msra.mxu0 %v4073_v9  ;;  %v4713_v9 = vpack.c.bf16 %v4229_v21, %v4228_v20 }
0x16f6   :  { %4149 = vmatprep.subr.bf16.mxu0 %v5278_v3  ;;  %v4059_v15 = vld [vmem:[#allocation7 + $0xd8] sm:$0xff]  ;;  %4712 = vmatpush3.bf16.msra.mxu1 %v4709_v19 }
0x16f7   :  { %v4074_v45 = vpack.c.bf16 %v4059_v15, %v4058_v2  ;;  %v4230_v2 = vld [vmem:[#allocation30 + $0x30] sm:$0xff]  ;;  %v4231_v15 = vld [vmem:[#allocation30 + $0x38] sm:$0xff]  ;;  %4714 = vmatprep.subr.bf16.mxu1 %v4713_v9 }
0x16f8   :  { %v4060_v56 = vld [vmem:[#allocation7 + $0xe0] sm:$0x1] }
0x16f9   :  { %4150 = vmatpush1.bf16.msra.mxu0 %v4074_v45  ;;  %v4075_v35 = vpack.c.bf16 %v4060_v56, %v4060_v56  ;;  %v4717_v56 = vpack.c.bf16 %v4231_v15, %v4230_v2 }
0x16fa   :  { %4151 = vmatprep.subr.bf16.mxu0 %v5278_v3  ;;  %4716 = vmatpush3.bf16.msra.mxu1 %v4713_v9 }
0x16fb   :  { %v4121_v24 = vand.u32 %v4075_v35, %v6801_v26  ;;  %4718 = vmatprep.subr.bf16.mxu1 %v4717_v56 }
0x16fd   :  { %4152 = vmatpush1.bf16.msra.mxu0 %v4121_v24  ;;  %v4232_v24 = vld [vmem:[#allocation30 + $0x40] sm:$0x1] }
0x16fe   :  { %4720 = vmatpush3.bf16.msra.mxu1 %v4717_v56 }
0x16ff   :  { %v4079_v27 = vpop.permute.xlu0 %4078  ;;  %4504 = vmatprep.subr.msk.mxu1 %vm2562_vm6, %v4232_v24 }
0x1700   :  { %4156 = vmatmul.mubr.bf16.vlgmr.msra.gmra.mrb[44].mxu0 %v4809_v47 }
0x1701   :  { %4433 = vmatprep.mubr.msk.bf16.mxu0 %vm3795_vm12, %v4812_v25  ;;  %v4084_v36 = vpop.permute.xlu1 %4083 }
0x1702   :  { %4505 = vmatpush3.msk.msra.mxu1 %vm2562_vm6, %v4232_v24  ;;  %vm4374_vm6 = vcmask 64512  }
0x1703   :  { %v4089_v16 = vpop.permute.xlu0 %4088 }
0x1705   :  { %v4094_v39 = vpop.permute.xlu1 %4093 }
0x1708   :  { %4164 = vmatmul.mubr.bf16.gmra.mrb[48].mxu0 %v4814_v31 }
0x17d3   :  { %v4157_v14 = vpop.f32.mrb[44].mxu0 }
0x17d4   :  { %v4158_v32 = vadd.f32 %v4157_v14, %v4079_v27  ;;  %v4159_v34 = vpop.f32.mrb[45].mxu0 }
0x17d5   :  { %v4160_v51 = vpop.f32.mrb[46].mxu0 }
0x17d6   :  { %v4172_v0 = vsub.f32 0.0, %v4158_v32  ;;  %v4161_v48 = vadd.f32 %v4160_v51, %v4084_v36  ;;  %v4162_v37 = vpop.f32.mrb[47].mxu0 }
0x17d8   :  { %v4176_v3 = vmul.f32 1.442695, %v4172_v0  ;;  %v4173_v44 = vsub.f32 0.0, %v4161_v48 }
0x17da   :  { %4885 = vpow2.f32 %v4176_v3  ;;  %v4178_v26 = vmul.f32 1.442695, %v4173_v44 }
0x17db   :  { %v4165_v38 = vpop.f32.mrb[48].mxu0 }
0x17dc   :  { %4887 = vpow2.f32 %v4178_v26  ;;  %v4166_v17 = vadd.f32 %v4165_v38, %v4089_v16  ;;  %v4167_v29 = vpop.f32.mrb[49].mxu0 }
0x17dd   :  { %v4168_v40 = vpop.f32.mrb[50].mxu0 }
0x17de   :  { %v4174_v28 = vsub.f32 0.0, %v4166_v17  ;;  %v4169_v6 = vadd.f32 %v4168_v40, %v4094_v39  ;;  %v4170_v43 = vpop.f32.mrb[51].mxu0 }
0x17e0   :  { %v4180_v62 = vmul.f32 1.442695, %v4174_v28  ;;  %v4175_v60 = vsub.f32 0.0, %v4169_v6 }
0x17e2   :  { %4889 = vpow2.f32 %v4180_v62  ;;  %v4182_v46 = vmul.f32 1.442695, %v4175_v60 }
0x17e4   :  { %v4886_v33 = vpop.eup %4885  ;;  %4891 = vpow2.f32 %v4182_v46 }
0x17e5   :  { %v4184_v54 = vadd.f32 1.0, %v4886_v33 }
0x17e6   :  { %v4888_v49 = vpop.eup %4887 }
0x17e7   :  { %4893 = vrcp.f32 %v4184_v54  ;;  %v4185_v50 = vadd.f32 1.0, %v4888_v49 }
0x17e9   :  { %4895 = vrcp.f32 %v4185_v50 }
0x17ec   :  { %v4890_v53 = vpop.eup %4889 }
0x17ed   :  { %v4186_v55 = vadd.f32 1.0, %v4890_v53 }
0x17ee   :  { %v4892_v42 = vpop.eup %4891 }
0x17ef   :  { %4897 = vrcp.f32 %v4186_v55  ;;  %v4187_v58 = vadd.f32 1.0, %v4892_v42 }
0x17f1   :  { %v4894_v59 = vpop.eup %4893  ;;  %4899 = vrcp.f32 %v4187_v58 }
0x17f2   :  { %v4196_v63 = vmul.f32 %v4894_v59, %v6690_v22 }
0x17f3   :  { %v4896_v41 = vpop.eup %4895 }
0x17f4   :  { %4204 = vrot.lane.b32.xlu0 %v4196_v63, %s5296_s16  ;;  %v4197_v8 = vmul.f32 %v4896_v41, %v6690_v22 }
0x17f6   :  { %4206 = vrot.lane.b32.xlu1 %v4197_v8, %s5296_s16 }
0x17f9   :  { %v4898_v13 = vpop.eup %4897 }
0x17fa   :  { %v4198_v1 = vmul.f32 %v4898_v13, %v6690_v22 }
0x17fb   :  { %v4900_v61 = vpop.eup %4899 }
0x17fc   :  { %4208 = vrot.lane.b32.xlu0 %v4198_v1, %s5296_s16  ;;  %v4199_v4 = vmul.f32 %v4900_v61, %v6690_v22 }
0x17fe   :  { %4210 = vrot.lane.b32.xlu1 %v4199_v4, %s5296_s16 }
0x1866   :  { %v4205_v5 = vpop.permute.xlu0 %4204 }
0x1867   :  { %4216 = vst.msk [vmem:[#allocation4] sm:$0xff] %vm3558_vm7, %v4205_v5 }
0x1868   :  { %v4207_v7 = vpop.permute.xlu1 %4206 }
0x1869   :  { %4217 = vst.msk [vmem:[#allocation4 + $0x8] sm:$0xff] %vm3558_vm7, %v4207_v7 }
0x186e   :  { %v4209_v10 = vpop.permute.xlu0 %4208  ;;  %v4220_v11 = vld [vmem:[#allocation4] sm:$0xff] }
0x186f   :  { %4218 = vst.msk [vmem:[#allocation4 + $0x10] sm:$0xff] %vm3558_vm7, %v4209_v10  ;;  %4237 = vrot.lane.b32.xlu0 %v4220_v11, %s5271_s29 }
0x1870   :  { %v4211_v22 = vpop.permute.xlu1 %4210  ;;  %v4221_v30 = vld [vmem:[#allocation4 + $0x8] sm:$0xff] }
0x1871   :  { %4219 = vst.msk [vmem:[#allocation4 + $0x18] sm:$0x1] %vm3562_vm9, %v4211_v22  ;;  %4239 = vrot.lane.b32.xlu1 %v4221_v30, %s5271_s29 }
0x1876   :  { %v4222_v45 = vld [vmem:[#allocation4 + $0x10] sm:$0xff] }
0x1877   :  { %4241 = vrot.lane.b32.xlu0 %v4222_v45, %s5271_s29 }
0x1878   :  { %v4223_v35 = vld [vmem:[#allocation4 + $0x18] sm:$0x1] }
0x1879   :  { %4243 = vrot.lane.b32.xlu1 %v4223_v35, %s5271_s29 }
0x18e1   :  { %v4238_v47 = vpop.permute.xlu0 %4237 }
0x18e2   :  { %v4249_v25 = vmax.f32 %v4220_v11, %v4238_v47 }
0x18e3   :  { %v4240_v31 = vpop.permute.xlu1 %4239 }
0x18e4   :  { %v4250_v27 = vmax.f32 %v4221_v30, %v4240_v31  ;;  %4257 = vrot.lane.b32.xlu0 %v4249_v25, %s5291_s15 }
0x18e6   :  { %4259 = vrot.lane.b32.xlu1 %v4250_v27, %s5291_s15 }
0x18e9   :  { %v4242_v14 = vpop.permute.xlu0 %4241 }
0x18ea   :  { %v4251_v32 = vmax.f32 %v4222_v45, %v4242_v14 }
0x18eb   :  { %v4244_v34 = vpop.permute.xlu1 %4243 }
0x18ec   :  { %v4252_v36 = vmax.f32 %v4223_v35, %v4244_v34  ;;  %4261 = vrot.lane.b32.xlu0 %v4251_v32, %s5291_s15 }
0x18ee   :  { %4263 = vrot.lane.b32.xlu1 %v4252_v36, %s5291_s15 }
0x1956   :  { %v4258_v51 = vpop.permute.xlu0 %4257 }
0x1957   :  { %v4269_v0 = vmax.f32 %v4249_v25, %v4258_v51 }
0x1958   :  { %v4260_v48 = vpop.permute.xlu1 %4259 }
0x1959   :  { %v4270_v37 = vmax.f32 %v4250_v27, %v4260_v48  ;;  %4506 = vmatprep.mubr.msk.f32.mxu1 %vm4273_vm5, %v4269_v0 }
0x195b   :  { %4507 = vmatmul.mubr.msk.f32.vlgmr.msra.gmra.mrb[18].mxu1 %vm4273_vm5, %v4270_v37 }
0x195e   :  { %v4262_v3 = vpop.permute.xlu0 %4261 }
0x195f   :  { %v4271_v44 = vmax.f32 %v4251_v32, %v4262_v3 }
0x1960   :  { %v4264_v26 = vpop.permute.xlu1 %4263 }
0x1961   :  { %v4272_v16 = vmax.f32 %v4252_v36, %v4264_v26  ;;  %4509 = vmatprep.mubr.msk.f32.mxu1 %vm4273_vm5, %v4271_v44 }
0x1963   :  { %4510 = vmatmul.mubr.msk.f32.gmra.mrb[28].mxu1 %vm4273_vm5, %v4272_v16 }
0x1a2e   :  { %v4508_v38 = vpop.f32.mrb[18].mxu1 }
0x1a2f   :  { %4376 = vst.msk [vmem:[%s7146_s26 + $0x8] sm:$0xff] %vm4374_vm6, %v4508_v38  ;;  %v4355_v17 = vpop.f32.mrb[19].mxu1 }
0x1a30   :  { %4375 = vst.msk [vmem:[%s7146_s26] sm:$0xff] %vm4374_vm6, %v4355_v17 }
0x1a36   :  { %v4511_v29 = vpop.f32.mrb[28].mxu1 }
0x1a37   :  { %4379 = vst.msk [vmem:[%s7146_s26 + $0x18] sm:$0x1] %vm4378_vm1, %v4511_v29  ;;  %v4365_v39 = vpop.f32.mrb[29].mxu1 }
0x1a38   :  { %4377 = vst.msk [vmem:[%s7146_s26 + $0x10] sm:$0xff] %vm4374_vm6, %v4365_v39 }
0x1a39   :  { %4384 = vsyncpa [#allocation9], 1 }
0x1a3a   :  { %4385 = vsyncpa [#allocation11], 1 }
0x1a3b   :  { %4386 = vsyncpa [#allocation14], 1 }
0x1a3c   :  { %4387 = vsyncpa [#allocation17], 1 }
0x1a3d   :  { %4388 = vsyncpa [#allocation20], 1 }
0x1a3e   :  { %4389 = vsyncpa [#allocation23], 1 }
0x1a3f   :  { %4390 = vsyncpa [#allocation26], 1 }
0x1a40   :  { %4391 = vsyncpa [#allocation29], 1 }

</bundles_post_ra>
